<compile_context>
chip_gen: v7x
topology: tpu7x:2x2x1
jax: 0.10.0
libtpu: 0.0.40
codegen_flags: <defaults>
</compile_context>

<pallas_src>
import numpy as np
import jax
import jax.numpy as jnp
from jax import lax
from jax.experimental import pallas as pl
from jax.experimental.pallas import tpu as pltpu


def _rup(v, m):
    return (v + m - 1) // m * m


# ----------------------------------------------------------------------------
# host-side constant matrices
# ----------------------------------------------------------------------------
def _interp_matrix_1d(out_size, in_size):
    A = np.zeros((out_size, in_size), np.float32)
    if in_size == 1 or out_size == 1:
        A[:, 0] = 1.0
        return A
    for o in range(out_size):
        src = o * (in_size - 1) / (out_size - 1)
        lo = int(np.floor(src))
        hi = min(lo + 1, in_size - 1)
        f = src - lo
        A[o, lo] += 1.0 - f
        A[o, hi] += f
    return A


def _upsample_matrix_t(hout, wout, hin, win):
    """(hin*win, hout*wout) transposed bilinear(align_corners=True) matrix."""
    return np.ascontiguousarray(
        np.kron(_interp_matrix_1d(hout, hin), _interp_matrix_1d(wout, win)).T)


def _pool_select_matrix(h, w):
    """0/1 matrix selecting the top-left (even,even) positions: (h*w/4, h*w)."""
    ho, wo = h // 2, w // 2
    S = np.zeros((ho * wo, h * w), np.float32)
    for y in range(ho):
        for x in range(wo):
            S[y * wo + x, (2 * y) * w + 2 * x] = 1.0
    return S


# ----------------------------------------------------------------------------
# parameter folding / K-packing (BN eval-mode affine folded into the weights)
# ----------------------------------------------------------------------------
def _pack_conv(w, scale, bias):
    """w (3,3,cin,cout) -> bf16 (Kpack, cout) with BN scale folded; f32 bias.

    K-row layout: tap t = 3*ky + kx occupies rows [t*cin, (t+1)*cin)."""
    cin, cout = w.shape[2], w.shape[3]
    kpack = _rup(9 * cin, 128)
    wf = w.reshape(9, cin, cout) * scale.reshape(1, 1, cout)
    wp = jnp.zeros((kpack, cout), jnp.float32).at[:9 * cin, :].set(
        wf.reshape(9 * cin, cout))
    return wp.astype(jnp.bfloat16), bias.reshape(1, cout).astype(jnp.float32)


# ----------------------------------------------------------------------------
# deterministic parameters (eval-mode BatchNorm folded to scale/bias).  The
# decoder layers are created for module fidelity but do not affect the output.
# ----------------------------------------------------------------------------
def init_params(key, class_number=1, in_channels=1):
    layer_defs = {
        'conv1_1': (in_channels, 8), 'conv1_2': (8, 8),
        'conv2_1': (8, 16), 'conv2_2': (16, 16),
        'conv3_1': (16, 32), 'conv3_2': (32, 32),
        'conv4': (32, 16), 'conv4_1': (32, 16), 'conv4_2': (16, 16),
        'conv5': (16, 8), 'conv5_1': (16, 8), 'conv5_2': (8, 8),
    }
    eps = 1e-5
    params = {}
    for name, (cin, cout) in layer_defs.items():
        key, kw, kb, kg, kbe, km, kv = jax.random.split(key, 7)
        fan_in = cin * 9
        w = jax.random.normal(kw, (3, 3, cin, cout), jnp.float32) * np.sqrt(2.0 / fan_in)
        conv_b = jax.random.normal(kb, (cout,), jnp.float32) * 0.01
        gamma = jax.random.uniform(kg, (cout,), jnp.float32, 0.5, 1.5)
        beta = jax.random.normal(kbe, (cout,), jnp.float32) * 0.1
        mean = jax.random.normal(km, (cout,), jnp.float32) * 0.1
        var = jax.random.uniform(kv, (cout,), jnp.float32, 0.5, 1.5)
        scale = gamma / jnp.sqrt(var + eps)
        bias = (conv_b - mean) * scale + beta
        params[name] = (w, scale, bias)
    key, kw, kb = jax.random.split(key, 3)
    w = jax.random.normal(kw, (1, 1, 8, class_number), jnp.float32) * np.sqrt(2.0 / 8)
    b = jax.random.normal(kb, (class_number,), jnp.float32) * 0.01
    params['score'] = (w, jnp.ones((class_number,), jnp.float32), b)
    return params


# ----------------------------------------------------------------------------
# fused full forward pass: one pallas_call, grid over batch
# ----------------------------------------------------------------------------
@jax.jit
def u_net_forward(x_nchw, params):
    n, cin_in, h, w = x_nchw.shape
    assert h % 4 == 0 and w % 4 == 0, "H, W must be multiples of 4"
    h2, w2, h3, w3 = h // 2, w // 2, h // 4, w // 4
    hw1 = h * w

    names = ['conv1_1', 'conv1_2', 'conv2_1', 'conv2_2', 'conv3_1', 'conv3_2']
    packed = []
    for nm in names:
        packed.extend(_pack_conv(*params[nm]))
    c12c = params['conv1_2'][0].shape[-1]
    c22c = params['conv2_2'][0].shape[-1]
    c32c = params['conv3_2'][0].shape[-1]
    cdesc = c32c + c22c + c12c

    m3t = jnp.asarray(_upsample_matrix_t(h, w, h3, w3), jnp.bfloat16)   # (hw/16, hw)
    m2t = jnp.asarray(_upsample_matrix_t(h, w, h2, w2), jnp.bfloat16)   # (hw/4,  hw)
    sel1 = jnp.asarray(_pool_select_matrix(h, w), jnp.bfloat16)         # (hw/4,  hw)
    sel2 = jnp.asarray(_pool_select_matrix(h2, w2), jnp.bfloat16)       # (hw/16, hw/4)
    eye1 = jnp.asarray(np.eye(hw1, dtype=np.float32), jnp.bfloat16)     # (hw, hw)

    base1 = _rup(w + 1, 8)
    scr_rows = _rup(base1 + hw1 + w + 1, 8)
    scr_cols = max(384, _rup(9 * cin_in, 128))

    # NCHW -> (n, h*w, cin); for cin==1 this is a free reshape.
    x = jnp.transpose(x_nchw, (0, 2, 3, 1)).reshape(n, hw1, cin_in)

    TNT = (((0,), (0,)), ((), ()))     # contract axis 0 of both operands

    def kernel(x_ref,
               w11, b11, w12, b12, w21, b21, w22, b22, w31, b31, w32, b32,
               m3t_ref, m2t_ref, sel1_ref, sel2_ref, eye_ref,
               out_ref, scr_ref):
        # One-time clear: guarantees every lane ever read is finite; K-padding
        # lanes that are never stored are annihilated by zero weight rows.
        scr_ref[...] = jnp.zeros_like(scr_ref)

        def col_masks(hh, ww):
            col = lax.broadcasted_iota(jnp.int32, (hh * ww, 1), 0) % ww
            return col <= ww - 2, col >= 1        # keep-masks for dx=-1 / dx=+1

        mk1, mk2, mk3 = col_masks(h, w), col_masks(h2, w2), col_masks(h3, w3)

        def conv3x3_bn_relu(xin, hh, ww, mk, w_ref, b_ref):
            """Packed-K conv: 9 shifted stores build (hw, 9*cin) patch rows in
            the scratch; a single aligned read feeds one bf16 MXU matmul."""
            cin = xin.shape[-1]
            hw = hh * ww
            base = _rup(ww + 1, 8)                 # halo / strip height >= ww+1
            kpack = w_ref.shape[0]
            strip = jnp.zeros((base, scr_cols), jnp.float32)
            scr_ref[base:2 * base, :] = strip      # rows the dy=-1 taps miss
            scr_ref[hw:hw + base, :] = strip       # rows the dy=+1 taps miss
            vals = (jnp.where(mk[0], xin, 0.0),    # dx = -1 taps
                    xin,                           # dx =  0 taps
                    jnp.where(mk[1], xin, 0.0))    # dx = +1 taps
            for ky, dy in enumerate((-1, 0, 1)):
                for kx, dx in enumerate((-1, 0, 1)):
                    t = 3 * ky + kx
                    r0 = base - dy * ww - dx
                    scr_ref[r0:r0 + hw, t * cin:(t + 1) * cin] = vals[kx]
            patches = scr_ref[base:base + hw, 0:kpack].astype(jnp.bfloat16)
            y = jnp.dot(patches, w_ref[...], preferred_element_type=jnp.float32)
            return jnp.maximum(y + b_ref[...], 0.0)     # folded BN bias + ReLU

        def maxpool2x2(xin, hh, ww, sel_ref):
            c = xin.shape[-1]
            hw = hh * ww
            halo = _rup(ww + 1, 8)
            scr_ref[hw:hw + halo, 0:c] = jnp.zeros((halo, c), jnp.float32)
            scr_ref[0:hw, 0:c] = xin
            m = jnp.maximum(
                jnp.maximum(scr_ref[0:hw, 0:c], scr_ref[1:1 + hw, 0:c]),
                jnp.maximum(scr_ref[ww:ww + hw, 0:c],
                            scr_ref[ww + 1:ww + 1 + hw, 0:c]))
            return jnp.dot(sel_ref[...], m.astype(jnp.bfloat16),
                           preferred_element_type=jnp.float32)

        xi = x_ref[0]                                              # (hw, cin)
        c11 = conv3x3_bn_relu(xi, h, w, mk1, w11, b11)
        c12 = conv3x3_bn_relu(c11, h, w, mk1, w12, b12)
        p1 = maxpool2x2(c12, h, w, sel1_ref)
        c21 = conv3x3_bn_relu(p1, h2, w2, mk2, w21, b21)
        c22 = conv3x3_bn_relu(c21, h2, w2, mk2, w22, b22)
        p2 = maxpool2x2(c22, h2, w2, sel2_ref)
        c31 = conv3x3_bn_relu(p2, h3, w3, mk3, w31, b31)
        c32 = conv3x3_bn_relu(c31, h3, w3, mk3, w32, b32)

        # Bilinear (align_corners=True) upsample / copy, emitted directly in
        # (channel, pixel) orientation so the single output is lane-dense.
        up31_t = lax.dot_general(c32.astype(jnp.bfloat16), m3t_ref[...], TNT,
                                 preferred_element_type=jnp.float32)  # (32, hw)
        up21_t = lax.dot_general(c22.astype(jnp.bfloat16), m2t_ref[...], TNT,
                                 preferred_element_type=jnp.float32)  # (16, hw)
        c12_t = lax.dot_general(c12.astype(jnp.bfloat16), eye_ref[...], TNT,
                                preferred_element_type=jnp.float32)   # (8, hw)
        out_ref[0, 0:c32c, :] = up31_t
        out_ref[0, c32c:c32c + c22c, :] = up21_t
        out_ref[0, c32c + c22c:cdesc, :] = c12_t
        # NOTE: the reference decoder branch (conv4..conv5_2, score) never
        # feeds the returned descriptors; it is dead code and dropped.

    const_args = packed + [m3t, m2t, sel1, sel2, eye1]
    in_specs = ([pl.BlockSpec((1, hw1, cin_in), lambda i: (i, 0, 0))] +
                [pl.BlockSpec(a.shape, lambda i: (0, 0)) for a in const_args])

    desc = pl.pallas_call(
        kernel,
        out_shape=jax.ShapeDtypeStruct((n, cdesc, hw1), jnp.float32),
        grid=(n,),
        in_specs=in_specs,
        out_specs=pl.BlockSpec((1, cdesc, hw1), lambda i: (i, 0, 0)),
        scratch_shapes=[pltpu.VMEM((scr_rows, scr_cols), jnp.float32)],
        compiler_params=pltpu.CompilerParams(
            dimension_semantics=("parallel",)),
    )(x, *const_args)

    # (n, 56, h*w) -> NCHW: a free reshape, no concat / transpose epilogue.
    return desc.reshape(n, cdesc, h, w)


if __name__ == "__main__":
    key = jax.random.PRNGKey(0)
    kx, kp = jax.random.split(key)
    N, C, H, W = 2, 1, 16, 16
    x = jax.random.normal(kx, (N, C, H, W), jnp.float32)
    params = init_params(kp, class_number=1, in_channels=C)

    out = jax.block_until_ready(u_net_forward(x, params))
    assert out.shape == (N, 56, H, W), out.shape
    assert out.dtype == jnp.float32
    assert bool(jnp.all(jnp.isfinite(out)))
    print("KERNEL_OK")
</pallas_src>

<mosaic_0001>
module attributes {stable_mosaic.version = 11 : i64} {
  func.func @kernel(%arg0: i32, %arg1: memref<1x256x1xf32, #tpu.memory_space<vmem>>, %arg2: memref<128x8xbf16, #tpu.memory_space<vmem>>, %arg3: memref<1x8xf32, #tpu.memory_space<vmem>>, %arg4: memref<128x8xbf16, #tpu.memory_space<vmem>>, %arg5: memref<1x8xf32, #tpu.memory_space<vmem>>, %arg6: memref<128x16xbf16, #tpu.memory_space<vmem>>, %arg7: memref<1x16xf32, #tpu.memory_space<vmem>>, %arg8: memref<256x16xbf16, #tpu.memory_space<vmem>>, %arg9: memref<1x16xf32, #tpu.memory_space<vmem>>, %arg10: memref<256x32xbf16, #tpu.memory_space<vmem>>, %arg11: memref<1x32xf32, #tpu.memory_space<vmem>>, %arg12: memref<384x32xbf16, #tpu.memory_space<vmem>>, %arg13: memref<1x32xf32, #tpu.memory_space<vmem>>, %arg14: memref<16x256xbf16, #tpu.memory_space<vmem>>, %arg15: memref<64x256xbf16, #tpu.memory_space<vmem>>, %arg16: memref<64x256xbf16, #tpu.memory_space<vmem>>, %arg17: memref<16x64xbf16, #tpu.memory_space<vmem>>, %arg18: memref<256x256xbf16, #tpu.memory_space<vmem>>, %arg19: memref<1x56x256xf32, #tpu.memory_space<vmem>>, %arg20: memref<304x384xf32, #tpu.memory_space<vmem>>) attributes {dimension_semantics = [#tpu.dimension_semantics<parallel>], iteration_bounds = array<i64: 2>, scalar_prefetch = 0 : i64, scratch_operands = 1 : i64, tpu.core_type = #tpu.core_type<tc>, window_params = [{transform_indices = @transform_0, window_bounds = array<i64: 1, 256, 1>}, {pipeline_mode = #tpu.pipeline_mode<synchronous>, transform_indices = @transform_1, window_bounds = array<i64: 128, 8>}, {pipeline_mode = #tpu.pipeline_mode<synchronous>, transform_indices = @transform_2, window_bounds = array<i64: 1, 8>}, {pipeline_mode = #tpu.pipeline_mode<synchronous>, transform_indices = @transform_3, window_bounds = array<i64: 128, 8>}, {pipeline_mode = #tpu.pipeline_mode<synchronous>, transform_indices = @transform_4, window_bounds = array<i64: 1, 8>}, {pipeline_mode = #tpu.pipeline_mode<synchronous>, transform_indices = @transform_5, window_bounds = array<i64: 128, 16>}, {pipeline_mode = #tpu.pipeline_mode<synchronous>, transform_indices = @transform_6, window_bounds = array<i64: 1, 16>}, {pipeline_mode = #tpu.pipeline_mode<synchronous>, transform_indices = @transform_7, window_bounds = array<i64: 256, 16>}, {pipeline_mode = #tpu.pipeline_mode<synchronous>, transform_indices = @transform_8, window_bounds = array<i64: 1, 16>}, {pipeline_mode = #tpu.pipeline_mode<synchronous>, transform_indices = @transform_9, window_bounds = array<i64: 256, 32>}, {pipeline_mode = #tpu.pipeline_mode<synchronous>, transform_indices = @transform_10, window_bounds = array<i64: 1, 32>}, {pipeline_mode = #tpu.pipeline_mode<synchronous>, transform_indices = @transform_11, window_bounds = array<i64: 384, 32>}, {pipeline_mode = #tpu.pipeline_mode<synchronous>, transform_indices = @transform_12, window_bounds = array<i64: 1, 32>}, {pipeline_mode = #tpu.pipeline_mode<synchronous>, transform_indices = @transform_13, window_bounds = array<i64: 16, 256>}, {pipeline_mode = #tpu.pipeline_mode<synchronous>, transform_indices = @transform_14, window_bounds = array<i64: 64, 256>}, {pipeline_mode = #tpu.pipeline_mode<synchronous>, transform_indices = @transform_15, window_bounds = array<i64: 64, 256>}, {pipeline_mode = #tpu.pipeline_mode<synchronous>, transform_indices = @transform_16, window_bounds = array<i64: 16, 64>}, {pipeline_mode = #tpu.pipeline_mode<synchronous>, transform_indices = @transform_17, window_bounds = array<i64: 256, 256>}, {transform_indices = @transform_18, window_bounds = array<i64: 1, 56, 256>}]} {
    %cst = arith.constant 0.000000e+00 : f32
    %0 = vector.broadcast %cst : f32 to vector<304x384xf32>
    %c0 = arith.constant 0 : index
    %c0_0 = arith.constant 0 : index
    %1 = vector.load %arg20[%c0, %c0_0] : memref<304x384xf32, #tpu.memory_space<vmem>>, vector<304x384xf32>
    tpu.vector_store %arg20[%c0, %c0_0], %0 {strides = array<i32>} : memref<304x384xf32, #tpu.memory_space<vmem>>, vector<304x384xf32>,
    %2 = tpu.iota {dimensions = array<i32: 0>} : vector<256x1xi32>
    %c16_i32 = arith.constant 16 : i32
    %c0_i32 = arith.constant 0 : i32
    %3 = arith.cmpi eq, %c16_i32, %c0_i32 : i32
    %c1_i32 = arith.constant 1 : i32
    %4 = arith.select %3, %c1_i32, %c16_i32 : i32
    %5 = vector.broadcast %4 : i32 to vector<256x1xi32>
    %6 = arith.remsi %2, %5 : vector<256x1xi32>
    %c0_i32_1 = arith.constant 0 : i32
    %7 = vector.broadcast %c0_i32_1 : i32 to vector<256x1xi32>
    %8 = arith.cmpi ne, %6, %7 : vector<256x1xi32>
    %c0_i32_2 = arith.constant 0 : i32
    %9 = vector.broadcast %c0_i32_2 : i32 to vector<256x1xi32>
    %10 = arith.cmpi slt, %6, %9 : vector<256x1xi32>
    %c0_i32_3 = arith.constant 0 : i32
    %11 = arith.cmpi slt, %4, %c0_i32_3 : i32
    %12 = vector.broadcast %11 : i1 to vector<256x1xi1>
    %13 = vector.broadcast %12 : vector<256x1xi1> to vector<256x1xi1>
    %14 = arith.xori %10, %13 : vector<256x1xi1>
    %15 = arith.andi %14, %8 : vector<256x1xi1>
    %16 = vector.broadcast %4 : i32 to vector<256x1xi32>
    %17 = arith.addi %6, %16 : vector<256x1xi32>
    %18 = arith.select %15, %17, %6 : vector<256x1xi1>, vector<256x1xi32>
    %c14_i32 = arith.constant 14 : i32
    %19 = vector.broadcast %c14_i32 : i32 to vector<256x1xi32>
    %20 = arith.cmpi sle, %18, %19 : vector<256x1xi32>
    %c1_i32_4 = arith.constant 1 : i32
    %21 = vector.broadcast %c1_i32_4 : i32 to vector<256x1xi32>
    %22 = arith.cmpi sge, %18, %21 : vector<256x1xi32>
    %23 = tpu.iota {dimensions = array<i32: 0>} : vector<64x1xi32>
    %c8_i32 = arith.constant 8 : i32
    %c0_i32_5 = arith.constant 0 : i32
    %24 = arith.cmpi eq, %c8_i32, %c0_i32_5 : i32
    %c1_i32_6 = arith.constant 1 : i32
    %25 = arith.select %24, %c1_i32_6, %c8_i32 : i32
    %26 = vector.broadcast %25 : i32 to vector<64x1xi32>
    %27 = arith.remsi %23, %26 : vector<64x1xi32>
    %c0_i32_7 = arith.constant 0 : i32
    %28 = vector.broadcast %c0_i32_7 : i32 to vector<64x1xi32>
    %29 = arith.cmpi ne, %27, %28 : vector<64x1xi32>
    %c0_i32_8 = arith.constant 0 : i32
    %30 = vector.broadcast %c0_i32_8 : i32 to vector<64x1xi32>
    %31 = arith.cmpi slt, %27, %30 : vector<64x1xi32>
    %c0_i32_9 = arith.constant 0 : i32
    %32 = arith.cmpi slt, %25, %c0_i32_9 : i32
    %33 = vector.broadcast %32 : i1 to vector<64x1xi1>
    %34 = vector.broadcast %33 : vector<64x1xi1> to vector<64x1xi1>
    %35 = arith.xori %31, %34 : vector<64x1xi1>
    %36 = arith.andi %35, %29 : vector<64x1xi1>
    %37 = vector.broadcast %25 : i32 to vector<64x1xi32>
    %38 = arith.addi %27, %37 : vector<64x1xi32>
    %39 = arith.select %36, %38, %27 : vector<64x1xi1>, vector<64x1xi32>
    %c6_i32 = arith.constant 6 : i32
    %40 = vector.broadcast %c6_i32 : i32 to vector<64x1xi32>
    %41 = arith.cmpi sle, %39, %40 : vector<64x1xi32>
    %c1_i32_10 = arith.constant 1 : i32
    %42 = vector.broadcast %c1_i32_10 : i32 to vector<64x1xi32>
    %43 = arith.cmpi sge, %39, %42 : vector<64x1xi32>
    %44 = tpu.iota {dimensions = array<i32: 0>} : vector<16x1xi32>
    %c4_i32 = arith.constant 4 : i32
    %c0_i32_11 = arith.constant 0 : i32
    %45 = arith.cmpi eq, %c4_i32, %c0_i32_11 : i32
    %c1_i32_12 = arith.constant 1 : i32
    %46 = arith.select %45, %c1_i32_12, %c4_i32 : i32
    %47 = vector.broadcast %46 : i32 to vector<16x1xi32>
    %48 = arith.remsi %44, %47 : vector<16x1xi32>
    %c0_i32_13 = arith.constant 0 : i32
    %49 = vector.broadcast %c0_i32_13 : i32 to vector<16x1xi32>
    %50 = arith.cmpi ne, %48, %49 : vector<16x1xi32>
    %c0_i32_14 = arith.constant 0 : i32
    %51 = vector.broadcast %c0_i32_14 : i32 to vector<16x1xi32>
    %52 = arith.cmpi slt, %48, %51 : vector<16x1xi32>
    %c0_i32_15 = arith.constant 0 : i32
    %53 = arith.cmpi slt, %46, %c0_i32_15 : i32
    %54 = vector.broadcast %53 : i1 to vector<16x1xi1>
    %55 = vector.broadcast %54 : vector<16x1xi1> to vector<16x1xi1>
    %56 = arith.xori %52, %55 : vector<16x1xi1>
    %57 = arith.andi %56, %50 : vector<16x1xi1>
    %58 = vector.broadcast %46 : i32 to vector<16x1xi32>
    %59 = arith.addi %48, %58 : vector<16x1xi32>
    %60 = arith.select %57, %59, %48 : vector<16x1xi1>, vector<16x1xi32>
    %c2_i32 = arith.constant 2 : i32
    %61 = vector.broadcast %c2_i32 : i32 to vector<16x1xi32>
    %62 = arith.cmpi sle, %60, %61 : vector<16x1xi32>
    %c1_i32_16 = arith.constant 1 : i32
    %63 = vector.broadcast %c1_i32_16 : i32 to vector<16x1xi32>
    %64 = arith.cmpi sge, %60, %63 : vector<16x1xi32>
    %c0_17 = arith.constant 0 : index
    %c0_18 = arith.constant 0 : index
    %c0_19 = arith.constant 0 : index
    %65 = vector.load %arg1[%c0_17, %c0_18, %c0_19] : memref<1x256x1xf32, #tpu.memory_space<vmem>>, vector<1x256x1xf32>
    %66 = vector.shape_cast %65 : vector<1x256x1xf32> to vector<256x1xf32>
    %cst_20 = arith.constant 0.000000e+00 : f32
    %67 = vector.broadcast %cst_20 : f32 to vector<24x384xf32>
    %c24 = arith.constant 24 : index
    %c0_21 = arith.constant 0 : index
    %68 = vector.load %arg20[%c24, %c0_21] : memref<304x384xf32, #tpu.memory_space<vmem>>, vector<24x384xf32>
    tpu.vector_store %arg20[%c24, %c0_21], %67 {strides = array<i32>} : memref<304x384xf32, #tpu.memory_space<vmem>>, vector<24x384xf32>,
    %c256 = arith.constant 256 : index
    %c0_22 = arith.constant 0 : index
    %69 = vector.load %arg20[%c256, %c0_22] : memref<304x384xf32, #tpu.memory_space<vmem>>, vector<24x384xf32>
    tpu.vector_store %arg20[%c256, %c0_22], %67 {strides = array<i32>} : memref<304x384xf32, #tpu.memory_space<vmem>>, vector<24x384xf32>,
    %cst_23 = arith.constant 0.000000e+00 : f32
    %70 = vector.broadcast %cst_23 : f32 to vector<256x1xf32>
    %71 = arith.select %20, %66, %70 : vector<256x1xi1>, vector<256x1xf32>
    %cst_24 = arith.constant 0.000000e+00 : f32
    %72 = vector.broadcast %cst_24 : f32 to vector<256x1xf32>
    %73 = arith.select %22, %66, %72 : vector<256x1xi1>, vector<256x1xf32>
    %c41 = arith.constant 41 : index
    %c0_25 = arith.constant 0 : index
    %74 = vector.load %arg20[%c41, %c0_25] : memref<304x384xf32, #tpu.memory_space<vmem>>, vector<256x1xf32>
    tpu.vector_store %arg20[%c41, %c0_25], %71 {strides = array<i32>} : memref<304x384xf32, #tpu.memory_space<vmem>>, vector<256x1xf32>,
    %c40 = arith.constant 40 : index
    %c1 = arith.constant 1 : index
    %75 = vector.load %arg20[%c40, %c1] : memref<304x384xf32, #tpu.memory_space<vmem>>, vector<256x1xf32>
    tpu.vector_store %arg20[%c40, %c1], %66 {strides = array<i32>} : memref<304x384xf32, #tpu.memory_space<vmem>>, vector<256x1xf32>,
    %c39 = arith.constant 39 : index
    %c2 = arith.constant 2 : index
    %76 = vector.load %arg20[%c39, %c2] : memref<304x384xf32, #tpu.memory_space<vmem>>, vector<256x1xf32>
    tpu.vector_store %arg20[%c39, %c2], %73 {strides = array<i32>} : memref<304x384xf32, #tpu.memory_space<vmem>>, vector<256x1xf32>,
    %c25 = arith.constant 25 : index
    %c3 = arith.constant 3 : index
    %77 = vector.load %arg20[%c25, %c3] : memref<304x384xf32, #tpu.memory_space<vmem>>, vector<256x1xf32>
    tpu.vector_store %arg20[%c25, %c3], %71 {strides = array<i32>} : memref<304x384xf32, #tpu.memory_space<vmem>>, vector<256x1xf32>,
    %c24_26 = arith.constant 24 : index
    %c4 = arith.constant 4 : index
    %78 = vector.load %arg20[%c24_26, %c4] : memref<304x384xf32, #tpu.memory_space<vmem>>, vector<256x1xf32>
    tpu.vector_store %arg20[%c24_26, %c4], %66 {strides = array<i32>} : memref<304x384xf32, #tpu.memory_space<vmem>>, vector<256x1xf32>,
    %c23 = arith.constant 23 : index
    %c5 = arith.constant 5 : index
    %79 = vector.load %arg20[%c23, %c5] : memref<304x384xf32, #tpu.memory_space<vmem>>, vector<256x1xf32>
    tpu.vector_store %arg20[%c23, %c5], %73 {strides = array<i32>} : memref<304x384xf32, #tpu.memory_space<vmem>>, vector<256x1xf32>,
    %c9 = arith.constant 9 : index
    %c6 = arith.constant 6 : index
    %80 = vector.load %arg20[%c9, %c6] : memref<304x384xf32, #tpu.memory_space<vmem>>, vector<256x1xf32>
    tpu.vector_store %arg20[%c9, %c6], %71 {strides = array<i32>} : memref<304x384xf32, #tpu.memory_space<vmem>>, vector<256x1xf32>,
    %c8 = arith.constant 8 : index
    %c7 = arith.constant 7 : index
    %81 = vector.load %arg20[%c8, %c7] : memref<304x384xf32, #tpu.memory_space<vmem>>, vector<256x1xf32>
    tpu.vector_store %arg20[%c8, %c7], %66 {strides = array<i32>} : memref<304x384xf32, #tpu.memory_space<vmem>>, vector<256x1xf32>,
    %c7_27 = arith.constant 7 : index
    %c8_28 = arith.constant 8 : index
    %82 = vector.load %arg20[%c7_27, %c8_28] : memref<304x384xf32, #tpu.memory_space<vmem>>, vector<256x1xf32>
    tpu.vector_store %arg20[%c7_27, %c8_28], %73 {strides = array<i32>} : memref<304x384xf32, #tpu.memory_space<vmem>>, vector<256x1xf32>,
    %c24_29 = arith.constant 24 : index
    %c0_30 = arith.constant 0 : index
    %83 = vector.load %arg20[%c24_29, %c0_30] : memref<304x384xf32, #tpu.memory_space<vmem>>, vector<256x128xf32>
    %84 = arith.truncf %83 : vector<256x128xf32> to vector<256x128xbf16>
    %c0_31 = arith.constant 0 : index
    %c0_32 = arith.constant 0 : index
    %85 = vector.load %arg2[%c0_31, %c0_32] : memref<128x8xbf16, #tpu.memory_space<vmem>>, vector<128x8xbf16>
    %cst_33 = arith.constant dense<0.000000e+00> : vector<256x8xf32>
    %86 = tpu.matmul %84, %85, %cst_33 {dimension_numbers = #tpu.dot_dimension_numbers<[1], [0], [0], [1], [0, 0, 1, 1], [], []>} : vector<256x128xbf16>, vector<128x8xbf16>, vector<256x8xf32> -> vector<256x8xf32>
    %c0_34 = arith.constant 0 : index
    %c0_35 = arith.constant 0 : index
    %87 = vector.load %arg3[%c0_34, %c0_35] : memref<1x8xf32, #tpu.memory_space<vmem>>, vector<1x8xf32>
    %88 = vector.broadcast %87 : vector<1x8xf32> to vector<256x8xf32>
    %89 = arith.addf %86, %88 : vector<256x8xf32>
    %cst_36 = arith.constant 0.000000e+00 : f32
    %90 = vector.broadcast %cst_36 : f32 to vector<256x8xf32>
    %91 = arith.maximumf %89, %90 : vector<256x8xf32>
    %cst_37 = arith.constant 0.000000e+00 : f32
    %92 = vector.broadcast %cst_37 : f32 to vector<24x384xf32>
    %c24_38 = arith.constant 24 : index
    %c0_39 = arith.constant 0 : index
    %93 = vector.load %arg20[%c24_38, %c0_39] : memref<304x384xf32, #tpu.memory_space<vmem>>, vector<24x384xf32>
    tpu.vector_store %arg20[%c24_38, %c0_39], %92 {strides = array<i32>} : memref<304x384xf32, #tpu.memory_space<vmem>>, vector<24x384xf32>,
    %c256_40 = arith.constant 256 : index
    %c0_41 = arith.constant 0 : index
    %94 = vector.load %arg20[%c256_40, %c0_41] : memref<304x384xf32, #tpu.memory_space<vmem>>, vector<24x384xf32>
    tpu.vector_store %arg20[%c256_40, %c0_41], %92 {strides = array<i32>} : memref<304x384xf32, #tpu.memory_space<vmem>>, vector<24x384xf32>,
    %cst_42 = arith.constant 0.000000e+00 : f32
    %95 = vector.shape_cast %20 : vector<256x1xi1> to vector<256x1xi1>
    %96 = vector.broadcast %95 : vector<256x1xi1> to vector<256x8xi1>
    %97 = vector.broadcast %cst_42 : f32 to vector<256x8xf32>
    %98 = arith.select %96, %91, %97 : vector<256x8xi1>, vector<256x8xf32>
    %cst_43 = arith.constant 0.000000e+00 : f32
    %99 = vector.shape_cast %22 : vector<256x1xi1> to vector<256x1xi1>
    %100 = vector.broadcast %99 : vector<256x1xi1> to vector<256x8xi1>
    %101 = vector.broadcast %cst_43 : f32 to vector<256x8xf32>
    %102 = arith.select %100, %91, %101 : vector<256x8xi1>, vector<256x8xf32>
    %c41_44 = arith.constant 41 : index
    %c0_45 = arith.constant 0 : index
    %103 = vector.load %arg20[%c41_44, %c0_45] : memref<304x384xf32, #tpu.memory_space<vmem>>, vector<256x8xf32>
    tpu.vector_store %arg20[%c41_44, %c0_45], %98 {strides = array<i32>} : memref<304x384xf32, #tpu.memory_space<vmem>>, vector<256x8xf32>,
    %c40_46 = arith.constant 40 : index
    %c8_47 = arith.constant 8 : index
    %104 = vector.load %arg20[%c40_46, %c8_47] : memref<304x384xf32, #tpu.memory_space<vmem>>, vector<256x8xf32>
    tpu.vector_store %arg20[%c40_46, %c8_47], %91 {strides = array<i32>} : memref<304x384xf32, #tpu.memory_space<vmem>>, vector<256x8xf32>,
    %c39_48 = arith.constant 39 : index
    %c16 = arith.constant 16 : index
    %105 = vector.load %arg20[%c39_48, %c16] : memref<304x384xf32, #tpu.memory_space<vmem>>, vector<256x8xf32>
    tpu.vector_store %arg20[%c39_48, %c16], %102 {strides = array<i32>} : memref<304x384xf32, #tpu.memory_space<vmem>>, vector<256x8xf32>,
    %c25_49 = arith.constant 25 : index
    %c24_50 = arith.constant 24 : index
    %106 = vector.load %arg20[%c25_49, %c24_50] : memref<304x384xf32, #tpu.memory_space<vmem>>, vector<256x8xf32>
    tpu.vector_store %arg20[%c25_49, %c24_50], %98 {strides = array<i32>} : memref<304x384xf32, #tpu.memory_space<vmem>>, vector<256x8xf32>,
    %c24_51 = arith.constant 24 : index
    %c32 = arith.constant 32 : index
    %107 = vector.load %arg20[%c24_51, %c32] : memref<304x384xf32, #tpu.memory_space<vmem>>, vector<256x8xf32>
    tpu.vector_store %arg20[%c24_51, %c32], %91 {strides = array<i32>} : memref<304x384xf32, #tpu.memory_space<vmem>>, vector<256x8xf32>,
    %c23_52 = arith.constant 23 : index
    %c40_53 = arith.constant 40 : index
    %108 = vector.load %arg20[%c23_52, %c40_53] : memref<304x384xf32, #tpu.memory_space<vmem>>, vector<256x8xf32>
    tpu.vector_store %arg20[%c23_52, %c40_53], %102 {strides = array<i32>} : memref<304x384xf32, #tpu.memory_space<vmem>>, vector<256x8xf32>,
    %c9_54 = arith.constant 9 : index
    %c48 = arith.constant 48 : index
    %109 = vector.load %arg20[%c9_54, %c48] : memref<304x384xf32, #tpu.memory_space<vmem>>, vector<256x8xf32>
    tpu.vector_store %arg20[%c9_54, %c48], %98 {strides = array<i32>} : memref<304x384xf32, #tpu.memory_space<vmem>>, vector<256x8xf32>,
    %c8_55 = arith.constant 8 : index
    %c56 = arith.constant 56 : index
    %110 = vector.load %arg20[%c8_55, %c56] : memref<304x384xf32, #tpu.memory_space<vmem>>, vector<256x8xf32>
    tpu.vector_store %arg20[%c8_55, %c56], %91 {strides = array<i32>} : memref<304x384xf32, #tpu.memory_space<vmem>>, vector<256x8xf32>,
    %c7_56 = arith.constant 7 : index
    %c64 = arith.constant 64 : index
    %111 = vector.load %arg20[%c7_56, %c64] : memref<304x384xf32, #tpu.memory_space<vmem>>, vector<256x8xf32>
    tpu.vector_store %arg20[%c7_56, %c64], %102 {strides = array<i32>} : memref<304x384xf32, #tpu.memory_space<vmem>>, vector<256x8xf32>,
    %c24_57 = arith.constant 24 : index
    %c0_58 = arith.constant 0 : index
    %112 = vector.load %arg20[%c24_57, %c0_58] : memref<304x384xf32, #tpu.memory_space<vmem>>, vector<256x128xf32>
    %113 = arith.truncf %112 : vector<256x128xf32> to vector<256x128xbf16>
    %c0_59 = arith.constant 0 : index
    %c0_60 = arith.constant 0 : index
    %114 = vector.load %arg4[%c0_59, %c0_60] : memref<128x8xbf16, #tpu.memory_space<vmem>>, vector<128x8xbf16>
    %cst_61 = arith.constant dense<0.000000e+00> : vector<256x8xf32>
    %115 = tpu.matmul %113, %114, %cst_61 {dimension_numbers = #tpu.dot_dimension_numbers<[1], [0], [0], [1], [0, 0, 1, 1], [], []>} : vector<256x128xbf16>, vector<128x8xbf16>, vector<256x8xf32> -> vector<256x8xf32>
    %c0_62 = arith.constant 0 : index
    %c0_63 = arith.constant 0 : index
    %116 = vector.load %arg5[%c0_62, %c0_63] : memref<1x8xf32, #tpu.memory_space<vmem>>, vector<1x8xf32>
    %117 = vector.broadcast %116 : vector<1x8xf32> to vector<256x8xf32>
    %118 = arith.addf %115, %117 : vector<256x8xf32>
    %cst_64 = arith.constant 0.000000e+00 : f32
    %119 = vector.broadcast %cst_64 : f32 to vector<256x8xf32>
    %120 = arith.maximumf %118, %119 : vector<256x8xf32>
    %cst_65 = arith.constant 0.000000e+00 : f32
    %121 = vector.broadcast %cst_65 : f32 to vector<24x8xf32>
    %c256_66 = arith.constant 256 : index
    %c0_67 = arith.constant 0 : index
    %122 = vector.load %arg20[%c256_66, %c0_67] : memref<304x384xf32, #tpu.memory_space<vmem>>, vector<24x8xf32>
    tpu.vector_store %arg20[%c256_66, %c0_67], %121 {strides = array<i32>} : memref<304x384xf32, #tpu.memory_space<vmem>>, vector<24x8xf32>,
    %c0_68 = arith.constant 0 : index
    %c0_69 = arith.constant 0 : index
    %123 = vector.load %arg20[%c0_68, %c0_69] : memref<304x384xf32, #tpu.memory_space<vmem>>, vector<256x8xf32>
    tpu.vector_store %arg20[%c0_68, %c0_69], %120 {strides = array<i32>} : memref<304x384xf32, #tpu.memory_space<vmem>>, vector<256x8xf32>,
    %c0_70 = arith.constant 0 : index
    %c0_71 = arith.constant 0 : index
    %124 = vector.load %arg20[%c0_70, %c0_71] : memref<304x384xf32, #tpu.memory_space<vmem>>, vector<256x8xf32>
    %c1_72 = arith.constant 1 : index
    %c0_73 = arith.constant 0 : index
    %125 = vector.load %arg20[%c1_72, %c0_73] : memref<304x384xf32, #tpu.memory_space<vmem>>, vector<256x8xf32>
    %126 = arith.maximumf %124, %125 : vector<256x8xf32>
    %c16_74 = arith.constant 16 : index
    %c0_75 = arith.constant 0 : index
    %127 = vector.load %arg20[%c16_74, %c0_75] : memref<304x384xf32, #tpu.memory_space<vmem>>, vector<256x8xf32>
    %c17 = arith.constant 17 : index
    %c0_76 = arith.constant 0 : index
    %128 = vector.load %arg20[%c17, %c0_76] : memref<304x384xf32, #tpu.memory_space<vmem>>, vector<256x8xf32>
    %129 = arith.maximumf %127, %128 : vector<256x8xf32>
    %130 = arith.maximumf %126, %129 : vector<256x8xf32>
    %c0_77 = arith.constant 0 : index
    %c0_78 = arith.constant 0 : index
    %131 = vector.load %arg16[%c0_77, %c0_78] : memref<64x256xbf16, #tpu.memory_space<vmem>>, vector<64x256xbf16>
    %132 = arith.truncf %130 : vector<256x8xf32> to vector<256x8xbf16>
    %cst_79 = arith.constant dense<0.000000e+00> : vector<64x8xf32>
    %133 = tpu.matmul %131, %132, %cst_79 {dimension_numbers = #tpu.dot_dimension_numbers<[1], [0], [0], [1], [0, 0, 1, 1], [], []>} : vector<64x256xbf16>, vector<256x8xbf16>, vector<64x8xf32> -> vector<64x8xf32>
    %cst_80 = arith.constant 0.000000e+00 : f32
    %134 = vector.broadcast %cst_80 : f32 to vector<16x384xf32>
    %c16_81 = arith.constant 16 : index
    %c0_82 = arith.constant 0 : index
    %135 = vector.load %arg20[%c16_81, %c0_82] : memref<304x384xf32, #tpu.memory_space<vmem>>, vector<16x384xf32>
    tpu.vector_store %arg20[%c16_81, %c0_82], %134 {strides = array<i32>} : memref<304x384xf32, #tpu.memory_space<vmem>>, vector<16x384xf32>,
    %c64_83 = arith.constant 64 : index
    %c0_84 = arith.constant 0 : index
    %136 = vector.load %arg20[%c64_83, %c0_84] : memref<304x384xf32, #tpu.memory_space<vmem>>, vector<16x384xf32>
    tpu.vector_store %arg20[%c64_83, %c0_84], %134 {strides = array<i32>} : memref<304x384xf32, #tpu.memory_space<vmem>>, vector<16x384xf32>,
    %cst_85 = arith.constant 0.000000e+00 : f32
    %137 = vector.shape_cast %41 : vector<64x1xi1> to vector<64x1xi1>
    %138 = vector.broadcast %137 : vector<64x1xi1> to vector<64x8xi1>
    %139 = vector.broadcast %cst_85 : f32 to vector<64x8xf32>
    %140 = arith.select %138, %133, %139 : vector<64x8xi1>, vector<64x8xf32>
    %cst_86 = arith.constant 0.000000e+00 : f32
    %141 = vector.shape_cast %43 : vector<64x1xi1> to vector<64x1xi1>
    %142 = vector.broadcast %141 : vector<64x1xi1> to vector<64x8xi1>
    %143 = vector.broadcast %cst_86 : f32 to vector<64x8xf32>
    %144 = arith.select %142, %133, %143 : vector<64x8xi1>, vector<64x8xf32>
    %c25_87 = arith.constant 25 : index
    %c0_88 = arith.constant 0 : index
    %145 = vector.load %arg20[%c25_87, %c0_88] : memref<304x384xf32, #tpu.memory_space<vmem>>, vector<64x8xf32>
    tpu.vector_store %arg20[%c25_87, %c0_88], %140 {strides = array<i32>} : memref<304x384xf32, #tpu.memory_space<vmem>>, vector<64x8xf32>,
    %c24_89 = arith.constant 24 : index
    %c8_90 = arith.constant 8 : index
    %146 = vector.load %arg20[%c24_89, %c8_90] : memref<304x384xf32, #tpu.memory_space<vmem>>, vector<64x8xf32>
    tpu.vector_store %arg20[%c24_89, %c8_90], %133 {strides = array<i32>} : memref<304x384xf32, #tpu.memory_space<vmem>>, vector<64x8xf32>,
    %c23_91 = arith.constant 23 : index
    %c16_92 = arith.constant 16 : index
    %147 = vector.load %arg20[%c23_91, %c16_92] : memref<304x384xf32, #tpu.memory_space<vmem>>, vector<64x8xf32>
    tpu.vector_store %arg20[%c23_91, %c16_92], %144 {strides = array<i32>} : memref<304x384xf32, #tpu.memory_space<vmem>>, vector<64x8xf32>,
    %c17_93 = arith.constant 17 : index
    %c24_94 = arith.constant 24 : index
    %148 = vector.load %arg20[%c17_93, %c24_94] : memref<304x384xf32, #tpu.memory_space<vmem>>, vector<64x8xf32>
    tpu.vector_store %arg20[%c17_93, %c24_94], %140 {strides = array<i32>} : memref<304x384xf32, #tpu.memory_space<vmem>>, vector<64x8xf32>,
    %c16_95 = arith.constant 16 : index
    %c32_96 = arith.constant 32 : index
    %149 = vector.load %arg20[%c16_95, %c32_96] : memref<304x384xf32, #tpu.memory_space<vmem>>, vector<64x8xf32>
    tpu.vector_store %arg20[%c16_95, %c32_96], %133 {strides = array<i32>} : memref<304x384xf32, #tpu.memory_space<vmem>>, vector<64x8xf32>,
    %c15 = arith.constant 15 : index
    %c40_97 = arith.constant 40 : index
    %150 = vector.load %arg20[%c15, %c40_97] : memref<304x384xf32, #tpu.memory_space<vmem>>, vector<64x8xf32>
    tpu.vector_store %arg20[%c15, %c40_97], %144 {strides = array<i32>} : memref<304x384xf32, #tpu.memory_space<vmem>>, vector<64x8xf32>,
    %c9_98 = arith.constant 9 : index
    %c48_99 = arith.constant 48 : index
    %151 = vector.load %arg20[%c9_98, %c48_99] : memref<304x384xf32, #tpu.memory_space<vmem>>, vector<64x8xf32>
    tpu.vector_store %arg20[%c9_98, %c48_99], %140 {strides = array<i32>} : memref<304x384xf32, #tpu.memory_space<vmem>>, vector<64x8xf32>,
    %c8_100 = arith.constant 8 : index
    %c56_101 = arith.constant 56 : index
    %152 = vector.load %arg20[%c8_100, %c56_101] : memref<304x384xf32, #tpu.memory_space<vmem>>, vector<64x8xf32>
    tpu.vector_store %arg20[%c8_100, %c56_101], %133 {strides = array<i32>} : memref<304x384xf32, #tpu.memory_space<vmem>>, vector<64x8xf32>,
    %c7_102 = arith.constant 7 : index
    %c64_103 = arith.constant 64 : index
    %153 = vector.load %arg20[%c7_102, %c64_103] : memref<304x384xf32, #tpu.memory_space<vmem>>, vector<64x8xf32>
    tpu.vector_store %arg20[%c7_102, %c64_103], %144 {strides = array<i32>} : memref<304x384xf32, #tpu.memory_space<vmem>>, vector<64x8xf32>,
    %c16_104 = arith.constant 16 : index
    %c0_105 = arith.constant 0 : index
    %154 = vector.load %arg20[%c16_104, %c0_105] : memref<304x384xf32, #tpu.memory_space<vmem>>, vector<64x128xf32>
    %155 = arith.truncf %154 : vector<64x128xf32> to vector<64x128xbf16>
    %c0_106 = arith.constant 0 : index
    %c0_107 = arith.constant 0 : index
    %156 = vector.load %arg6[%c0_106, %c0_107] : memref<128x16xbf16, #tpu.memory_space<vmem>>, vector<128x16xbf16>
    %cst_108 = arith.constant dense<0.000000e+00> : vector<64x16xf32>
    %157 = tpu.matmul %155, %156, %cst_108 {dimension_numbers = #tpu.dot_dimension_numbers<[1], [0], [0], [1], [0, 0, 1, 1], [], []>} : vector<64x128xbf16>, vector<128x16xbf16>, vector<64x16xf32> -> vector<64x16xf32>
    %c0_109 = arith.constant 0 : index
    %c0_110 = arith.constant 0 : index
    %158 = vector.load %arg7[%c0_109, %c0_110] : memref<1x16xf32, #tpu.memory_space<vmem>>, vector<1x16xf32>
    %159 = vector.broadcast %158 : vector<1x16xf32> to vector<64x16xf32>
    %160 = arith.addf %157, %159 : vector<64x16xf32>
    %cst_111 = arith.constant 0.000000e+00 : f32
    %161 = vector.broadcast %cst_111 : f32 to vector<64x16xf32>
    %162 = arith.maximumf %160, %161 : vector<64x16xf32>
    %cst_112 = arith.constant 0.000000e+00 : f32
    %163 = vector.broadcast %cst_112 : f32 to vector<16x384xf32>
    %c16_113 = arith.constant 16 : index
    %c0_114 = arith.constant 0 : index
    %164 = vector.load %arg20[%c16_113, %c0_114] : memref<304x384xf32, #tpu.memory_space<vmem>>, vector<16x384xf32>
    tpu.vector_store %arg20[%c16_113, %c0_114], %163 {strides = array<i32>} : memref<304x384xf32, #tpu.memory_space<vmem>>, vector<16x384xf32>,
    %c64_115 = arith.constant 64 : index
    %c0_116 = arith.constant 0 : index
    %165 = vector.load %arg20[%c64_115, %c0_116] : memref<304x384xf32, #tpu.memory_space<vmem>>, vector<16x384xf32>
    tpu.vector_store %arg20[%c64_115, %c0_116], %163 {strides = array<i32>} : memref<304x384xf32, #tpu.memory_space<vmem>>, vector<16x384xf32>,
    %cst_117 = arith.constant 0.000000e+00 : f32
    %166 = vector.shape_cast %41 : vector<64x1xi1> to vector<64x1xi1>
    %167 = vector.broadcast %166 : vector<64x1xi1> to vector<64x16xi1>
    %168 = vector.broadcast %cst_117 : f32 to vector<64x16xf32>
    %169 = arith.select %167, %162, %168 : vector<64x16xi1>, vector<64x16xf32>
    %cst_118 = arith.constant 0.000000e+00 : f32
    %170 = vector.shape_cast %43 : vector<64x1xi1> to vector<64x1xi1>
    %171 = vector.broadcast %170 : vector<64x1xi1> to vector<64x16xi1>
    %172 = vector.broadcast %cst_118 : f32 to vector<64x16xf32>
    %173 = arith.select %171, %162, %172 : vector<64x16xi1>, vector<64x16xf32>
    %c25_119 = arith.constant 25 : index
    %c0_120 = arith.constant 0 : index
    %174 = vector.load %arg20[%c25_119, %c0_120] : memref<304x384xf32, #tpu.memory_space<vmem>>, vector<64x16xf32>
    tpu.vector_store %arg20[%c25_119, %c0_120], %169 {strides = array<i32>} : memref<304x384xf32, #tpu.memory_space<vmem>>, vector<64x16xf32>,
    %c24_121 = arith.constant 24 : index
    %c16_122 = arith.constant 16 : index
    %175 = vector.load %arg20[%c24_121, %c16_122] : memref<304x384xf32, #tpu.memory_space<vmem>>, vector<64x16xf32>
    tpu.vector_store %arg20[%c24_121, %c16_122], %162 {strides = array<i32>} : memref<304x384xf32, #tpu.memory_space<vmem>>, vector<64x16xf32>,
    %c23_123 = arith.constant 23 : index
    %c32_124 = arith.constant 32 : index
    %176 = vector.load %arg20[%c23_123, %c32_124] : memref<304x384xf32, #tpu.memory_space<vmem>>, vector<64x16xf32>
    tpu.vector_store %arg20[%c23_123, %c32_124], %173 {strides = array<i32>} : memref<304x384xf32, #tpu.memory_space<vmem>>, vector<64x16xf32>,
    %c17_125 = arith.constant 17 : index
    %c48_126 = arith.constant 48 : index
    %177 = vector.load %arg20[%c17_125, %c48_126] : memref<304x384xf32, #tpu.memory_space<vmem>>, vector<64x16xf32>
    tpu.vector_store %arg20[%c17_125, %c48_126], %169 {strides = array<i32>} : memref<304x384xf32, #tpu.memory_space<vmem>>, vector<64x16xf32>,
    %c16_127 = arith.constant 16 : index
    %c64_128 = arith.constant 64 : index
    %178 = vector.load %arg20[%c16_127, %c64_128] : memref<304x384xf32, #tpu.memory_space<vmem>>, vector<64x16xf32>
    tpu.vector_store %arg20[%c16_127, %c64_128], %162 {strides = array<i32>} : memref<304x384xf32, #tpu.memory_space<vmem>>, vector<64x16xf32>,
    %c15_129 = arith.constant 15 : index
    %c80 = arith.constant 80 : index
    %179 = vector.load %arg20[%c15_129, %c80] : memref<304x384xf32, #tpu.memory_space<vmem>>, vector<64x16xf32>
    tpu.vector_store %arg20[%c15_129, %c80], %173 {strides = array<i32>} : memref<304x384xf32, #tpu.memory_space<vmem>>, vector<64x16xf32>,
    %c9_130 = arith.constant 9 : index
    %c96 = arith.constant 96 : index
    %180 = vector.load %arg20[%c9_130, %c96] : memref<304x384xf32, #tpu.memory_space<vmem>>, vector<64x16xf32>
    tpu.vector_store %arg20[%c9_130, %c96], %169 {strides = array<i32>} : memref<304x384xf32, #tpu.memory_space<vmem>>, vector<64x16xf32>,
    %c8_131 = arith.constant 8 : index
    %c112 = arith.constant 112 : index
    %181 = vector.load %arg20[%c8_131, %c112] : memref<304x384xf32, #tpu.memory_space<vmem>>, vector<64x16xf32>
    tpu.vector_store %arg20[%c8_131, %c112], %162 {strides = array<i32>} : memref<304x384xf32, #tpu.memory_space<vmem>>, vector<64x16xf32>,
    %c7_132 = arith.constant 7 : index
    %c128 = arith.constant 128 : index
    %182 = vector.load %arg20[%c7_132, %c128] : memref<304x384xf32, #tpu.memory_space<vmem>>, vector<64x16xf32>
    tpu.vector_store %arg20[%c7_132, %c128], %173 {strides = array<i32>} : memref<304x384xf32, #tpu.memory_space<vmem>>, vector<64x16xf32>,
    %c16_133 = arith.constant 16 : index
    %c0_134 = arith.constant 0 : index
    %183 = vector.load %arg20[%c16_133, %c0_134] : memref<304x384xf32, #tpu.memory_space<vmem>>, vector<64x256xf32>
    %184 = arith.truncf %183 : vector<64x256xf32> to vector<64x256xbf16>
    %c0_135 = arith.constant 0 : index
    %c0_136 = arith.constant 0 : index
    %185 = vector.load %arg8[%c0_135, %c0_136] : memref<256x16xbf16, #tpu.memory_space<vmem>>, vector<256x16xbf16>
    %cst_137 = arith.constant dense<0.000000e+00> : vector<64x16xf32>
    %186 = tpu.matmul %184, %185, %cst_137 {dimension_numbers = #tpu.dot_dimension_numbers<[1], [0], [0], [1], [0, 0, 1, 1], [], []>} : vector<64x256xbf16>, vector<256x16xbf16>, vector<64x16xf32> -> vector<64x16xf32>
    %c0_138 = arith.constant 0 : index
    %c0_139 = arith.constant 0 : index
    %187 = vector.load %arg9[%c0_138, %c0_139] : memref<1x16xf32, #tpu.memory_space<vmem>>, vector<1x16xf32>
    %188 = vector.broadcast %187 : vector<1x16xf32> to vector<64x16xf32>
    %189 = arith.addf %186, %188 : vector<64x16xf32>
    %cst_140 = arith.constant 0.000000e+00 : f32
    %190 = vector.broadcast %cst_140 : f32 to vector<64x16xf32>
    %191 = arith.maximumf %189, %190 : vector<64x16xf32>
    %cst_141 = arith.constant 0.000000e+00 : f32
    %192 = vector.broadcast %cst_141 : f32 to vector<16x16xf32>
    %c64_142 = arith.constant 64 : index
    %c0_143 = arith.constant 0 : index
    %193 = vector.load %arg20[%c64_142, %c0_143] : memref<304x384xf32, #tpu.memory_space<vmem>>, vector<16x16xf32>
    tpu.vector_store %arg20[%c64_142, %c0_143], %192 {strides = array<i32>} : memref<304x384xf32, #tpu.memory_space<vmem>>, vector<16x16xf32>,
    %c0_144 = arith.constant 0 : index
    %c0_145 = arith.constant 0 : index
    %194 = vector.load %arg20[%c0_144, %c0_145] : memref<304x384xf32, #tpu.memory_space<vmem>>, vector<64x16xf32>
    tpu.vector_store %arg20[%c0_144, %c0_145], %191 {strides = array<i32>} : memref<304x384xf32, #tpu.memory_space<vmem>>, vector<64x16xf32>,
    %c0_146 = arith.constant 0 : index
    %c0_147 = arith.constant 0 : index
    %195 = vector.load %arg20[%c0_146, %c0_147] : memref<304x384xf32, #tpu.memory_space<vmem>>, vector<64x16xf32>
    %c1_148 = arith.constant 1 : index
    %c0_149 = arith.constant 0 : index
    %196 = vector.load %arg20[%c1_148, %c0_149] : memref<304x384xf32, #tpu.memory_space<vmem>>, vector<64x16xf32>
    %197 = arith.maximumf %195, %196 : vector<64x16xf32>
    %c8_150 = arith.constant 8 : index
    %c0_151 = arith.constant 0 : index
    %198 = vector.load %arg20[%c8_150, %c0_151] : memref<304x384xf32, #tpu.memory_space<vmem>>, vector<64x16xf32>
    %c9_152 = arith.constant 9 : index
    %c0_153 = arith.constant 0 : index
    %199 = vector.load %arg20[%c9_152, %c0_153] : memref<304x384xf32, #tpu.memory_space<vmem>>, vector<64x16xf32>
    %200 = arith.maximumf %198, %199 : vector<64x16xf32>
    %201 = arith.maximumf %197, %200 : vector<64x16xf32>
    %c0_154 = arith.constant 0 : index
    %c0_155 = arith.constant 0 : index
    %202 = vector.load %arg17[%c0_154, %c0_155] : memref<16x64xbf16, #tpu.memory_space<vmem>>, vector<16x64xbf16>
    %203 = arith.truncf %201 : vector<64x16xf32> to vector<64x16xbf16>
    %cst_156 = arith.constant dense<0.000000e+00> : vector<16x16xf32>
    %204 = tpu.matmul %202, %203, %cst_156 {dimension_numbers = #tpu.dot_dimension_numbers<[1], [0], [0], [1], [0, 0, 1, 1], [], []>} : vector<16x64xbf16>, vector<64x16xbf16>, vector<16x16xf32> -> vector<16x16xf32>
    %cst_157 = arith.constant 0.000000e+00 : f32
    %205 = vector.broadcast %cst_157 : f32 to vector<8x384xf32>
    %c8_158 = arith.constant 8 : index
    %c0_159 = arith.constant 0 : index
    %206 = vector.load %arg20[%c8_158, %c0_159] : memref<304x384xf32, #tpu.memory_space<vmem>>, vector<8x384xf32>
    tpu.vector_store %arg20[%c8_158, %c0_159], %205 {strides = array<i32>} : memref<304x384xf32, #tpu.memory_space<vmem>>, vector<8x384xf32>,
    %c16_160 = arith.constant 16 : index
    %c0_161 = arith.constant 0 : index
    %207 = vector.load %arg20[%c16_160, %c0_161] : memref<304x384xf32, #tpu.memory_space<vmem>>, vector<8x384xf32>
    tpu.vector_store %arg20[%c16_160, %c0_161], %205 {strides = array<i32>} : memref<304x384xf32, #tpu.memory_space<vmem>>, vector<8x384xf32>,
    %cst_162 = arith.constant 0.000000e+00 : f32
    %208 = vector.shape_cast %62 : vector<16x1xi1> to vector<16x1xi1>
    %209 = vector.broadcast %208 : vector<16x1xi1> to vector<16x16xi1>
    %210 = vector.broadcast %cst_162 : f32 to vector<16x16xf32>
    %211 = arith.select %209, %204, %210 : vector<16x16xi1>, vector<16x16xf32>
    %cst_163 = arith.constant 0.000000e+00 : f32
    %212 = vector.shape_cast %64 : vector<16x1xi1> to vector<16x1xi1>
    %213 = vector.broadcast %212 : vector<16x1xi1> to vector<16x16xi1>
    %214 = vector.broadcast %cst_163 : f32 to vector<16x16xf32>
    %215 = arith.select %213, %204, %214 : vector<16x16xi1>, vector<16x16xf32>
    %c13 = arith.constant 13 : index
    %c0_164 = arith.constant 0 : index
    %216 = vector.load %arg20[%c13, %c0_164] : memref<304x384xf32, #tpu.memory_space<vmem>>, vector<16x16xf32>
    tpu.vector_store %arg20[%c13, %c0_164], %211 {strides = array<i32>} : memref<304x384xf32, #tpu.memory_space<vmem>>, vector<16x16xf32>,
    %c12 = arith.constant 12 : index
    %c16_165 = arith.constant 16 : index
    %217 = vector.load %arg20[%c12, %c16_165] : memref<304x384xf32, #tpu.memory_space<vmem>>, vector<16x16xf32>
    tpu.vector_store %arg20[%c12, %c16_165], %204 {strides = array<i32>} : memref<304x384xf32, #tpu.memory_space<vmem>>, vector<16x16xf32>,
    %c11 = arith.constant 11 : index
    %c32_166 = arith.constant 32 : index
    %218 = vector.load %arg20[%c11, %c32_166] : memref<304x384xf32, #tpu.memory_space<vmem>>, vector<16x16xf32>
    tpu.vector_store %arg20[%c11, %c32_166], %215 {strides = array<i32>} : memref<304x384xf32, #tpu.memory_space<vmem>>, vector<16x16xf32>,
    %c9_167 = arith.constant 9 : index
    %c48_168 = arith.constant 48 : index
    %219 = vector.load %arg20[%c9_167, %c48_168] : memref<304x384xf32, #tpu.memory_space<vmem>>, vector<16x16xf32>
    tpu.vector_store %arg20[%c9_167, %c48_168], %211 {strides = array<i32>} : memref<304x384xf32, #tpu.memory_space<vmem>>, vector<16x16xf32>,
    %c8_169 = arith.constant 8 : index
    %c64_170 = arith.constant 64 : index
    %220 = vector.load %arg20[%c8_169, %c64_170] : memref<304x384xf32, #tpu.memory_space<vmem>>, vector<16x16xf32>
    tpu.vector_store %arg20[%c8_169, %c64_170], %204 {strides = array<i32>} : memref<304x384xf32, #tpu.memory_space<vmem>>, vector<16x16xf32>,
    %c7_171 = arith.constant 7 : index
    %c80_172 = arith.constant 80 : index
    %221 = vector.load %arg20[%c7_171, %c80_172] : memref<304x384xf32, #tpu.memory_space<vmem>>, vector<16x16xf32>
    tpu.vector_store %arg20[%c7_171, %c80_172], %215 {strides = array<i32>} : memref<304x384xf32, #tpu.memory_space<vmem>>, vector<16x16xf32>,
    %c5_173 = arith.constant 5 : index
    %c96_174 = arith.constant 96 : index
    %222 = vector.load %arg20[%c5_173, %c96_174] : memref<304x384xf32, #tpu.memory_space<vmem>>, vector<16x16xf32>
    tpu.vector_store %arg20[%c5_173, %c96_174], %211 {strides = array<i32>} : memref<304x384xf32, #tpu.memory_space<vmem>>, vector<16x16xf32>,
    %c4_175 = arith.constant 4 : index
    %c112_176 = arith.constant 112 : index
    %223 = vector.load %arg20[%c4_175, %c112_176] : memref<304x384xf32, #tpu.memory_space<vmem>>, vector<16x16xf32>
    tpu.vector_store %arg20[%c4_175, %c112_176], %204 {strides = array<i32>} : memref<304x384xf32, #tpu.memory_space<vmem>>, vector<16x16xf32>,
    %c3_177 = arith.constant 3 : index
    %c128_178 = arith.constant 128 : index
    %224 = vector.load %arg20[%c3_177, %c128_178] : memref<304x384xf32, #tpu.memory_space<vmem>>, vector<16x16xf32>
    tpu.vector_store %arg20[%c3_177, %c128_178], %215 {strides = array<i32>} : memref<304x384xf32, #tpu.memory_space<vmem>>, vector<16x16xf32>,
    %c8_179 = arith.constant 8 : index
    %c0_180 = arith.constant 0 : index
    %225 = vector.load %arg20[%c8_179, %c0_180] : memref<304x384xf32, #tpu.memory_space<vmem>>, vector<16x256xf32>
    %226 = arith.truncf %225 : vector<16x256xf32> to vector<16x256xbf16>
    %c0_181 = arith.constant 0 : index
    %c0_182 = arith.constant 0 : index
    %227 = vector.load %arg10[%c0_181, %c0_182] : memref<256x32xbf16, #tpu.memory_space<vmem>>, vector<256x32xbf16>
    %cst_183 = arith.constant dense<0.000000e+00> : vector<16x32xf32>
    %228 = tpu.matmul %226, %227, %cst_183 {dimension_numbers = #tpu.dot_dimension_numbers<[1], [0], [0], [1], [0, 0, 1, 1], [], []>} : vector<16x256xbf16>, vector<256x32xbf16>, vector<16x32xf32> -> vector<16x32xf32>
    %c0_184 = arith.constant 0 : index
    %c0_185 = arith.constant 0 : index
    %229 = vector.load %arg11[%c0_184, %c0_185] : memref<1x32xf32, #tpu.memory_space<vmem>>, vector<1x32xf32>
    %230 = vector.broadcast %229 : vector<1x32xf32> to vector<16x32xf32>
    %231 = arith.addf %228, %230 : vector<16x32xf32>
    %cst_186 = arith.constant 0.000000e+00 : f32
    %232 = vector.broadcast %cst_186 : f32 to vector<16x32xf32>
    %233 = arith.maximumf %231, %232 : vector<16x32xf32>
    %cst_187 = arith.constant 0.000000e+00 : f32
    %234 = vector.broadcast %cst_187 : f32 to vector<8x384xf32>
    %c8_188 = arith.constant 8 : index
    %c0_189 = arith.constant 0 : index
    %235 = vector.load %arg20[%c8_188, %c0_189] : memref<304x384xf32, #tpu.memory_space<vmem>>, vector<8x384xf32>
    tpu.vector_store %arg20[%c8_188, %c0_189], %234 {strides = array<i32>} : memref<304x384xf32, #tpu.memory_space<vmem>>, vector<8x384xf32>,
    %c16_190 = arith.constant 16 : index
    %c0_191 = arith.constant 0 : index
    %236 = vector.load %arg20[%c16_190, %c0_191] : memref<304x384xf32, #tpu.memory_space<vmem>>, vector<8x384xf32>
    tpu.vector_store %arg20[%c16_190, %c0_191], %234 {strides = array<i32>} : memref<304x384xf32, #tpu.memory_space<vmem>>, vector<8x384xf32>,
    %cst_192 = arith.constant 0.000000e+00 : f32
    %237 = vector.shape_cast %62 : vector<16x1xi1> to vector<16x1xi1>
    %238 = vector.broadcast %237 : vector<16x1xi1> to vector<16x32xi1>
    %239 = vector.broadcast %cst_192 : f32 to vector<16x32xf32>
    %240 = arith.select %238, %233, %239 : vector<16x32xi1>, vector<16x32xf32>
    %cst_193 = arith.constant 0.000000e+00 : f32
    %241 = vector.shape_cast %64 : vector<16x1xi1> to vector<16x1xi1>
    %242 = vector.broadcast %241 : vector<16x1xi1> to vector<16x32xi1>
    %243 = vector.broadcast %cst_193 : f32 to vector<16x32xf32>
    %244 = arith.select %242, %233, %243 : vector<16x32xi1>, vector<16x32xf32>
    %c13_194 = arith.constant 13 : index
    %c0_195 = arith.constant 0 : index
    %245 = vector.load %arg20[%c13_194, %c0_195] : memref<304x384xf32, #tpu.memory_space<vmem>>, vector<16x32xf32>
    tpu.vector_store %arg20[%c13_194, %c0_195], %240 {strides = array<i32>} : memref<304x384xf32, #tpu.memory_space<vmem>>, vector<16x32xf32>,
    %c12_196 = arith.constant 12 : index
    %c32_197 = arith.constant 32 : index
    %246 = vector.load %arg20[%c12_196, %c32_197] : memref<304x384xf32, #tpu.memory_space<vmem>>, vector<16x32xf32>
    tpu.vector_store %arg20[%c12_196, %c32_197], %233 {strides = array<i32>} : memref<304x384xf32, #tpu.memory_space<vmem>>, vector<16x32xf32>,
    %c11_198 = arith.constant 11 : index
    %c64_199 = arith.constant 64 : index
    %247 = vector.load %arg20[%c11_198, %c64_199] : memref<304x384xf32, #tpu.memory_space<vmem>>, vector<16x32xf32>
    tpu.vector_store %arg20[%c11_198, %c64_199], %244 {strides = array<i32>} : memref<304x384xf32, #tpu.memory_space<vmem>>, vector<16x32xf32>,
    %c9_200 = arith.constant 9 : index
    %c96_201 = arith.constant 96 : index
    %248 = vector.load %arg20[%c9_200, %c96_201] : memref<304x384xf32, #tpu.memory_space<vmem>>, vector<16x32xf32>
    tpu.vector_store %arg20[%c9_200, %c96_201], %240 {strides = array<i32>} : memref<304x384xf32, #tpu.memory_space<vmem>>, vector<16x32xf32>,
    %c8_202 = arith.constant 8 : index
    %c128_203 = arith.constant 128 : index
    %249 = vector.load %arg20[%c8_202, %c128_203] : memref<304x384xf32, #tpu.memory_space<vmem>>, vector<16x32xf32>
    tpu.vector_store %arg20[%c8_202, %c128_203], %233 {strides = array<i32>} : memref<304x384xf32, #tpu.memory_space<vmem>>, vector<16x32xf32>,
    %c7_204 = arith.constant 7 : index
    %c160 = arith.constant 160 : index
    %250 = vector.load %arg20[%c7_204, %c160] : memref<304x384xf32, #tpu.memory_space<vmem>>, vector<16x32xf32>
    tpu.vector_store %arg20[%c7_204, %c160], %244 {strides = array<i32>} : memref<304x384xf32, #tpu.memory_space<vmem>>, vector<16x32xf32>,
    %c5_205 = arith.constant 5 : index
    %c192 = arith.constant 192 : index
    %251 = vector.load %arg20[%c5_205, %c192] : memref<304x384xf32, #tpu.memory_space<vmem>>, vector<16x32xf32>
    tpu.vector_store %arg20[%c5_205, %c192], %240 {strides = array<i32>} : memref<304x384xf32, #tpu.memory_space<vmem>>, vector<16x32xf32>,
    %c4_206 = arith.constant 4 : index
    %c224 = arith.constant 224 : index
    %252 = vector.load %arg20[%c4_206, %c224] : memref<304x384xf32, #tpu.memory_space<vmem>>, vector<16x32xf32>
    tpu.vector_store %arg20[%c4_206, %c224], %233 {strides = array<i32>} : memref<304x384xf32, #tpu.memory_space<vmem>>, vector<16x32xf32>,
    %c3_207 = arith.constant 3 : index
    %c256_208 = arith.constant 256 : index
    %253 = vector.load %arg20[%c3_207, %c256_208] : memref<304x384xf32, #tpu.memory_space<vmem>>, vector<16x32xf32>
    tpu.vector_store %arg20[%c3_207, %c256_208], %244 {strides = array<i32>} : memref<304x384xf32, #tpu.memory_space<vmem>>, vector<16x32xf32>,
    %c8_209 = arith.constant 8 : index
    %c0_210 = arith.constant 0 : index
    %254 = vector.load %arg20[%c8_209, %c0_210] : memref<304x384xf32, #tpu.memory_space<vmem>>, vector<16x384xf32>
    %255 = arith.truncf %254 : vector<16x384xf32> to vector<16x384xbf16>
    %c0_211 = arith.constant 0 : index
    %c0_212 = arith.constant 0 : index
    %256 = vector.load %arg12[%c0_211, %c0_212] : memref<384x32xbf16, #tpu.memory_space<vmem>>, vector<384x32xbf16>
    %cst_213 = arith.constant dense<0.000000e+00> : vector<16x32xf32>
    %257 = tpu.matmul %255, %256, %cst_213 {dimension_numbers = #tpu.dot_dimension_numbers<[1], [0], [0], [1], [0, 0, 1, 1], [], []>} : vector<16x384xbf16>, vector<384x32xbf16>, vector<16x32xf32> -> vector<16x32xf32>
    %c0_214 = arith.constant 0 : index
    %c0_215 = arith.constant 0 : index
    %258 = vector.load %arg13[%c0_214, %c0_215] : memref<1x32xf32, #tpu.memory_space<vmem>>, vector<1x32xf32>
    %259 = vector.broadcast %258 : vector<1x32xf32> to vector<16x32xf32>
    %260 = arith.addf %257, %259 : vector<16x32xf32>
    %cst_216 = arith.constant 0.000000e+00 : f32
    %261 = vector.broadcast %cst_216 : f32 to vector<16x32xf32>
    %262 = arith.maximumf %260, %261 : vector<16x32xf32>
    %263 = arith.truncf %262 : vector<16x32xf32> to vector<16x32xbf16>
    %c0_217 = arith.constant 0 : index
    %c0_218 = arith.constant 0 : index
    %264 = vector.load %arg14[%c0_217, %c0_218] : memref<16x256xbf16, #tpu.memory_space<vmem>>, vector<16x256xbf16>
    %cst_219 = arith.constant dense<0.000000e+00> : vector<32x256xf32>
    %265 = tpu.matmul %263, %264, %cst_219 {dimension_numbers = #tpu.dot_dimension_numbers<[0], [0], [1], [1], [0, 1, 1, 1], [], []>} : vector<16x32xbf16>, vector<16x256xbf16>, vector<32x256xf32> -> vector<32x256xf32>
    %266 = arith.truncf %191 : vector<64x16xf32> to vector<64x16xbf16>
    %c0_220 = arith.constant 0 : index
    %c0_221 = arith.constant 0 : index
    %267 = vector.load %arg15[%c0_220, %c0_221] : memref<64x256xbf16, #tpu.memory_space<vmem>>, vector<64x256xbf16>
    %cst_222 = arith.constant dense<0.000000e+00> : vector<16x256xf32>
    %268 = tpu.matmul %266, %267, %cst_222 {dimension_numbers = #tpu.dot_dimension_numbers<[0], [0], [1], [1], [0, 1, 1, 1], [], []>} : vector<64x16xbf16>, vector<64x256xbf16>, vector<16x256xf32> -> vector<16x256xf32>
    %269 = arith.truncf %120 : vector<256x8xf32> to vector<256x8xbf16>
    %c0_223 = arith.constant 0 : index
    %c0_224 = arith.constant 0 : index
    %270 = vector.load %arg18[%c0_223, %c0_224] : memref<256x256xbf16, #tpu.memory_space<vmem>>, vector<256x256xbf16>
    %cst_225 = arith.constant dense<0.000000e+00> : vector<8x256xf32>
    %271 = tpu.matmul %269, %270, %cst_225 {dimension_numbers = #tpu.dot_dimension_numbers<[0], [0], [1], [1], [0, 1, 1, 1], [], []>} : vector<256x8xbf16>, vector<256x256xbf16>, vector<8x256xf32> -> vector<8x256xf32>
    %c0_226 = arith.constant 0 : index
    %c0_227 = arith.constant 0 : index
    %c0_228 = arith.constant 0 : index
    %272 = vector.load %arg19[%c0_226, %c0_227, %c0_228] : memref<1x56x256xf32, #tpu.memory_space<vmem>>, vector<1x32x256xf32>
    %273 = vector.shape_cast %272 : vector<1x32x256xf32> to vector<32x256xf32>
    %274 = vector.shape_cast %265 : vector<32x256xf32> to vector<1x32x256xf32>
    tpu.vector_store %arg19[%c0_226, %c0_227, %c0_228], %274 {strides = array<i32>} : memref<1x56x256xf32, #tpu.memory_space<vmem>>, vector<1x32x256xf32>,
    %c0_229 = arith.constant 0 : index
    %c32_230 = arith.constant 32 : index
    %c0_231 = arith.constant 0 : index
    %275 = vector.load %arg19[%c0_229, %c32_230, %c0_231] : memref<1x56x256xf32, #tpu.memory_space<vmem>>, vector<1x16x256xf32>
    %276 = vector.shape_cast %275 : vector<1x16x256xf32> to vector<16x256xf32>
    %277 = vector.shape_cast %268 : vector<16x256xf32> to vector<1x16x256xf32>
    tpu.vector_store %arg19[%c0_229, %c32_230, %c0_231], %277 {strides = array<i32>} : memref<1x56x256xf32, #tpu.memory_space<vmem>>, vector<1x16x256xf32>,
    %c0_232 = arith.constant 0 : index
    %c48_233 = arith.constant 48 : index
    %c0_234 = arith.constant 0 : index
    %278 = vector.load %arg19[%c0_232, %c48_233, %c0_234] : memref<1x56x256xf32, #tpu.memory_space<vmem>>, vector<1x8x256xf32>
    %279 = vector.shape_cast %278 : vector<1x8x256xf32> to vector<8x256xf32>
    %280 = vector.shape_cast %271 : vector<8x256xf32> to vector<1x8x256xf32>
    tpu.vector_store %arg19[%c0_232, %c48_233, %c0_234], %280 {strides = array<i32>} : memref<1x56x256xf32, #tpu.memory_space<vmem>>, vector<1x8x256xf32>,
    return
  }
  func.func @transform_0(%arg0: i32) -> (i32, i32, i32) {
    %c0_i32 = arith.constant 0 : i32
    %c0_i32_0 = arith.constant 0 : i32
    %c0_i32_1 = arith.constant 0 : i32
    return %arg0, %c0_i32, %c0_i32_0 : i32, i32, i32
  }
  func.func @transform_1(%arg0: i32) -> (i32, i32) {
    %c0_i32 = arith.constant 0 : i32
    %c0_i32_0 = arith.constant 0 : i32
    %c0_i32_1 = arith.constant 0 : i32
    return %c0_i32, %c0_i32_0 : i32, i32
  }
  func.func @transform_2(%arg0: i32) -> (i32, i32) {
    %c0_i32 = arith.constant 0 : i32
    %c0_i32_0 = arith.constant 0 : i32
    %c0_i32_1 = arith.constant 0 : i32
    return %c0_i32, %c0_i32_0 : i32, i32
  }
  func.func @transform_3(%arg0: i32) -> (i32, i32) {
    %c0_i32 = arith.constant 0 : i32
    %c0_i32_0 = arith.constant 0 : i32
    %c0_i32_1 = arith.constant 0 : i32
    return %c0_i32, %c0_i32_0 : i32, i32
  }
  func.func @transform_4(%arg0: i32) -> (i32, i32) {
    %c0_i32 = arith.constant 0 : i32
    %c0_i32_0 = arith.constant 0 : i32
    %c0_i32_1 = arith.constant 0 : i32
    return %c0_i32, %c0_i32_0 : i32, i32
  }
  func.func @transform_5(%arg0: i32) -> (i32, i32) {
    %c0_i32 = arith.constant 0 : i32
    %c0_i32_0 = arith.constant 0 : i32
    %c0_i32_1 = arith.constant 0 : i32
    return %c0_i32, %c0_i32_0 : i32, i32
  }
  func.func @transform_6(%arg0: i32) -> (i32, i32) {
    %c0_i32 = arith.constant 0 : i32
    %c0_i32_0 = arith.constant 0 : i32
    %c0_i32_1 = arith.constant 0 : i32
    return %c0_i32, %c0_i32_0 : i32, i32
  }
  func.func @transform_7(%arg0: i32) -> (i32, i32) {
    %c0_i32 = arith.constant 0 : i32
    %c0_i32_0 = arith.constant 0 : i32
    %c0_i32_1 = arith.constant 0 : i32
    return %c0_i32, %c0_i32_0 : i32, i32
  }
  func.func @transform_8(%arg0: i32) -> (i32, i32) {
    %c0_i32 = arith.constant 0 : i32
    %c0_i32_0 = arith.constant 0 : i32
    %c0_i32_1 = arith.constant 0 : i32
    return %c0_i32, %c0_i32_0 : i32, i32
  }
  func.func @transform_9(%arg0: i32) -> (i32, i32) {
    %c0_i32 = arith.constant 0 : i32
    %c0_i32_0 = arith.constant 0 : i32
    %c0_i32_1 = arith.constant 0 : i32
    return %c0_i32, %c0_i32_0 : i32, i32
  }
  func.func @transform_10(%arg0: i32) -> (i32, i32) {
    %c0_i32 = arith.constant 0 : i32
    %c0_i32_0 = arith.constant 0 : i32
    %c0_i32_1 = arith.constant 0 : i32
    return %c0_i32, %c0_i32_0 : i32, i32
  }
  func.func @transform_11(%arg0: i32) -> (i32, i32) {
    %c0_i32 = arith.constant 0 : i32
    %c0_i32_0 = arith.constant 0 : i32
    %c0_i32_1 = arith.constant 0 : i32
    return %c0_i32, %c0_i32_0 : i32, i32
  }
  func.func @transform_12(%arg0: i32) -> (i32, i32) {
    %c0_i32 = arith.constant 0 : i32
    %c0_i32_0 = arith.constant 0 : i32
    %c0_i32_1 = arith.constant 0 : i32
    return %c0_i32, %c0_i32_0 : i32, i32
  }
  func.func @transform_13(%arg0: i32) -> (i32, i32) {
    %c0_i32 = arith.constant 0 : i32
    %c0_i32_0 = arith.constant 0 : i32
    %c0_i32_1 = arith.constant 0 : i32
    return %c0_i32, %c0_i32_0 : i32, i32
  }
  func.func @transform_14(%arg0: i32) -> (i32, i32) {
    %c0_i32 = arith.constant 0 : i32
    %c0_i32_0 = arith.constant 0 : i32
    %c0_i32_1 = arith.constant 0 : i32
    return %c0_i32, %c0_i32_0 : i32, i32
  }
  func.func @transform_15(%arg0: i32) -> (i32, i32) {
    %c0_i32 = arith.constant 0 : i32
    %c0_i32_0 = arith.constant 0 : i32
    %c0_i32_1 = arith.constant 0 : i32
    return %c0_i32, %c0_i32_0 : i32, i32
  }
  func.func @transform_16(%arg0: i32) -> (i32, i32) {
    %c0_i32 = arith.constant 0 : i32
    %c0_i32_0 = arith.constant 0 : i32
    %c0_i32_1 = arith.constant 0 : i32
    return %c0_i32, %c0_i32_0 : i32, i32
  }
  func.func @transform_17(%arg0: i32) -> (i32, i32) {
    %c0_i32 = arith.constant 0 : i32
    %c0_i32_0 = arith.constant 0 : i32
    %c0_i32_1 = arith.constant 0 : i32
    return %c0_i32, %c0_i32_0 : i32, i32
  }
  func.func @transform_18(%arg0: i32) -> (i32, i32, i32) {
    %c0_i32 = arith.constant 0 : i32
    %c0_i32_0 = arith.constant 0 : i32
    %c0_i32_1 = arith.constant 0 : i32
    return %arg0, %c0_i32, %c0_i32_0 : i32, i32, i32
  }
}

</mosaic_0001>

<bundles_post_ra>
// kernel: u_net_forward.1
= control target key start
LH: loop header
LB: loop body
LE: loop exit
PB: predicated region body
PF: predicated region fallthrough
CT: control target
= control target key end

     0   :  { %s8853_s27 = smov 0   ;;  %s13451_s0 = inlined_call_operand.vmem [shape: f32[2,256,1], index: 0, kind: input, shape index: {}]   ;;  %s13452_s1 = inlined_call_operand.vmem [shape: bf16[128,8], index: 1, kind: input, shape index: {}]   ;;  %s13453_s2 = inlined_call_operand.vmem [shape: f32[1,8], index: 2, kind: input, shape index: {}]   ;;  %s13454_s3 = inlined_call_operand.vmem [shape: bf16[128,8], index: 3, kind: input, shape index: {}]   ;;  %s13455_s4 = inlined_call_operand.vmem [shape: f32[1,8], index: 4, kind: input, shape index: {}]   ;;  %s13456_s5 = inlined_call_operand.vmem [shape: bf16[128,16], index: 5, kind: input, shape index: {}]   ;;  %s13457_s6 = inlined_call_operand.vmem [shape: f32[1,16], index: 6, kind: input, shape index: {}]   ;;  %s13458_s7 = inlined_call_operand.vmem [shape: bf16[256,16], index: 7, kind: input, shape index: {}]   ;;  %s13459_s8 = inlined_call_operand.vmem [shape: f32[1,16], index: 8, kind: input, shape index: {}]   ;;  %s13460_s9 = inlined_call_operand.vmem [shape: bf16[256,32], index: 9, kind: input, shape index: {}]   ;;  %s13461_s10 = inlined_call_operand.vmem [shape: f32[1,32], index: 10, kind: input, shape index: {}]   ;;  %s13462_s11 = inlined_call_operand.vmem [shape: bf16[384,32], index: 11, kind: input, shape index: {}]   ;;  %s13463_s12 = inlined_call_operand.vmem [shape: f32[1,32], index: 12, kind: input, shape index: {}]   ;;  %s13464_s13 = inlined_call_operand.vmem [shape: bf16[16,256], index: 13, kind: input, shape index: {}]   ;;  %s13465_s14 = inlined_call_operand.vmem [shape: bf16[64,256], index: 14, kind: input, shape index: {}]   ;;  %s13466_s15 = inlined_call_operand.vmem [shape: bf16[64,256], index: 15, kind: input, shape index: {}]   ;;  %s13467_s16 = inlined_call_operand.vmem [shape: bf16[16,64], index: 16, kind: input, shape index: {}]   ;;  %s13468_s17 = inlined_call_operand.vmem [shape: bf16[256,256], index: 17, kind: input, shape index: {}]   ;;  %s13469_s18 = inlined_call_operand.vmem [shape: f32[2,56,256], index: 18, kind: output, shape index: {}]  }
   0x1   :  { %13635 = sst [smem:[#allocation39_spill]] %s13451_s0 }
   0x2   :  { %13636 = sst [smem:[#allocation40_spill]] %s13452_s1 }
   0x3   :  { %13637 = sst [smem:[#allocation41_spill]] %s13453_s2 }
   0x4   :  { %13638 = sst [smem:[#allocation42_spill]] %s13454_s3 }
   0x5   :  { %13639 = sst [smem:[#allocation43_spill]] %s13455_s4 }
   0x6   :  { %13640 = sst [smem:[#allocation44_spill]] %s13456_s5 }
   0x7   :  { %13641 = sst [smem:[#allocation45_spill]] %s13457_s6 }
   0x8   :  { %13642 = sst [smem:[#allocation46_spill]] %s13466_s15 }
   0x9   :  { %13643 = sst [smem:[#allocation47_spill]] %s13469_s18 }
   0xa LB: > { %13644 = sst [smem:[#allocation3_spill]] %s8735_s27  ;;  %s8013_s28 = sadd.s32 4294967295, %s8735_s27   ;;  %s8735_s27 = sphi %s8853_s27, %s28_s27  }
   0xb   : > { %p8017_p0 = scmp.ge.s32.totalorder %s8735_s27, 1  ;;  %p512_p1 = scmp.lt.s32.totalorder %s8735_s27, 3 }
   0xd   : > { %p513_p2 = pnand %p8017_p0, %p512_p1 }
   0xf   : > { %516 = sbr.rel (%p513_p2) target bundleno = 3956 (0xf74), region = 92 }
  0x16   : > { %p8863_p3 = scmp.lt.s32.totalorder %s8013_s28, 1  ;;  %v691_v0 = vlaneseq  ;;  %v8737_v1 = vmov 0.0   ;;  %s13650_s1 = sld [smem:[#allocation39_spill]]  ;;  %vm13475_vm0 = vcmask 1046528   ;;  %vm13477_vm1 = vcmask 1040384  }
  0x17   : > { %1350 = vst [vmem:[#allocation2 + $0x78] sm:$0xff] %v8737_v1  ;;  %577 = vst [vmem:[#allocation2] sm:$0xff] %v8737_v1  ;;  %vm1555_vm2 = vcmask 7169   ;;  %v13651_v11 = vmov 0  ;;  %s13543_s21 = smov 1   ;;  %v13655_v18 = vmov 0 }
  0x18   : > { %578 = vst [vmem:[#allocation2 + $0x8] sm:$0xff] %v8737_v1  ;;  %579 = vst [vmem:[#allocation2 + $0x10] sm:$0xff] %v8737_v1  ;;  %s14425_s28 = smov (!%p8863_p3, %s8013_s28), 1  ;;  %v8873_v2 = vshrl.u32 %v691_v0, 7  ;;  %s13542_s22 = smov 3   ;;  %vm13474_vm7 = vcmask 7168  }
  0x19   : > { %580 = vst [vmem:[#allocation2 + $0x18] sm:$0xff] %v8737_v1  ;;  %581 = vst [vmem:[#allocation2 + $0x20] sm:$0xff] %v8737_v1  ;;  %s8164_s30 = sshll.u32 %s14425_s28, 8  ;;  %s13545_s2 = smov 2  }
  0x1a   : > { %583 = vst [vmem:[#allocation2 + $0x30] sm:$0xff] %v8737_v1  ;;  %595 = vst [vmem:[#allocation2 + $0x90] sm:$0xff] %v8737_v1  ;;  %v8877_v3 = vadd.s32 16, %v8873_v2  ;;  %v728_v4 = vand.u32 15, %v8873_v2  ;;  %v8881_v5 = vadd.s32 8, %v8873_v2  ;;  %v8884_v6 = vadd.s32 24, %v8873_v2 }
  0x1b   : > { %596 = vst [vmem:[#allocation2 + $0x98] sm:$0xff] %v8737_v1  ;;  %598 = vst [vmem:[#allocation2 + $0xa8] sm:$0xff] %v8737_v1  ;;  %v8919_v17 = vadd.s32 40, %v8873_v2  ;;  %v8959_v32 = vadd.s32 56, %v8873_v2  ;;  %v9008_v46 = vadd.s32 32, %v8873_v2  ;;  %v701_v55 = vadd.s32 72, %v8873_v2 }
  0x1c   : > { %599 = vst [vmem:[#allocation2 + $0xb0] sm:$0xff] %v8737_v1  ;;  %601 = vst [vmem:[#allocation2 + $0xc0] sm:$0xff] %v8737_v1  ;;  %s8889_s20 = scalar_lea.vmem %s13650_s1, %s8164_s30  ;;  %v742_v9 = vand.u32 15, %v8877_v3  ;;  %vm8901_vm3 = vcmp.ge.s32.totalorder %v728_v4, 1  ;;  %v735_v12 = vand.u32 15, %v8881_v5  ;;  %v749_v15 = vand.u32 15, %v8884_v6 }
  0x1d   : > { %604 = vst [vmem:[#allocation2 + $0xd8] sm:$0xff] %v8737_v1  ;;  %607 = vst [vmem:[#allocation2 + $0xf0] sm:$0xff] %v8737_v1  ;;  %v8892_v7 = vld [vmem:[%s8889_s20] sm:$0xff]  ;;  %v8895_v8 = vld [vmem:[%s8889_s20 + $0x8] sm:$0xff]  ;;  %v13652_v11 = vsel %vm8901_vm3, 4294967295, %v13651_v11  ;;  %v763_v30 = vand.u32 15, %v8919_v17 }
  0x1e   : > { %610 = vst [vmem:[#allocation2 + $0x108] sm:$0xff] %v8737_v1  ;;  %613 = vst [vmem:[#allocation2 + $0x120] sm:$0xff] %v8737_v1  ;;  %v8899_v10 = vld [vmem:[%s8889_s20 + $0x10] sm:$0xff]  ;;  %1623 = vrot.lane.b32.xlu0 %v8892_v7, %s13543_s21  ;;  %v8909_v13 = vrot.slane %v8892_v7, 7  ;;  %v1394_v14 = vsel %vm8901_vm3, %v8892_v7, 0.0  ;;  %v8916_v16 = vld [vmem:[%s8889_s20 + $0x18] sm:$0xff] }
  0x1f   : > { %616 = vst [vmem:[#allocation2 + $0x138] sm:$0xff] %v8737_v1  ;;  %619 = vst [vmem:[#allocation2 + $0x150] sm:$0xff] %v8737_v1  ;;  %vm8921_vm4 = vcmp.ge.s32.totalorder %v742_v9, 1  ;;  %v1786_v19 = vrot.slane %v8895_v8, 1  ;;  %vm8926_vm5 = vcmp.le.s32.totalorder %v735_v12, 14  ;;  %v1462_v21 = vrot.slane %v8899_v10, 7 }
  0x20   : > { %622 = vst [vmem:[#allocation2 + $0x168] sm:$0xff] %v8737_v1  ;;  %625 = vst [vmem:[#allocation2 + $0x180] sm:$0xff] %v8737_v1  ;;  %v13656_v18 = vsel %vm8921_vm4, 4294967295, %v13655_v18  ;;  %1983 = vrot.lane.b32.xlu1 %v8909_v13, %s13542_s22  ;;  %v1396_v22 = vsel %vm8921_vm4, %v8899_v10, 0.0  ;;  %v8936_v23 = vrot.slane %v1394_v14, 1  ;;  %v1363_v24 = vsel %vm8926_vm5, %v8895_v8, 0.0 }
  0x21   : > { %628 = vst [vmem:[#allocation2 + $0x198] sm:$0xff] %v8737_v1  ;;  %631 = vst [vmem:[#allocation2 + $0x1b0] sm:$0xff] %v8737_v1  ;;  %vm8941_vm6 = vcmp.le.s32.totalorder %v749_v15, 14  ;;  %v8947_v26 = vrot.slane %v1396_v22, 1  ;;  %v1460_v27 = vrot.slane %v1363_v24, 7  ;;  %v8956_v31 = vld [vmem:[%s8889_s20 + $0x28] sm:$0xff] }
  0x22   : > { %634 = vst [vmem:[#allocation2 + $0x1c8] sm:$0xff] %v8737_v1  ;;  %637 = vst [vmem:[#allocation2 + $0x1e0] sm:$0xff] %v8737_v1  ;;  %v1365_v28 = vsel %vm8941_vm6, %v8916_v16, 0.0  ;;  %1625 = vrot.lane.b32.xlu0 %v8895_v8, %s13543_s21  ;;  %v8978_v37 = vld [vmem:[%s8889_s20 + $0x20] sm:$0xff]  ;;  %vm8980_vm8 = vcmp.le.s32.totalorder %v763_v30, 14  ;;  %v8990_v39 = vsel %vm13475_vm0, %v8936_v23, %v1786_v19  ;;  %v8997_v42 = vld [vmem:[%s8889_s20 + $0x30] sm:$0xff] }
  0x23   : > { %640 = vst [vmem:[#allocation2 + $0x1f8] sm:$0xff] %v8737_v1  ;;  %643 = vst [vmem:[#allocation2 + $0x210] sm:$0xff] %v8737_v1  ;;  %v1464_v29 = vrot.slane %v1365_v28, 7  ;;  %v8963_v33 = vsel %vm13475_vm0, %v1786_v19, %v8947_v26  ;;  %v8967_v34 = vsel %vm13477_vm1, %v8909_v13, %v1460_v27  ;;  %v8970_v35 = vsel %vm13477_vm1, %v1460_v27, %v1462_v21  ;;  %v9005_v45 = vld [vmem:[%s8889_s20 + $0x38] sm:$0xff]  ;;  %v9032_v53 = vld [vmem:[%s8889_s20 + $0x40] sm:$0xff]  ;;  %s8741_s23 = smov 4  }
  0x24   : > { %646 = vst [vmem:[#allocation2 + $0x228] sm:$0xff] %v8737_v1  ;;  %649 = vst [vmem:[#allocation2 + $0x240] sm:$0xff] %v8737_v1  ;;  %1848 = vrot.lane.b32.xlu1 %v8936_v23, %s13545_s2  ;;  %v1367_v40 = vsel %vm8980_vm8, %v8956_v31, 0.0  ;;  %v1466_v41 = vrot.slane %v8978_v37, 7  ;;  %v777_v44 = vand.u32 15, %v8959_v32  ;;  %v1470_v48 = vrot.slane %v8997_v42, 7 }
  0x25   : > { %652 = vst [vmem:[#allocation2 + $0x258] sm:$0xff] %v8737_v1  ;;  %655 = vst [vmem:[#allocation2 + $0x270] sm:$0xff] %v8737_v1  ;;  %v8975_v36 = vsel %vm13477_vm1, %v1462_v21, %v1464_v29  ;;  %v1468_v43 = vrot.slane %v1367_v40, 7  ;;  %v1474_v56 = vrot.slane %v9032_v53, 7  ;;  %v756_v57 = vand.u32 15, %v9008_v46  ;;  %v9049_v60 = vld [vmem:[%s8889_s20 + $0x48] sm:$0xff] }
  0x26   : > { %658 = vst [vmem:[#allocation2 + $0x288] sm:$0xff] %v8737_v1  ;;  %661 = vst [vmem:[#allocation2 + $0x2a0] sm:$0xff] %v8737_v1  ;;  %1852 = vrot.lane.b32.xlu0 %v8963_v33, %s13545_s2  ;;  %v9011_v47 = vsel %vm13477_vm1, %v1464_v29, %v1466_v41  ;;  %vm9019_vm9 = vcmp.le.s32.totalorder %v777_v44, 14  ;;  %v791_v59 = vand.u32 15, %v701_v55  ;;  %v9059_v62 = vld [vmem:[%s8889_s20 + $0x50] sm:$0xff]  ;;  %v703_v0 = vadd.s32 88, %v8873_v2 }
  0x27   : > { %664 = vst [vmem:[#allocation2 + $0x2b8] sm:$0xff] %v8737_v1  ;;  %667 = vst [vmem:[#allocation2 + $0x2d0] sm:$0xff] %v8737_v1  ;;  %v9017_v49 = vsel %vm13477_vm1, %v1466_v41, %v1468_v43  ;;  %v1369_v51 = vsel %vm9019_vm9, %v9005_v45, 0.0  ;;  %v9029_v52 = vsel %vm13477_vm1, %v1468_v43, %v1470_v48  ;;  %vm9069_vm11 = vcmp.ge.s32.totalorder %v756_v57, 1  ;;  %v9079_v15 = vld [vmem:[%s8889_s20 + $0x58] sm:$0xff]  ;;  %s13677_s26 = sld [smem:[#allocation40_spill]] }
  0x28   : > { %670 = vst [vmem:[#allocation2 + $0x2e8] sm:$0xff] %v8737_v1  ;;  %1344 = vst [vmem:[#allocation2 + $0x48] sm:$0xff] %v8737_v1  ;;  %1850 = vrot.lane.b32.xlu1 %v8990_v39, %s13545_s2  ;;  %v1472_v54 = vrot.slane %v1369_v51, 7  ;;  %vm9063_vm10 = vcmp.le.s32.totalorder %v791_v59, 14  ;;  %v13673_v4 = vmov 0  ;;  %v805_v14 = vand.u32 15, %v703_v0 }
  0x29   : > { %1347 = vst [vmem:[#allocation2 + $0x60] sm:$0xff] %v8737_v1  ;;  %1353 = vst [vmem:[#allocation2 + $0x300] sm:$0xff] %v8737_v1  ;;  %v13674_v4 = vsel %vm9069_vm11, 4294967295, %v13673_v4  ;;  %v1371_v9 = vsel %vm9063_vm10, %v9049_v60, 0.0  ;;  %v1398_v19 = vsel %vm9069_vm11, %v8978_v37, 0.0  ;;  %v1790_v24 = vrot.slane %v8916_v16, 1 }
  0x2a   : > { %1356 = vst [vmem:[#allocation2 + $0x318] sm:$0xff] %v8737_v1  ;;  %1359 = vst [vmem:[#allocation2 + $0x330] sm:$0xff] %v8737_v1  ;;  %1985 = vrot.lane.b32.xlu0 %v8967_v34, %s13542_s22  ;;  %v9046_v58 = vsel %vm13477_vm1, %v1470_v48, %v1472_v54  ;;  %v9052_v61 = vsel %vm13477_vm1, %v1472_v54, %v1474_v56  ;;  %v1476_v12 = vrot.slane %v1371_v9, 7  ;;  %vm9094_vm12 = vcmp.le.s32.totalorder %v805_v14, 14  ;;  %s13560_s29 = smov 5   ;;  %s13472_s24 = smov 6  }
  0x2b   : > { %3097 = vst [vmem:[#allocation2 + $0x68] sm:$0xff] %v8737_v1  ;;  %3100 = vst [vmem:[#allocation2 + $0x80] sm:$0xff] %v8737_v1  ;;  %v9111_v29 = vrot.slane %v1398_v19, 1  ;;  %v9122_v40 = vsel %vm13475_vm0, %v8947_v26, %v1790_v24  ;;  %v9132_v44 = vadd.s32 48, %v8873_v2  ;;  %v705_v48 = vadd.s32 104, %v8873_v2  ;;  %v9156_v57 = vld [vmem:[%s8889_s20 + $0x60] sm:$0xff] }
  0x2c   : > { %5949 = vst [vmem:[#allocation2 + $0x38] sm:$0xff] %v8737_v1  ;;  %5955 = vst [vmem:[#allocation2 + $0xc8] sm:$0xff] %v8737_v1  ;;  %1987 = vrot.lane.b32.xlu1 %v8970_v35, %s13542_s22  ;;  %v9087_v21 = vsel %vm13477_vm1, %v1474_v56, %v1476_v12  ;;  %v9151_v56 = vld [vmem:[%s8889_s20 + $0x68] sm:$0xff]  ;;  %v1482_v59 = vrot.slane %v9156_v57, 7  ;;  %s13558_s1 = smov 7   ;;  %v13681_v14 = vmov 0 }
  0x2d   : > { %7034 = vst [vmem:[#allocation2 + $0x28] sm:$0xff] %v8737_v1  ;;  %5952 = vst [vmem:[#allocation2 + $0x50] sm:$0xff] %v8737_v1  ;;  %v8561_v28 = vld [vmem:[%s13677_s26] sm:$0xff]   ;;  %v8562_v41 = vld [vmem:[%s13677_s26 + $0x8] sm:$0xff]   ;;  %v1793_v43 = vsel %vm13475_vm0, %v1790_v24, %v9111_v29  ;;  %v819_v51 = vand.u32 15, %v705_v48  ;;  %s13594_s25 = smov 8  }
  0x2e   : > { %7037 = vst [vmem:[#allocation2 + $0x40] sm:$0xff] %v8737_v1  ;;  %13646 = vst [vmem:[#allocation4_spill] sm:$0xff] %v8873_v2  ;;  %1989 = vrot.lane.b32.xlu0 %v8975_v36, %s13542_s22  ;;  %v1478_v1 = vrot.slane %v9059_v62, 7  ;;  %8363 = vmatprep.subr.bf16.mxu0 %v8561_v28  ;;  %v8563_v26 = vld [vmem:[%s13677_s26 + $0x10] sm:$0xff]   ;;  %v8564_v54 = vld [vmem:[%s13677_s26 + $0x18] sm:$0xff]   ;;  %vm13694_vm11 = vcmask 1046528  }
  0x2f   : > { %13647 = vst [vmem:[#allocation5_spill] sm:$0xff] %v8877_v3  ;;  %13648 = vst [vmem:[#allocation6_spill] sm:$0xff] %v8881_v5  ;;  %8364 = vmatpush3.bf16.msra.mxu0 %v8561_v28  ;;  %vm9146_vm13 = vcmp.le.s32.totalorder %v819_v51, 14  ;;  %v8566_v19 = vld [vmem:[%s13677_s26 + $0x28] sm:$0xff]   ;;  %v8567_v24 = vld [vmem:[%s13677_s26 + $0x30] sm:$0xff]   ;;  %v700_v51 = vadd.s32 64, %v8873_v2 }
  0x30   : > { %13649 = vst [vmem:[#allocation7_spill] sm:$0xff] %v8884_v6  ;;  %13653 = vst [vmem:[#allocation8_spill] sm:$0xff] %v8909_v13  ;;  %2118 = vrot.lane.b32.xlu1 %v8892_v7, %s8741_s23  ;;  %v9090_v22 = vsel %vm13477_vm1, %v1476_v12, %v1478_v1  ;;  %8365 = vmatprep.subr.bf16.mxu0 %v8562_v41  ;;  %v8565_v12 = vld [vmem:[%s13677_s26 + $0x20] sm:$0xff]   ;;  %v8568_v28 = vld [vmem:[%s13677_s26 + $0x38] sm:$0xff]   ;;  %v13768_v3 = vmov 0  ;;  %s13877_s30 = sld [smem:[#allocation41_spill]] }
  0x31   : > { %13654 = vst [vmem:[#allocation9_spill] sm:$0xff] %v8919_v17  ;;  %13659 = vst [vmem:[#allocation10_spill] sm:$0xff] %v8936_v23  ;;  %s13567_s0 = smov 24   ;;  %s13563_s19 = smov 32  }
  0x32   : > { %1556 = vst.msk [vmem:[#allocation2 + $0x78] sm:$0xfe] %vm1555_vm2, %v8909_v13  ;;  %13662 = vst [vmem:[#allocation11_spill] sm:$0xff] %v8959_v32  ;;  %2120 = vrot.lane.b32.xlu0 %v8895_v8, %s8741_s23  ;;  %v1373_v8 = vsel %vm9094_vm12, %v9079_v15, 0.0  ;;  %v13818_v13 = vmov 0  ;;  %s14066_s3 = sld [smem:[#allocation42_spill]] }
  0x33   : > { %13663 = vst [vmem:[#allocation12_spill] sm:$0xff] %v8963_v33  ;;  %13664 = vst [vmem:[#allocation13_spill] sm:$0xff] %v8967_v34  ;;  %v1480_v27 = vrot.slane %v1373_v8, 7  ;;  %8366 = vmatpush3.bf16.msra.mxu0 %v8562_v41  ;;  %s14121_s4 = sld [smem:[#allocation43_spill]]  ;;  %s14186_s15 = sld [smem:[#allocation46_spill]] }
  0x34   : > { %1558 = vst.msk [vmem:[#allocation2 + $0x90] sm:$0xff] %vm13474_vm7, %v8967_v34  ;;  %1559 = vst.msk [vmem:[#allocation2 + $0xa8] sm:$0xff] %vm13474_vm7, %v8970_v35  ;;  %2122 = vrot.lane.b32.xlu1 %v8899_v10, %s8741_s23  ;;  %8367 = vmatprep.subr.bf16.mxu0 %v8563_v26  ;;  %s14259_s5 = sld [smem:[#allocation44_spill]]  ;;  %s14337_s6 = sld [smem:[#allocation45_spill]] }
  0x35   : > { %13667 = vst [vmem:[#allocation14_spill] sm:$0xff] %v8990_v39  ;;  %1560 = vst.msk [vmem:[#allocation2 + $0xc0] sm:$0xff] %vm13474_vm7, %v8975_v36  ;;  %v9114_v30 = vsel %vm13477_vm1, %v1478_v1, %v1480_v27  ;;  %v770_v1 = vand.u32 15, %v9132_v44  ;;  %s14345_s18 = smov 80  }
  0x36   : > { %13668 = vst [vmem:[#allocation15_spill] sm:$0xff] %v9008_v46  ;;  %1561 = vst.msk [vmem:[#allocation2 + $0xd8] sm:$0xff] %vm13474_vm7, %v9011_v47  ;;  %2124 = vrot.lane.b32.xlu0 %v8916_v16, %s8741_s23 }
  0x37   : > { %1562 = vst.msk [vmem:[#allocation2 + $0xf0] sm:$0xff] %vm13474_vm7, %v9017_v49  ;;  %1563 = vst.msk [vmem:[#allocation2 + $0x108] sm:$0xff] %vm13474_vm7, %v9029_v52  ;;  %8368 = vmatpush3.bf16.msra.mxu0 %v8563_v26  ;;  %vm9182_vm14 = vcmp.ge.s32.totalorder %v770_v1, 1 }
  0x38   : > { %1564 = vst.msk [vmem:[#allocation2 + $0x120] sm:$0xff] %vm13474_vm7, %v9046_v58  ;;  %1565 = vst.msk [vmem:[#allocation2 + $0x138] sm:$0xff] %vm13474_vm7, %v9052_v61  ;;  %2249 = vrot.lane.b32.xlu1 %v8990_v39, %s13560_s29  ;;  %8369 = vmatprep.subr.bf16.mxu0 %v8564_v54  ;;  %v13682_v14 = vsel %vm9182_vm14, 4294967295, %v13681_v14  ;;  %v1400_v8 = vsel %vm9182_vm14, %v8997_v42, 0.0  ;;  %vm1947_vm14 = vcmask 23575  }
  0x39   : > { %1566 = vst.msk [vmem:[#allocation2 + $0x150] sm:$0xff] %vm13474_vm7, %v9087_v21  ;;  %1567 = vst.msk [vmem:[#allocation2 + $0x168] sm:$0xff] %vm13474_vm7, %v9090_v22  ;;  %v1796_v41 = vrot.slane %v1400_v8, 1 }
  0x3a   : > { %1568 = vst.msk [vmem:[#allocation2 + $0x180] sm:$0xff] %vm13474_vm7, %v9114_v30  ;;  %2251 = vrot.lane.b32.xlu0 %v8963_v33, %s13560_s29  ;;  %13678 = vst [vmem:[#allocation16_spill] sm:$0xff] %v9132_v44 }
  0x3b   : > { %8370 = vmatpush3.bf16.msra.mxu0 %v8564_v54 }
  0x3c   : > { %2253 = vrot.lane.b32.xlu1 %v9122_v40, %s13560_s29  ;;  %8371 = vmatprep.subr.bf16.mxu0 %v8565_v12 }
  0x3e   : > { %2255 = vrot.lane.b32.xlu0 %v1793_v43, %s13560_s29 }
  0x3f   : > { %8372 = vmatpush3.bf16.msra.mxu0 %v8565_v12 }
  0x40   : > { %2386 = vrot.lane.b32.xlu1 %v8970_v35, %s13472_s24  ;;  %v1375_v35 = vsel %vm9146_vm13, %v9151_v56, 0.0  ;;  %8373 = vmatprep.subr.bf16.mxu0 %v8566_v19 }
  0x41   : > { %v1484_v0 = vrot.slane %v1375_v35, 7 }
  0x42   : > { %2388 = vrot.lane.b32.xlu0 %v8975_v36, %s13472_s24  ;;  %v9169_v36 = vsel %vm13477_vm1, %v1480_v27, %v1482_v59  ;;  %v1794_v27 = vrot.slane %v8956_v31, 1 }
  0x43   : > { %v9166_v9 = vsel %vm13477_vm1, %v1482_v59, %v1484_v0  ;;  %1569 = vst.msk [vmem:[#allocation2 + $0x198] sm:$0xff] %vm13474_vm7, %v9169_v36  ;;  %8374 = vmatpush3.bf16.msra.mxu0 %v8566_v19  ;;  %v784_v59 = vand.u32 15, %v700_v51  ;;  %v1798_v19 = vrot.slane %v9005_v45, 1 }
  0x44   : > { %2390 = vrot.lane.b32.xlu1 %v9011_v47, %s13472_s24  ;;  %1570 = vst.msk [vmem:[#allocation2 + $0x1b0] sm:$0xff] %vm13474_vm7, %v9166_v9  ;;  %8375 = vmatprep.subr.bf16.mxu0 %v8567_v24  ;;  %v1795_v26 = vsel %vm13475_vm0, %v9111_v29, %v1794_v27  ;;  %v1797_v48 = vsel %vm13475_vm0, %v1794_v27, %v1796_v41  ;;  %v9230_v29 = vld [vmem:[%s8889_s20 + $0x70] sm:$0xff] }
  0x45   : > { %v1486_v35 = vrot.slane %v9230_v29, 7  ;;  %vm9262_vm2 = vcmp.ge.s32.totalorder %v784_v59, 1  ;;  %v1799_v8 = vsel %vm13475_vm0, %v1796_v41, %v1798_v19  ;;  %v9293_v41 = vld [vmem:[%s8889_s20 + $0x88] sm:$0xff] }
  0x46   : > { %2392 = vrot.lane.b32.xlu0 %v9017_v49, %s13472_s24  ;;  %s13687_s24 = smov 6  }
  0x47   : > { %8376 = vmatpush3.bf16.msra.mxu0 %v8567_v24  ;;  %v9252_v12 = vsel %vm13477_vm1, %v1484_v0, %v1486_v35  ;;  %v1402_v0 = vsel %vm9262_vm2, %v9032_v53, 0.0  ;;  %v709_v24 = vadd.s32 136, %v8873_v2 }
  0x48   : > { %2521 = vrot.lane.b32.xlu1 %v8899_v10, %s13558_s1  ;;  %8377 = vmatprep.subr.bf16.mxu0 %v8568_v28  ;;  %1571 = vst.msk [vmem:[#allocation2 + $0x1c8] sm:$0xff] %vm13474_vm7, %v9252_v12 }
  0x49   : > { %v847_v27 = vand.u32 15, %v709_v24 }
  0x4a   : > { %2523 = vrot.lane.b32.xlu0 %v8916_v16, %s13558_s1 }
  0x4b   : > { %8378 = vmatpush3.bf16.msra.mxu0 %v8568_v28  ;;  %v13688_v28 = vmov 0 }
  0x4c   : > { %2525 = vrot.lane.b32.xlu1 %v8978_v37, %s13558_s1 }
  0x4e   : > { %2527 = vrot.lane.b32.xlu0 %v8956_v31, %s13558_s1 }
  0x50   : > { %2652 = vrot.lane.b32.xlu1 %v9122_v40, %s13594_s25 }
  0x52   : > { %2654 = vrot.lane.b32.xlu0 %v1793_v43, %s13594_s25 }
  0x54   : > { %1627 = vrot.lane.b32.xlu1 %v8899_v10, %s13543_s21  ;;  %v707_v10 = vadd.s32 120, %v8873_v2 }
  0x56   : > { %1629 = vrot.lane.b32.xlu0 %v8916_v16, %s13543_s21  ;;  %v833_v16 = vand.u32 15, %v707_v10 }
  0x58   : > { %2656 = vrot.lane.b32.xlu1 %v1795_v26, %s13594_s25  ;;  %vm9233_vm15 = vcmp.le.s32.totalorder %v833_v16, 14 }
  0x5a   : > { %2658 = vrot.lane.b32.xlu0 %v1797_v48, %s13594_s25 }
  0x5c   : > { %1631 = vrot.lane.b32.xlu1 %v8978_v37, %s13543_s21 }
  0x5e   : > { %1633 = vrot.lane.b32.xlu0 %v8956_v31, %s13543_s21 }
  0x60   : > { %1854 = vrot.lane.b32.xlu1 %v9122_v40, %s13545_s2  ;;  %v9238_v40 = vld [vmem:[%s8889_s20 + $0x78] sm:$0xff] }
  0x62   : > { %1856 = vrot.lane.b32.xlu0 %v1793_v43, %s13545_s2  ;;  %v1377_v43 = vsel %vm9233_vm15, %v9238_v40, 0.0 }
  0x64   : > { %1858 = vrot.lane.b32.xlu1 %v1795_v26, %s13545_s2 }
  0x66   : > { %1860 = vrot.lane.b32.xlu0 %v1797_v48, %s13545_s2 }
  0x68   : > { %1991 = vrot.lane.b32.xlu1 %v9011_v47, %s13542_s22  ;;  %v1488_v47 = vrot.slane %v1377_v43, 7 }
  0x6a   : > { %1993 = vrot.lane.b32.xlu0 %v9017_v49, %s13542_s22  ;;  %v9249_v1 = vsel %vm13477_vm1, %v1486_v35, %v1488_v47  ;;  %v13685_v49 = vmov 0  ;;  %v13692_v35 = vmov 0 }
  0x6b   : > { %1572 = vst.msk [vmem:[#allocation2 + $0x1e0] sm:$0xff] %vm13474_vm7, %v9249_v1  ;;  %v13686_v49 = vsel %vm9262_vm2, 4294967295, %v13685_v49  ;;  %vm9288_vm7 = vcmp.le.s32.totalorder %v847_v27, 14 }
  0x6c   : > { %1995 = vrot.lane.b32.xlu1 %v9029_v52, %s13542_s22  ;;  %v13689_v28 = vsel %vm9288_vm7, 4294967295, %v13688_v28 }
  0x6e   : > { %1997 = vrot.lane.b32.xlu0 %v9046_v58, %s13542_s22 }
  0x70   : > { %2126 = vrot.lane.b32.xlu1 %v8978_v37, %s8741_s23  ;;  %v1800_v37 = vrot.slane %v1402_v0, 1  ;;  %v1802_v0 = vrot.slane %v9049_v60, 1 }
  0x72   : > { %2128 = vrot.lane.b32.xlu0 %v8956_v31, %s8741_s23  ;;  %v9280_v31 = vsel %vm13475_vm0, %v1798_v19, %v1800_v37  ;;  %vm13690_vm0 = vcmask 7168  }
  0x73   : > { %vm13691_vm2 = vmmov %vm13690_vm0 }
  0x74   : > { %2130 = vrot.lane.b32.xlu1 %v8997_v42, %s8741_s23 }
  0x76   : > { %2132 = vrot.lane.b32.xlu0 %v9005_v45, %s8741_s23 }
  0x78   : > { %2257 = vrot.lane.b32.xlu1 %v1795_v26, %s13560_s29  ;;  %v9298_v26 = vld [vmem:[%s8889_s20 + $0x80] sm:$0xff] }
  0x79   : > { %v1490_v10 = vrot.slane %v9298_v26, 7 }
  0x7a   : > { %2259 = vrot.lane.b32.xlu0 %v1797_v48, %s13560_s29  ;;  %v1379_v48 = vsel %vm9288_vm7, %v9293_v41, 0.0 }
  0x7b   : > { %v9304_v16 = vrot.slane %v1379_v48, 7  ;;  %v9348_v48 = vsel %vm13694_vm11, %v1800_v37, %v1802_v0 }
  0x7c   : > { %2261 = vrot.lane.b32.xlu1 %v1799_v8, %s13560_s29 }
  0x7d   : > { %v9311_v51 = vsel %vm13477_vm1, %v1490_v10, %v9304_v16 }
  0x7e   : > { %2263 = vrot.lane.b32.xlu0 %v9280_v31, %s13560_s29  ;;  %1574 = vst.msk [vmem:[#allocation2 + $0x210] sm:$0xff] %vm13690_vm0, %v9311_v51  ;;  %vm13484_vm0 = vcmask 15368  }
  0x80   : > { %2394 = vrot.lane.b32.xlu1 %v9029_v52, %s13687_s24  ;;  %v702_v52 = vadd.s32 80, %v8873_v2 }
  0x82   : > { %2396 = vrot.lane.b32.xlu0 %v9046_v58, %s13687_s24  ;;  %v9314_v58 = vsel %vm13477_vm1, %v1488_v47, %v1490_v10  ;;  %v798_v43 = vand.u32 15, %v702_v52 }
  0x83   : > { %1573 = vst.msk [vmem:[#allocation2 + $0x1f8] sm:$0xff] %vm13691_vm2, %v9314_v58  ;;  %vm2082_vm2 = vcmask 31769  }
  0x84   : > { %2398 = vrot.lane.b32.xlu1 %v9052_v61, %s13687_s24  ;;  %vm9328_vm1 = vcmp.ge.s32.totalorder %v798_v43, 1 }
  0x85   : > { %v13693_v35 = vsel %vm9328_vm1, 4294967295, %v13692_v35  ;;  %v1404_v59 = vsel %vm9328_vm1, %v9059_v62, 0.0  ;;  %vm13483_vm1 = vcmask 23568  }
  0x86   : > { %2400 = vrot.lane.b32.xlu0 %v9087_v21, %s13687_s24  ;;  %v9342_v24 = vrot.slane %v1404_v59, 1 }
  0x88   : > { %2529 = vrot.lane.b32.xlu1 %v8997_v42, %s13558_s1 }
  0x8a   : > { %2531 = vrot.lane.b32.xlu0 %v9005_v45, %s13558_s1 }
  0x8c   : > { %2533 = vrot.lane.b32.xlu1 %v9032_v53, %s13558_s1 }
  0x8e   : > { %2535 = vrot.lane.b32.xlu0 %v9049_v60, %s13558_s1 }
  0x90   : > { %v1624_v47 = vpop.permute.xlu0 %1623  ;;  %2660 = vrot.lane.b32.xlu1 %v1799_v8, %s13594_s25 }
  0x91   : > { %1720 = vst.msk [vmem:[#allocation2 + $0x78] sm:$0xff] %vm13484_vm0, %v1624_v47 }
  0x92   : > { %2662 = vrot.lane.b32.xlu0 %v9280_v31, %s13594_s25  ;;  %v1984_v19 = vpop.permute.xlu1 %1983 }
  0x93   : > { %2083 = vst.msk [vmem:[#allocation2 + $0x48] sm:$0xfe] %vm2082_vm2, %v1984_v19  ;;  %vm13695_vm2 = vmmov %vm13694_vm11  ;;  %vm13481_vm11 = vcmask 31768   ;;  %v711_v19 = vadd.s32 152, %v8873_v2 }
  0x94   : > { %v1626_v27 = vpop.permute.xlu0 %1625  ;;  %1635 = vrot.lane.b32.xlu1 %v8997_v42, %s13543_s21  ;;  %v9354_v52 = vsel %vm13695_vm2, %v1802_v0, %v9342_v24  ;;  %vm13486_vm2 = vcmask 48168  }
  0x95   : > { %1721 = vst.msk [vmem:[#allocation2 + $0x90] sm:$0xff] %vm13484_vm0, %v1626_v27  ;;  %vm13700_vm0 = vcmask 7168  }
  0x96   : > { %1637 = vrot.lane.b32.xlu0 %v9005_v45, %s13543_s21  ;;  %v1849_v10 = vpop.permute.xlu1 %1848  ;;  %vm13701_vm4 = vmmov %vm13700_vm0 }
  0x97   : > { %1948 = vst.msk [vmem:[#allocation2 + $0x60] sm:$0x80] %vm1947_vm14, %v1849_v10  ;;  %vm13482_vm14 = vcmask 39968   ;;  %v704_v10 = vadd.s32 96, %v8873_v2 }
  0x98   : > { %v1853_v43 = vpop.permute.xlu0 %1852  ;;  %2664 = vrot.lane.b32.xlu1 %v9348_v48, %s13594_s25 }
  0x99   : > { %1951 = vst.msk [vmem:[#allocation2 + $0x90] sm:$0xff] %vm13483_vm1, %v1853_v43  ;;  %v13696_v43 = vmov 0 }
  0x9a   : > { %2666 = vrot.lane.b32.xlu0 %v9354_v52, %s13594_s25  ;;  %v1851_v42 = vpop.permute.xlu1 %1850 }
  0x9b   : > { %1950 = vst.msk [vmem:[#allocation2 + $0x78] sm:$0xff] %vm13483_vm1, %v1851_v42  ;;  %v9389_v42 = vld [vmem:[%s8889_s20 + $0x98] sm:$0xff] }
  0x9c   : > { %v1986_v45 = vpop.permute.xlu0 %1985  ;;  %1639 = vrot.lane.b32.xlu1 %v9032_v53, %s13543_s21 }
  0x9d   : > { %2085 = vst.msk [vmem:[#allocation2 + $0x60] sm:$0xff] %vm13481_vm11, %v1986_v45 }
  0x9e   : > { %1641 = vrot.lane.b32.xlu0 %v9049_v60, %s13543_s21  ;;  %v1988_v37 = vpop.permute.xlu1 %1987 }
  0x9f   : > { %2086 = vst.msk [vmem:[#allocation2 + $0x78] sm:$0xff] %vm13481_vm11, %v1988_v37  ;;  %v9394_v37 = vld [vmem:[%s8889_s20 + $0x90] sm:$0xff] }
  0xa0   : > { %v1990_v47 = vpop.permute.xlu0 %1989  ;;  %1862 = vrot.lane.b32.xlu1 %v1799_v8, %s13545_s2 }
  0xa1   : > { %2087 = vst.msk [vmem:[#allocation2 + $0x90] sm:$0xff] %vm13481_vm11, %v1990_v47  ;;  %v1494_v47 = vrot.slane %v9394_v37, 7 }
  0xa2   : > { %1864 = vrot.lane.b32.xlu0 %v9280_v31, %s13545_s2  ;;  %v2119_v59 = vpop.permute.xlu1 %2118  ;;  %v861_v31 = vand.u32 15, %v711_v19 }
  0xa3   : > { %2215 = vst.msk [vmem:[#allocation2 + $0x48] sm:$0xff] %vm13482_vm14, %v2119_v59 }
  0xa4   : > { %v2121_v0 = vpop.permute.xlu0 %2120  ;;  %1866 = vrot.lane.b32.xlu1 %v9348_v48, %s13545_s2  ;;  %vm9384_vm11 = vcmp.le.s32.totalorder %v861_v31, 14 }
  0xa5   : > { %2216 = vst.msk [vmem:[#allocation2 + $0x60] sm:$0xff] %vm13482_vm14, %v2121_v0  ;;  %v13697_v43 = vsel %vm9384_vm11, 4294967295, %v13696_v43 }
  0xa6   : > { %1868 = vrot.lane.b32.xlu0 %v9354_v52, %s13545_s2  ;;  %v2123_v8 = vpop.permute.xlu1 %2122 }
  0xa7   : > { %2217 = vst.msk [vmem:[#allocation2 + $0x78] sm:$0xff] %vm13482_vm14, %v2123_v8 }
  0xa8   : > { %v2125_v27 = vpop.permute.xlu0 %2124  ;;  %1999 = vrot.lane.b32.xlu1 %v9052_v61, %s13542_s22  ;;  %v1381_v61 = vsel %vm9384_vm11, %v9389_v42, 0.0 }
  0xa9   : > { %2218 = vst.msk [vmem:[#allocation2 + $0x90] sm:$0xff] %vm13482_vm14, %v2125_v27  ;;  %v9401_v59 = vrot.slane %v1381_v61, 7  ;;  %vm13698_vm14 = vcmask 1040384   ;;  %v1806_v61 = vrot.slane %v9079_v15, 1 }
  0xaa   : > { %2001 = vrot.lane.b32.xlu0 %v9087_v21, %s13542_s22  ;;  %v2250_v45 = vpop.permute.xlu1 %2249  ;;  %v812_v21 = vand.u32 15, %v704_v10  ;;  %vm13699_vm1 = vmmov %vm13698_vm14 }
  0xab   : > { %2349 = vst.msk [vmem:[#allocation2 + $0x48] sm:$0xff] %vm13486_vm2, %v2250_v45  ;;  %v9408_v19 = vsel %vm13698_vm14, %v1494_v47, %v9401_v59  ;;  %v9412_v8 = vsel %vm13699_vm1, %v9304_v16, %v1494_v47  ;;  %vm13488_vm14 = vcmask 56368   ;;  %v13702_v16 = vmov 0 }
  0xac   : > { %v2252_v0 = vpop.permute.xlu0 %2251  ;;  %2003 = vrot.lane.b32.xlu1 %v9090_v22, %s13542_s22  ;;  %1576 = vst.msk [vmem:[#allocation2 + $0x240] sm:$0xff] %vm13700_vm0, %v9408_v19  ;;  %vm9424_vm1 = vcmp.ge.s32.totalorder %v812_v21, 1  ;;  %vm13705_vm0 = vcmask 1046528  }
  0xad   : > { %2350 = vst.msk [vmem:[#allocation2 + $0x60] sm:$0xff] %vm13486_vm2, %v2252_v0  ;;  %v13703_v16 = vsel %vm9424_vm1, 4294967295, %v13702_v16  ;;  %v9448_v21 = vsel %vm13705_vm0, %v9342_v24, %v1806_v61  ;;  %v713_v24 = vadd.s32 168, %v8873_v2 }
  0xae   : > { %2005 = vrot.lane.b32.xlu0 %v9114_v30, %s13542_s22  ;;  %v2254_v31 = vpop.permute.xlu1 %2253  ;;  %1575 = vst.msk [vmem:[#allocation2 + $0x228] sm:$0xff] %vm13701_vm4, %v9412_v8  ;;  %13704 = vst [vmem:[#allocation17_spill] sm:$0xff] %v13703_v16  ;;  %vm13487_vm4 = vcmask 64568  }
  0xaf   : > { %2351 = vst.msk [vmem:[#allocation2 + $0x78] sm:$0xff] %vm13486_vm2, %v2254_v31 }
  0xb0   : > { %v2256_v27 = vpop.permute.xlu0 %2255  ;;  %2134 = vrot.lane.b32.xlu1 %v9032_v53, %s8741_s23  ;;  %v1406_v53 = vsel %vm9424_vm1, %v9156_v57, 0.0  ;;  %vm13711_vm1 = vcmask 7168  }
  0xb1   : > { %2352 = vst.msk [vmem:[#allocation2 + $0x90] sm:$0xff] %vm13486_vm2, %v2256_v27  ;;  %vm13706_vm2 = vmmov %vm13705_vm0 }
  0xb2   : > { %2136 = vrot.lane.b32.xlu0 %v9049_v60, %s8741_s23  ;;  %v2387_v10 = vpop.permute.xlu1 %2386  ;;  %v9441_v60 = vrot.slane %v1406_v53, 1  ;;  %v13707_v53 = vmov 0 }
  0xb3   : > { %2485 = vst.msk [vmem:[#allocation2 + $0x48] sm:$0xff] %vm13488_vm14, %v2387_v10 }
  0xb4   : > { %v2389_v45 = vpop.permute.xlu0 %2388  ;;  %2138 = vrot.lane.b32.xlu1 %v9059_v62, %s8741_s23  ;;  %v9455_v27 = vsel %vm13706_vm2, %v1806_v61, %v9441_v60  ;;  %vm13491_vm2 = vcmask 72768   ;;  %v9472_v61 = vld [vmem:[%s8889_s20 + $0xa8] sm:$0xff] }
  0xb5   : > { %2486 = vst.msk [vmem:[#allocation2 + $0x60] sm:$0xff] %vm13488_vm14, %v2389_v45 }
  0xb6   : > { %2140 = vrot.lane.b32.xlu0 %v9079_v15, %s8741_s23  ;;  %v2391_v47 = vpop.permute.xlu1 %2390 }
  0xb7   : > { %2487 = vst.msk [vmem:[#allocation2 + $0x78] sm:$0xff] %vm13488_vm14, %v2391_v47 }
  0xb8   : > { %v2393_v0 = vpop.permute.xlu0 %2392  ;;  %2265 = vrot.lane.b32.xlu1 %v9348_v48, %s13560_s29 }
  0xb9   : > { %2488 = vst.msk [vmem:[#allocation2 + $0x90] sm:$0xff] %vm13488_vm14, %v2393_v0  ;;  %v9477_v0 = vld [vmem:[%s8889_s20 + $0xa0] sm:$0xff] }
  0xba   : > { %2267 = vrot.lane.b32.xlu0 %v9354_v52, %s13560_s29  ;;  %v2522_v31 = vpop.permute.xlu1 %2521  ;;  %v875_v52 = vand.u32 15, %v713_v24 }
  0xbb   : > { %2616 = vst.msk [vmem:[#allocation2 + $0x48] sm:$0xff] %vm13487_vm4, %v2522_v31 }
  0xbc   : > { %v2524_v10 = vpop.permute.xlu0 %2523  ;;  %2269 = vrot.lane.b32.xlu1 %v9448_v21, %s13560_s29  ;;  %vm9467_vm0 = vcmp.le.s32.totalorder %v875_v52, 14 }
  0xbd   : > { %2617 = vst.msk [vmem:[#allocation2 + $0x60] sm:$0xff] %vm13487_vm4, %v2524_v10  ;;  %v13708_v53 = vsel %vm9467_vm0, 4294967295, %v13707_v53  ;;  %v1383_v31 = vsel %vm9467_vm0, %v9472_v61, 0.0  ;;  %vm13712_vm0 = vmmov %vm13711_vm1 }
  0xbe   : > { %2271 = vrot.lane.b32.xlu0 %v9455_v27, %s13560_s29  ;;  %v2526_v48 = vpop.permute.xlu1 %2525  ;;  %v9484_v10 = vrot.slane %v1383_v31, 7 }
  0xbf   : > { %2618 = vst.msk [vmem:[#allocation2 + $0x78] sm:$0xff] %vm13487_vm4, %v2526_v48 }
  0xc0   : > { %v2528_v45 = vpop.permute.xlu0 %2527  ;;  %2402 = vrot.lane.b32.xlu1 %v9090_v22, %s13687_s24  ;;  %v1498_v22 = vrot.slane %v9477_v0, 7 }
  0xc1   : > { %2619 = vst.msk [vmem:[#allocation2 + $0x90] sm:$0xff] %vm13487_vm4, %v2528_v45  ;;  %vm13709_vm4 = vcmask 1040384  }
  0xc2   : > { %2404 = vrot.lane.b32.xlu0 %v9114_v30, %s13687_s24  ;;  %v2653_v47 = vpop.permute.xlu1 %2652  ;;  %v706_v30 = vadd.s32 112, %v8873_v2  ;;  %v9492_v48 = vsel %vm13709_vm4, %v1498_v22, %v9484_v10  ;;  %vm13710_vm14 = vmmov %vm13709_vm4 }
  0xc3   : > { %2750 = vst.msk [vmem:[#allocation2 + $0x48] sm:$0xff] %vm13491_vm2, %v2653_v47  ;;  %v9496_v52 = vsel %vm13710_vm14, %v9401_v59, %v1498_v22  ;;  %vm13715_vm14 = vcmask 72768  }
  0xc4   : > { %v2655_v24 = vpop.permute.xlu0 %2654  ;;  %2406 = vrot.lane.b32.xlu1 %v9169_v36, %s13687_s24  ;;  %1578 = vst.msk [vmem:[#allocation2 + $0x270] sm:$0xff] %vm13711_vm1, %v9492_v48  ;;  %v826_v59 = vand.u32 15, %v706_v30  ;;  %vm13716_vm1 = vmmov %vm13715_vm14 }
  0xc5   : > { %2751 = vst.msk [vmem:[#allocation2 + $0x60] sm:$0xff] %vm13491_vm2, %v2655_v24  ;;  %vm13713_vm2 = vcmask 15368   ;;  %v8717_v24 = vld [vmem:[#allocation2] sm:$0xff] }
  0xc6   : > { %2408 = vrot.lane.b32.xlu0 %v9166_v9, %s13687_s24  ;;  %v1628_v45 = vpop.permute.xlu1 %1627  ;;  %1577 = vst.msk [vmem:[#allocation2 + $0x258] sm:$0xff] %vm13712_vm0, %v9496_v52  ;;  %vm13714_vm4 = vmmov %vm13713_vm2 }
  0xc7   : > { %1722 = vst.msk [vmem:[#allocation2 + $0xa8] sm:$0xff] %vm13713_vm2, %v1628_v45  ;;  %vm9514_vm2 = vcmp.ge.s32.totalorder %v826_v59, 1  ;;  %vm13719_vm0 = vmmov %vm13714_vm4  ;;  %v1810_v59 = vrot.slane %v9151_v56, 1 }
  0xc8   : > { %v1630_v47 = vpop.permute.xlu0 %1629  ;;  %2537 = vrot.lane.b32.xlu1 %v9059_v62, %s13558_s1 }
  0xc9   : > { %1723 = vst.msk [vmem:[#allocation2 + $0xc0] sm:$0xff] %vm13714_vm4, %v1630_v47  ;;  %vm13720_vm4 = vmmov %vm13719_vm0 }
  0xca   : > { %2539 = vrot.lane.b32.xlu0 %v9079_v15, %s13558_s1  ;;  %v2657_v31 = vpop.permute.xlu1 %2656  ;;  %v2781_v22 = vld [vmem:[#allocation2 + $0x48] sm:$0xff] }
  0xcb   : > { %2752 = vst.msk [vmem:[#allocation2 + $0x78] sm:$0xff] %vm13715_vm14, %v2657_v31  ;;  %3093 = vst [vmem:[#allocation2 + $0x48] sm:$0xff] %v8717_v24  ;;  %vm13721_vm14 = vcmask 23568  }
  0xcc   : > { %v2659_v32 = vpop.permute.xlu0 %2658  ;;  %2541 = vrot.lane.b32.xlu1 %v9156_v57, %s13558_s1  ;;  %v2782_v45 = vld [vmem:[#allocation2 + $0x60] sm:$0xff] }
  0xcd   : > { %2753 = vst.msk [vmem:[#allocation2 + $0x90] sm:$0xff] %vm13716_vm1, %v2659_v32  ;;  %v2813_v44 = vpack.c.bf16 %v2782_v45, %v2781_v22  ;;  %3096 = vst [vmem:[#allocation2 + $0x60] sm:$0xff] %v8717_v24  ;;  %v1408_v32 = vsel %vm9514_vm2, %v9230_v29, 0.0 }
  0xce   : > { %2543 = vrot.lane.b32.xlu0 %v9151_v56, %s13558_s1  ;;  %v1632_v47 = vpop.permute.xlu1 %1631  ;;  %vm13722_vm1 = vmmov %vm13721_vm14 }
  0xcf   : > { %8379 = vmatprep.mubr.bf16.mxu0 %v2813_v44  ;;  %1724 = vst.msk [vmem:[#allocation2 + $0xd8] sm:$0xff] %vm13719_vm0, %v1632_v47  ;;  %v9531_v44 = vrot.slane %v1408_v32, 1  ;;  %vm13723_vm0 = vcmask 1046528  }
  0xd0   : > { %v1634_v31 = vpop.permute.xlu0 %1633  ;;  %2668 = vrot.lane.b32.xlu1 %v9448_v21, %s13594_s25  ;;  %v9538_v46 = vsel %vm13723_vm0, %v9441_v60, %v1810_v59 }
  0xd1   : > { %1725 = vst.msk [vmem:[#allocation2 + $0xf0] sm:$0xff] %vm13720_vm4, %v1634_v31  ;;  %vm13724_vm4 = vmmov %vm13722_vm1 }
  0xd2   : > { %v2783_v22 = vld [vmem:[#allocation2 + $0x78] sm:$0xff]  ;;  %2670 = vrot.lane.b32.xlu0 %v9455_v27, %s13594_s25  ;;  %v1855_v45 = vpop.permute.xlu1 %1854 }
  0xd3   : > { %3099 = vst [vmem:[#allocation2 + $0x78] sm:$0xff] %v8717_v24  ;;  %1952 = vst.msk [vmem:[#allocation2 + $0xa8] sm:$0xff] %vm13721_vm14, %v1855_v45 }
  0xd4   : > { %v1857_v47 = vpop.permute.xlu0 %1856  ;;  %1643 = vrot.lane.b32.xlu1 %v9059_v62, %s13543_s21  ;;  %v2784_v17 = vld [vmem:[#allocation2 + $0x90] sm:$0xff]  ;;  %vm13725_vm14 = vmmov %vm13723_vm0  ;;  %vm13726_vm0 = vcmask 31768  }
  0xd5   : > { %1953 = vst.msk [vmem:[#allocation2 + $0xc0] sm:$0xff] %vm13722_vm1, %v1857_v47  ;;  %v2814_v31 = vpack.c.bf16 %v2784_v17, %v2783_v22  ;;  %v9545_v32 = vsel %vm13725_vm14, %v1810_v59, %v9531_v44  ;;  %vm13728_vm14 = vmmov %vm13726_vm0  ;;  %v715_v47 = vadd.s32 184, %v8873_v2 }
  0xd6   : > { %1645 = vrot.lane.b32.xlu0 %v9079_v15, %s13543_s21  ;;  %v1859_v24 = vpop.permute.xlu1 %1858 }
  0xd7   : > { %8380 = vmatmul.mubr.bf16.vlgmr.msra.gmra.mrb[0].mxu0 %v2814_v31  ;;  %1954 = vst.msk [vmem:[#allocation2 + $0xd8] sm:$0xff] %vm13724_vm4, %v1859_v24  ;;  %vm13727_vm4 = vmmov %vm13726_vm0  ;;  %v708_v24 = vadd.s32 128, %v8873_v2 }
  0xd8   : > { %v1861_v62 = vpop.permute.xlu0 %1860  ;;  %2672 = vrot.lane.b32.xlu1 %v9538_v46, %s13594_s25 }
  0xd9   : > { %1955 = vst.msk [vmem:[#allocation2 + $0xf0] sm:$0xff] %vm13722_vm1, %v1861_v62  ;;  %vm13729_vm1 = vmmov %vm13726_vm0  ;;  %v13734_v62 = vmov 0 }
  0xda   : > { %2674 = vrot.lane.b32.xlu0 %v9545_v32, %s13594_s25  ;;  %v1992_v17 = vpop.permute.xlu1 %1991 }
  0xdb   : > { %2088 = vst.msk [vmem:[#allocation2 + $0xa8] sm:$0xff] %vm13726_vm0, %v1992_v17  ;;  %vm13730_vm0 = vcmask 39968   ;;  %v9581_v17 = vld [vmem:[%s8889_s20 + $0xb8] sm:$0xff] }
  0xdc   : > { %v1994_v15 = vpop.permute.xlu0 %1993  ;;  %1647 = vrot.lane.b32.xlu1 %v9156_v57, %s13543_s21 }
  0xdd   : > { %2089 = vst.msk [vmem:[#allocation2 + $0xc0] sm:$0xff] %vm13727_vm4, %v1994_v15  ;;  %vm13731_vm4 = vmmov %vm13730_vm0 }
  0xde   : > { %1649 = vrot.lane.b32.xlu0 %v9151_v56, %s13543_s21  ;;  %v1996_v60 = vpop.permute.xlu1 %1995 }
  0xdf   : > { %2090 = vst.msk [vmem:[#allocation2 + $0xd8] sm:$0xff] %vm13728_vm14, %v1996_v60  ;;  %vm13732_vm14 = vmmov %vm13730_vm0  ;;  %v9586_v60 = vld [vmem:[%s8889_s20 + $0xb0] sm:$0xff] }
  0xe0   : > { %v1998_v59 = vpop.permute.xlu0 %1997  ;;  %1870 = vrot.lane.b32.xlu1 %v9448_v21, %s13545_s2 }
  0xe1   : > { %2091 = vst.msk [vmem:[#allocation2 + $0xf0] sm:$0xff] %vm13729_vm1, %v1998_v59  ;;  %vm13733_vm1 = vmmov %vm13730_vm0  ;;  %v1502_v59 = vrot.slane %v9586_v60, 7 }
  0xe2   : > { %1872 = vrot.lane.b32.xlu0 %v9455_v27, %s13545_s2  ;;  %v2127_v22 = vpop.permute.xlu1 %2126  ;;  %v889_v27 = vand.u32 15, %v715_v47  ;;  %v840_v47 = vand.u32 15, %v708_v24 }
  0xe3   : > { %2219 = vst.msk [vmem:[#allocation2 + $0xa8] sm:$0xff] %vm13730_vm0, %v2127_v22 }
  0xe4   : > { %v2129_v45 = vpop.permute.xlu0 %2128  ;;  %1874 = vrot.lane.b32.xlu1 %v9538_v46, %s13545_s2  ;;  %vm9576_vm0 = vcmp.le.s32.totalorder %v889_v27, 14 }
  0xe5   : > { %2220 = vst.msk [vmem:[#allocation2 + $0xc0] sm:$0xff] %vm13731_vm4, %v2129_v45  ;;  %v13735_v62 = vsel %vm9576_vm0, 4294967295, %v13734_v62  ;;  %vm13736_vm4 = vcmask 48168  }
  0xe6   : > { %1876 = vrot.lane.b32.xlu0 %v9545_v32, %s13545_s2  ;;  %v2131_v21 = vpop.permute.xlu1 %2130 }
  0xe7   : > { %2221 = vst.msk [vmem:[#allocation2 + $0xd8] sm:$0xff] %vm13732_vm14, %v2131_v21  ;;  %vm13737_vm14 = vmmov %vm13736_vm4 }
  0xe8   : > { %v2133_v31 = vpop.permute.xlu0 %2132  ;;  %2007 = vrot.lane.b32.xlu1 %v9169_v36, %s13542_s22  ;;  %v1385_v36 = vsel %vm9576_vm0, %v9581_v17, 0.0  ;;  %vm13742_vm7 = vmmov %vm13737_vm14 }
  0xe9   : > { %2222 = vst.msk [vmem:[#allocation2 + $0xf0] sm:$0xff] %vm13733_vm1, %v2133_v31  ;;  %v1504_v22 = vrot.slane %v1385_v36, 7  ;;  %vm13738_vm1 = vcmask 1040384   ;;  %v1814_v36 = vrot.slane %v9238_v40, 1 }
  0xea   : > { %2009 = vrot.lane.b32.xlu0 %v9166_v9, %s13542_s22  ;;  %v2258_v15 = vpop.permute.xlu1 %2257  ;;  %vm13739_vm3 = vmmov %vm13738_vm1 }
  0xeb   : > { %2353 = vst.msk [vmem:[#allocation2 + $0xa8] sm:$0xff] %vm13736_vm4, %v2258_v15  ;;  %v9597_v9 = vsel %vm13738_vm1, %v1502_v59, %v1504_v22  ;;  %v9601_v21 = vsel %vm13739_vm3, %v9484_v10, %v1502_v59  ;;  %vm13740_vm4 = vcmask 7168   ;;  %vm9613_vm3 = vcmp.ge.s32.totalorder %v840_v47, 1 }
  0xec   : > { %v2260_v45 = vpop.permute.xlu0 %2259  ;;  %2011 = vrot.lane.b32.xlu1 %v9252_v12, %s13542_s22  ;;  %1580 = vst.msk [vmem:[#allocation2 + $0x2a0] sm:$0xff] %vm13740_vm4, %v9597_v9  ;;  %vm13741_vm0 = vmmov %vm13740_vm4  ;;  %vm13746_vm1 = vcmask 56368  }
  0xed   : > { %2354 = vst.msk [vmem:[#allocation2 + $0xc0] sm:$0xff] %vm13737_vm14, %v2260_v45  ;;  %vm13743_vm14 = vmmov %vm13742_vm7 }
  0xee   : > { %2013 = vrot.lane.b32.xlu0 %v9249_v1, %s13542_s22  ;;  %v2262_v27 = vpop.permute.xlu1 %2261  ;;  %1579 = vst.msk [vmem:[#allocation2 + $0x288] sm:$0xff] %vm13741_vm0, %v9601_v21  ;;  %vm13748_vm0 = vmmov %vm13746_vm1 }
  0xef   : > { %2355 = vst.msk [vmem:[#allocation2 + $0xd8] sm:$0xff] %vm13742_vm7, %v2262_v27  ;;  %vm13747_vm7 = vmmov %vm13746_vm1 }
  0xf0   : > { %v2264_v31 = vpop.permute.xlu0 %2263  ;;  %2142 = vrot.lane.b32.xlu1 %v9156_v57, %s8741_s23  ;;  %v1410_v57 = vsel %vm9613_vm3, %v9298_v26, 0.0  ;;  %vm13749_vm4 = vmmov %vm13748_vm0 }
  0xf1   : > { %2356 = vst.msk [vmem:[#allocation2 + $0xf0] sm:$0xff] %vm13743_vm14, %v2264_v31  ;;  %vm13750_vm14 = vcmask 1046528  }
  0xf2   : > { %2144 = vrot.lane.b32.xlu0 %v9151_v56, %s8741_s23  ;;  %v2395_v24 = vpop.permute.xlu1 %2394  ;;  %v9630_v56 = vrot.slane %v1410_v57, 1  ;;  %v9637_v47 = vsel %vm13750_vm14, %v9531_v44, %v1814_v36  ;;  %v13756_v57 = vmov 0 }
  0xf3   : > { %2489 = vst.msk [vmem:[#allocation2 + $0xa8] sm:$0xff] %vm13746_vm1, %v2395_v24  ;;  %vm13751_vm1 = vcmask 64568  }
  0xf4   : > { %v2397_v15 = vpop.permute.xlu0 %2396  ;;  %2146 = vrot.lane.b32.xlu1 %v9230_v29, %s8741_s23 }
  0xf5   : > { %2490 = vst.msk [vmem:[#allocation2 + $0xc0] sm:$0xff] %vm13747_vm7, %v2397_v15  ;;  %vm13752_vm7 = vmmov %vm13750_vm14 }
  0xf6   : > { %2148 = vrot.lane.b32.xlu0 %v9238_v40, %s8741_s23  ;;  %v2399_v59 = vpop.permute.xlu1 %2398  ;;  %v9644_v31 = vsel %vm13752_vm7, %v1814_v36, %v9630_v56  ;;  %v9661_v36 = vld [vmem:[%s8889_s20 + $0xc8] sm:$0xff]  ;;  %vm13758_vm7 = vcmask 72768  }
  0xf7   : > { %2491 = vst.msk [vmem:[#allocation2 + $0xd8] sm:$0xff] %vm13748_vm0, %v2399_v59  ;;  %vm13753_vm0 = vmmov %vm13751_vm1 }
  0xf8   : > { %v2401_v45 = vpop.permute.xlu0 %2400  ;;  %2273 = vrot.lane.b32.xlu1 %v9538_v46, %s13560_s29  ;;  %v717_v46 = vadd.s32 200, %v8873_v2  ;;  %vm13755_vm14 = vmmov %vm13753_vm0 }
  0xf9   : > { %2492 = vst.msk [vmem:[#allocation2 + $0xf0] sm:$0xff] %vm13749_vm4, %v2401_v45  ;;  %vm13754_vm4 = vmmov %vm13753_vm0  ;;  %v9666_v45 = vld [vmem:[%s8889_s20 + $0xc0] sm:$0xff] }
  0xfa   : > { %2275 = vrot.lane.b32.xlu0 %v9545_v32, %s13560_s29  ;;  %v2530_v27 = vpop.permute.xlu1 %2529  ;;  %v903_v32 = vand.u32 15, %v717_v46 }
  0xfb   : > { %2620 = vst.msk [vmem:[#allocation2 + $0xa8] sm:$0xff] %vm13751_vm1, %v2530_v27 }
  0xfc   : > { %v2532_v24 = vpop.permute.xlu0 %2531  ;;  %2277 = vrot.lane.b32.xlu1 %v9637_v47, %s13560_s29  ;;  %vm9656_vm1 = vcmp.le.s32.totalorder %v903_v32, 14 }
  0xfd   : > { %2621 = vst.msk [vmem:[#allocation2 + $0xc0] sm:$0xff] %vm13753_vm0, %v2532_v24  ;;  %v13757_v57 = vsel %vm9656_vm1, 4294967295, %v13756_v57  ;;  %v1387_v27 = vsel %vm9656_vm1, %v9661_v36, 0.0  ;;  %vm13759_vm0 = vmmov %vm13758_vm7 }
  0xfe   : > { %2279 = vrot.lane.b32.xlu0 %v9644_v31, %s13560_s29  ;;  %v2534_v44 = vpop.permute.xlu1 %2533  ;;  %v9673_v24 = vrot.slane %v1387_v27, 7 }
  0xff   : > { %2622 = vst.msk [vmem:[#allocation2 + $0xd8] sm:$0xff] %vm13754_vm4, %v2534_v44  ;;  %vm13760_vm4 = vcmask 1040384  }
 0x100   : > { %v2536_v15 = vpop.permute.xlu0 %2535  ;;  %2410 = vrot.lane.b32.xlu1 %v9252_v12, %s13687_s24  ;;  %v1506_v12 = vrot.slane %v9666_v45, 7 }
 0x101   : > { %2623 = vst.msk [vmem:[#allocation2 + $0xf0] sm:$0xff] %vm13755_vm14, %v2536_v15  ;;  %vm13761_vm14 = vmmov %vm13760_vm4 }
 0x102   : > { %2412 = vrot.lane.b32.xlu0 %v9249_v1, %s13687_s24  ;;  %v2661_v59 = vpop.permute.xlu1 %2660  ;;  %v710_v1 = vadd.s32 144, %v8873_v2  ;;  %v9681_v44 = vsel %vm13760_vm4, %v1506_v12, %v9673_v24  ;;  %v9684_v32 = vsel %vm13761_vm14, %v1504_v22, %v1506_v12  ;;  %vm13766_vm14 = vcmask 72768  }
 0x103   : > { %2754 = vst.msk [vmem:[#allocation2 + $0xa8] sm:$0xff] %vm13758_vm7, %v2661_v59  ;;  %vm13762_vm7 = vcmask 7168  }
 0x104   : > { %v2663_v46 = vpop.permute.xlu0 %2662  ;;  %2414 = vrot.lane.b32.xlu1 %v9314_v58, %s13687_s24  ;;  %1582 = vst.msk [vmem:[#allocation2 + $0x2d0] sm:$0xff] %vm13762_vm7, %v9681_v44  ;;  %vm13763_vm1 = vmmov %vm13762_vm7  ;;  %v854_v22 = vand.u32 15, %v710_v1 }
 0x105   : > { %2755 = vst.msk [vmem:[#allocation2 + $0xc0] sm:$0xff] %vm13759_vm0, %v2663_v46  ;;  %vm13764_vm0 = vcmask 15368  }
 0x106   : > { %2416 = vrot.lane.b32.xlu0 %v9311_v51, %s13687_s24  ;;  %v1636_v15 = vpop.permute.xlu1 %1635  ;;  %1581 = vst.msk [vmem:[#allocation2 + $0x2b8] sm:$0xff] %vm13763_vm1, %v9684_v32  ;;  %vm13765_vm4 = vmmov %vm13764_vm0  ;;  %vm9702_vm7 = vcmp.ge.s32.totalorder %v854_v22, 1 }
 0x107   : > { %1726 = vst.msk [vmem:[#allocation2 + $0x108] sm:$0xff] %vm13764_vm0, %v1636_v15  ;;  %vm13767_vm1 = vmmov %vm13766_vm14  ;;  %v13769_v3 = vsel %vm9702_vm7, 4294967295, %v13768_v3 }
 0x108   : > { %v1638_v59 = vpop.permute.xlu0 %1637  ;;  %2545 = vrot.lane.b32.xlu1 %v9230_v29, %s13558_s1 }
 0x109   : > { %1727 = vst.msk [vmem:[#allocation2 + $0x120] sm:$0xff] %vm13765_vm4, %v1638_v59  ;;  %vm13770_vm4 = vmmov %vm13764_vm0 }
 0x10a   : > { %2547 = vrot.lane.b32.xlu0 %v9238_v40, %s13558_s1  ;;  %v2665_v27 = vpop.permute.xlu1 %2664  ;;  %v2785_v12 = vld [vmem:[#allocation2 + $0xa8] sm:$0xff] }
 0x10b   : > { %2756 = vst.msk [vmem:[#allocation2 + $0xd8] sm:$0xff] %vm13766_vm14, %v2665_v27  ;;  %v1412_v27 = vsel %vm9702_vm7, %v9394_v37, 0.0  ;;  %vm13771_vm14 = vcmask 23568  }
 0x10c   : > { %v2667_v46 = vpop.permute.xlu0 %2666  ;;  %2549 = vrot.lane.b32.xlu1 %v9298_v26, %s13558_s1  ;;  %v2786_v6 = vld [vmem:[#allocation2 + $0xc0] sm:$0xff] }
 0x10d   : > { %2757 = vst.msk [vmem:[#allocation2 + $0xf0] sm:$0xff] %vm13767_vm1, %v2667_v46  ;;  %v2815_v15 = vpack.c.bf16 %v2786_v6, %v2785_v12  ;;  %v1818_v6 = vrot.slane %v9293_v41, 1  ;;  %v9719_v46 = vrot.slane %v1412_v27, 1  ;;  %vm13772_vm1 = vmmov %vm13771_vm14 }
 0x10e   : > { %2551 = vrot.lane.b32.xlu0 %v9293_v41, %s13558_s1  ;;  %v1640_v1 = vpop.permute.xlu1 %1639 }
 0x10f   : > { %8383 = vmatprep.mubr.bf16.mxu0 %v2815_v15  ;;  %1728 = vst.msk [vmem:[#allocation2 + $0x138] sm:$0xff] %vm13764_vm0, %v1640_v1  ;;  %vm13773_vm0 = vcmask 1046528  }
 0x110   : > { %v1642_v59 = vpop.permute.xlu0 %1641  ;;  %2676 = vrot.lane.b32.xlu1 %v9637_v47, %s13594_s25 }
 0x111   : > { %1729 = vst.msk [vmem:[#allocation2 + $0x150] sm:$0xff] %vm13770_vm4, %v1642_v59  ;;  %v9726_v59 = vsel %vm13773_vm0, %v9630_v56, %v1818_v6  ;;  %vm13774_vm4 = vmmov %vm13772_vm1 }
 0x112   : > { %2678 = vrot.lane.b32.xlu0 %v9644_v31, %s13594_s25  ;;  %v1863_v22 = vpop.permute.xlu1 %1862  ;;  %v2787_v12 = vld [vmem:[#allocation2 + $0xd8] sm:$0xff] }
 0x113   : > { %1956 = vst.msk [vmem:[#allocation2 + $0x108] sm:$0xff] %vm13771_vm14, %v1863_v22  ;;  %vm13775_vm14 = vmmov %vm13773_vm0  ;;  %vm13776_vm0 = vcmask 31768  }
 0x114   : > { %v1865_v15 = vpop.permute.xlu0 %1864  ;;  %1651 = vrot.lane.b32.xlu1 %v9230_v29, %s13543_s21  ;;  %v2788_v1 = vld [vmem:[#allocation2 + $0xf0] sm:$0xff]  ;;  %v9733_v27 = vsel %vm13775_vm14, %v1818_v6, %v9719_v46  ;;  %vm13778_vm14 = vmmov %vm13776_vm0 }
 0x115   : > { %1957 = vst.msk [vmem:[#allocation2 + $0x120] sm:$0xff] %vm13772_vm1, %v1865_v15  ;;  %v2816_v5 = vpack.c.bf16 %v2788_v1, %v2787_v12  ;;  %v719_v12 = vadd.s32 216, %v8873_v2  ;;  %v712_v1 = vadd.s32 160, %v8873_v2 }
 0x116   : > { %1653 = vrot.lane.b32.xlu0 %v9238_v40, %s13543_s21  ;;  %v1867_v39 = vpop.permute.xlu1 %1866 }
 0x117   : > { %8384 = vmatmul.mubr.bf16.gmra.mrb[4].mxu0 %v2816_v5  ;;  %1958 = vst.msk [vmem:[#allocation2 + $0x138] sm:$0xff] %vm13774_vm4, %v1867_v39  ;;  %vm13777_vm4 = vmmov %vm13776_vm0 }
 0x118   : > { %v1869_v29 = vpop.permute.xlu0 %1868  ;;  %2680 = vrot.lane.b32.xlu1 %v9726_v59, %s13594_s25 }
 0x119   : > { %1959 = vst.msk [vmem:[#allocation2 + $0x150] sm:$0xff] %vm13772_vm1, %v1869_v29  ;;  %vm13779_vm1 = vmmov %vm13776_vm0  ;;  %v13784_v29 = vmov 0 }
 0x11a   : > { %2682 = vrot.lane.b32.xlu0 %v9733_v27, %s13594_s25  ;;  %v2000_v56 = vpop.permute.xlu1 %1999 }
 0x11b   : > { %2092 = vst.msk [vmem:[#allocation2 + $0x108] sm:$0xff] %vm13776_vm0, %v2000_v56  ;;  %vm13780_vm0 = vcmask 39968   ;;  %v9769_v56 = vld [vmem:[%s8889_s20 + $0xd8] sm:$0xff] }
 0x11c   : > { %v2002_v40 = vpop.permute.xlu0 %2001  ;;  %1655 = vrot.lane.b32.xlu1 %v9298_v26, %s13543_s21 }
 0x11d   : > { %2093 = vst.msk [vmem:[#allocation2 + $0x120] sm:$0xff] %vm13777_vm4, %v2002_v40  ;;  %vm13781_vm4 = vmmov %vm13780_vm0 }
 0x11e   : > { %1657 = vrot.lane.b32.xlu0 %v9293_v41, %s13543_s21  ;;  %v2004_v5 = vpop.permute.xlu1 %2003 }
 0x11f   : > { %2094 = vst.msk [vmem:[#allocation2 + $0x138] sm:$0xff] %vm13778_vm14, %v2004_v5  ;;  %vm13782_vm14 = vmmov %vm13780_vm0  ;;  %v9774_v5 = vld [vmem:[%s8889_s20 + $0xd0] sm:$0xff] }
 0x120   : > { %v2006_v39 = vpop.permute.xlu0 %2005  ;;  %1878 = vrot.lane.b32.xlu1 %v9637_v47, %s13545_s2 }
 0x121   : > { %2095 = vst.msk [vmem:[#allocation2 + $0x150] sm:$0xff] %vm13779_vm1, %v2006_v39  ;;  %vm13783_vm1 = vmmov %vm13780_vm0  ;;  %v1510_v39 = vrot.slane %v9774_v5, 7 }
 0x122   : > { %1880 = vrot.lane.b32.xlu0 %v9644_v31, %s13545_s2  ;;  %v2135_v6 = vpop.permute.xlu1 %2134  ;;  %v917_v31 = vand.u32 15, %v719_v12  ;;  %v868_v12 = vand.u32 15, %v712_v1 }
 0x123   : > { %2223 = vst.msk [vmem:[#allocation2 + $0x108] sm:$0xff] %vm13780_vm0, %v2135_v6 }
 0x124   : > { %v2137_v22 = vpop.permute.xlu0 %2136  ;;  %1882 = vrot.lane.b32.xlu1 %v9726_v59, %s13545_s2  ;;  %vm9764_vm0 = vcmp.le.s32.totalorder %v917_v31, 14 }
 0x125   : > { %2224 = vst.msk [vmem:[#allocation2 + $0x120] sm:$0xff] %vm13781_vm4, %v2137_v22  ;;  %v13785_v29 = vsel %vm9764_vm0, 4294967295, %v13784_v29  ;;  %vm13786_vm4 = vcmask 48168  }
 0x126   : > { %1884 = vrot.lane.b32.xlu0 %v9733_v27, %s13545_s2  ;;  %v2139_v47 = vpop.permute.xlu1 %2138 }
 0x127   : > { %2225 = vst.msk [vmem:[#allocation2 + $0x138] sm:$0xff] %vm13782_vm14, %v2139_v47  ;;  %vm13787_vm14 = vmmov %vm13786_vm4 }
 0x128   : > { %v2141_v15 = vpop.permute.xlu0 %2140  ;;  %2015 = vrot.lane.b32.xlu1 %v9314_v58, %s13542_s22  ;;  %v1389_v58 = vsel %vm9764_vm0, %v9769_v56, 0.0  ;;  %vm13792_vm11 = vmmov %vm13787_vm14 }
 0x129   : > { %2226 = vst.msk [vmem:[#allocation2 + $0x150] sm:$0xff] %vm13783_vm1, %v2141_v15  ;;  %v1512_v6 = vrot.slane %v1389_v58, 7  ;;  %vm13788_vm1 = vcmask 1040384   ;;  %v1822_v58 = vrot.slane %v9389_v42, 1 }
 0x12a   : > { %2017 = vrot.lane.b32.xlu0 %v9311_v51, %s13542_s22  ;;  %v2266_v40 = vpop.permute.xlu1 %2265  ;;  %vm13789_vm7 = vmmov %vm13788_vm1 }
 0x12b   : > { %2357 = vst.msk [vmem:[#allocation2 + $0x108] sm:$0xff] %vm13786_vm4, %v2266_v40  ;;  %v9785_v51 = vsel %vm13788_vm1, %v1510_v39, %v1512_v6  ;;  %v9789_v47 = vsel %vm13789_vm7, %v9673_v24, %v1510_v39  ;;  %vm13790_vm4 = vcmask 7168   ;;  %vm9801_vm7 = vcmp.ge.s32.totalorder %v868_v12, 1 }
 0x12c   : > { %v2268_v22 = vpop.permute.xlu0 %2267  ;;  %2019 = vrot.lane.b32.xlu1 %v9412_v8, %s13542_s22  ;;  %1584 = vst.msk [vmem:[#allocation2 + $0x300] sm:$0xff] %vm13790_vm4, %v9785_v51  ;;  %vm13791_vm0 = vmmov %vm13790_vm4  ;;  %vm13796_vm1 = vcmask 56368  }
 0x12d   : > { %2358 = vst.msk [vmem:[#allocation2 + $0x120] sm:$0xff] %vm13787_vm14, %v2268_v22  ;;  %vm13793_vm14 = vmmov %vm13792_vm11 }
 0x12e   : > { %2021 = vrot.lane.b32.xlu0 %v9408_v19, %s13542_s22  ;;  %v2270_v31 = vpop.permute.xlu1 %2269  ;;  %1583 = vst.msk [vmem:[#allocation2 + $0x2e8] sm:$0xff] %vm13791_vm0, %v9789_v47  ;;  %vm13798_vm0 = vmmov %vm13796_vm1 }
 0x12f   : > { %2359 = vst.msk [vmem:[#allocation2 + $0x138] sm:$0xff] %vm13792_vm11, %v2270_v31  ;;  %vm13797_vm11 = vmmov %vm13796_vm1 }
 0x130   : > { %v2272_v15 = vpop.permute.xlu0 %2271  ;;  %2150 = vrot.lane.b32.xlu1 %v9298_v26, %s8741_s23  ;;  %v1414_v26 = vsel %vm9801_vm7, %v9477_v0, 0.0  ;;  %vm13799_vm4 = vmmov %vm13798_vm0 }
 0x131   : > { %2360 = vst.msk [vmem:[#allocation2 + $0x150] sm:$0xff] %vm13793_vm14, %v2272_v15  ;;  %vm13800_vm14 = vcmask 1046528  }
 0x132   : > { %2152 = vrot.lane.b32.xlu0 %v9293_v41, %s8741_s23  ;;  %v2403_v1 = vpop.permute.xlu1 %2402  ;;  %v9818_v41 = vrot.slane %v1414_v26, 1  ;;  %v9825_v12 = vsel %vm13800_vm14, %v9719_v46, %v1822_v58  ;;  %v721_v46 = vadd.s32 232, %v8873_v2  ;;  %v13806_v26 = vmov 0 }
 0x133   : > { %2493 = vst.msk [vmem:[#allocation2 + $0x108] sm:$0xff] %vm13796_vm1, %v2403_v1  ;;  %vm13801_vm1 = vcmask 64568  }
 0x134   : > { %v2405_v40 = vpop.permute.xlu0 %2404  ;;  %2154 = vrot.lane.b32.xlu1 %v9394_v37, %s8741_s23 }
 0x135   : > { %2494 = vst.msk [vmem:[#allocation2 + $0x120] sm:$0xff] %vm13797_vm11, %v2405_v40  ;;  %vm13802_vm11 = vmmov %vm13800_vm14 }
 0x136   : > { %2156 = vrot.lane.b32.xlu0 %v9389_v42, %s8741_s23  ;;  %v2407_v39 = vpop.permute.xlu1 %2406  ;;  %v9832_v15 = vsel %vm13802_vm11, %v1822_v58, %v9818_v41  ;;  %v9849_v58 = vld [vmem:[%s8889_s20 + $0xe8] sm:$0xff]  ;;  %vm13808_vm11 = vcmask 72768  }
 0x137   : > { %2495 = vst.msk [vmem:[#allocation2 + $0x138] sm:$0xff] %vm13798_vm0, %v2407_v39  ;;  %vm13803_vm0 = vmmov %vm13801_vm1 }
 0x138   : > { %v2409_v22 = vpop.permute.xlu0 %2408  ;;  %2281 = vrot.lane.b32.xlu1 %v9726_v59, %s13560_s29  ;;  %vm13805_vm14 = vmmov %vm13803_vm0 }
 0x139   : > { %2496 = vst.msk [vmem:[#allocation2 + $0x150] sm:$0xff] %vm13799_vm4, %v2409_v22  ;;  %vm13804_vm4 = vmmov %vm13803_vm0  ;;  %v9854_v22 = vld [vmem:[%s8889_s20 + $0xe0] sm:$0xff] }
 0x13a   : > { %2283 = vrot.lane.b32.xlu0 %v9733_v27, %s13560_s29  ;;  %v2538_v31 = vpop.permute.xlu1 %2537  ;;  %v931_v27 = vand.u32 15, %v721_v46 }
 0x13b   : > { %2624 = vst.msk [vmem:[#allocation2 + $0x108] sm:$0xff] %vm13801_vm1, %v2538_v31 }
 0x13c   : > { %v2540_v1 = vpop.permute.xlu0 %2539  ;;  %2285 = vrot.lane.b32.xlu1 %v9825_v12, %s13560_s29  ;;  %vm9844_vm1 = vcmp.le.s32.totalorder %v931_v27, 14 }
 0x13d   : > { %2625 = vst.msk [vmem:[#allocation2 + $0x120] sm:$0xff] %vm13803_vm0, %v2540_v1  ;;  %v13807_v26 = vsel %vm9844_vm1, 4294967295, %v13806_v26  ;;  %v1391_v31 = vsel %vm9844_vm1, %v9849_v58, 0.0  ;;  %vm13809_vm0 = vmmov %vm13808_vm11 }
 0x13e   : > { %2287 = vrot.lane.b32.xlu0 %v9832_v15, %s13560_s29  ;;  %v2542_v59 = vpop.permute.xlu1 %2541  ;;  %v9861_v1 = vrot.slane %v1391_v31, 7 }
 0x13f   : > { %2626 = vst.msk [vmem:[#allocation2 + $0x138] sm:$0xff] %vm13804_vm4, %v2542_v59  ;;  %vm13810_vm4 = vcmask 1040384  }
 0x140   : > { %v2544_v40 = vpop.permute.xlu0 %2543  ;;  %2418 = vrot.lane.b32.xlu1 %v9412_v8, %s13687_s24  ;;  %v1514_v8 = vrot.slane %v9854_v22, 7 }
 0x141   : > { %2627 = vst.msk [vmem:[#allocation2 + $0x150] sm:$0xff] %vm13805_vm14, %v2544_v40  ;;  %vm13811_vm14 = vmmov %vm13810_vm4 }
 0x142   : > { %2420 = vrot.lane.b32.xlu0 %v9408_v19, %s13687_s24  ;;  %v2669_v39 = vpop.permute.xlu1 %2668  ;;  %v714_v19 = vadd.s32 176, %v8873_v2  ;;  %v9869_v59 = vsel %vm13810_vm4, %v1514_v8, %v9861_v1  ;;  %v9872_v27 = vsel %vm13811_vm14, %v1512_v6, %v1514_v8  ;;  %vm13816_vm14 = vcmask 72768  }
 0x143   : > { %2758 = vst.msk [vmem:[#allocation2 + $0x108] sm:$0xff] %vm13808_vm11, %v2669_v39  ;;  %vm13812_vm11 = vcmask 7168  }
 0x144   : > { %v2671_v46 = vpop.permute.xlu0 %2670  ;;  %2422 = vrot.lane.b32.xlu1 %v9496_v52, %s13687_s24  ;;  %1586 = vst.msk [vmem:[#allocation2 + $0x330] sm:$0xff] %vm13812_vm11, %v9869_v59  ;;  %vm13813_vm1 = vmmov %vm13812_vm11  ;;  %v882_v6 = vand.u32 15, %v714_v19 }
 0x145   : > { %2759 = vst.msk [vmem:[#allocation2 + $0x120] sm:$0xff] %vm13809_vm0, %v2671_v46  ;;  %vm13814_vm0 = vcmask 15368  }
 0x146   : > { %2424 = vrot.lane.b32.xlu0 %v9492_v48, %s13687_s24  ;;  %v1644_v40 = vpop.permute.xlu1 %1643  ;;  %1585 = vst.msk [vmem:[#allocation2 + $0x318] sm:$0xff] %vm13813_vm1, %v9872_v27  ;;  %vm13815_vm4 = vmmov %vm13814_vm0  ;;  %vm9890_vm11 = vcmp.ge.s32.totalorder %v882_v6, 1 }
 0x147   : > { %1730 = vst.msk [vmem:[#allocation2 + $0x168] sm:$0xff] %vm13814_vm0, %v1644_v40  ;;  %vm13817_vm1 = vmmov %vm13816_vm14  ;;  %v13819_v13 = vsel %vm9890_vm11, 4294967295, %v13818_v13 }
 0x148   : > { %v1646_v39 = vpop.permute.xlu0 %1645  ;;  %2553 = vrot.lane.b32.xlu1 %v9394_v37, %s13558_s1 }
 0x149   : > { %1731 = vst.msk [vmem:[#allocation2 + $0x180] sm:$0xff] %vm13815_vm4, %v1646_v39  ;;  %vm13820_vm4 = vmmov %vm13814_vm0 }
 0x14a   : > { %2555 = vrot.lane.b32.xlu0 %v9389_v42, %s13558_s1  ;;  %v2673_v31 = vpop.permute.xlu1 %2672  ;;  %v2789_v8 = vld [vmem:[#allocation2 + $0x108] sm:$0xff] }
 0x14b   : > { %2760 = vst.msk [vmem:[#allocation2 + $0x138] sm:$0xff] %vm13816_vm14, %v2673_v31  ;;  %v1416_v31 = vsel %vm9890_vm11, %v9586_v60, 0.0  ;;  %vm13821_vm14 = vcmask 23568  }
 0x14c   : > { %v2675_v46 = vpop.permute.xlu0 %2674  ;;  %2557 = vrot.lane.b32.xlu1 %v9477_v0, %s13558_s1  ;;  %v2790_v33 = vld [vmem:[#allocation2 + $0x120] sm:$0xff] }
 0x14d   : > { %2761 = vst.msk [vmem:[#allocation2 + $0x150] sm:$0xff] %vm13817_vm1, %v2675_v46  ;;  %v2817_v40 = vpack.c.bf16 %v2790_v33, %v2789_v8  ;;  %v1826_v33 = vrot.slane %v9472_v61, 1  ;;  %v9907_v46 = vrot.slane %v1416_v31, 1  ;;  %vm13822_vm1 = vmmov %vm13821_vm14 }
 0x14e   : > { %2559 = vrot.lane.b32.xlu0 %v9472_v61, %s13558_s1  ;;  %v1648_v19 = vpop.permute.xlu1 %1647  ;;  %vm13826_vm11 = vmmov %vm13822_vm1 }
 0x14f   : > { %8387 = vmatprep.mubr.bf16.mxu0 %v2817_v40  ;;  %1732 = vst.msk [vmem:[#allocation2 + $0x198] sm:$0xff] %vm13814_vm0, %v1648_v19  ;;  %vm13823_vm0 = vcmask 1046528  }
 0x150   : > { %v1650_v39 = vpop.permute.xlu0 %1649  ;;  %2684 = vrot.lane.b32.xlu1 %v9825_v12, %s13594_s25 }
 0x151   : > { %1733 = vst.msk [vmem:[#allocation2 + $0x1b0] sm:$0xff] %vm13820_vm4, %v1650_v39  ;;  %v1827_v39 = vsel %vm13823_vm0, %v9818_v41, %v1826_v33  ;;  %vm13824_vm4 = vmmov %vm13822_vm1 }
 0x152   : > { %2686 = vrot.lane.b32.xlu0 %v9832_v15, %s13594_s25  ;;  %v1871_v6 = vpop.permute.xlu1 %1870  ;;  %v2791_v8 = vld [vmem:[#allocation2 + $0x138] sm:$0xff] }
 0x153   : > { %1960 = vst.msk [vmem:[#allocation2 + $0x168] sm:$0xff] %vm13821_vm14, %v1871_v6  ;;  %vm13825_vm14 = vmmov %vm13823_vm0 }
 0x154   : > { %v1873_v40 = vpop.permute.xlu0 %1872  ;;  %1659 = vrot.lane.b32.xlu1 %v9394_v37, %s13543_s21  ;;  %v2792_v19 = vld [vmem:[#allocation2 + $0x150] sm:$0xff]  ;;  %v1829_v31 = vsel %vm13825_vm14, %v1826_v33, %v9907_v46  ;;  %vm13831_vm14 = vcmask 39968  }
 0x155   : > { %1961 = vst.msk [vmem:[#allocation2 + $0x180] sm:$0xff] %vm13822_vm1, %v1873_v40  ;;  %v2818_v23 = vpack.c.bf16 %v2792_v19, %v2791_v8  ;;  %vm13827_vm1 = vcmask 31768  }
 0x156   : > { %1661 = vrot.lane.b32.xlu0 %v9389_v42, %s13543_s21  ;;  %v1875_v34 = vpop.permute.xlu1 %1874  ;;  %vm13828_vm0 = vmmov %vm13827_vm1 }
 0x157   : > { %8388 = vmatmul.mubr.bf16.gmra.mrb[8].mxu0 %v2818_v23  ;;  %1962 = vst.msk [vmem:[#allocation2 + $0x198] sm:$0xff] %vm13824_vm4, %v1875_v34  ;;  %vm13829_vm4 = vmmov %vm13828_vm0 }
 0x158   : > { %v1877_v6 = vpop.permute.xlu0 %1876  ;;  %2688 = vrot.lane.b32.xlu1 %v1827_v39, %s13594_s25 }
 0x159   : > { %1963 = vst.msk [vmem:[#allocation2 + $0x1b0] sm:$0xff] %vm13826_vm11, %v1877_v6  ;;  %vm13830_vm11 = vmmov %vm13828_vm0 }
 0x15a   : > { %2690 = vrot.lane.b32.xlu0 %v1829_v31, %s13594_s25  ;;  %v2008_v37 = vpop.permute.xlu1 %2007 }
 0x15b   : > { %2096 = vst.msk [vmem:[#allocation2 + $0x168] sm:$0xff] %vm13827_vm1, %v2008_v37  ;;  %vm13832_vm1 = vmmov %vm13831_vm14 }
 0x15c   : > { %v2010_v41 = vpop.permute.xlu0 %2009  ;;  %1663 = vrot.lane.b32.xlu1 %v9477_v0, %s13543_s21 }
 0x15d   : > { %2097 = vst.msk [vmem:[#allocation2 + $0x180] sm:$0xff] %vm13828_vm0, %v2010_v41  ;;  %vm13833_vm0 = vmmov %vm13832_vm1 }
 0x15e   : > { %1665 = vrot.lane.b32.xlu0 %v9472_v61, %s13543_s21  ;;  %v2012_v23 = vpop.permute.xlu1 %2011 }
 0x15f   : > { %2098 = vst.msk [vmem:[#allocation2 + $0x198] sm:$0xff] %vm13829_vm4, %v2012_v23  ;;  %vm13834_vm4 = vmmov %vm13833_vm0 }
 0x160   : > { %v2014_v34 = vpop.permute.xlu0 %2013  ;;  %1886 = vrot.lane.b32.xlu1 %v9825_v12, %s13545_s2  ;;  %v716_v12 = vadd.s32 192, %v8873_v2 }
 0x161   : > { %2099 = vst.msk [vmem:[#allocation2 + $0x1b0] sm:$0xff] %vm13830_vm11, %v2014_v34  ;;  %vm13835_vm11 = vcmask 48168   ;;  %v1830_v34 = vrot.slane %v9581_v17, 1 }
 0x162   : > { %1888 = vrot.lane.b32.xlu0 %v9832_v15, %s13545_s2  ;;  %v2143_v42 = vpop.permute.xlu1 %2142  ;;  %v896_v6 = vand.u32 15, %v716_v12 }
 0x163   : > { %2227 = vst.msk [vmem:[#allocation2 + $0x168] sm:$0xff] %vm13831_vm14, %v2143_v42  ;;  %vm13836_vm14 = vmmov %vm13835_vm11 }
 0x164   : > { %v2145_v33 = vpop.permute.xlu0 %2144  ;;  %1890 = vrot.lane.b32.xlu1 %v1827_v39, %s13545_s2 }
 0x165   : > { %2228 = vst.msk [vmem:[#allocation2 + $0x180] sm:$0xff] %vm13832_vm1, %v2145_v33  ;;  %vm13837_vm1 = vmmov %vm13835_vm11 }
 0x166   : > { %1892 = vrot.lane.b32.xlu0 %v1829_v31, %s13545_s2  ;;  %v2147_v8 = vpop.permute.xlu1 %2146 }
 0x167   : > { %2229 = vst.msk [vmem:[#allocation2 + $0x198] sm:$0xff] %vm13833_vm0, %v2147_v8  ;;  %vm13838_vm0 = vmmov %vm13837_vm1 }
 0x168   : > { %v2149_v40 = vpop.permute.xlu0 %2148  ;;  %2023 = vrot.lane.b32.xlu1 %v9496_v52, %s13542_s22 }
 0x169   : > { %2230 = vst.msk [vmem:[#allocation2 + $0x1b0] sm:$0xff] %vm13834_vm4, %v2149_v40  ;;  %vm9955_vm4 = vcmp.ge.s32.totalorder %v896_v6, 1 }
 0x16a   : > { %2025 = vrot.lane.b32.xlu0 %v9492_v48, %s13542_s22  ;;  %v2274_v15 = vpop.permute.xlu1 %2273  ;;  %v13839_v48 = vmov 0 }
 0x16b   : > { %2361 = vst.msk [vmem:[#allocation2 + $0x168] sm:$0xff] %vm13835_vm11, %v2274_v15  ;;  %v13840_v48 = vsel %vm9955_vm4, 4294967295, %v13839_v48  ;;  %vm13841_vm11 = vcmask 56368   ;;  %v723_v15 = vadd.s32 248, %v8873_v2 }
 0x16c   : > { %v2276_v19 = vpop.permute.xlu0 %2275  ;;  %2027 = vrot.lane.b32.xlu1 %v9601_v21, %s13542_s22 }
 0x16d   : > { %2362 = vst.msk [vmem:[#allocation2 + $0x180] sm:$0xff] %vm13836_vm14, %v2276_v19  ;;  %vm13842_vm14 = vmmov %vm13841_vm11 }
 0x16e   : > { %2029 = vrot.lane.b32.xlu0 %v9597_v9, %s13542_s22  ;;  %v2278_v52 = vpop.permute.xlu1 %2277 }
 0x16f   : > { %2363 = vst.msk [vmem:[#allocation2 + $0x198] sm:$0xff] %vm13837_vm1, %v2278_v52  ;;  %vm13843_vm1 = vmmov %vm13841_vm11 }
 0x170   : > { %v2280_v37 = vpop.permute.xlu0 %2279  ;;  %2158 = vrot.lane.b32.xlu1 %v9477_v0, %s8741_s23  ;;  %v1418_v0 = vsel %vm9955_vm4, %v9666_v45, 0.0 }
 0x171   : > { %2364 = vst.msk [vmem:[#allocation2 + $0x1b0] sm:$0xff] %vm13838_vm0, %v2280_v37  ;;  %v9972_v42 = vrot.slane %v1418_v0, 1  ;;  %vm13844_vm0 = vmmov %vm13843_vm1 }
 0x172   : > { %2160 = vrot.lane.b32.xlu0 %v9472_v61, %s8741_s23  ;;  %v2411_v41 = vpop.permute.xlu1 %2410 }
 0x173   : > { %2497 = vst.msk [vmem:[#allocation2 + $0x168] sm:$0xff] %vm13841_vm11, %v2411_v41  ;;  %vm13845_vm11 = vcmask 1046528   ;;  %v10006_v41 = vld [vmem:[%s8889_s20 + $0xf8] sm:$0xff] }
 0x174   : > { %v2413_v23 = vpop.permute.xlu0 %2412  ;;  %2162 = vrot.lane.b32.xlu1 %v9586_v60, %s8741_s23  ;;  %v9978_v8 = vsel %vm13845_vm11, %v9907_v46, %v1830_v34  ;;  %vm13847_vm4 = vmmov %vm13845_vm11 }
 0x175   : > { %2498 = vst.msk [vmem:[#allocation2 + $0x180] sm:$0xff] %vm13842_vm14, %v2413_v23  ;;  %vm13846_vm14 = vcmask 64568   ;;  %v9984_v12 = vsel %vm13847_vm4, %v1830_v34, %v9972_v42  ;;  %vm13850_vm4 = vcmask 1040384  }
 0x176   : > { %2164 = vrot.lane.b32.xlu0 %v9581_v17, %s8741_s23  ;;  %v2415_v61 = vpop.permute.xlu1 %2414 }
 0x177   : > { %2499 = vst.msk [vmem:[#allocation2 + $0x198] sm:$0xff] %vm13843_vm1, %v2415_v61  ;;  %vm13848_vm1 = vmmov %vm13846_vm14 }
 0x178   : > { %v2417_v33 = vpop.permute.xlu0 %2416  ;;  %2289 = vrot.lane.b32.xlu1 %v1827_v39, %s13560_s29  ;;  %v9990_v39 = vld [vmem:[%s8889_s20 + $0xf0] sm:$0xff] }
 0x179   : > { %2500 = vst.msk [vmem:[#allocation2 + $0x1b0] sm:$0xff] %vm13844_vm0, %v2417_v33  ;;  %v1518_v46 = vrot.slane %v9990_v39, 7  ;;  %vm13849_vm0 = vmmov %vm13848_vm1 }
 0x17a   : > { %2291 = vrot.lane.b32.xlu0 %v1829_v31, %s13560_s29  ;;  %v2546_v40 = vpop.permute.xlu1 %2545  ;;  %v945_v31 = vand.u32 15, %v723_v15 }
 0x17b   : > { %2628 = vst.msk [vmem:[#allocation2 + $0x168] sm:$0xff] %vm13846_vm14, %v2546_v40  ;;  %v9999_v52 = vsel %vm13850_vm4, %v9861_v1, %v1518_v46  ;;  %vm13853_vm14 = vmmov %vm13849_vm0 }
 0x17c   : > { %v2548_v19 = vpop.permute.xlu0 %2547  ;;  %2293 = vrot.lane.b32.xlu1 %v9978_v8, %s13560_s29  ;;  %vm10001_vm11 = vcmp.le.s32.totalorder %v945_v31, 14 }
 0x17d   : > { %2629 = vst.msk [vmem:[#allocation2 + $0x180] sm:$0xff] %vm13848_vm1, %v2548_v19  ;;  %v1393_v0 = vsel %vm10001_vm11, %v10006_v41, 0.0  ;;  %vm13855_vm1 = vcmask 72768  }
 0x17e   : > { %2295 = vrot.lane.b32.xlu0 %v9984_v12, %s13560_s29  ;;  %v2550_v6 = vpop.permute.xlu1 %2549  ;;  %v10014_v34 = vrot.slane %v1393_v0, 7  ;;  %v13862_v0 = vmov 0 }
 0x17f   : > { %2630 = vst.msk [vmem:[#allocation2 + $0x198] sm:$0xff] %vm13849_vm0, %v2550_v6  ;;  %vm13856_vm0 = vmmov %vm13850_vm4 }
 0x180   : > { %v2552_v23 = vpop.permute.xlu0 %2551  ;;  %2426 = vrot.lane.b32.xlu1 %v9601_v21, %s13687_s24  ;;  %13854 = vst [vmem:[#allocation18_spill] sm:$0xff] %v10014_v34  ;;  %v10021_v61 = vsel %vm13856_vm0, %v1518_v46, %v10014_v34  ;;  %vm13857_vm4 = vmmov %vm13855_vm1  ;;  %v718_v21 = vadd.s32 208, %v8873_v2 }
 0x181   : > { %2631 = vst.msk [vmem:[#allocation2 + $0x1b0] sm:$0xff] %vm13853_vm14, %v2552_v23  ;;  %vm13858_vm14 = vcmask 15368   ;;  %vm13860_vm0 = vmmov %vm13857_vm4 }
 0x182   : > { %2428 = vrot.lane.b32.xlu0 %v9597_v9, %s13687_s24  ;;  %v2677_v1 = vpop.permute.xlu1 %2676  ;;  %v910_v15 = vand.u32 15, %v718_v21 }
 0x183   : > { %2762 = vst.msk [vmem:[#allocation2 + $0x168] sm:$0xff] %vm13855_vm1, %v2677_v1  ;;  %vm13859_vm1 = vmmov %vm13858_vm14 }
 0x184   : > { %v2679_v33 = vpop.permute.xlu0 %2678  ;;  %2430 = vrot.lane.b32.xlu1 %v9684_v32, %s13687_s24 }
 0x185   : > { %2763 = vst.msk [vmem:[#allocation2 + $0x180] sm:$0xff] %vm13857_vm4, %v2679_v33  ;;  %vm13861_vm4 = vmmov %vm13860_vm0 }
 0x186   : > { %2432 = vrot.lane.b32.xlu0 %v9681_v44, %s13687_s24  ;;  %v1652_v40 = vpop.permute.xlu1 %1651 }
 0x187   : > { %1734 = vst.msk [vmem:[#allocation2 + $0x1c8] sm:$0xff] %vm13858_vm14, %v1652_v40  ;;  %vm10039_vm14 = vcmp.ge.s32.totalorder %v910_v15, 1  ;;  %v1834_v40 = vrot.slane %v9661_v36, 1 }
 0x188   : > { %v1654_v9 = vpop.permute.xlu0 %1653  ;;  %2561 = vrot.lane.b32.xlu1 %v9586_v60, %s13558_s1  ;;  %v13863_v0 = vsel %vm10039_vm14, 4294967295, %v13862_v0  ;;  %v1420_v21 = vsel %vm10039_vm14, %v9774_v5, 0.0 }
 0x189   : > { %1735 = vst.msk [vmem:[#allocation2 + $0x1e0] sm:$0xff] %vm13859_vm1, %v1654_v9 }
 0x18a   : > { %2563 = vrot.lane.b32.xlu0 %v9581_v17, %s13558_s1  ;;  %v2681_v19 = vpop.permute.xlu1 %2680  ;;  %v2793_v46 = vld [vmem:[#allocation2 + $0x168] sm:$0xff] }
 0x18b   : > { %2764 = vst.msk [vmem:[#allocation2 + $0x198] sm:$0xff] %vm13860_vm0, %v2681_v19  ;;  %vm13864_vm0 = vmmov %vm13859_vm1  ;;  %v10056_v19 = vrot.slane %v1420_v21, 1 }
 0x18c   : > { %v2683_v31 = vpop.permute.xlu0 %2682  ;;  %2565 = vrot.lane.b32.xlu1 %v9666_v45, %s13558_s1  ;;  %v2794_v6 = vld [vmem:[#allocation2 + $0x180] sm:$0xff] }
 0x18d   : > { %2765 = vst.msk [vmem:[#allocation2 + $0x1b0] sm:$0xff] %vm13861_vm4, %v2683_v31  ;;  %v2819_v23 = vpack.c.bf16 %v2794_v6, %v2793_v46  ;;  %vm13865_vm4 = vcmask 23568  }
 0x18e   : > { %2567 = vrot.lane.b32.xlu0 %v9661_v36, %s13558_s1  ;;  %v1656_v1 = vpop.permute.xlu1 %1655 }
 0x18f   : > { %8391 = vmatprep.mubr.bf16.mxu0 %v2819_v23  ;;  %1736 = vst.msk [vmem:[#allocation2 + $0x1f8] sm:$0xff] %vm13859_vm1, %v1656_v1  ;;  %vm13866_vm1 = vmmov %vm13865_vm4 }
 0x190   : > { %v1658_v33 = vpop.permute.xlu0 %1657  ;;  %2692 = vrot.lane.b32.xlu1 %v9978_v8, %s13594_s25 }
 0x191   : > { %1737 = vst.msk [vmem:[#allocation2 + $0x210] sm:$0xff] %vm13864_vm0, %v1658_v33  ;;  %vm13867_vm0 = vcmask 1046528  }
 0x192   : > { %2694 = vrot.lane.b32.xlu0 %v9984_v12, %s13594_s25  ;;  %v1879_v9 = vpop.permute.xlu1 %1878  ;;  %v2795_v15 = vld [vmem:[#allocation2 + $0x198] sm:$0xff]  ;;  %v10063_v23 = vsel %vm13867_vm0, %v9972_v42, %v1834_v40  ;;  %vm13869_vm14 = vmmov %vm13867_vm0  ;;  %vm13870_vm0 = vcmask 31768  }
 0x193   : > { %1964 = vst.msk [vmem:[#allocation2 + $0x1c8] sm:$0xff] %vm13865_vm4, %v1879_v9  ;;  %vm13868_vm4 = vmmov %vm13866_vm1  ;;  %v10070_v33 = vsel %vm13869_vm14, %v1834_v40, %v10056_v19 }
 0x194   : > { %v1881_v46 = vpop.permute.xlu0 %1880  ;;  %1667 = vrot.lane.b32.xlu1 %v9586_v60, %s13543_s21  ;;  %v2796_v31 = vld [vmem:[#allocation2 + $0x1b0] sm:$0xff]  ;;  %vm13872_vm14 = vmmov %vm13870_vm0 }
 0x195   : > { %1965 = vst.msk [vmem:[#allocation2 + $0x1e0] sm:$0xff] %vm13866_vm1, %v1881_v46  ;;  %v2820_v6 = vpack.c.bf16 %v2796_v31, %v2795_v15  ;;  %v720_v31 = vadd.s32 224, %v8873_v2 }
 0x196   : > { %1669 = vrot.lane.b32.xlu0 %v9581_v17, %s13543_s21  ;;  %v1883_v1 = vpop.permute.xlu1 %1882 }
 0x197   : > { %8392 = vmatmul.mubr.bf16.gmra.mrb[12].mxu0 %v2820_v6  ;;  %1966 = vst.msk [vmem:[#allocation2 + $0x1f8] sm:$0xff] %vm13868_vm4, %v1883_v1  ;;  %vm13871_vm4 = vmmov %vm13870_vm0 }
 0x198   : > { %v1885_v60 = vpop.permute.xlu0 %1884  ;;  %2696 = vrot.lane.b32.xlu1 %v10063_v23, %s13594_s25 }
 0x199   : > { %1967 = vst.msk [vmem:[#allocation2 + $0x210] sm:$0xff] %vm13866_vm1, %v1885_v60  ;;  %vm13873_vm1 = vmmov %vm13870_vm0 }
 0x19a   : > { %2698 = vrot.lane.b32.xlu0 %v10070_v33, %s13594_s25  ;;  %v2016_v42 = vpop.permute.xlu1 %2015 }
 0x19b   : > { %2100 = vst.msk [vmem:[#allocation2 + $0x1c8] sm:$0xff] %vm13870_vm0, %v2016_v42  ;;  %vm13874_vm0 = vcmask 39968  }
 0x19c   : > { %v2018_v17 = vpop.permute.xlu0 %2017  ;;  %1671 = vrot.lane.b32.xlu1 %v9666_v45, %s13543_s21 }
 0x19d   : > { %2101 = vst.msk [vmem:[#allocation2 + $0x1e0] sm:$0xff] %vm13871_vm4, %v2018_v17  ;;  %vm13875_vm4 = vmmov %vm13874_vm0 }
 0x19e   : > { %1673 = vrot.lane.b32.xlu0 %v9661_v36, %s13543_s21  ;;  %v2020_v21 = vpop.permute.xlu1 %2019 }
 0x19f   : > { %2102 = vst.msk [vmem:[#allocation2 + $0x1f8] sm:$0xff] %vm13872_vm14, %v2020_v21  ;;  %vm13876_vm14 = vmmov %vm13874_vm0 }
 0x1a0   : > { %v2022_v40 = vpop.permute.xlu0 %2021  ;;  %1894 = vrot.lane.b32.xlu1 %v9978_v8, %s13545_s2 }
 0x1a1   : > { %2103 = vst.msk [vmem:[#allocation2 + $0x210] sm:$0xff] %vm13873_vm1, %v2022_v40  ;;  %vm13878_vm1 = vmmov %vm13874_vm0 }
 0x1a2   : > { %1896 = vrot.lane.b32.xlu0 %v9984_v12, %s13545_s2  ;;  %v2151_v9 = vpop.permute.xlu1 %2150  ;;  %v10099_v12 = vld [vmem:[%s13877_s30] ss:$0 sm:$0xff] }
 0x1a3   : > { %2231 = vst.msk [vmem:[#allocation2 + $0x1c8] sm:$0xff] %vm13874_vm0, %v2151_v9  ;;  %vm13879_vm0 = vcmask 48168  }
 0x1a4   : > { %v2153_v15 = vpop.permute.xlu0 %2152  ;;  %1898 = vrot.lane.b32.xlu1 %v10063_v23, %s13545_s2 }
 0x1a5   : > { %2232 = vst.msk [vmem:[#allocation2 + $0x1e0] sm:$0xff] %vm13875_vm4, %v2153_v15  ;;  %vm13880_vm4 = vmmov %vm13879_vm0 }
 0x1a6   : > { %1900 = vrot.lane.b32.xlu0 %v10070_v33, %s13545_s2  ;;  %v2155_v46 = vpop.permute.xlu1 %2154 }
 0x1a7   : > { %2233 = vst.msk [vmem:[#allocation2 + $0x1f8] sm:$0xff] %vm13876_vm14, %v2155_v46  ;;  %vm13882_vm14 = vmmov %vm13879_vm0 }
 0x1a8   : > { %v2157_v8 = vpop.permute.xlu0 %2156  ;;  %2031 = vrot.lane.b32.xlu1 %v9684_v32, %s13542_s22 }
 0x1a9   : > { %2234 = vst.msk [vmem:[#allocation2 + $0x210] sm:$0xff] %vm13878_vm1, %v2157_v8  ;;  %vm13520_vm1 = vcmask 64513  }
 0x1aa   : > { %2033 = vrot.lane.b32.xlu0 %v9681_v44, %s13542_s22  ;;  %v8381_v6 = vpop.f32.mrb[0].mxu0  ;;  %v2282_v1 = vpop.permute.xlu1 %2281  ;;  %v924_v44 = vand.u32 15, %v720_v31 }
 0x1ab   : > { %v2943_v60 = vadd.f32 %v8381_v6, %v10099_v12  ;;  %v2934_v42 = vpop.f32.mrb[1].mxu0  ;;  %2365 = vst.msk [vmem:[#allocation2 + $0x1c8] sm:$0xff] %vm13879_vm0, %v2282_v1 }
 0x1ac   : > { %v2935_v17 = vadd.f32 %v10099_v12, %v2934_v42  ;;  %v2284_v21 = vpop.permute.xlu0 %2283  ;;  %v8382_v40 = vpop.f32.mrb[2].mxu0  ;;  %2035 = vrot.lane.b32.xlu1 %v9789_v47, %s13542_s22 }
 0x1ad   : > { %2366 = vst.msk [vmem:[#allocation2 + $0x1e0] sm:$0xff] %vm13880_vm4, %v2284_v21  ;;  %v2946_v32 = vadd.f32 %v8382_v40, %v10099_v12  ;;  %v2937_v9 = vpop.f32.mrb[3].mxu0  ;;  %v10114_v15 = vmax.f32 %v2943_v60, 0.0  ;;  %vm10132_vm4 = vcmp.ge.s32.totalorder %v924_v44, 1 }
 0x1ae   : > { %v10116_v46 = vmax.f32 %v2935_v17, 0.0  ;;  %v2938_v8 = vadd.f32 %v10099_v12, %v2937_v9  ;;  %2037 = vrot.lane.b32.xlu0 %v9785_v51, %s13542_s22  ;;  %v2286_v6 = vpop.permute.xlu1 %2285  ;;  %v1422_v20 = vsel %vm10132_vm4, %v9854_v22, 0.0 }
 0x1af   : > { %v10121_v1 = vmax.f32 %v2946_v32, 0.0  ;;  %2367 = vst.msk [vmem:[#allocation2 + $0x1f8] sm:$0xff] %vm13882_vm14, %v2286_v6  ;;  %v3338_v32 = vrot.slane %v10114_v15, 7  ;;  %vm13521_vm14 = vcmask 64512  }
 0x1b0   : > { %13881 = vst [vmem:[#allocation19_spill] sm:$0xff] %v10116_v46  ;;  %v10124_v42 = vmax.f32 %v2938_v8, 0.0  ;;  %v2288_v21 = vpop.permute.xlu0 %2287  ;;  %2166 = vrot.lane.b32.xlu1 %v9666_v45, %s8741_s23  ;;  %v10129_v31 = vrot.slane %v10116_v46, 7  ;;  %v1838_v8 = vrot.slane %v9769_v56, 1 }
 0x1b1   : > { %2368 = vst.msk [vmem:[#allocation2 + $0x210] sm:$0xff] %vm13879_vm0, %v2288_v21  ;;  %v3178_v17 = vsel %vm8941_vm6, %v10121_v1, 0.0  ;;  %vm13887_vm0 = vcmask 56368  }
 0x1b2   : > { %13883 = vst [vmem:[#allocation20_spill] sm:$0xff] %v10124_v42  ;;  %13884 = vst [vmem:[#allocation21_spill] sm:$0xff] %v10129_v31  ;;  %2168 = vrot.lane.b32.xlu0 %v9661_v36, %s8741_s23  ;;  %v2419_v40 = vpop.permute.xlu1 %2418  ;;  %v3176_v45 = vsel %vm8926_vm5, %v10124_v42, 0.0  ;;  %v10145_v9 = vrot.slane %v3178_v17, 7  ;;  %vm13888_vm5 = vcmask 1040384  }
 0x1b3   : > { %3432 = vst.msk [vmem:[#allocation2 + $0x78] sm:$0xfe] %vm13520_vm1, %v10129_v31  ;;  %v3336_v25 = vrot.slane %v3176_v45, 7  ;;  %vm13889_vm6 = vmmov %vm13887_vm0 }
 0x1b4   : > { %2501 = vst.msk [vmem:[#allocation2 + $0x1c8] sm:$0xff] %vm13887_vm0, %v2419_v40  ;;  %v2421_v44 = vpop.permute.xlu0 %2420  ;;  %2170 = vrot.lane.b32.xlu1 %v9774_v5, %s8741_s23  ;;  %v10157_v36 = vsel %vm13888_vm5, %v3338_v32, %v10145_v9  ;;  %vm13890_vm1 = vmmov %vm13888_vm5  ;;  %v1840_v40 = vrot.slane %v1422_v20, 1 }
 0x1b5   : > { %2502 = vst.msk [vmem:[#allocation2 + $0x1e0] sm:$0xff] %vm13889_vm6, %v2421_v44  ;;  %v10163_v6 = vsel %vm13890_vm1, %v10129_v31, %v3336_v25  ;;  %vm13892_vm0 = vmmov %vm13890_vm1 }
 0x1b6   : > { %13891 = vst [vmem:[#allocation22_spill] sm:$0xff] %v10163_v6  ;;  %v10166_v21 = vsel %vm13892_vm0, %v3336_v25, %v3338_v32  ;;  %3436 = vst.msk [vmem:[#allocation2 + $0xc0] sm:$0xff] %vm13521_vm14, %v10157_v36  ;;  %2172 = vrot.lane.b32.xlu0 %v9769_v56, %s8741_s23  ;;  %v2423_v17 = vpop.permute.xlu1 %2422  ;;  %vm13896_vm0 = vcmask 64568  }
 0x1b7   : > { %3434 = vst.msk [vmem:[#allocation2 + $0x90] sm:$0xff] %vm13521_vm14, %v10163_v6  ;;  %3435 = vst.msk [vmem:[#allocation2 + $0xa8] sm:$0xff] %vm13521_vm14, %v10166_v21 }
 0x1b8   : > { %vm13893_vm5 = vmmov %vm13889_vm6  ;;  %v2425_v45 = vpop.permute.xlu0 %2424  ;;  %2297 = vrot.lane.b32.xlu1 %v10063_v23, %s13560_s29  ;;  %vm13895_vm6 = vcmask 1046528  }
 0x1b9   : > { %2503 = vst.msk [vmem:[#allocation2 + $0x1f8] sm:$0xff] %vm13893_vm5, %v2423_v17  ;;  %vm13894_vm1 = vmmov %vm13893_vm5  ;;  %v10182_v32 = vsel %vm13895_vm6, %v10056_v19, %v1838_v8  ;;  %v722_v17 = vadd.s32 240, %v8873_v2 }
 0x1ba   : > { %2504 = vst.msk [vmem:[#allocation2 + $0x210] sm:$0xff] %vm13894_vm1, %v2425_v45  ;;  %2299 = vrot.lane.b32.xlu0 %v10070_v33, %s13560_s29  ;;  %v2554_v25 = vpop.permute.xlu1 %2553  ;;  %vm13897_vm14 = vmmov %vm13895_vm6 }
 0x1bb   : > { %2632 = vst.msk [vmem:[#allocation2 + $0x1c8] sm:$0xff] %vm13896_vm0, %v2554_v25  ;;  %v10188_v44 = vsel %vm13897_vm14, %v1838_v8, %v1840_v40  ;;  %vm13898_vm5 = vmmov %vm13896_vm0  ;;  %vm13901_vm14 = vcmask 72768  }
 0x1bc   : > { %v2556_v20 = vpop.permute.xlu0 %2555  ;;  %2301 = vrot.lane.b32.xlu1 %v10182_v32, %s13560_s29  ;;  %vm13899_vm1 = vmmov %vm13896_vm0 }
 0x1bd   : > { %2633 = vst.msk [vmem:[#allocation2 + $0x1e0] sm:$0xff] %vm13898_vm5, %v2556_v20  ;;  %vm13900_vm6 = vmmov %vm13896_vm0  ;;  %vm13903_vm5 = vcmask 15368  }
 0x1be   : > { %2303 = vrot.lane.b32.xlu0 %v10188_v44, %s13560_s29  ;;  %v2558_v19 = vpop.permute.xlu1 %2557  ;;  %vm13902_vm0 = vmmov %vm13901_vm14 }
 0x1bf   : > { %2634 = vst.msk [vmem:[#allocation2 + $0x1f8] sm:$0xff] %vm13899_vm1, %v2558_v19  ;;  %vm13904_vm1 = vmmov %vm13903_vm5 }
 0x1c0   : > { %v2560_v23 = vpop.permute.xlu0 %2559  ;;  %2434 = vrot.lane.b32.xlu1 %v9789_v47, %s13687_s24 }
 0x1c1   : > { %2635 = vst.msk [vmem:[#allocation2 + $0x210] sm:$0xff] %vm13900_vm6, %v2560_v23  ;;  %vm13905_vm6 = vmmov %vm13902_vm0 }
 0x1c2   : > { %2436 = vrot.lane.b32.xlu0 %v9785_v51, %s13687_s24  ;;  %v2685_v33 = vpop.permute.xlu1 %2684  ;;  %v938_v51 = vand.u32 15, %v722_v17 }
 0x1c3   : > { %2766 = vst.msk [vmem:[#allocation2 + $0x1c8] sm:$0xff] %vm13901_vm14, %v2685_v33  ;;  %vm13906_vm14 = vmmov %vm13902_vm0 }
 0x1c4   : > { %v2687_v8 = vpop.permute.xlu0 %2686  ;;  %2438 = vrot.lane.b32.xlu1 %v9872_v27, %s13687_s24 }
 0x1c5   : > { %2767 = vst.msk [vmem:[#allocation2 + $0x1e0] sm:$0xff] %vm13902_vm0, %v2687_v8  ;;  %vm10218_vm0 = vcmp.ge.s32.totalorder %v938_v51, 1  ;;  %v13907_v8 = vmov 0  ;;  %v1842_v51 = vrot.slane %v9849_v58, 1 }
 0x1c6   : > { %2440 = vrot.lane.b32.xlu0 %v9869_v59, %s13687_s24  ;;  %v1660_v47 = vpop.permute.xlu1 %1659  ;;  %v13908_v8 = vsel %vm10218_vm0, 4294967295, %v13907_v8 }
 0x1c7   : > { %1738 = vst.msk [vmem:[#allocation2 + $0x228] sm:$0xff] %vm13903_vm5, %v1660_v47  ;;  %13909 = vst [vmem:[#allocation23_spill] sm:$0xff] %v13908_v8 }
 0x1c8   : > { %v1662_v45 = vpop.permute.xlu0 %1661  ;;  %2569 = vrot.lane.b32.xlu1 %v9774_v5, %s13558_s1  ;;  %vm13910_vm5 = vmmov %vm13904_vm1 }
 0x1c9   : > { %1739 = vst.msk [vmem:[#allocation2 + $0x240] sm:$0xff] %vm13904_vm1, %v1662_v45  ;;  %v1424_v45 = vsel %vm10218_vm0, %v9990_v39, 0.0 }
 0x1ca   : > { %2571 = vrot.lane.b32.xlu0 %v9769_v56, %s13558_s1  ;;  %v2689_v25 = vpop.permute.xlu1 %2688  ;;  %v2797_v20 = vld [vmem:[#allocation2 + $0x1c8] sm:$0xff] }
 0x1cb   : > { %2768 = vst.msk [vmem:[#allocation2 + $0x1f8] sm:$0xff] %vm13905_vm6, %v2689_v25  ;;  %vm13911_vm6 = vcmask 23568  }
 0x1cc   : > { %v2691_v19 = vpop.permute.xlu0 %2690  ;;  %2573 = vrot.lane.b32.xlu1 %v9854_v22, %s13558_s1  ;;  %v2798_v23 = vld [vmem:[#allocation2 + $0x1e0] sm:$0xff] }
 0x1cd   : > { %2769 = vst.msk [vmem:[#allocation2 + $0x210] sm:$0xff] %vm13906_vm14, %v2691_v19  ;;  %v2821_v33 = vpack.c.bf16 %v2798_v23, %v2797_v20  ;;  %v10235_v19 = vrot.slane %v1424_v45, 1  ;;  %vm13912_vm14 = vmmov %vm13911_vm6 }
 0x1ce   : > { %2575 = vrot.lane.b32.xlu0 %v9849_v58, %s13558_s1  ;;  %v1664_v17 = vpop.permute.xlu1 %1663 }
 0x1cf   : > { %8395 = vmatprep.mubr.bf16.mxu0 %v2821_v33  ;;  %1740 = vst.msk [vmem:[#allocation2 + $0x258] sm:$0xff] %vm13910_vm5, %v1664_v17  ;;  %vm13913_vm5 = vcmask 1046528  }
 0x1d0   : > { %v1666_v47 = vpop.permute.xlu0 %1665  ;;  %2700 = vrot.lane.b32.xlu1 %v10182_v32, %s13594_s25 }
 0x1d1   : > { %1741 = vst.msk [vmem:[#allocation2 + $0x270] sm:$0xff] %vm13904_vm1, %v1666_v47  ;;  %v1843_v47 = vsel %vm13913_vm5, %v1840_v40, %v1842_v51  ;;  %vm13914_vm1 = vmmov %vm13911_vm6 }
 0x1d2   : > { %2702 = vrot.lane.b32.xlu0 %v10188_v44, %s13594_s25  ;;  %v1887_v25 = vpop.permute.xlu1 %1886  ;;  %v2799_v20 = vld [vmem:[#allocation2 + $0x1f8] sm:$0xff]  ;;  %vm13916_vm0 = vmmov %vm13914_vm1 }
 0x1d3   : > { %1968 = vst.msk [vmem:[#allocation2 + $0x228] sm:$0xff] %vm13911_vm6, %v1887_v25  ;;  %vm13915_vm6 = vmmov %vm13913_vm5 }
 0x1d4   : > { %v1889_v23 = vpop.permute.xlu0 %1888  ;;  %1675 = vrot.lane.b32.xlu1 %v9774_v5, %s13543_s21  ;;  %v2800_v33 = vld [vmem:[#allocation2 + $0x210] sm:$0xff]  ;;  %v1845_v45 = vsel %vm13915_vm6, %v1842_v51, %v10235_v19  ;;  %vm13921_vm6 = vcmask 39968  }
 0x1d5   : > { %1969 = vst.msk [vmem:[#allocation2 + $0x240] sm:$0xff] %vm13912_vm14, %v1889_v23  ;;  %v2822_v17 = vpack.c.bf16 %v2800_v33, %v2799_v20  ;;  %vm13917_vm14 = vcmask 31768  }
 0x1d6   : > { %1677 = vrot.lane.b32.xlu0 %v9769_v56, %s13543_s21  ;;  %v1891_v2 = vpop.permute.xlu1 %1890  ;;  %vm13918_vm5 = vmmov %vm13917_vm14 }
 0x1d7   : > { %8396 = vmatmul.mubr.bf16.gmra.mrb[16].mxu0 %v2822_v17  ;;  %1970 = vst.msk [vmem:[#allocation2 + $0x258] sm:$0xff] %vm13914_vm1, %v1891_v2  ;;  %vm13919_vm1 = vmmov %vm13918_vm5 }
 0x1d8   : > { %v1893_v25 = vpop.permute.xlu0 %1892  ;;  %2704 = vrot.lane.b32.xlu1 %v1843_v47, %s13594_s25 }
 0x1d9   : > { %1971 = vst.msk [vmem:[#allocation2 + $0x270] sm:$0xff] %vm13916_vm0, %v1893_v25  ;;  %vm13920_vm0 = vmmov %vm13919_vm1 }
 0x1da   : > { %2706 = vrot.lane.b32.xlu0 %v1845_v45, %s13594_s25  ;;  %v2024_v5 = vpop.permute.xlu1 %2023 }
 0x1db   : > { %2104 = vst.msk [vmem:[#allocation2 + $0x228] sm:$0xff] %vm13917_vm14, %v2024_v5  ;;  %vm13922_vm14 = vmmov %vm13921_vm6 }
 0x1dc   : > { %v2026_v40 = vpop.permute.xlu0 %2025  ;;  %1902 = vrot.lane.b32.xlu1 %v10182_v32, %s13545_s2 }
 0x1dd   : > { %2105 = vst.msk [vmem:[#allocation2 + $0x240] sm:$0xff] %vm13918_vm5, %v2026_v40  ;;  %vm13923_vm5 = vmmov %vm13921_vm6 }
 0x1de   : > { %v2028_v2 = vpop.permute.xlu1 %2027  ;;  %1904 = vrot.lane.b32.xlu0 %v10188_v44, %s13545_s2 }
 0x1df   : > { %2106 = vst.msk [vmem:[#allocation2 + $0x258] sm:$0xff] %vm13919_vm1, %v2028_v2  ;;  %vm13924_vm1 = vmmov %vm13923_vm5 }
 0x1e0   : > { %v2030_v56 = vpop.permute.xlu0 %2029  ;;  %2039 = vrot.lane.b32.xlu1 %v9872_v27, %s13542_s22 }
 0x1e1   : > { %2107 = vst.msk [vmem:[#allocation2 + $0x270] sm:$0xff] %vm13920_vm0, %v2030_v56  ;;  %vm13925_vm0 = vcmask 48168  }
 0x1e2   : > { %v2159_v51 = vpop.permute.xlu1 %2158  ;;  %2041 = vrot.lane.b32.xlu0 %v9869_v59, %s13542_s22 }
 0x1e3   : > { %2235 = vst.msk [vmem:[#allocation2 + $0x228] sm:$0xff] %vm13921_vm6, %v2159_v51  ;;  %vm13926_vm6 = vmmov %vm13925_vm0 }
 0x1e4   : > { %v2161_v32 = vpop.permute.xlu0 %2160  ;;  %1679 = vrot.lane.b32.xlu1 %v9854_v22, %s13543_s21 }
 0x1e5   : > { %2236 = vst.msk [vmem:[#allocation2 + $0x240] sm:$0xff] %vm13922_vm14, %v2161_v32  ;;  %vm13927_vm14 = vmmov %vm13925_vm0 }
 0x1e6   : > { %v2163_v44 = vpop.permute.xlu1 %2162  ;;  %2174 = vrot.lane.b32.xlu0 %v9854_v22, %s8741_s23 }
 0x1e7   : > { %2237 = vst.msk [vmem:[#allocation2 + $0x258] sm:$0xff] %vm13923_vm5, %v2163_v44  ;;  %vm13928_vm5 = vmmov %vm13925_vm0 }
 0x1e8   : > { %v2165_v27 = vpop.permute.xlu0 %2164  ;;  %2176 = vrot.lane.b32.xlu1 %v9849_v58, %s8741_s23 }
 0x1e9   : > { %2238 = vst.msk [vmem:[#allocation2 + $0x270] sm:$0xff] %vm13924_vm1, %v2165_v27  ;;  %vm13929_vm1 = vcmask 1040384  }
 0x1ea   : > { %v8385_v59 = vpop.f32.mrb[4].mxu0  ;;  %v2290_v20 = vpop.permute.xlu1 %2289  ;;  %1681 = vrot.lane.b32.xlu0 %v9849_v58, %s13543_s21  ;;  %s13565_s21 = smov 48  }
 0x1eb   : > { %v2959_v23 = vadd.f32 %v8385_v59, %v10099_v12  ;;  %v2950_v33 = vpop.f32.mrb[5].mxu0  ;;  %2369 = vst.msk [vmem:[#allocation2 + $0x228] sm:$0xff] %vm13925_vm0, %v2290_v20  ;;  %vm13930_vm0 = vcmask 56368  }
 0x1ec   : > { %v2951_v22 = vadd.f32 %v10099_v12, %v2950_v33  ;;  %v2292_v17 = vpop.permute.xlu0 %2291  ;;  %v8386_v25 = vpop.f32.mrb[6].mxu0  ;;  %1906 = vrot.lane.b32.xlu1 %v1843_v47, %s13545_s2 }
 0x1ed   : > { %2370 = vst.msk [vmem:[#allocation2 + $0x240] sm:$0xff] %vm13926_vm6, %v2292_v17  ;;  %v2962_v5 = vadd.f32 %v8386_v25, %v10099_v12  ;;  %v2953_v40 = vpop.f32.mrb[7].mxu0  ;;  %v10279_v2 = vmax.f32 %v2959_v23, 0.0  ;;  %vm13931_vm6 = vcmask 64512  }
 0x1ee   : > { %v10281_v56 = vmax.f32 %v2951_v22, 0.0  ;;  %v2954_v58 = vadd.f32 %v10099_v12, %v2953_v40  ;;  %v2294_v51 = vpop.permute.xlu1 %2293  ;;  %2305 = vrot.lane.b32.xlu0 %v1843_v47, %s13560_s29 }
 0x1ef   : > { %v10285_v32 = vmax.f32 %v2962_v5, 0.0  ;;  %2371 = vst.msk [vmem:[#allocation2 + $0x258] sm:$0xff] %vm13927_vm14, %v2294_v51  ;;  %v3346_v22 = vrot.slane %v10279_v2, 7  ;;  %vm13933_vm14 = vmmov %vm13930_vm0  ;;  %v10342_v51 = vrot.slane %v10006_v41, 1 }
 0x1f0   : > { %v10288_v44 = vmax.f32 %v2954_v58, 0.0  ;;  %v2296_v27 = vpop.permute.xlu0 %2295  ;;  %2307 = vrot.lane.b32.xlu1 %v1845_v45, %s13560_s29  ;;  %v3342_v59 = vrot.slane %v10281_v56, 7 }
 0x1f1   : > { %2372 = vst.msk [vmem:[#allocation2 + $0x270] sm:$0xff] %vm13928_vm5, %v2296_v27  ;;  %v3182_v20 = vsel %vm9019_vm9, %v10285_v32, 0.0  ;;  %vm13932_vm9 = vmmov %vm13929_vm1 }
 0x1f2   : > { %v2427_v23 = vpop.permute.xlu1 %2426  ;;  %1908 = vrot.lane.b32.xlu0 %v1845_v45, %s13545_s2  ;;  %v10299_v47 = vsel %vm13929_vm1, %v10145_v9, %v3342_v59  ;;  %v3180_v33 = vsel %vm8980_vm8, %v10288_v44, 0.0  ;;  %v10305_v17 = vrot.slane %v3182_v20, 7  ;;  %vm13934_vm8 = vmmov %vm13929_vm1  ;;  %13943 = vst [vmem:[#allocation24_spill] sm:$0xff] %v10342_v51  ;;  %s13592_s2 = smov 56  }
 0x1f3   : > { %2505 = vst.msk [vmem:[#allocation2 + $0x228] sm:$0xff] %vm13930_vm0, %v2427_v23  ;;  %v3344_v50 = vrot.slane %v3180_v33, 7  ;;  %vm13935_vm5 = vmmov %vm13929_vm1 }
 0x1f4   : > { %3437 = vst.msk [vmem:[#allocation2 + $0xd8] sm:$0xff] %vm13931_vm6, %v10299_v47  ;;  %v2429_v25 = vpop.permute.xlu0 %2428  ;;  %2043 = vrot.lane.b32.xlu1 %v9999_v52, %s13542_s22  ;;  %v10314_v9 = vsel %vm13932_vm9, %v3346_v22, %v10305_v17  ;;  %vm13936_vm1 = vmmov %vm13931_vm6 }
 0x1f5   : > { %2506 = vst.msk [vmem:[#allocation2 + $0x240] sm:$0xff] %vm13933_vm14, %v2429_v25  ;;  %v10318_v38 = vsel %vm13934_vm8, %v3342_v59, %v3344_v50  ;;  %v10321_v45 = vsel %vm13935_vm5, %v3344_v50, %v3346_v22  ;;  %vm13937_vm0 = vmmov %vm13936_vm1  ;;  %vm13941_vm8 = vcmask 64568  }
 0x1f6   : > { %3440 = vst.msk [vmem:[#allocation2 + $0x120] sm:$0xff] %vm13936_vm1, %v10314_v9  ;;  %v2431_v5 = vpop.permute.xlu1 %2430  ;;  %2442 = vrot.lane.b32.xlu0 %v9999_v52, %s13687_s24  ;;  %vm13938_vm6 = vmmov %vm13937_vm0 }
 0x1f7   : > { %3438 = vst.msk [vmem:[#allocation2 + $0xf0] sm:$0xff] %vm13937_vm0, %v10318_v38  ;;  %vm13939_vm9 = vmmov %vm13933_vm14 }
 0x1f8   : > { %3439 = vst.msk [vmem:[#allocation2 + $0x108] sm:$0xff] %vm13938_vm6, %v10321_v45  ;;  %v2433_v40 = vpop.permute.xlu0 %2432  ;;  %2444 = vrot.lane.b32.xlu1 %v10021_v61, %s13687_s24  ;;  %vm13940_vm14 = vmmov %vm13939_vm9  ;;  %vm13946_vm6 = vcmask 1046528  }
 0x1f9   : > { %2507 = vst.msk [vmem:[#allocation2 + $0x258] sm:$0xff] %vm13939_vm9, %v2431_v5  ;;  %vm13942_vm5 = vmmov %vm13941_vm8  ;;  %vm13948_vm9 = vcmask 72768  }
 0x1fa   : > { %2508 = vst.msk [vmem:[#allocation2 + $0x270] sm:$0xff] %vm13940_vm14, %v2433_v40  ;;  %v2562_v58 = vpop.permute.xlu1 %2561  ;;  %2045 = vrot.lane.b32.xlu0 %v10021_v61, %s13542_s22  ;;  %vm13944_vm1 = vmmov %vm13942_vm5  ;;  %v10353_v61 = vsel %vm13946_vm6, %v10235_v19, %v10342_v51  ;;  %s13561_s22 = smov 40  }
 0x1fb   : > { %2636 = vst.msk [vmem:[#allocation2 + $0x228] sm:$0xff] %vm13941_vm8, %v2562_v58  ;;  %vm13945_vm0 = vmmov %vm13944_vm1  ;;  %vm13950_vm8 = vcmask 15368  }
 0x1fc   : > { %v2564_v52 = vpop.permute.xlu0 %2563  ;;  %2178 = vrot.lane.b32.xlu1 %v9990_v39, %s8741_s23  ;;  %13947 = vst [vmem:[#allocation25_spill] sm:$0xff] %v10353_v61  ;;  %vm13949_vm14 = vmmov %vm13948_vm9 }
 0x1fd   : > { %2637 = vst.msk [vmem:[#allocation2 + $0x240] sm:$0xff] %vm13942_vm5, %v2564_v52  ;;  %vm13951_vm5 = vmmov %vm13950_vm8 }
 0x1fe   : > { %v2566_v27 = vpop.permute.xlu1 %2565  ;;  %2577 = vrot.lane.b32.xlu0 %v9990_v39, %s13558_s1  ;;  %vm13954_vm6 = vmmov %vm13951_vm5 }
 0x1ff   : > { %2638 = vst.msk [vmem:[#allocation2 + $0x258] sm:$0xff] %vm13944_vm1, %v2566_v27  ;;  %vm13952_vm1 = vmmov %vm13948_vm9 }
 0x200   : > { %v2568_v59 = vpop.permute.xlu0 %2567  ;;  %2579 = vrot.lane.b32.xlu1 %v10006_v41, %s13558_s1  ;;  %s14083_s1 = smov 40  }
 0x201   : > { %2639 = vst.msk [vmem:[#allocation2 + $0x270] sm:$0xff] %vm13945_vm0, %v2568_v59  ;;  %vm13953_vm0 = vmmov %vm13952_vm1 }
 0x202   : > { %v2693_v20 = vpop.permute.xlu1 %2692  ;;  %2180 = vrot.lane.b32.xlu0 %v10006_v41, %s8741_s23  ;;  %s13569_s23 = smov 16  }
 0x203   : > { %2770 = vst.msk [vmem:[#allocation2 + $0x228] sm:$0xff] %vm13948_vm9, %v2693_v20  ;;  %vm13955_vm9 = vmmov %vm13951_vm5 }
 0x204   : > { %v2695_v39 = vpop.permute.xlu0 %2694  ;;  %2309 = vrot.lane.b32.xlu1 %v10353_v61, %s13560_s29 }
 0x205   : > { %2771 = vst.msk [vmem:[#allocation2 + $0x240] sm:$0xff] %vm13949_vm14, %v2695_v39  ;;  %vm13956_vm14 = vcmask 23568  }
 0x206   : > { %v1668_v23 = vpop.permute.xlu1 %1667  ;;  %2708 = vrot.lane.b32.xlu0 %v10353_v61, %s13594_s25 }
 0x207   : > { %1742 = vst.msk [vmem:[#allocation2 + $0x288] sm:$0xff] %vm13950_vm8, %v1668_v23  ;;  %vm13957_vm8 = vmmov %vm13956_vm14 }
 0x208   : > { %v1670_v19 = vpop.permute.xlu0 %1669  ;;  %2710 = vrot.lane.b32.xlu1 %v10342_v51, %s13594_s25 }
 0x209   : > { %1743 = vst.msk [vmem:[#allocation2 + $0x2a0] sm:$0xff] %vm13951_vm5, %v1670_v19  ;;  %vm13958_vm5 = vmmov %vm13957_vm8 }
 0x20a   : > { %v2697_v41 = vpop.permute.xlu1 %2696  ;;  %v2801_v33 = vld [vmem:[#allocation2 + $0x228] sm:$0xff]  ;;  %2311 = vrot.lane.b32.xlu0 %v10342_v51, %s13560_s29  ;;  %s13590_s29 = smov 64  }
 0x20b   : > { %2772 = vst.msk [vmem:[#allocation2 + $0x258] sm:$0xff] %vm13952_vm1, %v2697_v41  ;;  %vm13959_vm1 = vmmov %vm13958_vm5 }
 0x20c   : > { %v2699_v22 = vpop.permute.xlu0 %2698  ;;  %v2802_v50 = vld [vmem:[#allocation2 + $0x240] sm:$0xff]  ;;  %2446 = vrot.lane.b32.xlu1 %v10014_v34, %s13687_s24 }
 0x20d   : > { %2773 = vst.msk [vmem:[#allocation2 + $0x270] sm:$0xff] %vm13953_vm0, %v2699_v22  ;;  %v2823_v25 = vpack.c.bf16 %v2802_v50, %v2801_v33  ;;  %vm13960_vm0 = vcmask 31768  }
 0x20e   : > { %v1672_v5 = vpop.permute.xlu1 %1671 }
 0x20f   : > { %8399 = vmatprep.mubr.bf16.mxu0 %v2823_v25  ;;  %1744 = vst.msk [vmem:[#allocation2 + $0x2b8] sm:$0xff] %vm13954_vm6, %v1672_v5  ;;  %vm13961_vm6 = vmmov %vm13960_vm0 }
 0x210   : > { %v1674_v40 = vpop.permute.xlu0 %1673 }
 0x211   : > { %1745 = vst.msk [vmem:[#allocation2 + $0x2d0] sm:$0xff] %vm13955_vm9, %v1674_v40  ;;  %vm13962_vm9 = vmmov %vm13960_vm0 }
 0x212   : > { %v1895_v58 = vpop.permute.xlu1 %1894  ;;  %v2803_v52 = vld [vmem:[#allocation2 + $0x258] sm:$0xff] }
 0x213   : > { %1972 = vst.msk [vmem:[#allocation2 + $0x288] sm:$0xff] %vm13956_vm14, %v1895_v58  ;;  %vm13963_vm14 = vmmov %vm13960_vm0 }
 0x214   : > { %v1897_v27 = vpop.permute.xlu0 %1896  ;;  %v2804_v59 = vld [vmem:[#allocation2 + $0x270] sm:$0xff] }
 0x215   : > { %1973 = vst.msk [vmem:[#allocation2 + $0x2a0] sm:$0xff] %vm13957_vm8, %v1897_v27  ;;  %v2824_v20 = vpack.c.bf16 %v2804_v59, %v2803_v52  ;;  %vm13964_vm8 = vcmask 39968  }
 0x216   : > { %v1899_v39 = vpop.permute.xlu1 %1898 }
 0x217   : > { %8400 = vmatmul.mubr.bf16.gmra.mrb[20].mxu0 %v2824_v20  ;;  %1974 = vst.msk [vmem:[#allocation2 + $0x2b8] sm:$0xff] %vm13958_vm5, %v1899_v39  ;;  %vm13965_vm5 = vmmov %vm13964_vm8 }
 0x218   : > { %v1901_v23 = vpop.permute.xlu0 %1900 }
 0x219   : > { %1975 = vst.msk [vmem:[#allocation2 + $0x2d0] sm:$0xff] %vm13959_vm1, %v1901_v23  ;;  %vm13966_vm1 = vmmov %vm13965_vm5 }
 0x21a   : > { %v2032_v19 = vpop.permute.xlu1 %2031 }
 0x21b   : > { %2108 = vst.msk [vmem:[#allocation2 + $0x288] sm:$0xff] %vm13960_vm0, %v2032_v19  ;;  %vm13967_vm0 = vmmov %vm13966_vm1 }
 0x21c   : > { %v2034_v41 = vpop.permute.xlu0 %2033 }
 0x21d   : > { %2109 = vst.msk [vmem:[#allocation2 + $0x2a0] sm:$0xff] %vm13961_vm6, %v2034_v41  ;;  %vm13968_vm6 = vcmask 48168  }
 0x21e   : > { %v2036_v33 = vpop.permute.xlu1 %2035 }
 0x21f   : > { %2110 = vst.msk [vmem:[#allocation2 + $0x2b8] sm:$0xff] %vm13962_vm9, %v2036_v33  ;;  %vm13969_vm9 = vmmov %vm13968_vm6 }
 0x220   : > { %v2038_v22 = vpop.permute.xlu0 %2037 }
 0x221   : > { %2111 = vst.msk [vmem:[#allocation2 + $0x2d0] sm:$0xff] %vm13963_vm14, %v2038_v22  ;;  %vm13970_vm14 = vmmov %vm13968_vm6 }
 0x222   : > { %v2167_v50 = vpop.permute.xlu1 %2166 }
 0x223   : > { %2239 = vst.msk [vmem:[#allocation2 + $0x288] sm:$0xff] %vm13964_vm8, %v2167_v50  ;;  %vm13971_vm8 = vmmov %vm13968_vm6 }
 0x224   : > { %v2169_v25 = vpop.permute.xlu0 %2168 }
 0x225   : > { %2240 = vst.msk [vmem:[#allocation2 + $0x2a0] sm:$0xff] %vm13965_vm5, %v2169_v25  ;;  %vm13972_vm5 = vcmask 1040384  }
 0x226   : > { %v2171_v5 = vpop.permute.xlu1 %2170 }
 0x227   : > { %2241 = vst.msk [vmem:[#allocation2 + $0x2b8] sm:$0xff] %vm13966_vm1, %v2171_v5  ;;  %vm13973_vm1 = vcmask 56368  }
 0x228   : > { %v2173_v40 = vpop.permute.xlu0 %2172 }
 0x229   : > { %2242 = vst.msk [vmem:[#allocation2 + $0x2d0] sm:$0xff] %vm13967_vm0, %v2173_v40  ;;  %vm13974_vm0 = vcmask 64512  }
 0x22a   : > { %v8389_v58 = vpop.f32.mrb[8].mxu0  ;;  %v2298_v52 = vpop.permute.xlu1 %2297 }
 0x22b   : > { %v2975_v27 = vadd.f32 %v8389_v58, %v10099_v12  ;;  %v2966_v59 = vpop.f32.mrb[9].mxu0  ;;  %2373 = vst.msk [vmem:[#allocation2 + $0x288] sm:$0xff] %vm13968_vm6, %v2298_v52  ;;  %vm13976_vm6 = vmmov %vm13973_vm1 }
 0x22c   : > { %v2967_v20 = vadd.f32 %v10099_v12, %v2966_v59  ;;  %v2300_v39 = vpop.permute.xlu0 %2299  ;;  %v8390_v23 = vpop.f32.mrb[10].mxu0 }
 0x22d   : > { %2374 = vst.msk [vmem:[#allocation2 + $0x2a0] sm:$0xff] %vm13969_vm9, %v2300_v39  ;;  %v2978_v19 = vadd.f32 %v8390_v23, %v10099_v12  ;;  %v2969_v41 = vpop.f32.mrb[11].mxu0  ;;  %v10392_v33 = vmax.f32 %v2975_v27, 0.0  ;;  %vm13977_vm9 = vmmov %vm13972_vm5 }
 0x22e   : > { %v10394_v22 = vmax.f32 %v2967_v20, 0.0  ;;  %v2970_v50 = vadd.f32 %v10099_v12, %v2969_v41  ;;  %v2302_v25 = vpop.permute.xlu1 %2301 }
 0x22f   : > { %v10397_v5 = vmax.f32 %v2978_v19, 0.0  ;;  %2375 = vst.msk [vmem:[#allocation2 + $0x2b8] sm:$0xff] %vm13970_vm14, %v2302_v25  ;;  %v3354_v23 = vrot.slane %v10392_v33, 7  ;;  %vm13979_vm14 = vmmov %vm13974_vm0 }
 0x230   : > { %v10400_v40 = vmax.f32 %v2970_v50, 0.0  ;;  %v2304_v58 = vpop.permute.xlu0 %2303  ;;  %v3350_v52 = vrot.slane %v10394_v22, 7 }
 0x231   : > { %2376 = vst.msk [vmem:[#allocation2 + $0x2d0] sm:$0xff] %vm13971_vm8, %v2304_v58  ;;  %v3186_v27 = vsel %vm9094_vm12, %v10397_v5, 0.0  ;;  %vm13975_vm12 = vmmov %vm13972_vm5  ;;  %v3681_v60 = vrot.slane %v10397_v5, 1 }
 0x232   : > { %v2435_v59 = vpop.permute.xlu1 %2434  ;;  %v10409_v20 = vsel %vm13972_vm5, %v10305_v17, %v3350_v52  ;;  %v3184_v39 = vsel %vm9063_vm10, %v10400_v40, 0.0  ;;  %v10415_v19 = vrot.slane %v3186_v27, 7  ;;  %vm13978_vm10 = vmmov %vm13972_vm5 }
 0x233   : > { %2509 = vst.msk [vmem:[#allocation2 + $0x288] sm:$0xff] %vm13973_vm1, %v2435_v59  ;;  %v3352_v7 = vrot.slane %v3184_v39, 7  ;;  %vm13980_vm8 = vmmov %vm13974_vm0 }
 0x234   : > { %3441 = vst.msk [vmem:[#allocation2 + $0x138] sm:$0xff] %vm13974_vm0, %v10409_v20  ;;  %v2437_v41 = vpop.permute.xlu0 %2436  ;;  %v10422_v50 = vsel %vm13975_vm12, %v3354_v23, %v10415_v19  ;;  %vm13981_vm5 = vmmov %vm13974_vm0  ;;  %vm13983_vm12 = vcmask 64568  }
 0x235   : > { %2510 = vst.msk [vmem:[#allocation2 + $0x2a0] sm:$0xff] %vm13976_vm6, %v2437_v41  ;;  %v10426_v63 = vsel %vm13977_vm9, %v3350_v52, %v3352_v7  ;;  %v10429_v17 = vsel %vm13978_vm10, %v3352_v7, %v3354_v23  ;;  %vm13982_vm0 = vmmov %vm13973_vm1 }
 0x236   : > { %3444 = vst.msk [vmem:[#allocation2 + $0x180] sm:$0xff] %vm13979_vm14, %v10422_v50  ;;  %v2439_v25 = vpop.permute.xlu1 %2438  ;;  %vm13984_vm6 = vmmov %vm13983_vm12  ;;  %vm13987_vm14 = vcmask 72768  }
 0x237   : > { %3442 = vst.msk [vmem:[#allocation2 + $0x150] sm:$0xff] %vm13980_vm8, %v10426_v63  ;;  %vm13985_vm9 = vmmov %vm13984_vm6 }
 0x238   : > { %3443 = vst.msk [vmem:[#allocation2 + $0x168] sm:$0xff] %vm13981_vm5, %v10429_v17  ;;  %v2441_v58 = vpop.permute.xlu0 %2440  ;;  %vm13986_vm10 = vmmov %vm13984_vm6  ;;  %vm13989_vm5 = vcmask 15368  }
 0x239   : > { %2511 = vst.msk [vmem:[#allocation2 + $0x2b8] sm:$0xff] %vm13973_vm1, %v2439_v25  ;;  %vm13988_vm8 = vmmov %vm13987_vm14 }
 0x23a   : > { %2512 = vst.msk [vmem:[#allocation2 + $0x2d0] sm:$0xff] %vm13982_vm0, %v2441_v58  ;;  %v2570_v52 = vpop.permute.xlu1 %2569  ;;  %vm13990_vm1 = vmmov %vm13989_vm5 }
 0x23b   : > { %2640 = vst.msk [vmem:[#allocation2 + $0x288] sm:$0xff] %vm13983_vm12, %v2570_v52  ;;  %vm13991_vm0 = vmmov %vm13988_vm8 }
 0x23c   : > { %v2572_v27 = vpop.permute.xlu0 %2571  ;;  %vm13992_vm12 = vmmov %vm13991_vm0 }
 0x23d   : > { %2641 = vst.msk [vmem:[#allocation2 + $0x2a0] sm:$0xff] %vm13984_vm6, %v2572_v27  ;;  %vm13993_vm6 = vcmask 23568  }
 0x23e   : > { %v2574_v59 = vpop.permute.xlu1 %2573 }
 0x23f   : > { %2642 = vst.msk [vmem:[#allocation2 + $0x2b8] sm:$0xff] %vm13985_vm9, %v2574_v59  ;;  %vm13994_vm9 = vmmov %vm13993_vm6 }
 0x240   : > { %v2576_v39 = vpop.permute.xlu0 %2575 }
 0x241   : > { %2643 = vst.msk [vmem:[#allocation2 + $0x2d0] sm:$0xff] %vm13986_vm10, %v2576_v39  ;;  %vm13995_vm10 = vcmask 31768  }
 0x242   : > { %v2701_v23 = vpop.permute.xlu1 %2700 }
 0x243   : > { %2774 = vst.msk [vmem:[#allocation2 + $0x288] sm:$0xff] %vm13987_vm14, %v2701_v23  ;;  %vm13996_vm14 = vmmov %vm13995_vm10 }
 0x244   : > { %v2703_v7 = vpop.permute.xlu0 %2702 }
 0x245   : > { %2775 = vst.msk [vmem:[#allocation2 + $0x2a0] sm:$0xff] %vm13988_vm8, %v2703_v7  ;;  %vm13997_vm8 = vmmov %vm13990_vm1 }
 0x246   : > { %v1676_v41 = vpop.permute.xlu1 %1675 }
 0x247   : > { %1746 = vst.msk [vmem:[#allocation2 + $0x2e8] sm:$0xff] %vm13989_vm5, %v1676_v41  ;;  %vm13998_vm5 = vcmask 39968  }
 0x248   : > { %v1678_v25 = vpop.permute.xlu0 %1677 }
 0x249   : > { %1747 = vst.msk [vmem:[#allocation2 + $0x300] sm:$0xff] %vm13990_vm1, %v1678_v25  ;;  %vm13999_vm1 = vmmov %vm13998_vm5 }
 0x24a   : > { %v2705_v58 = vpop.permute.xlu1 %2704  ;;  %v2805_v52 = vld [vmem:[#allocation2 + $0x288] sm:$0xff] }
 0x24b   : > { %2776 = vst.msk [vmem:[#allocation2 + $0x2b8] sm:$0xff] %vm13991_vm0, %v2705_v58  ;;  %vm14000_vm0 = vmmov %vm13997_vm8 }
 0x24c   : > { %v2707_v27 = vpop.permute.xlu0 %2706  ;;  %v2806_v59 = vld [vmem:[#allocation2 + $0x2a0] sm:$0xff] }
 0x24d   : > { %2777 = vst.msk [vmem:[#allocation2 + $0x2d0] sm:$0xff] %vm13992_vm12, %v2707_v27  ;;  %v2825_v39 = vpack.c.bf16 %v2806_v59, %v2805_v52  ;;  %vm14001_vm12 = vmmov %vm13993_vm6 }
 0x24e   : > { %v1903_v34 = vpop.permute.xlu1 %1902 }
 0x24f   : > { %8403 = vmatprep.mubr.bf16.mxu0 %v2825_v39  ;;  %1976 = vst.msk [vmem:[#allocation2 + $0x2e8] sm:$0xff] %vm13993_vm6, %v1903_v34  ;;  %vm14002_vm6 = vcmask 48168  }
 0x250   : > { %v1905_v23 = vpop.permute.xlu0 %1904 }
 0x251   : > { %1977 = vst.msk [vmem:[#allocation2 + $0x300] sm:$0xff] %vm13994_vm9, %v1905_v23  ;;  %vm14003_vm9 = vmmov %vm14002_vm6 }
 0x252   : > { %v2807_v7 = vld [vmem:[#allocation2 + $0x2b8] sm:$0xff]  ;;  %v2040_v41 = vpop.permute.xlu1 %2039 }
 0x253   : > { %2112 = vst.msk [vmem:[#allocation2 + $0x2e8] sm:$0xff] %vm13995_vm10, %v2040_v41  ;;  %vm14004_vm10 = vmmov %vm14001_vm12 }
 0x254   : > { %v2808_v25 = vld [vmem:[#allocation2 + $0x2d0] sm:$0xff]  ;;  %v2042_v51 = vpop.permute.xlu0 %2041 }
 0x255   : > { %v2826_v61 = vpack.c.bf16 %v2808_v25, %v2807_v7  ;;  %2113 = vst.msk [vmem:[#allocation2 + $0x300] sm:$0xff] %vm13996_vm14, %v2042_v51 }
 0x256   : > { %v1680_v58 = vpop.permute.xlu1 %1679 }
 0x257   : > { %8404 = vmatmul.mubr.bf16.gmra.mrb[24].mxu0 %v2826_v61  ;;  %1748 = vst.msk [vmem:[#allocation2 + $0x318] sm:$0xff] %vm13997_vm8, %v1680_v58  ;;  %vm14005_vm8 = vcmask 56368  }
 0x258   : > { %v2175_v52 = vpop.permute.xlu0 %2174 }
 0x259   : > { %2243 = vst.msk [vmem:[#allocation2 + $0x2e8] sm:$0xff] %vm13998_vm5, %v2175_v52  ;;  %vm14006_vm5 = vmmov %vm14005_vm8 }
 0x25a   : > { %v2177_v34 = vpop.permute.xlu1 %2176 }
 0x25b   : > { %2244 = vst.msk [vmem:[#allocation2 + $0x300] sm:$0xff] %vm13999_vm1, %v2177_v34  ;;  %vm14007_vm1 = vmmov %vm13996_vm14 }
 0x25c   : > { %v1682_v27 = vpop.permute.xlu0 %1681 }
 0x25d   : > { %1749 = vst.msk [vmem:[#allocation2 + $0x330] sm:$0xff] %vm14000_vm0, %v1682_v27  ;;  %vm14009_vm0 = vcmask 39968  }
 0x25e   : > { %v1907_v59 = vpop.permute.xlu1 %1906 }
 0x25f   : > { %1978 = vst.msk [vmem:[#allocation2 + $0x318] sm:$0xff] %vm14001_vm12, %v1907_v59  ;;  %vm14011_vm12 = vcmask 64568  }
 0x260   : > { %v2306_v39 = vpop.permute.xlu0 %2305 }
 0x261   : > { %2377 = vst.msk [vmem:[#allocation2 + $0x2e8] sm:$0xff] %vm14002_vm6, %v2306_v39  ;;  %vm14012_vm6 = vcmask 1040384  }
 0x262   : > { %v2308_v51 = vpop.permute.xlu1 %2307 }
 0x263   : > { %2378 = vst.msk [vmem:[#allocation2 + $0x300] sm:$0xff] %vm14003_vm9, %v2308_v51  ;;  %vm14014_vm9 = vmmov %vm14011_vm12 }
 0x264   : > { %v1909_v61 = vpop.permute.xlu0 %1908 }
 0x265   : > { %1979 = vst.msk [vmem:[#allocation2 + $0x330] sm:$0xff] %vm14004_vm10, %v1909_v61  ;;  %vm14015_vm10 = vcmask 64512  }
 0x266   : > { %v2044_v23 = vpop.permute.xlu1 %2043 }
 0x267   : > { %2114 = vst.msk [vmem:[#allocation2 + $0x318] sm:$0xff] %vm13996_vm14, %v2044_v23  ;;  %vm14018_vm14 = vmmov %vm14009_vm0 }
 0x268   : > { %v2443_v7 = vpop.permute.xlu0 %2442 }
 0x269   : > { %2513 = vst.msk [vmem:[#allocation2 + $0x2e8] sm:$0xff] %vm14005_vm8, %v2443_v7  ;;  %vm14019_vm8 = vmmov %vm14012_vm6 }
 0x26a   : > { %v8393_v41 = vpop.f32.mrb[12].mxu0  ;;  %v2445_v25 = vpop.permute.xlu1 %2444 }
 0x26b   : > { %v2991_v58 = vadd.f32 %v8393_v41, %v10099_v12  ;;  %v2982_v52 = vpop.f32.mrb[13].mxu0  ;;  %2514 = vst.msk [vmem:[#allocation2 + $0x300] sm:$0xff] %vm14006_vm5, %v2445_v25  ;;  %vm14022_vm5 = vmmov %vm14012_vm6 }
 0x26c   : > { %v2983_v34 = vadd.f32 %v10099_v12, %v2982_v52  ;;  %v8394_v27 = vpop.f32.mrb[14].mxu0  ;;  %v2046_v59 = vpop.permute.xlu0 %2045 }
 0x26d   : > { %v10466_v39 = vmax.f32 %v2991_v58, 0.0  ;;  %v2994_v51 = vadd.f32 %v8394_v27, %v10099_v12  ;;  %v2985_v61 = vpop.f32.mrb[15].mxu0  ;;  %2115 = vst.msk [vmem:[#allocation2 + $0x330] sm:$0xff] %vm14007_vm1, %v2046_v59  ;;  %vm14024_vm1 = vmmov %vm14015_vm10 }
 0x26e   : > { %v10470_v23 = vmax.f32 %v2983_v34, 0.0  ;;  %v2986_v7 = vadd.f32 %v10099_v12, %v2985_v61  ;;  %v2179_v8 = vpop.permute.xlu1 %2178 }
 0x26f   : > { %v10473_v41 = vmax.f32 %v2994_v51, 0.0  ;;  %3527 = vrot.lane.b32.xlu0 %v10466_v39, %s13594_s25  ;;  %2245 = vst.msk [vmem:[#allocation2 + $0x318] sm:$0xff] %vm14009_vm0, %v2179_v8  ;;  %v3362_v51 = vrot.slane %v10466_v39, 7  ;;  %vm14025_vm0 = vmmov %vm14024_vm1 }
 0x270   : > { %14008 = vst [vmem:[#allocation26_spill] sm:$0xff] %v10470_v23  ;;  %v10478_v25 = vmax.f32 %v2986_v7, 0.0  ;;  %v2578_v58 = vpop.permute.xlu0 %2577  ;;  %v3358_v52 = vrot.slane %v10470_v23, 7 }
 0x271   : > { %3529 = vrot.lane.b32.xlu1 %v10473_v41, %s13594_s25  ;;  %2644 = vst.msk [vmem:[#allocation2 + $0x2e8] sm:$0xff] %vm14011_vm12, %v2578_v58  ;;  %v3190_v34 = vsel %vm9233_vm15, %v10473_v41, 0.0  ;;  %vm14016_vm15 = vmmov %vm14012_vm6  ;;  %vm14026_vm12 = vcmask 48168  }
 0x272   : > { %14010 = vst [vmem:[#allocation27_spill] sm:$0xff] %v10478_v25  ;;  %v2580_v27 = vpop.permute.xlu1 %2579  ;;  %v3364_v59 = vrot.slane %v3190_v34, 7  ;;  %v3188_v8 = vsel %vm9146_vm13, %v10478_v25, 0.0  ;;  %v10493_v61 = vsel %vm14012_vm6, %v10415_v19, %v3358_v52  ;;  %vm14021_vm13 = vmmov %vm14015_vm10  ;;  %vm2779_vm6 = vcmask 71744  }
 0x273   : > { %14013 = vst [vmem:[#allocation28_spill] sm:$0xff] %v10493_v61  ;;  %2645 = vst.msk [vmem:[#allocation2 + $0x300] sm:$0xff] %vm14014_vm9, %v2580_v27  ;;  %v3360_v7 = vrot.slane %v3188_v8, 7  ;;  %vm14027_vm9 = vcmask 72768  }
 0x274   : > { %3445 = vst.msk [vmem:[#allocation2 + $0x198] sm:$0xff] %vm14015_vm10, %v10493_v61  ;;  %v2181_v54 = vpop.permute.xlu0 %2180  ;;  %v10499_v58 = vsel %vm14016_vm15, %v3362_v51, %v3364_v59  ;;  %vm2380_vm10 = vcmask 47144   ;;  %vm2515_vm15 = vcmask 49200  }
 0x275   : > { %14017 = vst [vmem:[#allocation29_spill] sm:$0xff] %v10499_v58  ;;  %2246 = vst.msk [vmem:[#allocation2 + $0x330] sm:$0xff] %vm14018_vm14, %v2181_v54  ;;  %v10503_v55 = vsel %vm14019_vm8, %v3360_v7, %v3362_v51  ;;  %v10508_v19 = vsel %vm14022_vm5, %v3358_v52, %v3360_v7  ;;  %vm14031_vm8 = vnez %v13689_v28 }
 0x276   : > { %14020 = vst [vmem:[#allocation30_spill] sm:$0xff] %v10503_v55  ;;  %3448 = vst.msk [vmem:[#allocation2 + $0x1e0] sm:$0xff] %vm14021_vm13, %v10499_v58  ;;  %v2310_v34 = vpop.permute.xlu1 %2309  ;;  %v8718_v58 = vld [vmem:[#allocation2] sm:$0xff] }
 0x277   : > { %14023 = vst [vmem:[#allocation31_spill] sm:$0xff] %v10508_v19  ;;  %3447 = vst.msk [vmem:[#allocation2 + $0x1c8] sm:$0xff] %vm14024_vm1, %v10503_v55 }
 0x278   : > { %3446 = vst.msk [vmem:[#allocation2 + $0x1b0] sm:$0xff] %vm14025_vm0, %v10508_v19  ;;  %v2709_v27 = vpop.permute.xlu0 %2708  ;;  %vm14030_vm14 = vmmov %vm14022_vm5 }
 0x279   : > { %2379 = vst.msk [vmem:[#allocation2 + $0x318] sm:$0xff] %vm14026_vm12, %v2310_v34  ;;  %vm14033_vm13 = vmmov %vm14025_vm0 }
 0x27a   : > { %2778 = vst.msk [vmem:[#allocation2 + $0x2e8] sm:$0xff] %vm14027_vm9, %v2709_v27  ;;  %v2711_v8 = vpop.permute.xlu1 %2710  ;;  %vm14035_vm0 = vmmov %vm14022_vm5 }
 0x27b   : > { %2780 = vst.msk [vmem:[#allocation2 + $0x300] sm:$0x7f] %vm2779_vm6, %v2711_v8  ;;  %vm14036_vm12 = vmmov %vm14035_vm0 }
 0x27c   : > { %v2312_v51 = vpop.permute.xlu0 %2311  ;;  %vm14037_vm6 = vmmov %vm14033_vm13 }
 0x27d   : > { %2381 = vst.msk [vmem:[#allocation2 + $0x330] sm:$0x7f] %vm2380_vm10, %v2312_v51  ;;  %vm14038_vm9 = vmmov %vm14037_vm6 }
 0x27e   : > { %v2447_v52 = vpop.permute.xlu1 %2446  ;;  %vm14039_vm10 = vmmov %vm14037_vm6 }
 0x27f   : > { %2516 = vst.msk [vmem:[#allocation2 + $0x318] sm:$0x1] %vm2515_vm15, %v2447_v52  ;;  %v3285_v52 = vsel %vm9514_vm2, %v10466_v39, 0.0  ;;  %vm14029_vm2 = vnez %v13697_v43  ;;  %vm14040_vm15 = vnez %v13652_v11 }
 0x281   : > { %v2809_v7 = vld [vmem:[#allocation2 + $0x2e8] sm:$0xff] }
 0x282   : > { %v2810_v54 = vld [vmem:[#allocation2 + $0x300] sm:$0xff] }
 0x283   : > { %v2827_v55 = vpack.c.bf16 %v2810_v54, %v2809_v7  ;;  %3102 = vst [vmem:[#allocation2 + $0x300] sm:$0xff] %v8718_v58 }
 0x284   : > { %v2812_v25 = vld [vmem:[#allocation2 + $0x330] sm:$0xff] }
 0x285   : > { %8407 = vmatprep.mubr.bf16.mxu0 %v2827_v55  ;;  %3108 = vst [vmem:[#allocation2 + $0x330] sm:$0xff] %v8718_v58 }
 0x286   : > { %v2811_v34 = vld [vmem:[#allocation2 + $0x318] sm:$0xff] }
 0x287   : > { %v2828_v19 = vpack.c.bf16 %v2812_v25, %v2811_v34  ;;  %3105 = vst [vmem:[#allocation2 + $0x318] sm:$0xff] %v8718_v58 }
 0x289   : > { %8408 = vmatmul.mubr.bf16.gmra.mrb[28].mxu0 %v2828_v19  ;;  %v10529_v19 = vrot.slane %v3285_v52, 1 }
 0x2aa   : > { %v8397_v27 = vpop.f32.mrb[16].mxu0 }
 0x2ab   : > { %v3007_v8 = vadd.f32 %v8397_v27, %v10099_v12  ;;  %v2998_v61 = vpop.f32.mrb[17].mxu0 }
 0x2ac   : > { %v2999_v51 = vadd.f32 %v10099_v12, %v2998_v61  ;;  %v8398_v16 = vpop.f32.mrb[18].mxu0  ;;  %v3689_v61 = vrot.slane %v10473_v41, 1 }
 0x2ad   : > { %v3010_v7 = vadd.f32 %v8398_v16, %v10099_v12  ;;  %v3001_v54 = vpop.f32.mrb[19].mxu0  ;;  %v10522_v55 = vmax.f32 %v3007_v8, 0.0 }
 0x2ae   : > { %v10524_v23 = vmax.f32 %v2999_v51, 0.0  ;;  %v3002_v25 = vadd.f32 %v10099_v12, %v3001_v54 }
 0x2af   : > { %v10527_v58 = vmax.f32 %v3010_v7, 0.0  ;;  %v3370_v10 = vrot.slane %v10522_v55, 7 }
 0x2b0   : > { %14028 = vst [vmem:[#allocation32_spill] sm:$0xff] %v10524_v23  ;;  %v10532_v34 = vmax.f32 %v3002_v25, 0.0  ;;  %3531 = vrot.lane.b32.xlu0 %v10524_v23, %s13594_s25  ;;  %v3287_v16 = vsel %vm9613_vm3, %v10524_v23, 0.0  ;;  %v3366_v30 = vrot.slane %v10524_v23, 7  ;;  %vm14032_vm3 = vcmask 1046528  }
 0x2b1   : > { %v3691_v27 = vrot.slane %v3287_v16, 1  ;;  %v3194_v12 = vsel %vm14029_vm2, %v10527_v58, 0.0  ;;  %v10556_v7 = vsel %vm14032_vm3, %v10529_v19, %v3689_v61  ;;  %vm14034_vm1 = vmmov %vm14032_vm3  ;;  %vm14042_vm2 = vnez %v13769_v3 }
 0x2b2   : > { %3533 = vrot.lane.b32.xlu1 %v10532_v34, %s13594_s25  ;;  %v10546_v8 = vsel %vm14030_vm14, %v3364_v59, %v3366_v30  ;;  %v3192_v51 = vsel %vm14031_vm8, %v10532_v34, 0.0  ;;  %v10552_v52 = vrot.slane %v3194_v12, 7  ;;  %v3693_v16 = vrot.slane %v10532_v34, 1  ;;  %vm14043_vm14 = vmmov %vm14034_vm1 }
 0x2b3   : > { %v3368_v43 = vrot.slane %v3192_v51, 7  ;;  %3449 = vst.msk [vmem:[#allocation2 + $0x1f8] sm:$0xff] %vm14033_vm13, %v10546_v8  ;;  %v10567_v59 = vsel %vm14034_vm1, %v3689_v61, %v3691_v27  ;;  %v3271_v61 = vsel %vm14040_vm15, %v10116_v46, 0.0  ;;  %v3289_v12 = vsel %vm14042_vm2, %v10522_v55, 0.0  ;;  %vm14045_vm8 = vmmov %vm14034_vm1 }
 0x2b4   : > { %3753 = vrot.lane.b32.xlu0 %v10556_v7, %s13569_s23  ;;  %v10564_v28 = vsel %vm14022_vm5, %v3370_v10, %v10552_v52  ;;  %v10599_v11 = vsel %vm14043_vm14, %v3691_v27, %v3693_v16  ;;  %v3695_v51 = vrot.slane %v3289_v12, 1  ;;  %vm14047_vm3 = vnez %v13656_v18  ;;  %vm14048_vm13 = vmmov %vm14034_vm1 }
 0x2b5   : > { %v10570_v54 = vsel %vm14035_vm0, %v3366_v30, %v3368_v43  ;;  %v10573_v25 = vsel %vm14036_vm12, %v3368_v43, %v3370_v10  ;;  %3452 = vst.msk [vmem:[#allocation2 + $0x240] sm:$0xff] %vm14037_vm6, %v10564_v28  ;;  %v10591_v30 = vrot.slane %v3271_v61, 1  ;;  %14044 = vst [vmem:[#allocation34_spill] sm:$0xff] %v10599_v11  ;;  %v3661_v43 = vrot.slane %v10124_v42, 1 }
 0x2b6   : > { %3755 = vrot.lane.b32.xlu1 %v10567_v59, %s13569_s23  ;;  %3450 = vst.msk [vmem:[#allocation2 + $0x210] sm:$0xff] %vm14038_vm9, %v10570_v54  ;;  %v10604_v10 = vsel %vm14045_vm8, %v3693_v16, %v3695_v51  ;;  %v3273_v3 = vsel %vm14047_vm3, %v10114_v15, 0.0  ;;  %vm14050_vm5 = vmmov %vm14034_vm1  ;;  %vm13609_vm1 = vcmask 130112   ;;  %vm14053_vm12 = vnez %v13735_v62 }
 0x2b7   : > { %3451 = vst.msk [vmem:[#allocation2 + $0x228] sm:$0xff] %vm14039_vm10, %v10573_v25  ;;  %14041 = vst [vmem:[#allocation33_spill] sm:$0xff] %v10591_v30  ;;  %v10618_v27 = vsel %vm14048_vm13, %v10591_v30, %v3661_v43  ;;  %v10620_v61 = vrot.slane %v3273_v3, 1  ;;  %vm14054_vm6 = vcmask 1040384   ;;  %vm14057_vm15 = vnez %v13674_v4 }
 0x2b8   : > { %3499 = vrot.lane.b32.xlu0 %v10116_v46, %s13594_s25  ;;  %14046 = vst [vmem:[#allocation35_spill] sm:$0xff] %v10604_v10  ;;  %14049 = vst [vmem:[#allocation36_spill] sm:$0xff] %v10618_v27 }
 0x2b9   : > { %v10626_v16 = vsel %vm14050_vm5, %v3661_v43, %v10620_v61  ;;  %v3697_v43 = vrot.slane %v10527_v58, 1  ;;  %vm14052_vm0 = vmmov %vm14050_vm5 }
 0x2ba   : > { %3501 = vrot.lane.b32.xlu1 %v10124_v42, %s13594_s25  ;;  %14051 = vst [vmem:[#allocation37_spill] sm:$0xff] %v10626_v16  ;;  %vm14056_vm9 = vmmov %vm14052_vm0 }
 0x2bb   : > { %vm14058_vm2 = vmmov %vm14054_vm6 }
 0x2bc   : > { %3723 = vrot.lane.b32.xlu0 %v10591_v30, %s13569_s23  ;;  %vm14059_vm14 = vmmov %vm14052_vm0 }
 0x2bd   : > { %vm14060_vm8 = vmmov %vm14058_vm2 }
 0x2be   : > { %3757 = vrot.lane.b32.xlu1 %v10599_v11, %s13569_s23  ;;  %vm14061_vm3 = vmmov %vm14058_vm2 }
 0x2bf   : > { %vm14062_vm13 = vmmov %vm14039_vm10 }
 0x2c0   : > { %3759 = vrot.lane.b32.xlu0 %v10604_v10, %s13569_s23  ;;  %vm14063_vm5 = vmmov %vm14039_vm10 }
 0x2c2   : > { %3890 = vrot.lane.b32.xlu1 %v10546_v8, %s13567_s0 }
 0x2c4   : > { %3892 = vrot.lane.b32.xlu0 %v10570_v54, %s13567_s0 }
 0x2c6   : > { %3725 = vrot.lane.b32.xlu1 %v10618_v27, %s13569_s23 }
 0x2c8   : > { %3727 = vrot.lane.b32.xlu0 %v10626_v16, %s13569_s23 }
 0x2ca   : > { %3858 = vrot.lane.b32.xlu1 %v10129_v31, %s13567_s0 }
 0x2cc   : > { %3860 = vrot.lane.b32.xlu0 %v10163_v6, %s13567_s0 }
 0x2ce   : > { %3894 = vrot.lane.b32.xlu1 %v10573_v25, %s13567_s0 }
 0x2d0   : > { %3896 = vrot.lane.b32.xlu0 %v10564_v28, %s13567_s0 }
 0x2d2   : > { %4025 = vrot.lane.b32.xlu1 %v10524_v23, %s13563_s19 }
 0x2d4   : > { %4027 = vrot.lane.b32.xlu0 %v10532_v34, %s13563_s19 }
 0x2d6   : > { %3862 = vrot.lane.b32.xlu1 %v10166_v21, %s13567_s0 }
 0x2d8   : > { %3864 = vrot.lane.b32.xlu0 %v10157_v36, %s13567_s0 }
 0x2da   : > { %3993 = vrot.lane.b32.xlu1 %v10116_v46, %s13563_s19 }
 0x2dc   : > { %3995 = vrot.lane.b32.xlu0 %v10124_v42, %s13563_s19 }
 0x2de   : > { %4029 = vrot.lane.b32.xlu1 %v10522_v55, %s13563_s19 }
 0x2e0   : > { %4031 = vrot.lane.b32.xlu0 %v10527_v58, %s13563_s19 }
 0x2e1   : > { %v3528_v18 = vpop.permute.xlu0 %3527 }
 0x2e2   : > { %3610 = vst.msk [vmem:[#allocation2 + $0x1c8] sm:$0xff] %vm13609_vm1, %v3528_v18  ;;  %4156 = vrot.lane.b32.xlu1 %v10599_v11, %s13561_s22  ;;  %v10670_v18 = vld [vmem:[%s13877_s30] ss:$0 sm:$0xff] }
 0x2e3   : > { %v3530_v12 = vpop.permute.xlu1 %3529 }
 0x2e4   : > { %3611 = vst.msk [vmem:[#allocation2 + $0x1e0] sm:$0xff] %vm13609_vm1, %v3530_v12  ;;  %4158 = vrot.lane.b32.xlu0 %v10604_v10, %s13561_s22 }
 0x2e6   : > { %3997 = vrot.lane.b32.xlu1 %v10114_v15, %s13563_s19 }
 0x2e8   : > { %3999 = vrot.lane.b32.xlu0 %v10121_v1, %s13563_s19  ;;  %s14132_s19 = smov 7  }
 0x2ea   : > { %4124 = vrot.lane.b32.xlu1 %v10618_v27, %s13561_s22  ;;  %v8401_v3 = vpop.f32.mrb[20].mxu0  ;;  %v10678_v27 = vsel %vm14052_vm0, %v3695_v51, %v3697_v43  ;;  %vm14064_vm0 = vmmov %vm14063_vm5 }
 0x2eb   : > { %v3023_v12 = vadd.f32 %v10670_v18, %v8401_v3  ;;  %v3014_v42 = vpop.f32.mrb[21].mxu0 }
 0x2ec   : > { %v3015_v46 = vadd.f32 %v10670_v18, %v3014_v42  ;;  %4126 = vrot.lane.b32.xlu0 %v10626_v16, %s13561_s22  ;;  %v8402_v31 = vpop.f32.mrb[22].mxu0 }
 0x2ed   : > { %v3026_v6 = vadd.f32 %v10670_v18, %v8402_v31  ;;  %v3017_v30 = vpop.f32.mrb[23].mxu0  ;;  %v10680_v11 = vmax.f32 %v3023_v12, 0.0 }
 0x2ee   : > { %v10682_v10 = vmax.f32 %v3015_v46, 0.0  ;;  %v3018_v23 = vadd.f32 %v10670_v18, %v3017_v30  ;;  %4160 = vrot.lane.b32.xlu1 %v10678_v27, %s13561_s22  ;;  %v3665_v46 = vrot.slane %v10121_v1, 1 }
 0x2ef   : > { %v10687_v42 = vmax.f32 %v3026_v6, 0.0 }
 0x2f0   : > { %v10689_v3 = vmax.f32 %v3018_v23, 0.0  ;;  %v3291_v31 = vsel %vm9801_vm7, %v10682_v10, 0.0  ;;  %v3374_v51 = vrot.slane %v10682_v10, 7  ;;  %vm14055_vm7 = vnez %v13708_v53 }
 0x2f1   : > { %v10695_v16 = vrot.slane %v3291_v31, 1  ;;  %v3198_v30 = vsel %vm14053_vm12, %v10687_v42, 0.0  ;;  %v3378_v23 = vrot.slane %v10680_v11, 7  ;;  %v3275_v53 = vsel %vm14057_vm15, %v10281_v56, 0.0  ;;  %vm14065_vm12 = vmmov %vm14056_vm9 }
 0x2f2   : > { %4293 = vrot.lane.b32.xlu1 %v10573_v25, %s13565_s21  ;;  %v10705_v6 = vsel %vm14054_vm6, %v10552_v52, %v3374_v51  ;;  %v3196_v24 = vsel %vm14055_vm7, %v10689_v3, 0.0  ;;  %v10711_v12 = vrot.slane %v3198_v30, 7  ;;  %v10730_v31 = vsel %vm14059_vm14, %v10620_v61, %v3665_v46  ;;  %vm14067_vm6 = vmmov %vm14056_vm9 }
 0x2f3   : > { %v10715_v62 = vsel %vm14056_vm9, %v3697_v43, %v10695_v16  ;;  %3453 = vst.msk [vmem:[#allocation2 + $0x258] sm:$0xff] %vm14039_vm10, %v10705_v6  ;;  %v3376_v25 = vrot.slane %v3196_v24, 7  ;;  %v10746_v4 = vrot.slane %v3275_v53, 1  ;;  %v8574_v24 = vld [vmem:[%s14066_s3 + $0x28] sm:$0xff]   ;;  %vm14068_vm7 = vnez %v13819_v13  ;;  %vm14069_vm10 = vmmov %vm14067_vm6 }
 0x2f4   : > { %4162 = vrot.lane.b32.xlu0 %v10715_v62, %s13561_s22  ;;  %v10726_v52 = vsel %vm14058_vm2, %v3378_v23, %v10711_v12  ;;  %vm13604_vm9 = vcmask 195712   ;;  %vm13605_vm15 = vcmask 195719   ;;  %vm14070_vm2 = vmmov %vm14067_vm6  ;;  %vm14071_vm14 = vnez %v13682_v14 }
 0x2f5   : > { %v10733_v43 = vsel %vm14060_vm8, %v3374_v51, %v3376_v25  ;;  %v10736_v30 = vsel %vm14061_vm3, %v3376_v25, %v3378_v23  ;;  %3456 = vst.msk [vmem:[#allocation2 + $0x2a0] sm:$0xff] %vm14062_vm13, %v10726_v52  ;;  %v10754_v61 = vsel %vm14065_vm12, %v3665_v46, %v10746_v4  ;;  %v8572_v51 = vld [vmem:[%s14066_s3 + $0x18] sm:$0xff]   ;;  %v8573_v46 = vld [vmem:[%s14066_s3 + $0x20] sm:$0xff]   ;;  %v8575_v23 = vld [vmem:[%s14066_s3 + $0x30] sm:$0xff]   ;;  %vm14072_vm8 = vnez %v13785_v29 }
 0x2f6   : > { %4128 = vrot.lane.b32.xlu1 %v10730_v31, %s13561_s22  ;;  %3454 = vst.msk [vmem:[#allocation2 + $0x270] sm:$0xff] %vm14063_vm5, %v10733_v43  ;;  %v8576_v25 = vld [vmem:[%s14066_s3 + $0x38] sm:$0xff]   ;;  %vm13602_vm3 = vcmask 261312   ;;  %vm14073_vm13 = vcmask 1040384   ;;  %vm14074_vm5 = vnez %v13757_v57 }
 0x2f7   : > { %3455 = vst.msk [vmem:[#allocation2 + $0x288] sm:$0xff] %vm14064_vm0, %v10736_v30  ;;  %vm14075_vm12 = vmmov %vm14073_vm13 }
 0x2f8   : > { %4295 = vrot.lane.b32.xlu0 %v10564_v28, %s13565_s21  ;;  %v8571_v28 = vld [vmem:[%s14066_s3 + $0x10] sm:$0xff]  }
 0x2fa   : > { %4261 = vrot.lane.b32.xlu1 %v10166_v21, %s13565_s21  ;;  %v8569_v21 = vld [vmem:[%s14066_s3] sm:$0xff]  }
 0x2fb   : > { %8515 = vmatprep.subr.bf16.mxu1 %v8569_v21  ;;  %8411 = vmatprep.subr.bf16.mxu0 %v8569_v21 }
 0x2fc   : > { %4130 = vrot.lane.b32.xlu0 %v10754_v61, %s13561_s22  ;;  %8523 = vmatpush3.bf16.msra.mxu1 %v8569_v21  ;;  %s14091_s22 = smov 48  }
 0x2fd   : > { %8412 = vmatpush3.bf16.msra.mxu0 %v8569_v21  ;;  %v3293_v21 = vsel %vm14068_vm7, %v10680_v11, 0.0 }
 0x2fe   : > { %4297 = vrot.lane.b32.xlu1 %v10705_v6, %s13565_s21 }
 0x300   : > { %4263 = vrot.lane.b32.xlu0 %v10157_v36, %s13565_s21  ;;  %v8570_v36 = vld [vmem:[%s14066_s3 + $0x8] sm:$0xff]   ;;  %s14220_s3 = smov 8  }
 0x301   : > { %8516 = vmatprep.subr.bf16.mxu1 %v8570_v36  ;;  %8413 = vmatprep.subr.bf16.mxu0 %v8570_v36 }
 0x302   : > { %4428 = vrot.lane.b32.xlu1 %v10522_v55, %s13592_s2  ;;  %8524 = vmatpush3.bf16.msra.mxu1 %v8570_v36 }
 0x303   : > { %8414 = vmatpush3.bf16.msra.mxu0 %v8570_v36  ;;  %8517 = vmatprep.subr.bf16.mxu1 %v8571_v28 }
 0x304   : > { %4299 = vrot.lane.b32.xlu0 %v10733_v43, %s13565_s21  ;;  %8415 = vmatprep.subr.bf16.mxu0 %v8571_v28 }
 0x306   : > { %4265 = vrot.lane.b32.xlu1 %v10299_v47, %s13565_s21  ;;  %8525 = vmatpush3.bf16.msra.mxu1 %v8571_v28 }
 0x307   : > { %8416 = vmatpush3.bf16.msra.mxu0 %v8571_v28  ;;  %8518 = vmatprep.subr.bf16.mxu1 %v8572_v51 }
 0x308   : > { %4430 = vrot.lane.b32.xlu0 %v10527_v58, %s13592_s2  ;;  %8417 = vmatprep.subr.bf16.mxu0 %v8572_v51 }
 0x30a   : > { %4396 = vrot.lane.b32.xlu1 %v10114_v15, %s13592_s2  ;;  %8526 = vmatpush3.bf16.msra.mxu1 %v8572_v51 }
 0x30b   : > { %8418 = vmatpush3.bf16.msra.mxu0 %v8572_v51  ;;  %8519 = vmatprep.subr.bf16.mxu1 %v8573_v46 }
 0x30c   : > { %4267 = vrot.lane.b32.xlu0 %v10318_v38, %s13565_s21  ;;  %8419 = vmatprep.subr.bf16.mxu0 %v8573_v46  ;;  %s14082_s21 = smov 32  }
 0x30e   : > { %4432 = vrot.lane.b32.xlu1 %v10682_v10, %s13592_s2  ;;  %8527 = vmatpush3.bf16.msra.mxu1 %v8573_v46 }
 0x30f   : > { %8420 = vmatpush3.bf16.msra.mxu0 %v8573_v46  ;;  %8520 = vmatprep.subr.bf16.mxu1 %v8574_v24 }
 0x310   : > { %4398 = vrot.lane.b32.xlu0 %v10121_v1, %s13592_s2  ;;  %8421 = vmatprep.subr.bf16.mxu0 %v8574_v24 }
 0x312   : > { %4559 = vrot.lane.b32.xlu1 %v10678_v27, %s13590_s29  ;;  %8528 = vmatpush3.bf16.msra.mxu1 %v8574_v24 }
 0x313   : > { %8422 = vmatpush3.bf16.msra.mxu0 %v8574_v24  ;;  %8521 = vmatprep.subr.bf16.mxu1 %v8575_v23 }
 0x314   : > { %4434 = vrot.lane.b32.xlu0 %v10689_v3, %s13592_s2  ;;  %8423 = vmatprep.subr.bf16.mxu0 %v8575_v23 }
 0x316   : > { %3535 = vrot.lane.b32.xlu1 %v10522_v55, %s13594_s25  ;;  %v3701_v55 = vrot.slane %v10689_v3, 1  ;;  %8529 = vmatpush3.bf16.msra.mxu1 %v8575_v23 }
 0x317   : > { %8424 = vmatpush3.bf16.msra.mxu0 %v8575_v23  ;;  %8522 = vmatprep.subr.bf16.mxu1 %v8576_v25 }
 0x318   : > { %4561 = vrot.lane.b32.xlu0 %v10715_v62, %s13590_s29  ;;  %v10821_v53 = vsel %vm14067_vm6, %v10695_v16, %v3701_v55  ;;  %8425 = vmatprep.subr.bf16.mxu0 %v8576_v25  ;;  %v10832_v16 = vrot.slane %v3293_v21, 1  ;;  %vm14076_vm6 = vmmov %vm14075_vm12 }
 0x319   : > { %vm14077_vm7 = vmmov %vm14076_vm6 }
 0x31a   : > { %4400 = vrot.lane.b32.xlu1 %v10281_v56, %s13592_s2  ;;  %8530 = vmatpush3.bf16.msra.mxu1 %v8576_v25  ;;  %v10839_v13 = vsel %vm14069_vm10, %v3701_v55, %v10832_v16  ;;  %vm14078_vm10 = vmmov %vm14064_vm0 }
 0x31b   : > { %8426 = vmatpush3.bf16.msra.mxu0 %v8576_v25 }
 0x31c   : > { %3537 = vrot.lane.b32.xlu0 %v10527_v58, %s13594_s25 }
 0x31e   : > { %4527 = vrot.lane.b32.xlu1 %v10730_v31, %s13590_s29 }
 0x320   : > { %4402 = vrot.lane.b32.xlu0 %v10288_v44, %s13592_s2 }
 0x322   : > { %v3532_v58 = vpop.permute.xlu0 %3531  ;;  %4563 = vrot.lane.b32.xlu1 %v10821_v53, %s13590_s29 }
 0x323   : > { %3612 = vst.msk [vmem:[#allocation2 + $0x1f8] sm:$0xff] %vm13609_vm1, %v3532_v58 }
 0x324   : > { %4529 = vrot.lane.b32.xlu0 %v10754_v61, %s13590_s29  ;;  %v3534_v36 = vpop.permute.xlu1 %3533 }
 0x325   : > { %3613 = vst.msk [vmem:[#allocation2 + $0x210] sm:$0xff] %vm13609_vm1, %v3534_v36  ;;  %v3669_v36 = vrot.slane %v10288_v44, 1 }
 0x326   : > { %v3754_v28 = vpop.permute.xlu0 %3753  ;;  %3503 = vrot.lane.b32.xlu1 %v10114_v15, %s13594_s25 }
 0x327   : > { %3839 = vst.msk [vmem:[#allocation2 + $0x1c8] sm:$0xff] %vm13604_vm9, %v3754_v28 }
 0x328   : > { %4565 = vrot.lane.b32.xlu0 %v10839_v13, %s13590_s29  ;;  %v3756_v51 = vpop.permute.xlu1 %3755 }
 0x329   : > { %3840 = vst.msk [vmem:[#allocation2 + $0x1e0] sm:$0xff] %vm13604_vm9, %v3756_v51 }
 0x32a   : > { %v3500_v46 = vpop.permute.xlu0 %3499  ;;  %3539 = vrot.lane.b32.xlu1 %v10682_v10, %s13594_s25  ;;  %v8405_v24 = vpop.f32.mrb[24].mxu0 }
 0x32b   : > { %3596 = vst.msk [vmem:[#allocation2 + $0x78] sm:$0xff] %vm13609_vm1, %v3500_v46  ;;  %v3039_v15 = vadd.f32 %v10670_v18, %v8405_v24  ;;  %v3030_v23 = vpop.f32.mrb[25].mxu0 }
 0x32c   : > { %v3031_v25 = vadd.f32 %v10670_v18, %v3030_v23  ;;  %3505 = vrot.lane.b32.xlu0 %v10121_v1, %s13594_s25  ;;  %v3502_v55 = vpop.permute.xlu1 %3501  ;;  %v8406_v58 = vpop.f32.mrb[26].mxu0 }
 0x32d   : > { %v10851_v21 = vmax.f32 %v3039_v15, 0.0  ;;  %3597 = vst.msk [vmem:[#allocation2 + $0x90] sm:$0xff] %vm13609_vm1, %v3502_v55  ;;  %v3042_v28 = vadd.f32 %v10670_v18, %v8406_v58  ;;  %v3033_v51 = vpop.f32.mrb[27].mxu0 }
 0x32e   : > { %v10856_v46 = vmax.f32 %v3031_v25, 0.0  ;;  %v3724_v24 = vpop.permute.xlu0 %3723  ;;  %3761 = vrot.lane.b32.xlu1 %v10678_v27, %s13569_s23  ;;  %v3034_v1 = vadd.f32 %v10670_v18, %v3033_v51  ;;  %v10873_v27 = vsel %vm14070_vm2, %v10746_v4, %v3669_v36  ;;  %vm14079_vm2 = vmmov %vm14064_vm0 }
 0x32f   : > { %3823 = vst.msk [vmem:[#allocation2 + $0x60] sm:$0x80] %vm13605_vm15, %v3724_v24  ;;  %v10862_v23 = vmax.f32 %v3042_v28, 0.0  ;;  %v3386_v25 = vrot.slane %v10851_v21, 7  ;;  %v3277_v28 = vsel %vm14071_vm14, %v10279_v2, 0.0  ;;  %vm14080_vm14 = vmmov %vm14064_vm0 }
 0x330   : > { %3541 = vrot.lane.b32.xlu0 %v10689_v3, %s13594_s25  ;;  %v3758_v15 = vpop.permute.xlu1 %3757  ;;  %v10866_v55 = vmax.f32 %v3034_v1, 0.0  ;;  %v3382_v58 = vrot.slane %v10856_v46, 7  ;;  %v10902_v57 = vrot.slane %v3277_v28, 1 }
 0x331   : > { %3841 = vst.msk [vmem:[#allocation2 + $0x1f8] sm:$0xff] %vm13604_vm9, %v3758_v15  ;;  %v3202_v51 = vsel %vm14072_vm8, %v10862_v23, 0.0  ;;  %vm14081_vm8 = vcmask 1046528  }
 0x332   : > { %v3760_v24 = vpop.permute.xlu0 %3759  ;;  %4531 = vrot.lane.b32.xlu1 %v10873_v27, %s13590_s29  ;;  %v10885_v1 = vsel %vm14073_vm13, %v10711_v12, %v3382_v58  ;;  %v3200_v4 = vsel %vm14074_vm5, %v10866_v55, 0.0  ;;  %v10890_v15 = vrot.slane %v3202_v51, 7  ;;  %vm13603_vm13 = vcmask 261313  }
 0x333   : > { %3842 = vst.msk [vmem:[#allocation2 + $0x210] sm:$0xff] %vm13604_vm9, %v3760_v24  ;;  %v3384_v14 = vrot.slane %v3200_v4, 7  ;;  %vm13601_vm5 = vcmask 326912  }
 0x334   : > { %3457 = vst.msk [vmem:[#allocation2 + $0x2b8] sm:$0xff] %vm14064_vm0, %v10885_v1  ;;  %3763 = vrot.lane.b32.xlu0 %v10715_v62, %s13569_s23  ;;  %v3891_v29 = vpop.permute.xlu1 %3890  ;;  %v10899_v12 = vsel %vm14075_vm12, %v3386_v25, %v10890_v15  ;;  %v10921_v62 = vsel %vm14081_vm8, %v3669_v36, %v10902_v57  ;;  %vm13571_vm0 = vcmask 392512   ;;  %vm13600_vm12 = vcmask 458112  }
 0x335   : > { %3975 = vst.msk [vmem:[#allocation2 + $0x1c8] sm:$0xff] %vm13602_vm3, %v3891_v29  ;;  %v10905_v51 = vsel %vm14076_vm6, %v3382_v58, %v3384_v14  ;;  %v10908_v24 = vsel %vm14077_vm7, %v3384_v14, %v3386_v25  ;;  %vm14084_vm7 = vmmov %vm14079_vm2  ;;  %vm14089_vm8 = vnez %v13840_v48  ;;  %v3673_v48 = vrot.slane %v10285_v32, 1 }
 0x336   : > { %3460 = vst.msk [vmem:[#allocation2 + $0x300] sm:$0xff] %vm14078_vm10, %v10899_v12  ;;  %v3893_v4 = vpop.permute.xlu0 %3892  ;;  %3507 = vrot.lane.b32.xlu1 %v10281_v56, %s13594_s25  ;;  %vm14085_vm10 = vnez %v13807_v26 }
 0x337   : > { %3458 = vst.msk [vmem:[#allocation2 + $0x2d0] sm:$0xff] %vm14079_vm2, %v10905_v51  ;;  %vm14087_vm2 = vmmov %vm14076_vm6 }
 0x338   : > { %3459 = vst.msk [vmem:[#allocation2 + $0x2e8] sm:$0xff] %vm14080_vm14, %v10908_v24  ;;  %4533 = vrot.lane.b32.xlu0 %v10921_v62, %s13590_s29  ;;  %v3726_v58 = vpop.permute.xlu1 %3725  ;;  %vm3465_vm14 = vcmask 57344  }
 0x339   : > { %3976 = vst.msk [vmem:[#allocation2 + $0x1e0] sm:$0xff] %vm13602_vm3, %v3893_v4 }
 0x33a   : > { %3825 = vst.msk [vmem:[#allocation2 + $0x78] sm:$0xff] %vm13604_vm9, %v3726_v58  ;;  %v3728_v25 = vpop.permute.xlu0 %3727  ;;  %3729 = vrot.lane.b32.xlu1 %v10730_v31, %s13569_s23 }
 0x33b   : > { %3826 = vst.msk [vmem:[#allocation2 + $0x90] sm:$0xff] %vm13604_vm9, %v3728_v25 }
 0x33c   : > { %3509 = vrot.lane.b32.xlu0 %v10288_v44, %s13594_s25  ;;  %v3859_v28 = vpop.permute.xlu1 %3858 }
 0x33d   : > { %3958 = vst.msk [vmem:[#allocation2 + $0x48] sm:$0xfe] %vm13603_vm13, %v3859_v28 }
 0x33e   : > { %v3861_v36 = vpop.permute.xlu0 %3860  ;;  %3765 = vrot.lane.b32.xlu1 %v10821_v53, %s13569_s23 }
 0x33f   : > { %3960 = vst.msk [vmem:[#allocation2 + $0x60] sm:$0xff] %vm13602_vm3, %v3861_v36 }
 0x340   : > { %3731 = vrot.lane.b32.xlu0 %v10754_v61, %s13569_s23  ;;  %v3895_v14 = vpop.permute.xlu1 %3894 }
 0x341   : > { %3977 = vst.msk [vmem:[#allocation2 + $0x1f8] sm:$0xff] %vm13602_vm3, %v3895_v14 }
 0x342   : > { %v3897_v31 = vpop.permute.xlu0 %3896  ;;  %3898 = vrot.lane.b32.xlu1 %v10705_v6, %s13567_s0 }
 0x343   : > { %3978 = vst.msk [vmem:[#allocation2 + $0x210] sm:$0xff] %vm13602_vm3, %v3897_v31 }
 0x344   : > { %3767 = vrot.lane.b32.xlu0 %v10839_v13, %s13569_s23  ;;  %v4026_v29 = vpop.permute.xlu1 %4025 }
 0x345   : > { %4106 = vst.msk [vmem:[#allocation2 + $0x1c8] sm:$0xff] %vm13601_vm5, %v4026_v29 }
 0x346   : > { %v4028_v4 = vpop.permute.xlu0 %4027  ;;  %3733 = vrot.lane.b32.xlu1 %v10873_v27, %s13569_s23 }
 0x347   : > { %4107 = vst.msk [vmem:[#allocation2 + $0x1e0] sm:$0xff] %vm13601_vm5, %v4028_v4 }
 0x348   : > { %3900 = vrot.lane.b32.xlu0 %v10733_v43, %s13567_s0  ;;  %v3863_v61 = vpop.permute.xlu1 %3862 }
 0x349   : > { %3961 = vst.msk [vmem:[#allocation2 + $0x78] sm:$0xff] %vm13602_vm3, %v3863_v61 }
 0x34a   : > { %v3865_v6 = vpop.permute.xlu0 %3864  ;;  %3866 = vrot.lane.b32.xlu1 %v10299_v47, %s13567_s0 }
 0x34b   : > { %3962 = vst.msk [vmem:[#allocation2 + $0x90] sm:$0xff] %vm13602_vm3, %v3865_v6 }
 0x34c   : > { %3735 = vrot.lane.b32.xlu0 %v10921_v62, %s13569_s23  ;;  %v3994_v58 = vpop.permute.xlu1 %3993 }
 0x34d   : > { %4090 = vst.msk [vmem:[#allocation2 + $0x48] sm:$0xff] %vm13601_vm5, %v3994_v58 }
 0x34e   : > { %v3996_v25 = vpop.permute.xlu0 %3995  ;;  %3902 = vrot.lane.b32.xlu1 %v10736_v30, %s13567_s0 }
 0x34f   : > { %4091 = vst.msk [vmem:[#allocation2 + $0x60] sm:$0xff] %vm13601_vm5, %v3996_v25 }
 0x350   : > { %3868 = vrot.lane.b32.xlu0 %v10318_v38, %s13567_s0  ;;  %v4030_v43 = vpop.permute.xlu1 %4029 }
 0x351   : > { %4108 = vst.msk [vmem:[#allocation2 + $0x1f8] sm:$0xff] %vm13601_vm5, %v4030_v43 }
 0x352   : > { %v4032_v47 = vpop.permute.xlu0 %4031  ;;  %4033 = vrot.lane.b32.xlu1 %v10682_v10, %s14082_s21 }
 0x353   : > { %4109 = vst.msk [vmem:[#allocation2 + $0x210] sm:$0xff] %vm13601_vm5, %v4032_v47 }
 0x354   : > { %3904 = vrot.lane.b32.xlu0 %v10726_v52, %s13567_s0  ;;  %v4157_v28 = vpop.permute.xlu1 %4156 }
 0x355   : > { %4240 = vst.msk [vmem:[#allocation2 + $0x1c8] sm:$0xff] %vm13571_vm0, %v4157_v28 }
 0x356   : > { %v4159_v36 = vpop.permute.xlu0 %4158  ;;  %3870 = vrot.lane.b32.xlu1 %v10321_v45, %s13567_s0 }
 0x357   : > { %4241 = vst.msk [vmem:[#allocation2 + $0x1e0] sm:$0xff] %vm13571_vm0, %v4159_v36 }
 0x358   : > { %4035 = vrot.lane.b32.xlu0 %v10689_v3, %s14082_s21  ;;  %v3998_v38 = vpop.permute.xlu1 %3997 }
 0x359   : > { %4092 = vst.msk [vmem:[#allocation2 + $0x78] sm:$0xff] %vm13601_vm5, %v3998_v38 }
 0x35a   : > { %v4000_v10 = vpop.permute.xlu0 %3999  ;;  %4001 = vrot.lane.b32.xlu1 %v10281_v56, %s14082_s21 }
 0x35b   : > { %4093 = vst.msk [vmem:[#allocation2 + $0x90] sm:$0xff] %vm13601_vm5, %v4000_v10 }
 0x35c   : > { %3872 = vrot.lane.b32.xlu0 %v10314_v9, %s13567_s0  ;;  %v4125_v14 = vpop.permute.xlu1 %4124  ;;  %v10979_v31 = vpop.f32.mrb[28].mxu0 }
 0x35d   : > { %4224 = vst.msk [vmem:[#allocation2 + $0x48] sm:$0xff] %vm13571_vm0, %v4125_v14  ;;  %v3046_v29 = vpop.f32.mrb[29].mxu0 }
 0x35e   : > { %v4127_v4 = vpop.permute.xlu0 %4126  ;;  %4037 = vrot.lane.b32.xlu1 %v10680_v11, %s14082_s21  ;;  %v3047_v3 = vadd.f32 %v10670_v18, %v3046_v29  ;;  %v8410_v6 = vpop.f32.mrb[30].mxu0 }
 0x35f   : > { %4225 = vst.msk [vmem:[#allocation2 + $0x60] sm:$0xff] %vm13571_vm0, %v4127_v4  ;;  %v3058_v58 = vadd.f32 %v10670_v18, %v8410_v6  ;;  %v3049_v25 = vpop.f32.mrb[31].mxu0  ;;  %v3705_v4 = vrot.slane %v10687_v42, 1 }
 0x360   : > { %4003 = vrot.lane.b32.xlu0 %v10288_v44, %s14082_s21  ;;  %v4161_v56 = vpop.permute.xlu1 %4160  ;;  %v10988_v61 = vmax.f32 %v3047_v3, 0.0  ;;  %v3050_v43 = vadd.f32 %v10670_v18, %v3049_v25  ;;  %v3295_v3 = vsel %vm14089_vm8, %v10856_v46, 0.0 }
 0x361   : > { %4242 = vst.msk [vmem:[#allocation2 + $0x1f8] sm:$0xff] %vm13571_vm0, %v4161_v56  ;;  %v10996_v28 = vmax.f32 %v3058_v58, 0.0  ;;  %v11048_v6 = vrot.slane %v3295_v3, 1 }
 0x362   : > { %4164 = vrot.lane.b32.xlu1 %v10821_v53, %s14083_s1  ;;  %v3390_v47 = vrot.slane %v10988_v61, 7  ;;  %v11000_v36 = vmax.f32 %v3050_v43, 0.0 }
 0x363   : > { %v3206_v10 = vsel %vm10001_vm11, %v10996_v28, 0.0  ;;  %vm14088_vm11 = vmmov %vm14084_vm7 }
 0x364   : > { %4039 = vrot.lane.b32.xlu0 %v10687_v42, %s14082_s21  ;;  %v4294_v44 = vpop.permute.xlu1 %4293  ;;  %v11004_v38 = vsel %vm14076_vm6, %v10890_v15, %v3390_v47  ;;  %v3204_v53 = vsel %vm14085_vm10, %v11000_v36, 0.0  ;;  %v11022_v29 = vrot.slane %v3206_v10, 7  ;;  %vm14090_vm6 = vcmask 1046528  }
 0x365   : > { %4376 = vst.msk [vmem:[#allocation2 + $0x1c8] sm:$0xff] %vm13600_vm12, %v4294_v44  ;;  %v11018_v15 = vrot.slane %v3204_v53, 7  ;;  %v11043_v56 = vsel %vm14090_vm6, %v10832_v16, %v3705_v4  ;;  %vm14092_vm10 = vmmov %vm14090_vm6 }
 0x366   : > { %3461 = vst.msk [vmem:[#allocation2 + $0x318] sm:$0xff] %vm14084_vm7, %v11004_v38  ;;  %v4163_v18 = vpop.permute.xlu0 %4162  ;;  %4005 = vrot.lane.b32.xlu1 %v10279_v2, %s14082_s21  ;;  %14086 = vst [vmem:[#allocation38_spill] sm:$0xff] %v11022_v29  ;;  %vm13599_vm7 = vcmask 523712   ;;  %v11059_v16 = vsel %vm14092_vm10, %v3705_v4, %v11048_v6  ;;  %vm14096_vm10 = vnez %v13863_v0 }
 0x367   : > { %4243 = vst.msk [vmem:[#allocation2 + $0x210] sm:$0xff] %vm13571_vm0, %v4163_v18  ;;  %v11028_v26 = vsel %vm14087_vm2, %v3390_v47, %v11018_v15  ;;  %vm14093_vm2 = vnez %v13686_v49  ;;  %vm14095_vm8 = vmmov %vm14090_vm6 }
 0x368   : > { %4166 = vrot.lane.b32.xlu0 %v10839_v13, %s14083_s1  ;;  %v4129_v14 = vpop.permute.xlu1 %4128  ;;  %3462 = vst.msk [vmem:[#allocation2 + $0x330] sm:$0xff] %vm14088_vm11, %v11028_v26  ;;  %v3279_v43 = vsel %vm14093_vm2, %v10394_v22, 0.0  ;;  %vm14094_vm11 = vmmov %vm14090_vm6  ;;  %vm13598_vm6 = vcmask 589312  }
 0x369   : > { %4226 = vst.msk [vmem:[#allocation2 + $0x78] sm:$0xff] %vm13571_vm0, %v4129_v14  ;;  %v11074_v44 = vrot.slane %v3279_v43, 1  ;;  %vm14097_vm2 = vmmov %vm14095_vm8 }
 0x36a   : > { %v4296_v37 = vpop.permute.xlu0 %4295  ;;  %4132 = vrot.lane.b32.xlu1 %v10873_v27, %s14083_s1 }
 0x36b   : > { %4377 = vst.msk [vmem:[#allocation2 + $0x1e0] sm:$0xff] %vm13600_vm12, %v4296_v37 }
 0x36c   : > { %4007 = vrot.lane.b32.xlu0 %v10285_v32, %s14082_s21  ;;  %v4262_v13 = vpop.permute.xlu1 %4261 }
 0x36d   : > { %4360 = vst.msk [vmem:[#allocation2 + $0x48] sm:$0xff] %vm13600_vm12, %v4262_v13 }
 0x36e   : > { %v4131_v27 = vpop.permute.xlu0 %4130  ;;  %4168 = vrot.lane.b32.xlu1 %v11043_v56, %s14083_s1 }
 0x36f   : > { %4227 = vst.msk [vmem:[#allocation2 + $0x90] sm:$0xff] %vm13571_vm0, %v4131_v27 }
 0x370   : > { %4134 = vrot.lane.b32.xlu0 %v10921_v62, %s14083_s1  ;;  %v4298_v58 = vpop.permute.xlu1 %4297 }
 0x371   : > { %4378 = vst.msk [vmem:[#allocation2 + $0x1f8] sm:$0xff] %vm13600_vm12, %v4298_v58 }
 0x372   : > { %v4264_v25 = vpop.permute.xlu0 %4263  ;;  %4301 = vrot.lane.b32.xlu1 %v10736_v30, %s14091_s22  ;;  %v11069_v30 = vsel %vm14094_vm11, %v10902_v57, %v3673_v48  ;;  %v11084_v57 = vsel %vm14095_vm8, %v3673_v48, %v11074_v44  ;;  %vm14098_vm11 = vmmov %vm14097_vm2 }
 0x373   : > { %4361 = vst.msk [vmem:[#allocation2 + $0x60] sm:$0xff] %vm13600_vm12, %v4264_v25  ;;  %vm14099_vm8 = vmmov %vm14097_vm2 }
 0x374   : > { %4170 = vrot.lane.b32.xlu0 %v11059_v16, %s14083_s1  ;;  %v4429_v62 = vpop.permute.xlu1 %4428 }
 0x375   : > { %4507 = vst.msk [vmem:[#allocation2 + $0x1c8] sm:$0xff] %vm13599_vm7, %v4429_v62 }
 0x376   : > { %v4300_v47 = vpop.permute.xlu0 %4299  ;;  %4136 = vrot.lane.b32.xlu1 %v11069_v30, %s14083_s1 }
 0x377   : > { %4379 = vst.msk [vmem:[#allocation2 + $0x210] sm:$0xff] %vm13600_vm12, %v4300_v47 }
 0x378   : > { %4303 = vrot.lane.b32.xlu0 %v10726_v52, %s14091_s22  ;;  %v4266_v18 = vpop.permute.xlu1 %4265 }
 0x379   : > { %4362 = vst.msk [vmem:[#allocation2 + $0x78] sm:$0xff] %vm13600_vm12, %v4266_v18 }
 0x37a   : > { %v4431_v49 = vpop.permute.xlu0 %4430  ;;  %4269 = vrot.lane.b32.xlu1 %v10321_v45, %s14091_s22 }
 0x37b   : > { %4508 = vst.msk [vmem:[#allocation2 + $0x1e0] sm:$0xff] %vm13599_vm7, %v4431_v49 }
 0x37c   : > { %4138 = vrot.lane.b32.xlu0 %v11084_v57, %s14083_s1  ;;  %v4397_v53 = vpop.permute.xlu1 %4396 }
 0x37d   : > { %4491 = vst.msk [vmem:[#allocation2 + $0x48] sm:$0xff] %vm13599_vm7, %v4397_v53 }
 0x37e   : > { %v4268_v52 = vpop.permute.xlu0 %4267  ;;  %4305 = vrot.lane.b32.xlu1 %v10885_v1, %s14091_s22 }
 0x37f   : > { %4363 = vst.msk [vmem:[#allocation2 + $0x90] sm:$0xff] %vm13600_vm12, %v4268_v52 }
 0x380   : > { %4271 = vrot.lane.b32.xlu0 %v10314_v9, %s14091_s22  ;;  %v4433_v45 = vpop.permute.xlu1 %4432 }
 0x381   : > { %4509 = vst.msk [vmem:[#allocation2 + $0x1f8] sm:$0xff] %vm13599_vm7, %v4433_v45 }
 0x382   : > { %v4399_v10 = vpop.permute.xlu0 %4398  ;;  %4436 = vrot.lane.b32.xlu1 %v10680_v11, %s13592_s2 }
 0x383   : > { %4492 = vst.msk [vmem:[#allocation2 + $0x60] sm:$0xff] %vm13599_vm7, %v4399_v10 }
 0x384   : > { %4307 = vrot.lane.b32.xlu0 %v10905_v51, %s14091_s22  ;;  %v4560_v14 = vpop.permute.xlu1 %4559 }
 0x385   : > { %4641 = vst.msk [vmem:[#allocation2 + $0x1c8] sm:$0xff] %vm13598_vm6, %v4560_v14 }
 0x386   : > { %v4435_v4 = vpop.permute.xlu0 %4434  ;;  %4273 = vrot.lane.b32.xlu1 %v10409_v20, %s14091_s22 }
 0x387   : > { %4510 = vst.msk [vmem:[#allocation2 + $0x210] sm:$0xff] %vm13599_vm7, %v4435_v4 }
 0x388   : > { %4438 = vrot.lane.b32.xlu0 %v10687_v42, %s13592_s2  ;;  %v3536_v9 = vpop.permute.xlu1 %3535 }
 0x389   : > { %3614 = vst.msk [vmem:[#allocation2 + $0x228] sm:$0xff] %vm13609_vm1, %v3536_v9 }
 0x38a   : > { %v4562_v37 = vpop.permute.xlu0 %4561  ;;  %4404 = vrot.lane.b32.xlu1 %v10279_v2, %s13592_s2 }
 0x38b   : > { %4642 = vst.msk [vmem:[#allocation2 + $0x1e0] sm:$0xff] %vm13598_vm6, %v4562_v37 }
 0x38c   : > { %4275 = vrot.lane.b32.xlu0 %v10426_v63, %s14091_s22  ;;  %v4401_v13 = vpop.permute.xlu1 %4400  ;;  %v4672_v48 = vld [vmem:[#allocation2 + $0x1c8] sm:$0xff] }
 0x38d   : > { %4493 = vst.msk [vmem:[#allocation2 + $0x78] sm:$0xff] %vm13599_vm7, %v4401_v13 }
 0x38e   : > { %v3538_v3 = vpop.permute.xlu0 %3537  ;;  %4440 = vrot.lane.b32.xlu1 %v10856_v46, %s13592_s2 }
 0x38f   : > { %3615 = vst.msk [vmem:[#allocation2 + $0x240] sm:$0xff] %vm13609_vm1, %v3538_v3 }
 0x390   : > { %4406 = vrot.lane.b32.xlu0 %v10285_v32, %s13592_s2  ;;  %v4528_v27 = vpop.permute.xlu1 %4527 }
 0x391   : > { %4625 = vst.msk [vmem:[#allocation2 + $0x48] sm:$0xff] %vm13598_vm6, %v4528_v27 }
 0x392   : > { %v4403_v58 = vpop.permute.xlu0 %4402  ;;  %4567 = vrot.lane.b32.xlu1 %v11043_v56, %s13590_s29  ;;  %v4673_v25 = vld [vmem:[#allocation2 + $0x1e0] sm:$0xff] }
 0x393   : > { %4494 = vst.msk [vmem:[#allocation2 + $0x90] sm:$0xff] %vm13599_vm7, %v4403_v58  ;;  %v4696_v62 = vpack.c.bf16 %v4673_v25, %v4672_v48 }
 0x394   : > { %4442 = vrot.lane.b32.xlu0 %v10866_v55, %s13592_s2  ;;  %v4564_v43 = vpop.permute.xlu1 %4563 }
 0x395   : > { %4643 = vst.msk [vmem:[#allocation2 + $0x1f8] sm:$0xff] %vm13598_vm6, %v4564_v43  ;;  %8443 = vmatprep.mubr.bf16.mxu1 %v4696_v62  ;;  %v3677_v43 = vrot.slane %v10400_v40, 1 }
 0x396   : > { %v4530_v47 = vpop.permute.xlu0 %4529  ;;  %3543 = vrot.lane.b32.xlu1 %v10680_v11, %s13594_s25  ;;  %v3709_v11 = vrot.slane %v10866_v55, 1 }
 0x397   : > { %4626 = vst.msk [vmem:[#allocation2 + $0x60] sm:$0xff] %vm13598_vm6, %v4530_v47 }
 0x398   : > { %4569 = vrot.lane.b32.xlu0 %v11059_v16, %s13590_s29  ;;  %v3504_v18 = vpop.permute.xlu1 %3503  ;;  %v4656_v45 = vld [vmem:[#allocation2 + $0x48] sm:$0xff]  ;;  %v11149_v9 = vsel %vm14097_vm2, %v11048_v6, %v3709_v11 }
 0x399   : > { %3598 = vst.msk [vmem:[#allocation2 + $0xa8] sm:$0xff] %vm13609_vm1, %v3504_v18 }
 0x39a   : > { %v4566_v49 = vpop.permute.xlu0 %4565  ;;  %4408 = vrot.lane.b32.xlu1 %v10394_v22, %s13592_s2 }
 0x39b   : > { %4644 = vst.msk [vmem:[#allocation2 + $0x210] sm:$0xff] %vm13598_vm6, %v4566_v49 }
 0x39c   : > { %3545 = vrot.lane.b32.xlu0 %v10687_v42, %s13594_s25  ;;  %v3540_v53 = vpop.permute.xlu1 %3539  ;;  %v3297_v42 = vsel %vm14096_vm10, %v10851_v21, 0.0  ;;  %v4674_v13 = vld [vmem:[#allocation2 + $0x1f8] sm:$0xff]  ;;  %vm14100_vm10 = vnez %v13693_v35 }
 0x39d   : > { %3616 = vst.msk [vmem:[#allocation2 + $0x258] sm:$0xff] %vm13609_vm1, %v3540_v53  ;;  %v11154_v58 = vrot.slane %v3297_v42, 1 }
 0x39e   : > { %v3506_v52 = vpop.permute.xlu0 %3505  ;;  %4535 = vrot.lane.b32.xlu1 %v11069_v30, %s13590_s29  ;;  %v4657_v10 = vld [vmem:[#allocation2 + $0x60] sm:$0xff] }
 0x39f   : > { %3599 = vst.msk [vmem:[#allocation2 + $0xc0] sm:$0xff] %vm13609_vm1, %v3506_v52  ;;  %v4688_v14 = vpack.c.bf16 %v4657_v10, %v4656_v45  ;;  %v11164_v48 = vsel %vm14098_vm11, %v3709_v11, %v11154_v58  ;;  %vm14101_vm11 = vmmov %vm14097_vm2 }
 0x3a0   : > { %4410 = vrot.lane.b32.xlu0 %v10400_v40, %s13592_s2  ;;  %v3762_v4 = vpop.permute.xlu1 %3761 }
 0x3a1   : > { %3843 = vst.msk [vmem:[#allocation2 + $0x228] sm:$0xff] %vm13604_vm9, %v3762_v4  ;;  %8427 = vmatprep.mubr.bf16.mxu0 %v4688_v14 }
 0x3a2   : > { %v3542_v37 = vpop.permute.xlu0 %3541  ;;  %4571 = vrot.lane.b32.xlu1 %v11149_v9, %s13590_s29  ;;  %v4675_v3 = vld [vmem:[#allocation2 + $0x210] sm:$0xff] }
 0x3a3   : > { %3617 = vst.msk [vmem:[#allocation2 + $0x270] sm:$0xff] %vm13609_vm1, %v3542_v37  ;;  %v4697_v27 = vpack.c.bf16 %v4675_v3, %v4674_v13 }
 0x3a4   : > { %4537 = vrot.lane.b32.xlu0 %v11084_v57, %s13590_s29  ;;  %v4532_v0 = vpop.permute.xlu1 %4531 }
 0x3a5   : > { %4627 = vst.msk [vmem:[#allocation2 + $0x78] sm:$0xff] %vm13598_vm6, %v4532_v0  ;;  %8444 = vmatmul.mubr.bf16.vlgmr.msra.gmra.mrb[0].mxu1 %v4697_v27 }
 0x3a6   : > { %v3764_v6 = vpop.permute.xlu0 %3763  ;;  %3511 = vrot.lane.b32.xlu1 %v10279_v2, %s13594_s25 }
 0x3a7   : > { %3844 = vst.msk [vmem:[#allocation2 + $0x240] sm:$0xff] %vm13604_vm9, %v3764_v6 }
 0x3a8   : > { %4573 = vrot.lane.b32.xlu0 %v11164_v48, %s13590_s29  ;;  %v3508_v25 = vpop.permute.xlu1 %3507 }
 0x3a9   : > { %3600 = vst.msk [vmem:[#allocation2 + $0xd8] sm:$0xff] %vm13609_vm1, %v3508_v25 }
 0x3aa   : > { %v4534_v62 = vpop.permute.xlu0 %4533  ;;  %3547 = vrot.lane.b32.xlu1 %v10856_v46, %s13594_s25 }
 0x3ab   : > { %4628 = vst.msk [vmem:[#allocation2 + $0x90] sm:$0xff] %vm13598_vm6, %v4534_v62 }
 0x3ac   : > { %3513 = vrot.lane.b32.xlu0 %v10285_v32, %s13594_s25  ;;  %v3730_v2 = vpop.permute.xlu1 %3729  ;;  %v11184_v32 = vsel %vm14099_vm8, %v11074_v44, %v3677_v43  ;;  %v4658_v53 = vld [vmem:[#allocation2 + $0x78] sm:$0xff] }
 0x3ad   : > { %3827 = vst.msk [vmem:[#allocation2 + $0xa8] sm:$0xff] %vm13604_vm9, %v3730_v2 }
 0x3ae   : > { %v3510_v47 = vpop.permute.xlu0 %3509  ;;  %3769 = vrot.lane.b32.xlu1 %v11043_v56, %s13569_s23  ;;  %v3281_v56 = vsel %vm14100_vm10, %v10392_v33, 0.0  ;;  %vm14106_vm10 = vmmov %vm14097_vm2 }
 0x3af   : > { %3601 = vst.msk [vmem:[#allocation2 + $0xf0] sm:$0xff] %vm13609_vm1, %v3510_v47  ;;  %v11195_v44 = vrot.slane %v3281_v56, 1 }
 0x3b0   : > { %3549 = vrot.lane.b32.xlu0 %v10866_v55, %s13594_s25  ;;  %v3766_v18 = vpop.permute.xlu1 %3765 }
 0x3b1   : > { %3845 = vst.msk [vmem:[#allocation2 + $0x258] sm:$0xff] %vm13604_vm9, %v3766_v18  ;;  %v11202_v35 = vsel %vm14097_vm2, %v3677_v43, %v11195_v44 }
 0x3b2   : > { %v3732_v49 = vpop.permute.xlu0 %3731  ;;  %4539 = vrot.lane.b32.xlu1 %v11184_v32, %s13590_s29  ;;  %v4659_v11 = vld [vmem:[#allocation2 + $0x90] sm:$0xff] }
 0x3b3   : > { %3828 = vst.msk [vmem:[#allocation2 + $0xc0] sm:$0xff] %vm13604_vm9, %v3732_v49  ;;  %v4689_v52 = vpack.c.bf16 %v4659_v11, %v4658_v53  ;;  %v3299_v53 = vsel %vm10132_vm4, %v10988_v61, 0.0  ;;  %vm14102_vm4 = vmmov %vm14097_vm2 }
 0x3b4   : > { %3771 = vrot.lane.b32.xlu0 %v11059_v16, %s13569_s23  ;;  %v3899_v45 = vpop.permute.xlu1 %3898 }
 0x3b5   : > { %3979 = vst.msk [vmem:[#allocation2 + $0x228] sm:$0xff] %vm13602_vm3, %v3899_v45  ;;  %8428 = vmatmul.mubr.bf16.vlgmr.msra.gmra.mrb[32].mxu0 %v4689_v52 }
 0x3b6   : > { %v3768_v10 = vpop.permute.xlu0 %3767  ;;  %3515 = vrot.lane.b32.xlu1 %v10394_v22, %s13594_s25 }
 0x3b7   : > { %3846 = vst.msk [vmem:[#allocation2 + $0x270] sm:$0xff] %vm13604_vm9, %v3768_v10  ;;  %v14103_v10 = vld [vmem:[#allocation26_spill] sm:$0xff] }
 0x3b8   : > { %4541 = vrot.lane.b32.xlu0 %v11202_v35, %s13590_s29  ;;  %v3734_v16 = vpop.permute.xlu1 %3733 }
 0x3b9   : > { %3829 = vst.msk [vmem:[#allocation2 + $0xd8] sm:$0xff] %vm13604_vm9, %v3734_v16 }
 0x3ba   : > { %v3901_v14 = vpop.permute.xlu0 %3900  ;;  %3737 = vrot.lane.b32.xlu1 %v11069_v30, %s13569_s23 }
 0x3bb   : > { %3980 = vst.msk [vmem:[#allocation2 + $0x240] sm:$0xff] %vm13602_vm3, %v3901_v14  ;;  %v11317_v14 = vsel %vm14106_vm10, %v11195_v44, %v3681_v60  ;;  %vm14115_vm10 = vmmov %vm14097_vm2 }
 0x3bc   : > { %3517 = vrot.lane.b32.xlu0 %v10400_v40, %s13594_s25  ;;  %v3867_v4 = vpop.permute.xlu1 %3866 }
 0x3bd   : > { %3963 = vst.msk [vmem:[#allocation2 + $0xa8] sm:$0xff] %vm13602_vm3, %v3867_v4 }
 0x3be   : > { %v3736_v42 = vpop.permute.xlu0 %3735  ;;  %3773 = vrot.lane.b32.xlu1 %v11149_v9, %s13569_s23 }
 0x3bf   : > { %3830 = vst.msk [vmem:[#allocation2 + $0xf0] sm:$0xff] %vm13604_vm9, %v3736_v42 }
 0x3c0   : > { %3739 = vrot.lane.b32.xlu0 %v11084_v57, %s13569_s23  ;;  %v3903_v37 = vpop.permute.xlu1 %3902 }
 0x3c1   : > { %3981 = vst.msk [vmem:[#allocation2 + $0x258] sm:$0xff] %vm13602_vm3, %v3903_v37 }
 0x3c2   : > { %v3869_v30 = vpop.permute.xlu0 %3868  ;;  %3906 = vrot.lane.b32.xlu1 %v10885_v1, %s13567_s0 }
 0x3c3   : > { %3964 = vst.msk [vmem:[#allocation2 + $0xc0] sm:$0xff] %vm13602_vm3, %v3869_v30 }
 0x3c4   : > { %3775 = vrot.lane.b32.xlu0 %v11164_v48, %s13569_s23  ;;  %v4034_v13 = vpop.permute.xlu1 %4033 }
 0x3c5   : > { %4110 = vst.msk [vmem:[#allocation2 + $0x228] sm:$0xff] %vm13601_vm5, %v4034_v13 }
 0x3c6   : > { %v3905_v3 = vpop.permute.xlu0 %3904  ;;  %3741 = vrot.lane.b32.xlu1 %v11184_v32, %s13569_s23 }
 0x3c7   : > { %3982 = vst.msk [vmem:[#allocation2 + $0x270] sm:$0xff] %vm13602_vm3, %v3905_v3 }
 0x3c8   : > { %3908 = vrot.lane.b32.xlu0 %v10905_v51, %s13567_s0  ;;  %v3871_v57 = vpop.permute.xlu1 %3870 }
 0x3c9   : > { %3965 = vst.msk [vmem:[#allocation2 + $0xd8] sm:$0xff] %vm13602_vm3, %v3871_v57 }
 0x3ca   : > { %v4036_v1 = vpop.permute.xlu0 %4035  ;;  %3874 = vrot.lane.b32.xlu1 %v10409_v20, %s13567_s0 }
 0x3cb   : > { %4111 = vst.msk [vmem:[#allocation2 + $0x240] sm:$0xff] %vm13601_vm5, %v4036_v1  ;;  %v14107_v1 = vld [vmem:[#allocation28_spill] sm:$0xff] }
 0x3cc   : > { %3743 = vrot.lane.b32.xlu0 %v11202_v35, %s13569_s23  ;;  %v4002_v27 = vpop.permute.xlu1 %4001 }
 0x3cd   : > { %4094 = vst.msk [vmem:[#allocation2 + $0xa8] sm:$0xff] %vm13601_vm5, %v4002_v27 }
 0x3ce   : > { %v3873_v0 = vpop.permute.xlu0 %3872  ;;  %3910 = vrot.lane.b32.xlu1 %v10908_v24, %s13567_s0 }
 0x3cf   : > { %3966 = vst.msk [vmem:[#allocation2 + $0xf0] sm:$0xff] %vm13602_vm3, %v3873_v0  ;;  %v14108_v0 = vld [vmem:[#allocation31_spill] sm:$0xff] }
 0x3d0   : > { %3876 = vrot.lane.b32.xlu0 %v10426_v63, %s13567_s0  ;;  %v4038_v51 = vpop.permute.xlu1 %4037 }
 0x3d1   : > { %4112 = vst.msk [vmem:[#allocation2 + $0x258] sm:$0xff] %vm13601_vm5, %v4038_v51 }
 0x3d2   : > { %v4004_v20 = vpop.permute.xlu0 %4003  ;;  %4041 = vrot.lane.b32.xlu1 %v10856_v46, %s14082_s21 }
 0x3d3   : > { %4095 = vst.msk [vmem:[#allocation2 + $0xc0] sm:$0xff] %vm13601_vm5, %v4004_v20 }
 0x3d4   : > { %3912 = vrot.lane.b32.xlu0 %v10899_v12, %s13567_s0  ;;  %v4165_v6 = vpop.permute.xlu1 %4164 }
 0x3d5   : > { %4244 = vst.msk [vmem:[#allocation2 + $0x228] sm:$0xff] %vm13571_vm0, %v4165_v6 }
 0x3d6   : > { %v4040_v25 = vpop.permute.xlu0 %4039  ;;  %3878 = vrot.lane.b32.xlu1 %v10429_v17, %s13567_s0 }
 0x3d7   : > { %4113 = vst.msk [vmem:[#allocation2 + $0x270] sm:$0xff] %vm13601_vm5, %v4040_v25 }
 0x3d8   : > { %4043 = vrot.lane.b32.xlu0 %v10866_v55, %s14082_s21  ;;  %v4006_v63 = vpop.permute.xlu1 %4005 }
 0x3d9   : > { %4096 = vst.msk [vmem:[#allocation2 + $0xd8] sm:$0xff] %vm13601_vm5, %v4006_v63 }
 0x3da   : > { %v4167_v46 = vpop.permute.xlu0 %4166  ;;  %4009 = vrot.lane.b32.xlu1 %v10394_v22, %s14082_s21 }
 0x3db   : > { %4245 = vst.msk [vmem:[#allocation2 + $0x240] sm:$0xff] %vm13571_vm0, %v4167_v46 }
 0x3dc   : > { %3880 = vrot.lane.b32.xlu0 %v10422_v50, %s13567_s0  ;;  %v4133_v62 = vpop.permute.xlu1 %4132  ;;  %s14116_s0 = smov 24  }
 0x3dd   : > { %4228 = vst.msk [vmem:[#allocation2 + $0xa8] sm:$0xff] %vm13571_vm0, %v4133_v62 }
 0x3de   : > { %v4008_v2 = vpop.permute.xlu0 %4007  ;;  %4045 = vrot.lane.b32.xlu1 %v10851_v21, %s14082_s21 }
 0x3df   : > { %4097 = vst.msk [vmem:[#allocation2 + $0xf0] sm:$0xff] %vm13601_vm5, %v4008_v2 }
 0x3e0   : > { %4011 = vrot.lane.b32.xlu0 %v10400_v40, %s14082_s21  ;;  %v4169_v55 = vpop.permute.xlu1 %4168 }
 0x3e1   : > { %4246 = vst.msk [vmem:[#allocation2 + $0x258] sm:$0xff] %vm13571_vm0, %v4169_v55 }
 0x3e2   : > { %v4135_v22 = vpop.permute.xlu0 %4134  ;;  %4172 = vrot.lane.b32.xlu1 %v11149_v9, %s14083_s1  ;;  %v3713_v9 = vrot.slane %v10862_v23, 1 }
 0x3e3   : > { %4229 = vst.msk [vmem:[#allocation2 + $0xc0] sm:$0xff] %vm13571_vm0, %v4135_v22  ;;  %v8720_v22 = vld [vmem:[%s13877_s30] ss:$0 sm:$0xff]  ;;  %s14264_s30 = smov 56  }
 0x3e4   : > { %4047 = vrot.lane.b32.xlu0 %v10862_v23, %s14082_s21  ;;  %v4302_v43 = vpop.permute.xlu1 %4301 }
 0x3e5   : > { %4380 = vst.msk [vmem:[#allocation2 + $0x228] sm:$0xff] %vm13600_vm12, %v4302_v43  ;;  %v3055_v43 = vadd.f32 %v8720_v22, %v10979_v31  ;;  %v3717_v31 = vrot.slane %v11000_v36, 1 }
 0x3e6   : > { %v4171_v47 = vpop.permute.xlu0 %4170  ;;  %4013 = vrot.lane.b32.xlu1 %v10392_v33, %s14082_s21 }
 0x3e7   : > { %4247 = vst.msk [vmem:[#allocation2 + $0x270] sm:$0xff] %vm13571_vm0, %v4171_v47 }
 0x3e8   : > { %4174 = vrot.lane.b32.xlu0 %v11164_v48, %s14083_s1  ;;  %v4137_v40 = vpop.permute.xlu1 %4136  ;;  %v11291_v48 = vsel %vm14101_vm11, %v11154_v58, %v3713_v9 }
 0x3e9   : > { %4230 = vst.msk [vmem:[#allocation2 + $0xd8] sm:$0xff] %vm13571_vm0, %v4137_v40 }
 0x3ea   : > { %v4304_v18 = vpop.permute.xlu0 %4303  ;;  %4140 = vrot.lane.b32.xlu1 %v11184_v32, %s14083_s1  ;;  %v11296_v32 = vrot.slane %v3299_v53, 1 }
 0x3eb   : > { %4381 = vst.msk [vmem:[#allocation2 + $0x240] sm:$0xff] %vm13600_vm12, %v4304_v18 }
 0x3ec   : > { %4015 = vrot.lane.b32.xlu0 %v10397_v5, %s14082_s21  ;;  %v4270_v49 = vpop.permute.xlu1 %4269  ;;  %v11307_v58 = vsel %vm14102_vm4, %v3713_v9, %v11296_v32  ;;  %vm14113_vm4 = vmmov %vm14097_vm2 }
 0x3ed   : > { %4364 = vst.msk [vmem:[#allocation2 + $0xa8] sm:$0xff] %vm13600_vm12, %v4270_v49 }
 0x3ee   : > { %v4139_v11 = vpop.permute.xlu0 %4138  ;;  %4176 = vrot.lane.b32.xlu1 %v11291_v48, %s14083_s1 }
 0x3ef   : > { %4231 = vst.msk [vmem:[#allocation2 + $0xf0] sm:$0xff] %vm13571_vm0, %v4139_v11 }
 0x3f0   : > { %4142 = vrot.lane.b32.xlu0 %v11202_v35, %s14083_s1  ;;  %v4306_v56 = vpop.permute.xlu1 %4305  ;;  %v14104_v35 = vld [vmem:[#allocation17_spill] sm:$0xff] }
 0x3f1   : > { %4382 = vst.msk [vmem:[#allocation2 + $0x258] sm:$0xff] %vm13600_vm12, %v4306_v56  ;;  %vm14105_vm8 = vnez %v14104_v35  ;;  %v14110_v56 = vld [vmem:[#allocation27_spill] sm:$0xff] }
 0x3f2   : > { %v4272_v52 = vpop.permute.xlu0 %4271  ;;  %4309 = vrot.lane.b32.xlu1 %v10908_v24, %s14091_s22  ;;  %v3283_v16 = vsel %vm14105_vm8, %v14103_v10, 0.0  ;;  %vm14114_vm8 = vmmov %vm14097_vm2 }
 0x3f3   : > { %4365 = vst.msk [vmem:[#allocation2 + $0xc0] sm:$0xff] %vm13600_vm12, %v4272_v52  ;;  %v11322_v4 = vrot.slane %v3283_v16, 1 }
 0x3f4   : > { %4178 = vrot.lane.b32.xlu0 %v11307_v58, %s14083_s1  ;;  %v4437_v45 = vpop.permute.xlu1 %4436 }
 0x3f5   : > { %4511 = vst.msk [vmem:[#allocation2 + $0x228] sm:$0xff] %vm13599_vm7, %v4437_v45  ;;  %v11332_v44 = vsel %vm14097_vm2, %v3681_v60, %v11322_v4  ;;  %v11403_v45 = vsel %vm14113_vm4, %v11296_v32, %v3717_v31 }
 0x3f6   : > { %v4308_v24 = vpop.permute.xlu0 %4307  ;;  %4144 = vrot.lane.b32.xlu1 %v11317_v14, %s14083_s1 }
 0x3f7   : > { %4383 = vst.msk [vmem:[#allocation2 + $0x270] sm:$0xff] %vm13600_vm12, %v4308_v24 }
 0x3f8   : > { %4311 = vrot.lane.b32.xlu0 %v10899_v12, %s14091_s22  ;;  %v4274_v42 = vpop.permute.xlu1 %4273 }
 0x3f9   : > { %4366 = vst.msk [vmem:[#allocation2 + $0xd8] sm:$0xff] %vm13600_vm12, %v4274_v42 }
 0x3fa   : > { %v4439_v37 = vpop.permute.xlu0 %4438  ;;  %4277 = vrot.lane.b32.xlu1 %v10429_v17, %s14091_s22 }
 0x3fb   : > { %4512 = vst.msk [vmem:[#allocation2 + $0x240] sm:$0xff] %vm13599_vm7, %v4439_v37 }
 0x3fc   : > { %4146 = vrot.lane.b32.xlu0 %v11332_v44, %s14083_s1  ;;  %v4405_v30 = vpop.permute.xlu1 %4404 }
 0x3fd   : > { %4495 = vst.msk [vmem:[#allocation2 + $0xa8] sm:$0xff] %vm13599_vm7, %v4405_v30 }
 0x3fe   : > { %v4276_v12 = vpop.permute.xlu0 %4275  ;;  %4313 = vrot.lane.b32.xlu1 %v11004_v38, %s14091_s22 }
 0x3ff   : > { %4367 = vst.msk [vmem:[#allocation2 + $0xf0] sm:$0xff] %vm13600_vm12, %v4276_v12 }
 0x400   : > { %4279 = vrot.lane.b32.xlu0 %v10422_v50, %s14091_s22  ;;  %v4441_v17 = vpop.permute.xlu1 %4440 }
 0x401   : > { %4513 = vst.msk [vmem:[#allocation2 + $0x258] sm:$0xff] %vm13599_vm7, %v4441_v17 }
 0x402   : > { %v4407_v13 = vpop.permute.xlu0 %4406  ;;  %4444 = vrot.lane.b32.xlu1 %v10851_v21, %s13592_s2 }
 0x403   : > { %4496 = vst.msk [vmem:[#allocation2 + $0xc0] sm:$0xff] %vm13599_vm7, %v4407_v13  ;;  %v3685_v13 = vrot.slane %v14110_v56, 1 }
 0x404   : > { %4315 = vrot.lane.b32.xlu0 %v11028_v26, %s14091_s22  ;;  %v4568_v3 = vpop.permute.xlu1 %4567 }
 0x405   : > { %4645 = vst.msk [vmem:[#allocation2 + $0x228] sm:$0xff] %vm13598_vm6, %v4568_v3 }
 0x406   : > { %v4443_v57 = vpop.permute.xlu0 %4442  ;;  %4281 = vrot.lane.b32.xlu1 %v14107_v1, %s14091_s22 }
 0x407   : > { %4514 = vst.msk [vmem:[#allocation2 + $0x270] sm:$0xff] %vm13599_vm7, %v4443_v57  ;;  %v11432_v57 = vsel %vm14115_vm10, %v11322_v4, %v3685_v13  ;;  %v11445_v4 = vsel %vm14097_vm2, %v3685_v13, %v10529_v19  ;;  %v11558_v13 = vrot.slane %v10996_v28, 1  ;;  %vm14124_vm10 = vcmask 64512  }
 0x408   : > { %4446 = vrot.lane.b32.xlu0 %v10862_v23, %s13592_s2  ;;  %v3544_v50 = vpop.permute.xlu1 %3543 }
 0x409   : > { %3618 = vst.msk [vmem:[#allocation2 + $0x288] sm:$0xff] %vm13609_vm1, %v3544_v50 }
 0x40a   : > { %v4570_v27 = vpop.permute.xlu0 %4569  ;;  %4412 = vrot.lane.b32.xlu1 %v10392_v33, %s13592_s2 }
 0x40b   : > { %4646 = vst.msk [vmem:[#allocation2 + $0x240] sm:$0xff] %vm13598_vm6, %v4570_v27 }
 0x40c   : > { %4283 = vrot.lane.b32.xlu0 %v14108_v0, %s14091_s22  ;;  %v4409_v51 = vpop.permute.xlu1 %4408  ;;  %v4676_v63 = vld [vmem:[#allocation2 + $0x228] sm:$0xff] }
 0x40d   : > { %4497 = vst.msk [vmem:[#allocation2 + $0xd8] sm:$0xff] %vm13599_vm7, %v4409_v51 }
 0x40e   : > { %v3546_v20 = vpop.permute.xlu0 %3545  ;;  %4448 = vrot.lane.b32.xlu1 %v10988_v61, %s13592_s2 }
 0x40f   : > { %3619 = vst.msk [vmem:[#allocation2 + $0x2a0] sm:$0xff] %vm13609_vm1, %v3546_v20 }
 0x410   : > { %4414 = vrot.lane.b32.xlu0 %v10397_v5, %s13592_s2  ;;  %v4536_v6 = vpop.permute.xlu1 %4535 }
 0x411   : > { %4629 = vst.msk [vmem:[#allocation2 + $0xa8] sm:$0xff] %vm13598_vm6, %v4536_v6 }
 0x412   : > { %v4411_v25 = vpop.permute.xlu0 %4410  ;;  %4575 = vrot.lane.b32.xlu1 %v11291_v48, %s13590_s29  ;;  %v4677_v46 = vld [vmem:[#allocation2 + $0x240] sm:$0xff] }
 0x413   : > { %4498 = vst.msk [vmem:[#allocation2 + $0xf0] sm:$0xff] %vm13599_vm7, %v4411_v25  ;;  %v4698_v62 = vpack.c.bf16 %v4677_v46, %v4676_v63 }
 0x414   : > { %4450 = vrot.lane.b32.xlu0 %v11000_v36, %s13592_s2  ;;  %v4572_v2 = vpop.permute.xlu1 %4571 }
 0x415   : > { %4647 = vst.msk [vmem:[#allocation2 + $0x258] sm:$0xff] %vm13598_vm6, %v4572_v2  ;;  %8447 = vmatprep.mubr.bf16.mxu1 %v4698_v62 }
 0x416   : > { %v4538_v55 = vpop.permute.xlu0 %4537  ;;  %3551 = vrot.lane.b32.xlu1 %v10851_v21, %s13594_s25  ;;  %v11386_v21 = vmax.f32 %v3055_v43, 0.0  ;;  %v14117_v43 = vld [vmem:[#allocation29_spill] sm:$0xff] }
 0x417   : > { %4630 = vst.msk [vmem:[#allocation2 + $0xc0] sm:$0xff] %vm13598_vm6, %v4538_v55 }
 0x418   : > { %4577 = vrot.lane.b32.xlu0 %v11307_v58, %s13590_s29  ;;  %v3512_v47 = vpop.permute.xlu1 %3511  ;;  %14109 = vst [vmem:[#allocation26_spill] sm:$0xff] %v11386_v21  ;;  %v4660_v49 = vld [vmem:[#allocation2 + $0xa8] sm:$0xff] }
 0x419   : > { %3602 = vst.msk [vmem:[#allocation2 + $0x108] sm:$0xff] %vm13609_vm1, %v3512_v47 }
 0x41a   : > { %v4574_v40 = vpop.permute.xlu0 %4573  ;;  %4416 = vrot.lane.b32.xlu1 %v14103_v10, %s13592_s2 }
 0x41b   : > { %4648 = vst.msk [vmem:[#allocation2 + $0x270] sm:$0xff] %vm13598_vm6, %v4574_v40 }
 0x41c   : > { %3553 = vrot.lane.b32.xlu0 %v10862_v23, %s13594_s25  ;;  %v3548_v9 = vpop.permute.xlu1 %3547  ;;  %v14111_v23 = vld [vmem:[#allocation23_spill] sm:$0xff]  ;;  %v4678_v16 = vld [vmem:[#allocation2 + $0x258] sm:$0xff] }
 0x41d   : > { %3620 = vst.msk [vmem:[#allocation2 + $0x2b8] sm:$0xff] %vm13609_vm1, %v3548_v9  ;;  %vm14112_vm11 = vnez %v14111_v23  ;;  %v3394_v9 = vrot.slane %v11386_v21, 7 }
 0x41e   : > { %v3514_v18 = vpop.permute.xlu0 %3513  ;;  %4543 = vrot.lane.b32.xlu1 %v11317_v14, %s13590_s29  ;;  %v4661_v53 = vld [vmem:[#allocation2 + $0xc0] sm:$0xff]  ;;  %v3301_v52 = vsel %vm14112_vm11, %v11386_v21, 0.0  ;;  %vm14119_vm11 = vcmask 1040384  }
 0x41f   : > { %3603 = vst.msk [vmem:[#allocation2 + $0x120] sm:$0xff] %vm13609_vm1, %v3514_v18  ;;  %v4690_v11 = vpack.c.bf16 %v4661_v53, %v4660_v49  ;;  %v11408_v37 = vrot.slane %v3301_v52, 1  ;;  %vm14120_vm4 = vmmov %vm14119_vm11 }
 0x420   : > { %4418 = vrot.lane.b32.xlu0 %v14110_v56, %s13592_s2  ;;  %v3770_v60 = vpop.permute.xlu1 %3769  ;;  %v3397_v23 = vsel %vm14120_vm4, %v3394_v9, %v11022_v29 }
 0x421   : > { %3847 = vst.msk [vmem:[#allocation2 + $0x288] sm:$0xff] %vm13604_vm9, %v3770_v60  ;;  %8431 = vmatprep.mubr.bf16.mxu0 %v4690_v11  ;;  %v11418_v12 = vsel %vm14114_vm8, %v3717_v31, %v11408_v37  ;;  %vm14122_vm8 = vmmov %vm14097_vm2 }
 0x422   : > { %v3550_v35 = vpop.permute.xlu0 %3549  ;;  %4579 = vrot.lane.b32.xlu1 %v11403_v45, %s13590_s29  ;;  %v4679_v24 = vld [vmem:[#allocation2 + $0x270] sm:$0xff]  ;;  %vm14125_vm2 = vmmov %vm14124_vm10 }
 0x423   : > { %3621 = vst.msk [vmem:[#allocation2 + $0x2d0] sm:$0xff] %vm13609_vm1, %v3550_v35  ;;  %v4699_v42 = vpack.c.bf16 %v4679_v24, %v4678_v16  ;;  %vm14143_vm4 = vmmov %vm14125_vm2 }
 0x424   : > { %4545 = vrot.lane.b32.xlu0 %v11332_v44, %s13590_s29  ;;  %v4540_v30 = vpop.permute.xlu1 %4539 }
 0x425   : > { %4631 = vst.msk [vmem:[#allocation2 + $0xd8] sm:$0xff] %vm13598_vm6, %v4540_v30  ;;  %8448 = vmatmul.mubr.bf16.gmra.mrb[4].mxu1 %v4699_v42 }
 0x426   : > { %v3772_v32 = vpop.permute.xlu0 %3771  ;;  %3519 = vrot.lane.b32.xlu1 %v10392_v33, %s13594_s25 }
 0x427   : > { %3848 = vst.msk [vmem:[#allocation2 + $0x2a0] sm:$0xff] %vm13604_vm9, %v3772_v32 }
 0x428   : > { %4581 = vrot.lane.b32.xlu0 %v11418_v12, %s13590_s29  ;;  %v3516_v17 = vpop.permute.xlu1 %3515 }
 0x429   : > { %3604 = vst.msk [vmem:[#allocation2 + $0x138] sm:$0xff] %vm13609_vm1, %v3516_v17 }
 0x42a   : > { %v4542_v3 = vpop.permute.xlu0 %4541  ;;  %3777 = vrot.lane.b32.xlu1 %v11291_v48, %s13569_s23 }
 0x42b   : > { %4632 = vst.msk [vmem:[#allocation2 + $0xf0] sm:$0xff] %vm13598_vm6, %v4542_v3  ;;  %v11563_v3 = vld [vmem:[%s14121_s4] ss:$0 sm:$0xff] }
 0x42c   : > { %3521 = vrot.lane.b32.xlu0 %v10397_v5, %s13594_s25  ;;  %v3738_v33 = vpop.permute.xlu1 %3737  ;;  %v4662_v27 = vld [vmem:[#allocation2 + $0xd8] sm:$0xff] }
 0x42d   : > { %3831 = vst.msk [vmem:[#allocation2 + $0x108] sm:$0xff] %vm13604_vm9, %v3738_v33 }
 0x42e   : > { %v3518_v50 = vpop.permute.xlu0 %3517  ;;  %4547 = vrot.lane.b32.xlu1 %v11432_v57, %s13590_s29 }
 0x42f   : > { %3605 = vst.msk [vmem:[#allocation2 + $0x150] sm:$0xff] %vm13609_vm1, %v3518_v50 }
 0x430   : > { %3779 = vrot.lane.b32.xlu0 %v11307_v58, %s13569_s23  ;;  %v3774_v48 = vpop.permute.xlu1 %3773 }
 0x431   : > { %3849 = vst.msk [vmem:[#allocation2 + $0x2b8] sm:$0xff] %vm13604_vm9, %v3774_v48 }
 0x432   : > { %v3740_v5 = vpop.permute.xlu0 %3739  ;;  %3523 = vrot.lane.b32.xlu1 %v14103_v10, %s13594_s25  ;;  %v4663_v51 = vld [vmem:[#allocation2 + $0xf0] sm:$0xff] }
 0x433   : > { %3832 = vst.msk [vmem:[#allocation2 + $0x120] sm:$0xff] %vm13604_vm9, %v3740_v5  ;;  %v4691_v20 = vpack.c.bf16 %v4663_v51, %v4662_v27  ;;  %v11580_v51 = vsel %vm14122_vm8, %v11408_v37, %v11558_v13  ;;  %vm14144_vm8 = vmmov %vm14125_vm2 }
 0x434   : > { %4549 = vrot.lane.b32.xlu0 %v11445_v4, %s13590_s29  ;;  %v3907_v58 = vpop.permute.xlu1 %3906  ;;  %14123 = vst [vmem:[#allocation17_spill] sm:$0xff] %v11580_v51 }
 0x435   : > { %3983 = vst.msk [vmem:[#allocation2 + $0x288] sm:$0xff] %vm13602_vm3, %v3907_v58  ;;  %8432 = vmatmul.mubr.bf16.gmra.mrb[36].mxu0 %v4691_v20 }
 0x436   : > { %v3776_v6 = vpop.permute.xlu0 %3775  ;;  %3745 = vrot.lane.b32.xlu1 %v11317_v14, %s13569_s23 }
 0x437   : > { %3850 = vst.msk [vmem:[#allocation2 + $0x2d0] sm:$0xff] %vm13604_vm9, %v3776_v6 }
 0x438   : > { %3525 = vrot.lane.b32.xlu0 %v14110_v56, %s13594_s25  ;;  %v3742_v25 = vpop.permute.xlu1 %3741 }
 0x439   : > { %3833 = vst.msk [vmem:[#allocation2 + $0x138] sm:$0xff] %vm13604_vm9, %v3742_v25 }
 0x43a   : > { %v3909_v19 = vpop.permute.xlu0 %3908  ;;  %3914 = vrot.lane.b32.xlu1 %v11004_v38, %s14116_s0 }
 0x43b   : > { %3984 = vst.msk [vmem:[#allocation2 + $0x2a0] sm:$0xff] %vm13602_vm3, %v3909_v19 }
 0x43c   : > { %3747 = vrot.lane.b32.xlu0 %v11332_v44, %s13569_s23  ;;  %v3875_v63 = vpop.permute.xlu1 %3874 }
 0x43d   : > { %3967 = vst.msk [vmem:[#allocation2 + $0x108] sm:$0xff] %vm13602_vm3, %v3875_v63 }
 0x43e   : > { %v3744_v14 = vpop.permute.xlu0 %3743  ;;  %3555 = vrot.lane.b32.xlu1 %v10988_v61, %s13594_s25 }
 0x43f   : > { %3834 = vst.msk [vmem:[#allocation2 + $0x150] sm:$0xff] %vm13604_vm9, %v3744_v14 }
 0x440   : > { %3916 = vrot.lane.b32.xlu0 %v11028_v26, %s14116_s0  ;;  %v3911_v46 = vpop.permute.xlu1 %3910 }
 0x441   : > { %3985 = vst.msk [vmem:[#allocation2 + $0x2b8] sm:$0xff] %vm13602_vm3, %v3911_v46 }
 0x442   : > { %v3877_v38 = vpop.permute.xlu0 %3876  ;;  %3751 = vrot.lane.b32.xlu1 %v11445_v4, %s13569_s23 }
 0x443   : > { %3968 = vst.msk [vmem:[#allocation2 + $0x120] sm:$0xff] %vm13602_vm3, %v3877_v38 }
 0x444   : > { %3749 = vrot.lane.b32.xlu0 %v11432_v57, %s13569_s23  ;;  %v4042_v44 = vpop.permute.xlu1 %4041 }
 0x445   : > { %4114 = vst.msk [vmem:[#allocation2 + $0x288] sm:$0xff] %vm13601_vm5, %v4042_v44 }
 0x446   : > { %v3913_v62 = vpop.permute.xlu0 %3912  ;;  %3884 = vrot.lane.b32.xlu1 %v14108_v0, %s14116_s0 }
 0x447   : > { %3986 = vst.msk [vmem:[#allocation2 + $0x2d0] sm:$0xff] %vm13602_vm3, %v3913_v62 }
 0x448   : > { %3882 = vrot.lane.b32.xlu0 %v14107_v1, %s14116_s0  ;;  %v3879_v26 = vpop.permute.xlu1 %3878 }
 0x449   : > { %3969 = vst.msk [vmem:[#allocation2 + $0x138] sm:$0xff] %vm13602_vm3, %v3879_v26 }
 0x44a   : > { %v4044_v2 = vpop.permute.xlu0 %4043  ;;  %4051 = vrot.lane.b32.xlu1 %v11000_v36, %s14082_s21 }
 0x44b   : > { %4115 = vst.msk [vmem:[#allocation2 + $0x2a0] sm:$0xff] %vm13601_vm5, %v4044_v2 }
 0x44c   : > { %4049 = vrot.lane.b32.xlu0 %v10988_v61, %s14082_s21  ;;  %v4010_v55 = vpop.permute.xlu1 %4009  ;;  %v14118_v61 = vld [vmem:[#allocation30_spill] sm:$0xff] }
 0x44d   : > { %4098 = vst.msk [vmem:[#allocation2 + $0x108] sm:$0xff] %vm13601_vm5, %v4010_v55 }
 0x44e   : > { %v3881_v0 = vpop.permute.xlu0 %3880  ;;  %3781 = vrot.lane.b32.xlu1 %v11403_v45, %s13569_s23 }
 0x44f   : > { %3970 = vst.msk [vmem:[#allocation2 + $0x150] sm:$0xff] %vm13602_vm3, %v3881_v0  ;;  %v14126_v0 = vld [vmem:[#allocation32_spill] sm:$0xff] }
 0x450   : > { %3557 = vrot.lane.b32.xlu0 %v11000_v36, %s13594_s25  ;;  %v4046_v1 = vpop.permute.xlu1 %4045 }
 0x451   : > { %4116 = vst.msk [vmem:[#allocation2 + $0x2b8] sm:$0xff] %vm13601_vm5, %v4046_v1 }
 0x452   : > { %v4012_v22 = vpop.permute.xlu0 %4011  ;;  %3888 = vrot.lane.b32.xlu1 %v14117_v43, %s14116_s0 }
 0x453   : > { %4099 = vst.msk [vmem:[#allocation2 + $0x120] sm:$0xff] %vm13601_vm5, %v4012_v22 }
 0x454   : > { %3886 = vrot.lane.b32.xlu0 %v14118_v61, %s14116_s0  ;;  %v4173_v47 = vpop.permute.xlu1 %4172 }
 0x455   : > { %4248 = vst.msk [vmem:[#allocation2 + $0x288] sm:$0xff] %vm13571_vm0, %v4173_v47 }
 0x456   : > { %v4048_v40 = vpop.permute.xlu0 %4047  ;;  %4019 = vrot.lane.b32.xlu1 %v14110_v56, %s14082_s21 }
 0x457   : > { %4117 = vst.msk [vmem:[#allocation2 + $0x2d0] sm:$0xff] %vm13601_vm5, %v4048_v40  ;;  %v14127_v40 = vld [vmem:[#allocation35_spill] sm:$0xff] }
 0x458   : > { %4017 = vrot.lane.b32.xlu0 %v14103_v10, %s14082_s21  ;;  %v4014_v36 = vpop.permute.xlu1 %4013  ;;  %v3395_v10 = vsel %vm14119_vm11, %v11018_v15, %v3394_v9  ;;  %vm13572_vm11 = vcmask 588288  }
 0x459   : > { %4100 = vst.msk [vmem:[#allocation2 + $0x138] sm:$0xff] %vm13601_vm5, %v4014_v36 }
 0x45a   : > { %v4175_v31 = vpop.permute.xlu0 %4174  ;;  %4182 = vrot.lane.b32.xlu1 %v11418_v12, %s14083_s1 }
 0x45b   : > { %4249 = vst.msk [vmem:[#allocation2 + $0x2a0] sm:$0xff] %vm13571_vm0, %v4175_v31  ;;  %v14129_v31 = vld [vmem:[#allocation13_spill] sm:$0xff] }
 0x45c   : > { %4180 = vrot.lane.b32.xlu0 %v11403_v45, %s14083_s1  ;;  %v4141_v18 = vpop.permute.xlu1 %4140 }
 0x45d   : > { %4232 = vst.msk [vmem:[#allocation2 + $0x108] sm:$0xff] %vm13571_vm0, %v4141_v18 }
 0x45e   : > { %v4016_v49 = vpop.permute.xlu0 %4015  ;;  %3918 = vrot.lane.b32.xlu1 %v3395_v10, %s14116_s0 }
 0x45f   : > { %4101 = vst.msk [vmem:[#allocation2 + $0x150] sm:$0xff] %vm13601_vm5, %v4016_v49  ;;  %v14131_v49 = vld [vmem:[#allocation10_spill] sm:$0xff] }
 0x460   : > { %3783 = vrot.lane.b32.xlu0 %v11418_v12, %s13569_s23  ;;  %v4177_v53 = vpop.permute.xlu1 %4176  ;;  %s14130_s23 = smov 5  }
 0x461   : > { %4250 = vst.msk [vmem:[#allocation2 + $0x2b8] sm:$0xff] %vm13571_vm0, %v4177_v53 }
 0x462   : > { %v4143_v11 = vpop.permute.xlu0 %4142  ;;  %4023 = vrot.lane.b32.xlu1 %v10473_v41, %s14082_s21 }
 0x463   : > { %4233 = vst.msk [vmem:[#allocation2 + $0x120] sm:$0xff] %vm13571_vm0, %v4143_v11 }
 0x464   : > { %4021 = vrot.lane.b32.xlu0 %v10466_v39, %s14082_s21  ;;  %v4310_v15 = vpop.permute.xlu1 %4309 }
 0x465   : > { %4384 = vst.msk [vmem:[#allocation2 + $0x288] sm:$0xff] %vm13600_vm12, %v4310_v15  ;;  %v8722_v15 = vld [vmem:[%s8889_s20 + $0x8] sm:$0xff] }
 0x466   : > { %v4179_v56 = vpop.permute.xlu0 %4178  ;;  %4150 = vrot.lane.b32.xlu1 %v11445_v4, %s14083_s1 }
 0x467   : > { %4251 = vst.msk [vmem:[#allocation2 + $0x2d0] sm:$0xff] %vm13571_vm0, %v4179_v56 }
 0x468   : > { %4148 = vrot.lane.b32.xlu0 %v11432_v57, %s14083_s1  ;;  %v4145_v60 = vpop.permute.xlu1 %4144 }
 0x469   : > { %4234 = vst.msk [vmem:[#allocation2 + $0x138] sm:$0xff] %vm13571_vm0, %v4145_v60 }
 0x46a   : > { %v4312_v52 = vpop.permute.xlu0 %4311  ;;  %4319 = vrot.lane.b32.xlu1 %v3397_v23, %s14091_s22 }
 0x46b   : > { %4385 = vst.msk [vmem:[#allocation2 + $0x2a0] sm:$0xff] %vm13600_vm12, %v4312_v52  ;;  %v14133_v52 = vld [vmem:[#allocation8_spill] sm:$0xff] }
 0x46c   : > { %4317 = vrot.lane.b32.xlu0 %v3395_v10, %s14091_s22  ;;  %v4278_v45 = vpop.permute.xlu1 %4277 }
 0x46d   : > { %4368 = vst.msk [vmem:[#allocation2 + $0x108] sm:$0xff] %vm13600_vm12, %v4278_v45 }
 0x46e   : > { %v4147_v35 = vpop.permute.xlu0 %4146  ;;  %4053 = vrot.lane.b32.xlu1 %v11386_v21, %s14082_s21 }
 0x46f   : > { %4235 = vst.msk [vmem:[#allocation2 + $0x150] sm:$0xff] %vm13571_vm0, %v4147_v35 }
 0x470   : > { %3920 = vrot.lane.b32.xlu0 %v3397_v23, %s14116_s0  ;;  %v4314_v16 = vpop.permute.xlu1 %4313 }
 0x471   : > { %4386 = vst.msk [vmem:[#allocation2 + $0x2b8] sm:$0xff] %vm13600_vm12, %v4314_v16  ;;  %v14134_v16 = vld [vmem:[#allocation12_spill] sm:$0xff] }
 0x472   : > { %v4280_v24 = vpop.permute.xlu0 %4279  ;;  %4154 = vrot.lane.b32.xlu1 %v10567_v59, %s14083_s1 }
 0x473   : > { %4369 = vst.msk [vmem:[#allocation2 + $0x120] sm:$0xff] %vm13600_vm12, %v4280_v24  ;;  %v8723_v24 = vld [vmem:[%s8889_s20] sm:$0xff] }
 0x474   : > { %4152 = vrot.lane.b32.xlu0 %v10556_v7, %s14083_s1  ;;  %v4445_v42 = vpop.permute.xlu1 %4444 }
 0x475   : > { %4515 = vst.msk [vmem:[#allocation2 + $0x288] sm:$0xff] %vm13599_vm7, %v4445_v42 }
 0x476   : > { %v4316_v30 = vpop.permute.xlu0 %4315  ;;  %4287 = vrot.lane.b32.xlu1 %v14117_v43, %s14091_s22 }
 0x477   : > { %4387 = vst.msk [vmem:[#allocation2 + $0x2d0] sm:$0xff] %vm13600_vm12, %v4316_v30 }
 0x478   : > { %4285 = vrot.lane.b32.xlu0 %v14118_v61, %s14091_s22  ;;  %v11552_v32 = vpop.f32.mrb[0].mxu1  ;;  %v4282_v12 = vpop.permute.xlu1 %4281 }
 0x479   : > { %4370 = vst.msk [vmem:[#allocation2 + $0x138] sm:$0xff] %vm13600_vm12, %v4282_v12  ;;  %v11555_v17 = vpop.f32.mrb[1].mxu1  ;;  %v14135_v12 = vld [vmem:[#allocation33_spill] sm:$0xff] }
 0x47a   : > { %v4447_v33 = vpop.permute.xlu0 %4446  ;;  %v8446_v57 = vpop.f32.mrb[2].mxu1  ;;  %4454 = vrot.lane.b32.xlu1 %v10996_v28, %s13592_s2 }
 0x47b   : > { %4516 = vst.msk [vmem:[#allocation2 + $0x2a0] sm:$0xff] %vm13599_vm7, %v4447_v33  ;;  %v11569_v50 = vadd.f32 %v8446_v57, %v11563_v3  ;;  %v11571_v48 = vpop.f32.mrb[3].mxu1  ;;  %v14136_v33 = vld [vmem:[#allocation14_spill] sm:$0xff] }
 0x47c   : > { %4452 = vrot.lane.b32.xlu0 %v11386_v21, %s13592_s2  ;;  %v4413_v5 = vpop.permute.xlu1 %4412 }
 0x47d   : > { %v13576_v27 = vmax.f32 %v11569_v50, 0.0  ;;  %4499 = vst.msk [vmem:[#allocation2 + $0x108] sm:$0xff] %vm13599_vm7, %v4413_v5 }
 0x47e   : > { %v4284_v4 = vpop.permute.xlu0 %4283  ;;  %4184 = vrot.lane.b32.xlu1 %v11580_v51, %s14083_s1 }
 0x47f   : > { %4990 = vst.msk [vmem:[#allocation2 + $0x1c8] sm:$0xff] %vm14124_vm10, %v13576_v27  ;;  %vm13573_vm10 = vcmask 450944  }
 0x480   : > { %4371 = vst.msk [vmem:[#allocation2 + $0x150] sm:$0xff] %vm13600_vm12, %v4284_v4  ;;  %4055 = vrot.lane.b32.xlu0 %v10996_v28, %s14082_s21  ;;  %v4449_v20 = vpop.permute.xlu1 %4448  ;;  %v14137_v4 = vld [vmem:[#allocation22_spill] sm:$0xff] }
 0x481   : > { %4517 = vst.msk [vmem:[#allocation2 + $0x2b8] sm:$0xff] %vm13599_vm7, %v4449_v20 }
 0x482   : > { %v4415_v58 = vpop.permute.xlu0 %4414  ;;  %4291 = vrot.lane.b32.xlu1 %v10570_v54, %s14091_s22 }
 0x483   : > { %4500 = vst.msk [vmem:[#allocation2 + $0x120] sm:$0xff] %vm13599_vm7, %v4415_v58 }
 0x484   : > { %4289 = vrot.lane.b32.xlu0 %v10546_v8, %s14091_s22  ;;  %v4576_v37 = vpop.permute.xlu1 %4575 }
 0x485   : > { %4649 = vst.msk [vmem:[#allocation2 + $0x288] sm:$0xff] %vm13598_vm6, %v4576_v37 }
 0x486   : > { %v4451_v6 = vpop.permute.xlu0 %4450  ;;  %4422 = vrot.lane.b32.xlu1 %v10473_v41, %s13592_s2 }
 0x487   : > { %4518 = vst.msk [vmem:[#allocation2 + $0x2d0] sm:$0xff] %vm13599_vm7, %v4451_v6  ;;  %v14138_v6 = vld [vmem:[#allocation21_spill] sm:$0xff] }
 0x488   : > { %4420 = vrot.lane.b32.xlu0 %v10466_v39, %s13592_s2  ;;  %v11602_v25 = vpop.f32.mrb[32].mxu0  ;;  %v3552_v54 = vpop.permute.xlu1 %3551 }
 0x489   : > { %3622 = vst.msk [vmem:[#allocation2 + $0x2e8] sm:$0xff] %vm13609_vm1, %v3552_v54  ;;  %v11605_v19 = vpop.f32.mrb[33].mxu0 }
 0x48a   : > { %v4578_v8 = vpop.permute.xlu0 %4577  ;;  %v8430_v63 = vpop.f32.mrb[34].mxu0  ;;  %4585 = vrot.lane.b32.xlu1 %v11558_v13, %s13590_s29 }
 0x48b   : > { %4650 = vst.msk [vmem:[#allocation2 + $0x2a0] sm:$0xff] %vm13598_vm6, %v4578_v8  ;;  %v11611_v41 = vadd.f32 %v8430_v63, %v11563_v3  ;;  %v11613_v14 = vpop.f32.mrb[35].mxu0  ;;  %v14139_v63 = vld [vmem:[#allocation19_spill] sm:$0xff] }
 0x48c   : > { %4583 = vrot.lane.b32.xlu0 %v11580_v51, %s13590_s29  ;;  %v4417_v39 = vpop.permute.xlu1 %4416  ;;  %v4680_v26 = vld [vmem:[#allocation2 + $0x288] sm:$0xff] }
 0x48d   : > { %v13582_v46 = vmax.f32 %v11611_v41, 0.0  ;;  %4501 = vst.msk [vmem:[#allocation2 + $0x138] sm:$0xff] %vm13599_vm7, %v4417_v39 }
 0x48e   : > { %v3554_v38 = vpop.permute.xlu0 %3553  ;;  %4321 = vrot.lane.b32.xlu1 %v11022_v29, %s14091_s22 }
 0x48f   : > { %4974 = vst.msk [vmem:[#allocation2 + $0x48] sm:$0xff] %vm14125_vm2, %v13582_v46 }
 0x490   : > { %3623 = vst.msk [vmem:[#allocation2 + $0x300] sm:$0xff] %vm13609_vm1, %v3554_v38  ;;  %4186 = vrot.lane.b32.xlu0 %v11558_v13, %s14083_s1  ;;  %v4544_v44 = vpop.permute.xlu1 %4543 }
 0x491   : > { %4633 = vst.msk [vmem:[#allocation2 + $0x108] sm:$0xff] %vm13598_vm6, %v4544_v44  ;;  %v14140_v44 = vld [vmem:[#allocation20_spill] sm:$0xff] }
 0x492   : > { %v4419_v62 = vpop.permute.xlu0 %4418  ;;  %4426 = vrot.lane.b32.xlu1 %v10532_v34, %s13592_s2  ;;  %v4681_v2 = vld [vmem:[#allocation2 + $0x2a0] sm:$0xff] }
 0x493   : > { %4502 = vst.msk [vmem:[#allocation2 + $0x150] sm:$0xff] %vm13599_vm7, %v4419_v62  ;;  %v4700_v55 = vpack.c.bf16 %v4681_v2, %v4680_v26  ;;  %v11639_v34 = vld [vmem:[#allocation2] sm:$0xff]  ;;  %v14141_v2 = vld [vmem:[#allocation37_spill] sm:$0xff] }
 0x494   : > { %4424 = vrot.lane.b32.xlu0 %v14126_v0, %s13592_s2  ;;  %v4580_v1 = vpop.permute.xlu1 %4579 }
 0x495   : > { %4651 = vst.msk [vmem:[#allocation2 + $0x2b8] sm:$0xff] %vm13598_vm6, %v4580_v1  ;;  %8451 = vmatprep.mubr.bf16.mxu1 %v4700_v55  ;;  %v14142_v55 = vld [vmem:[#allocation36_spill] sm:$0xff] }
 0x496   : > { %v4546_v22 = vpop.permute.xlu0 %4545  ;;  %4553 = vrot.lane.b32.xlu1 %v10567_v59, %s13590_s29  ;;  %v11636_v43 = vld [vmem:[#allocation2 + $0x48] sm:$0xff]  ;;  %v14128_v59 = vld [vmem:[#allocation34_spill] sm:$0xff] }
 0x497   : > { %4634 = vst.msk [vmem:[#allocation2 + $0x120] sm:$0xff] %vm13598_vm6, %v4546_v22  ;;  %5387 = vst [vmem:[#allocation2 + $0x48] sm:$0xff] %v11639_v34 }
 0x498   : > { %4551 = vrot.lane.b32.xlu0 %v10556_v7, %s13590_s29  ;;  %v3520_v61 = vpop.permute.xlu1 %3519  ;;  %v4664_v7 = vld [vmem:[#allocation2 + $0x108] sm:$0xff] }
 0x499   : > { %3606 = vst.msk [vmem:[#allocation2 + $0x168] sm:$0xff] %vm13609_vm1, %v3520_v61 }
 0x49a   : > { %v4582_v47 = vpop.permute.xlu0 %4581  ;;  %4557 = vrot.lane.b32.xlu1 %v14127_v40, %s13590_s29 }
 0x49b   : > { %4652 = vst.msk [vmem:[#allocation2 + $0x2d0] sm:$0xff] %vm13598_vm6, %v4582_v47 }
 0x49c   : > { %4555 = vrot.lane.b32.xlu0 %v14128_v59, %s13590_s29  ;;  %v3778_v36 = vpop.permute.xlu1 %3777  ;;  %v4682_v56 = vld [vmem:[#allocation2 + $0x2b8] sm:$0xff] }
 0x49d   : > { %3851 = vst.msk [vmem:[#allocation2 + $0x2e8] sm:$0xff] %vm13604_vm9, %v3778_v36 }
 0x49e   : > { %v3522_v9 = vpop.permute.xlu0 %3521  ;;  %2384 = vrot.lane.b32.xlu1 %v14129_v31, %s13687_s24  ;;  %v4665_v18 = vld [vmem:[#allocation2 + $0x120] sm:$0xff] }
 0x49f   : > { %3607 = vst.msk [vmem:[#allocation2 + $0x180] sm:$0xff] %vm13609_vm1, %v3522_v9  ;;  %v4692_v10 = vpack.c.bf16 %v4665_v18, %v4664_v7 }
 0x4a0   : > { %2247 = vrot.lane.b32.xlu0 %v14131_v49, %s14130_s23  ;;  %v4548_v53 = vpop.permute.xlu1 %4547  ;;  %s14399_s23 = smov 1  }
 0x4a1   : > { %4635 = vst.msk [vmem:[#allocation2 + $0x138] sm:$0xff] %vm13598_vm6, %v4548_v53  ;;  %8435 = vmatprep.mubr.bf16.mxu0 %v4692_v10 }
 0x4a2   : > { %v3780_v11 = vpop.permute.xlu0 %3779  ;;  %2519 = vrot.lane.b32.xlu1 %v8722_v15, %s14132_s19  ;;  %v4683_v60 = vld [vmem:[#allocation2 + $0x2d0] sm:$0xff] }
 0x4a3   : > { %3852 = vst.msk [vmem:[#allocation2 + $0x300] sm:$0xff] %vm13604_vm9, %v3780_v11  ;;  %v4701_v23 = vpack.c.bf16 %v4683_v60, %v4682_v56 }
 0x4a4   : > { %2382 = vrot.lane.b32.xlu0 %v14133_v52, %s13687_s24  ;;  %v3524_v45 = vpop.permute.xlu1 %3523  ;;  %s14422_s24 = sld [smem:[#allocation47_spill]] }
 0x4a5   : > { %3608 = vst.msk [vmem:[#allocation2 + $0x198] sm:$0xff] %vm13609_vm1, %v3524_v45  ;;  %8452 = vmatmul.mubr.bf16.gmra.mrb[8].mxu1 %v4701_v23 }
 0x4a6   : > { %v4550_v35 = vpop.permute.xlu0 %4549  ;;  %2650 = vrot.lane.b32.xlu1 %v14134_v16, %s13594_s25 }
 0x4a7   : > { %4636 = vst.msk [vmem:[#allocation2 + $0x150] sm:$0xff] %vm13598_vm6, %v4550_v35 }
 0x4a8   : > { %2517 = vrot.lane.b32.xlu0 %v8723_v24, %s14132_s19  ;;  %v3746_v42 = vpop.permute.xlu1 %3745  ;;  %v4666_v20 = vld [vmem:[#allocation2 + $0x138] sm:$0xff]  ;;  %s13618_s19 = smov 112  }
 0x4a9   : > { %3835 = vst.msk [vmem:[#allocation2 + $0x168] sm:$0xff] %vm13604_vm9, %v3746_v42 }
 0x4aa   : > { %v3526_v30 = vpop.permute.xlu0 %3525  ;;  %4122 = vrot.lane.b32.xlu1 %v14135_v12, %s14083_s1 }
 0x4ab   : > { %3609 = vst.msk [vmem:[#allocation2 + $0x1b0] sm:$0xff] %vm13609_vm1, %v3526_v30 }
 0x4ac   : > { %2648 = vrot.lane.b32.xlu0 %v14136_v33, %s13594_s25  ;;  %v3915_v57 = vpop.permute.xlu1 %3914 }
 0x4ad   : > { %3987 = vst.msk [vmem:[#allocation2 + $0x2e8] sm:$0xff] %vm13602_vm3, %v3915_v57 }
 0x4ae   : > { %v3748_v5 = vpop.permute.xlu0 %3747  ;;  %4259 = vrot.lane.b32.xlu1 %v14137_v4, %s14091_s22  ;;  %v4667_v58 = vld [vmem:[#allocation2 + $0x150] sm:$0xff] }
 0x4af   : > { %3836 = vst.msk [vmem:[#allocation2 + $0x180] sm:$0xff] %vm13604_vm9, %v3748_v5  ;;  %v4693_v37 = vpack.c.bf16 %v4667_v58, %v4666_v20 }
 0x4b0   : > { %4257 = vrot.lane.b32.xlu0 %v14138_v6, %s14091_s22  ;;  %v3556_v54 = vpop.permute.xlu1 %3555 }
 0x4b1   : > { %3624 = vst.msk [vmem:[#allocation2 + $0x318] sm:$0xff] %vm13609_vm1, %v3556_v54  ;;  %8436 = vmatmul.mubr.bf16.gmra.mrb[40].mxu0 %v4693_v37 }
 0x4b2   : > { %v3917_v8 = vpop.permute.xlu0 %3916  ;;  %4392 = vrot.lane.b32.xlu1 %v14139_v63, %s13592_s2 }
 0x4b3   : > { %3988 = vst.msk [vmem:[#allocation2 + $0x300] sm:$0xff] %vm13602_vm3, %v3917_v8 }
 0x4b4   : > { %2646 = vrot.lane.b32.xlu0 %v14131_v49, %s13594_s25  ;;  %v3752_v39 = vpop.permute.xlu1 %3751  ;;  %s14268_s25 = smov 64  }
 0x4b5   : > { %3838 = vst.msk [vmem:[#allocation2 + $0x1b0] sm:$0xff] %vm13604_vm9, %v3752_v39 }
 0x4b6   : > { %v3750_v38 = vpop.permute.xlu0 %3749  ;;  %4521 = vrot.lane.b32.xlu1 %v14135_v12, %s13590_s29 }
 0x4b7   : > { %3837 = vst.msk [vmem:[#allocation2 + $0x198] sm:$0xff] %vm13604_vm9, %v3750_v38 }
 0x4b8   : > { %4394 = vrot.lane.b32.xlu0 %v14140_v44, %s13592_s2  ;;  %v3885_v62 = vpop.permute.xlu1 %3884 }
 0x4b9   : > { %3972 = vst.msk [vmem:[#allocation2 + $0x180] sm:$0xff] %vm13602_vm3, %v3885_v62 }
 0x4ba   : > { %v3883_v26 = vpop.permute.xlu0 %3882  ;;  %4525 = vrot.lane.b32.xlu1 %v14141_v2, %s13590_s29 }
 0x4bb   : > { %3971 = vst.msk [vmem:[#allocation2 + $0x168] sm:$0xff] %vm13602_vm3, %v3883_v26 }
 0x4bc   : > { %4523 = vrot.lane.b32.xlu0 %v14142_v55, %s13590_s29  ;;  %v4052_v0 = vpop.permute.xlu1 %4051  ;;  %s13621_s29 = smov 80  }
 0x4bd   : > { %4119 = vst.msk [vmem:[#allocation2 + $0x300] sm:$0xff] %vm13601_vm5, %v4052_v0 }
 0x4be   : > { %v4050_v1 = vpop.permute.xlu0 %4049 }
 0x4bf   : > { %4118 = vst.msk [vmem:[#allocation2 + $0x2e8] sm:$0xff] %vm13601_vm5, %v4050_v1 }
 0x4c0   : > { %v3782_v22 = vpop.permute.xlu1 %3781 }
 0x4c1   : > { %3853 = vst.msk [vmem:[#allocation2 + $0x318] sm:$0xff] %vm13604_vm9, %v3782_v22 }
 0x4c2   : > { %v3558_v61 = vpop.permute.xlu0 %3557 }
 0x4c3   : > { %3625 = vst.msk [vmem:[#allocation2 + $0x330] sm:$0xff] %vm13609_vm1, %v3558_v61 }
 0x4c4   : > { %v3889_v47 = vpop.permute.xlu1 %3888 }
 0x4c5   : > { %3974 = vst.msk [vmem:[#allocation2 + $0x1b0] sm:$0xff] %vm13602_vm3, %v3889_v47 }
 0x4c6   : > { %v3887_v40 = vpop.permute.xlu0 %3886 }
 0x4c7   : > { %3973 = vst.msk [vmem:[#allocation2 + $0x198] sm:$0xff] %vm13602_vm3, %v3887_v40 }
 0x4c8   : > { %v4020_v59 = vpop.permute.xlu1 %4019 }
 0x4c9   : > { %4103 = vst.msk [vmem:[#allocation2 + $0x180] sm:$0xff] %vm13601_vm5, %v4020_v59 }
 0x4ca   : > { %v4018_v36 = vpop.permute.xlu0 %4017 }
 0x4cb   : > { %4102 = vst.msk [vmem:[#allocation2 + $0x168] sm:$0xff] %vm13601_vm5, %v4018_v36 }
 0x4cc   : > { %v4183_v9 = vpop.permute.xlu1 %4182 }
 0x4cd   : > { %4253 = vst.msk [vmem:[#allocation2 + $0x300] sm:$0xff] %vm13571_vm0, %v4183_v9 }
 0x4ce   : > { %v4181_v31 = vpop.permute.xlu0 %4180 }
 0x4cf   : > { %4252 = vst.msk [vmem:[#allocation2 + $0x2e8] sm:$0xff] %vm13571_vm0, %v4181_v31 }
 0x4d0   : > { %v3919_v7 = vpop.permute.xlu1 %3918 }
 0x4d1   : > { %3989 = vst.msk [vmem:[#allocation2 + $0x318] sm:$0xff] %vm13602_vm3, %v3919_v7 }
 0x4d2   : > { %v3784_v18 = vpop.permute.xlu0 %3783 }
 0x4d3   : > { %3854 = vst.msk [vmem:[#allocation2 + $0x330] sm:$0xff] %vm13604_vm9, %v3784_v18 }
 0x4d4   : > { %v4024_v10 = vpop.permute.xlu1 %4023 }
 0x4d5   : > { %4105 = vst.msk [vmem:[#allocation2 + $0x1b0] sm:$0xff] %vm13601_vm5, %v4024_v10 }
 0x4d6   : > { %v4022_v49 = vpop.permute.xlu0 %4021 }
 0x4d7   : > { %4104 = vst.msk [vmem:[#allocation2 + $0x198] sm:$0xff] %vm13601_vm5, %v4022_v49 }
 0x4d8   : > { %v4151_v53 = vpop.permute.xlu1 %4150 }
 0x4d9   : > { %4237 = vst.msk [vmem:[#allocation2 + $0x180] sm:$0xff] %vm13571_vm0, %v4151_v53 }
 0x4da   : > { %v4149_v11 = vpop.permute.xlu0 %4148 }
 0x4db   : > { %4236 = vst.msk [vmem:[#allocation2 + $0x168] sm:$0xff] %vm13571_vm0, %v4149_v11 }
 0x4dc   : > { %v4320_v15 = vpop.permute.xlu1 %4319 }
 0x4dd   : > { %4389 = vst.msk [vmem:[#allocation2 + $0x300] sm:$0xff] %vm13600_vm12, %v4320_v15 }
 0x4de   : > { %v4318_v56 = vpop.permute.xlu0 %4317 }
 0x4df   : > { %4388 = vst.msk [vmem:[#allocation2 + $0x2e8] sm:$0xff] %vm13600_vm12, %v4318_v56 }
 0x4e0   : > { %v4054_v60 = vpop.permute.xlu1 %4053 }
 0x4e1   : > { %4120 = vst.msk [vmem:[#allocation2 + $0x318] sm:$0xff] %vm13601_vm5, %v4054_v60 }
 0x4e2   : > { %v3921_v23 = vpop.permute.xlu0 %3920 }
 0x4e3   : > { %3990 = vst.msk [vmem:[#allocation2 + $0x330] sm:$0xff] %vm13602_vm3, %v3921_v23  ;;  %vm14241_vm3 = vcmask 1040384  }
 0x4e4   : > { %v4155_v52 = vpop.permute.xlu1 %4154  ;;  %vm14243_vm13 = vmmov %vm14241_vm3 }
 0x4e5   : > { %4239 = vst.msk [vmem:[#allocation2 + $0x1b0] sm:$0xff] %vm13571_vm0, %v4155_v52 }
 0x4e6   : > { %v4153_v45 = vpop.permute.xlu0 %4152 }
 0x4e7   : > { %4238 = vst.msk [vmem:[#allocation2 + $0x198] sm:$0xff] %vm13571_vm0, %v4153_v45 }
 0x4e8   : > { %v4288_v35 = vpop.permute.xlu1 %4287 }
 0x4e9   : > { %4373 = vst.msk [vmem:[#allocation2 + $0x180] sm:$0xff] %vm13600_vm12, %v4288_v35 }
 0x4ea   : > { %v4286_v16 = vpop.permute.xlu0 %4285 }
 0x4eb   : > { %4372 = vst.msk [vmem:[#allocation2 + $0x168] sm:$0xff] %vm13600_vm12, %v4286_v16  ;;  %v11773_v16 = vadd.f32 %v11563_v3, %v11555_v17 }
 0x4ec   : > { %v4455_v24 = vpop.permute.xlu1 %4454 }
 0x4ed   : > { %4520 = vst.msk [vmem:[#allocation2 + $0x300] sm:$0xff] %vm13599_vm7, %v4455_v24 }
 0x4ee   : > { %v4453_v42 = vpop.permute.xlu0 %4452 }
 0x4ef   : > { %4519 = vst.msk [vmem:[#allocation2 + $0x2e8] sm:$0xff] %vm13599_vm7, %v4453_v42 }
 0x4f0   : > { %v4185_v30 = vpop.permute.xlu1 %4184 }
 0x4f1   : > { %4254 = vst.msk [vmem:[#allocation2 + $0x318] sm:$0xff] %vm13571_vm0, %v4185_v30  ;;  %vm14145_vm0 = vmmov %vm14125_vm2 }
 0x4f2   : > { %v4056_v12 = vpop.permute.xlu0 %4055 }
 0x4f3   : > { %4121 = vst.msk [vmem:[#allocation2 + $0x330] sm:$0xff] %vm13601_vm5, %v4056_v12 }
 0x4f4   : > { %v4292_v33 = vpop.permute.xlu1 %4291 }
 0x4f5   : > { %4375 = vst.msk [vmem:[#allocation2 + $0x1b0] sm:$0xff] %vm13600_vm12, %v4292_v33 }
 0x4f6   : > { %v4290_v57 = vpop.permute.xlu0 %4289 }
 0x4f7   : > { %4374 = vst.msk [vmem:[#allocation2 + $0x198] sm:$0xff] %vm13600_vm12, %v4290_v57 }
 0x4f8   : > { %v8449_v5 = vpop.f32.mrb[4].mxu1  ;;  %v4423_v4 = vpop.permute.xlu1 %4422 }
 0x4f9   : > { %v4898_v20 = vadd.f32 %v8449_v5, %v11563_v3  ;;  %4504 = vst.msk [vmem:[#allocation2 + $0x180] sm:$0xff] %vm13599_vm7, %v4423_v4  ;;  %v4889_v58 = vpop.f32.mrb[5].mxu1 }
 0x4fa   : > { %v4890_v37 = vadd.f32 %v11563_v3, %v4889_v58  ;;  %v4421_v6 = vpop.permute.xlu0 %4420  ;;  %v8450_v54 = vpop.f32.mrb[6].mxu1 }
 0x4fb   : > { %v4958_v8 = vmax.f32 %v4898_v20, 0.0  ;;  %4503 = vst.msk [vmem:[#allocation2 + $0x168] sm:$0xff] %vm13599_vm7, %v4421_v6  ;;  %v4901_v63 = vadd.f32 %v8450_v54, %v11563_v3  ;;  %v4892_v39 = vpop.f32.mrb[7].mxu1 }
 0x4fc   : > { %v4956_v38 = vmax.f32 %v4890_v37, 0.0  ;;  %v4893_v44 = vadd.f32 %v11563_v3, %v4892_v39  ;;  %v4586_v62 = vpop.permute.xlu1 %4585 }
 0x4fd   : > { %4993 = vst.msk [vmem:[#allocation2 + $0x210] sm:$0xff] %vm14143_vm4, %v4958_v8  ;;  %v4959_v26 = vmax.f32 %v4901_v63, 0.0  ;;  %vm13575_vm4 = vcmask 391488  }
 0x4fe   : > { %4655 = vst.msk [vmem:[#allocation2 + $0x300] sm:$0x7f] %vm13572_vm11, %v4586_v62  ;;  %v4957_v2 = vmax.f32 %v4893_v44, 0.0  ;;  %v4584_v55 = vpop.permute.xlu0 %4583  ;;  %v11799_v44 = vadd.f32 %v11552_v32, %v11563_v3  ;;  %v13579_v62 = vmax.f32 %v11773_v16, 0.0  ;;  %vm14152_vm11 = vmmov %vm14145_vm0 }
 0x4ff   : > { %4991 = vst.msk [vmem:[#allocation2 + $0x1e0] sm:$0xff] %vm14144_vm8, %v4956_v38  ;;  %v11738_v0 = vpack.c.bf16 %v4959_v26, %v4958_v8  ;;  %vm14146_vm8 = vmmov %vm14145_vm0 }
 0x500   : > { %4994 = vst.msk [vmem:[#allocation2 + $0x228] sm:$0xff] %vm14125_vm2, %v4959_v26  ;;  %v11742_v1 = vpack.c.bf16 %v4957_v2, %v4956_v38  ;;  %v4322_v22 = vpop.permute.xlu1 %4321  ;;  %vm14147_vm2 = vcmask 1046528  }
 0x501   : > { %4653 = vst.msk [vmem:[#allocation2 + $0x2e8] sm:$0xff] %vm13598_vm6, %v4584_v55 }
 0x502   : > { %4992 = vst.msk [vmem:[#allocation2 + $0x1f8] sm:$0xff] %vm14145_vm0, %v4957_v2  ;;  %v4187_v61 = vpop.permute.xlu0 %4186 }
 0x503   : > { %4391 = vst.msk [vmem:[#allocation2 + $0x318] sm:$0x1] %vm13573_vm10, %v4322_v22  ;;  %vm14154_vm10 = vcmask 64568  }
 0x504   : > { %4256 = vst.msk [vmem:[#allocation2 + $0x330] sm:$0x7f] %vm13575_vm4, %v4187_v61  ;;  %v4427_v47 = vpop.permute.xlu1 %4426  ;;  %v11746_v59 = vld [vmem:[#allocation2 + $0x210] sm:$0xff]  ;;  %v11811_v61 = vadd.f32 %v11563_v3, %v11571_v48 }
 0x505   : > { %v4685_v40 = vld [vmem:[#allocation2 + $0x300] sm:$0xff]  ;;  %4506 = vst.msk [vmem:[#allocation2 + $0x1b0] sm:$0xff] %vm13599_vm7, %v4427_v47  ;;  %v5113_v49 = vrot.slane %v11746_v59, 1 }
 0x506   : > { %4968 = vst.msk [vmem:[#allocation2 + $0x300] sm:$0xff] %vm14146_vm8, %v11639_v34  ;;  %v11751_v36 = vld [vmem:[#allocation2 + $0x1e0] sm:$0xff]  ;;  %v4425_v9 = vpop.permute.xlu0 %4424  ;;  %vm14148_vm8 = vmmov %vm14147_vm2  ;;  %v13578_v48 = vmax.f32 %v11811_v61, 0.0 }
 0x507   : > { %v11753_v7 = vld [vmem:[#allocation2 + $0x228] sm:$0xff]  ;;  %4505 = vst.msk [vmem:[#allocation2 + $0x198] sm:$0xff] %vm13599_vm7, %v4425_v9  ;;  %v5109_v60 = vrot.slane %v11751_v36, 1 }
 0x508   : > { %v4684_v31 = vld [vmem:[#allocation2 + $0x2e8] sm:$0xff]  ;;  %v5115_v53 = vrot.slane %v11753_v7, 1  ;;  %v8433_v11 = vpop.f32.mrb[36].mxu0  ;;  %v4554_v15 = vpop.permute.xlu1 %4553 }
 0x509   : > { %v4702_v18 = vpack.c.bf16 %v4685_v40, %v4684_v31  ;;  %v11756_v10 = vld [vmem:[#allocation2 + $0x1f8] sm:$0xff]  ;;  %v4834_v52 = vadd.f32 %v8433_v11, %v11563_v3  ;;  %4638 = vst.msk [vmem:[#allocation2 + $0x180] sm:$0xff] %vm13598_vm6, %v4554_v15  ;;  %v4825_v45 = vpop.f32.mrb[37].mxu0  ;;  %v13577_v40 = vmax.f32 %v11799_v44, 0.0 }
 0x50a   : > { %v4686_v56 = vld [vmem:[#allocation2 + $0x318] sm:$0xff]  ;;  %v5111_v23 = vrot.slane %v11756_v10, 1  ;;  %v5116_v35 = vsel %vm14147_vm2, %v5113_v49, %v5115_v53  ;;  %v4826_v24 = vadd.f32 %v11563_v3, %v4825_v45  ;;  %v4552_v42 = vpop.permute.xlu0 %4551  ;;  %v8434_v30 = vpop.f32.mrb[38].mxu0  ;;  %vm14149_vm2 = vmmov %vm14145_vm0 }
 0x50b   : > { %8455 = vmatprep.mubr.bf16.mxu1 %v4702_v18  ;;  %4969 = vst.msk [vmem:[#allocation2 + $0x318] sm:$0xff] %vm14145_vm0, %v11639_v34  ;;  %v4687_v12 = vld [vmem:[#allocation2 + $0x330] sm:$0xff]  ;;  %v11782_v57 = vmax.f32 %v11746_v59, %v5116_v35  ;;  %v4942_v5 = vmax.f32 %v4834_v52, 0.0  ;;  %v4837_v17 = vadd.f32 %v8434_v30, %v11563_v3  ;;  %v4828_v4 = vpop.f32.mrb[39].mxu0 }
 0x50c   : > { %v5112_v33 = vsel %vm14148_vm8, %v5109_v60, %v5111_v23  ;;  %4637 = vst.msk [vmem:[#allocation2 + $0x168] sm:$0xff] %vm13598_vm6, %v4552_v42  ;;  %v4703_v20 = vpack.c.bf16 %v4687_v12, %v4686_v56  ;;  %v4940_v37 = vmax.f32 %v4826_v24, 0.0  ;;  %v4829_v6 = vadd.f32 %v11563_v3, %v4828_v4  ;;  %v4558_v54 = vpop.permute.xlu1 %4557  ;;  %vm14150_vm8 = vmmov %vm14145_vm0 }
 0x50d   : > { %4970 = vst.msk [vmem:[#allocation2 + $0x330] sm:$0xff] %vm14145_vm0, %v11639_v34  ;;  %v11789_v58 = vmax.f32 %v11751_v36, %v5112_v33  ;;  %v4943_v8 = vmax.f32 %v4837_v17, 0.0 }
 0x50e   : > { %4977 = vst.msk [vmem:[#allocation2 + $0x90] sm:$0xff] %vm14149_vm2, %v4942_v5  ;;  %8456 = vmatmul.mubr.bf16.gmra.mrb[12].mxu1 %v4703_v20  ;;  %v4941_v39 = vmax.f32 %v4829_v6, 0.0  ;;  %v4556_v38 = vpop.permute.xlu0 %4555  ;;  %vm14151_vm2 = vmmov %vm14145_vm0  ;;  %v5022_v20 = vld [vmem:[#allocation2 + $0x1c8] sm:$0xff] }
 0x50f   : > { %4640 = vst.msk [vmem:[#allocation2 + $0x1b0] sm:$0xff] %vm13598_vm6, %v4558_v54  ;;  %v5243_v63 = vmax.f32 %v11789_v58, %v11782_v57  ;;  %v11803_v26 = vpack.c.bf16 %v4943_v8, %v4942_v5  ;;  %4639 = vst.msk [vmem:[#allocation2 + $0x198] sm:$0xff] %vm13598_vm6, %v4556_v38 }
 0x510   : > { %4975 = vst.msk [vmem:[#allocation2 + $0x60] sm:$0xff] %vm14150_vm8, %v4940_v37  ;;  %v11807_v2 = vpack.c.bf16 %v4941_v39, %v4940_v37  ;;  %v2385_v55 = vpop.permute.xlu1 %2384  ;;  %vm2346_vm8 = vcmask 48175   ;;  %v4669_v22 = vld [vmem:[#allocation2 + $0x180] sm:$0xff] }
 0x511   : > { %4978 = vst.msk [vmem:[#allocation2 + $0xa8] sm:$0xff] %vm14145_vm0, %v4943_v8  ;;  %vm14153_vm0 = vcmask 56368  }
 0x512   : > { %4976 = vst.msk [vmem:[#allocation2 + $0x78] sm:$0xff] %vm14151_vm2, %v4941_v39  ;;  %v2248_v32 = vpop.permute.xlu0 %2247  ;;  %vm2481_vm2 = vcmask 56369  }
 0x513   : > { %4987 = vst.msk [vmem:[#allocation2 + $0x180] sm:$0xff] %vm14152_vm11, %v13579_v62  ;;  %v4668_v47 = vld [vmem:[#allocation2 + $0x168] sm:$0xff] }
 0x514   : > { %2347 = vst.msk [vmem:[#allocation2 + $0x30] sm:$0x80] %vm2346_vm8, %v2248_v32  ;;  %v4694_v9 = vpack.c.bf16 %v4669_v22, %v4668_v47  ;;  %v2520_v31 = vpop.permute.xlu1 %2519  ;;  %vm14155_vm8 = vmmov %vm14152_vm11  ;;  %v5107_v22 = vrot.slane %v5022_v20, 1 }
 0x515   : > { %2484 = vst.msk [vmem:[#allocation2 + $0x30] sm:$0xff] %vm14153_vm0, %v2385_v55  ;;  %v11818_v11 = vld [vmem:[#allocation2 + $0x90] sm:$0xff]  ;;  %vm14157_vm0 = vcmask 1046528  }
 0x516   : > { %v4671_v18 = vld [vmem:[#allocation2 + $0x1b0] sm:$0xff]  ;;  %2615 = vst.msk [vmem:[#allocation2 + $0x30] sm:$0xff] %vm14154_vm10, %v2520_v31  ;;  %8439 = vmatprep.mubr.bf16.mxu0 %v4694_v9  ;;  %v2383_v56 = vpop.permute.xlu0 %2382  ;;  %v4670_v52 = vld [vmem:[#allocation2 + $0x198] sm:$0xff]  ;;  %v5081_v42 = vrot.slane %v11818_v11, 1  ;;  %vm14156_vm10 = vcmask 72768   ;;  %vm14162_vm4 = vmmov %vm14157_vm0 }
 0x517   : > { %4989 = vst.msk [vmem:[#allocation2 + $0x1b0] sm:$0xff] %vm14152_vm11, %v13577_v40  ;;  %v11825_v15 = vld [vmem:[#allocation2 + $0x60] sm:$0xff]  ;;  %v4695_v35 = vpack.c.bf16 %v4671_v18, %v4670_v52  ;;  %vm14158_vm11 = vmmov %vm14157_vm0 }
 0x518   : > { %v11827_v45 = vld [vmem:[#allocation2 + $0xa8] sm:$0xff]  ;;  %2482 = vst.msk [vmem:[#allocation2 + $0x18] sm:$0xfe] %vm2481_vm2, %v2383_v56  ;;  %v2651_v12 = vpop.permute.xlu1 %2650  ;;  %v5077_v33 = vrot.slane %v11825_v15, 1  ;;  %vm13574_vm2 = vcmask 392519  }
 0x519   : > { %4988 = vst.msk [vmem:[#allocation2 + $0x198] sm:$0xff] %vm14155_vm8, %v13578_v48  ;;  %v11832_v24 = vld [vmem:[#allocation2 + $0x78] sm:$0xff]  ;;  %v5083_v30 = vrot.slane %v11827_v45, 1  ;;  %8440 = vmatmul.mubr.bf16.gmra.mrb[44].mxu0 %v4695_v35  ;;  %vm14159_vm8 = vcmask 64568  }
 0x51a   : > { %v5079_v5 = vrot.slane %v11832_v24, 1  ;;  %2749 = vst.msk [vmem:[#allocation2 + $0x30] sm:$0xff] %vm14156_vm10, %v2651_v12  ;;  %v2518_v4 = vpop.permute.xlu0 %2517  ;;  %v11856_v39 = vld [vmem:[#allocation2 + $0x180] sm:$0xff] }
 0x51b   : > { %v5084_v17 = vsel %vm14157_vm0, %v5081_v42, %v5083_v30  ;;  %2614 = vst.msk [vmem:[#allocation2 + $0x18] sm:$0xff] %vm14159_vm8, %v2518_v4  ;;  %v13586_v31 = vrot.slane %v11856_v39, 1  ;;  %vm13581_vm8 = vcmask 458113   ;;  %v14208_v21 = vrot.slane %v11856_v39, 1 }
 0x51c   : > { %v5080_v37 = vsel %vm14158_vm11, %v5077_v33, %v5079_v5  ;;  %v11850_v6 = vmax.f32 %v11818_v11, %v5084_v17  ;;  %v4123_v8 = vpop.permute.xlu1 %4122  ;;  %vm14160_vm11 = vmmov %vm14157_vm0 }
 0x51d   : > { %v11854_v54 = vmax.f32 %v11825_v15, %v5080_v37  ;;  %4222 = vst.msk [vmem:[#allocation2 + $0x30] sm:$0x80] %vm13574_vm2, %v4123_v8  ;;  %v5110_v52 = vsel %vm14160_vm11, %v5107_v22, %v5109_v60  ;;  %vm14161_vm2 = vmmov %vm14157_vm0  ;;  %v11880_v60 = vadd.f32 %v11563_v3, %v11605_v19 }
 0x51e   : > { %v5021_v38 = vld [vmem:[#allocation2 + $0x1b0] sm:$0xff]  ;;  %v2649_v47 = vpop.permute.xlu0 %2648  ;;  %v5186_v36 = vmax.f32 %v5022_v20, %v5110_v52  ;;  %v11887_v20 = vadd.f32 %v11602_v25, %v11563_v3 }
 0x51f   : > { %v5105_v55 = vrot.slane %v5021_v38, 1  ;;  %v5227_v32 = vmax.f32 %v11854_v54, %v11850_v6  ;;  %2748 = vst.msk [vmem:[#allocation2 + $0x18] sm:$0xff] %vm14156_vm10, %v2649_v47  ;;  %vm2745_vm10 = vcmask 72775  }
 0x520   : > { %v5020_v9 = vld [vmem:[#allocation2 + $0x198] sm:$0xff]  ;;  %v4260_v35 = vpop.permute.xlu1 %4259  ;;  %v13583_v25 = vmax.f32 %v11887_v20, 0.0 }
 0x521   : > { %v5103_v18 = vrot.slane %v5020_v9, 1  ;;  %v5108_v56 = vsel %vm14157_vm0, %v5105_v55, %v5107_v22  ;;  %4359 = vst.msk [vmem:[#allocation2 + $0x30] sm:$0xff] %vm13600_vm12, %v4260_v35 }
 0x522   : > { %v4258_v4 = vpop.permute.xlu0 %4257  ;;  %v5185_v47 = vmax.f32 %v5021_v38, %v5108_v56  ;;  %v13585_v38 = vmax.f32 %v11880_v60, 0.0 }
 0x523   : > { %v5104_v12 = vsel %vm14161_vm2, %v13586_v31, %v5103_v18  ;;  %v5106_v17 = vsel %vm14162_vm4, %v5103_v18, %v5105_v55  ;;  %4357 = vst.msk [vmem:[#allocation2 + $0x18] sm:$0xfe] %vm13581_vm8, %v4258_v4  ;;  %vm13580_vm4 = vcmask 589319   ;;  %vm14163_vm2 = vcmask 64512  }
 0x524   : > { %v11873_v37 = vmax.f32 %v11856_v39, %v5104_v12  ;;  %v11875_v8 = vmax.f32 %v5020_v9, %v5106_v17  ;;  %v4393_v22 = vpop.permute.xlu1 %4392  ;;  %v11893_v9 = vadd.f32 %v11563_v3, %v11613_v14  ;;  %vm14164_vm0 = vmmov %vm14163_vm2 }
 0x525   : > { %4489 = vst.msk [vmem:[#allocation2 + $0x18] sm:$0xff] %vm13599_vm7, %v4393_v22  ;;  %vm14165_vm11 = vmmov %vm14164_vm0 }
 0x526   : > { %v5239_v35 = vmax.f32 %v11873_v37, %v5185_v47  ;;  %v5240_v55 = vmax.f32 %v11875_v8, %v5186_v36  ;;  %v2647_v18 = vpop.permute.xlu0 %2646  ;;  %v13584_v17 = vmax.f32 %v11893_v9, 0.0 }
 0x527   : > { %2746 = vst.msk [vmem:[#allocation2] sm:$0x80] %vm2745_vm10, %v2647_v18  ;;  %vm14166_vm10 = vcmask 1046528  }
 0x528   : > { %v5271_v12 = vpack.c.bf16 %v5240_v55, %v5239_v35  ;;  %v4522_v19 = vpop.permute.xlu1 %4521  ;;  %v5075_v55 = vrot.slane %v11636_v43, 1 }
 0x529   : > { %4621 = vst.msk [vmem:[#allocation2] sm:$0x80] %vm13580_vm4, %v4522_v19  ;;  %v5114_v19 = vsel %vm14166_vm10, %v5111_v23, %v5113_v49 }
 0x52a   : > { %8213 = vmatprep.subr.bf16.mxu0 %v5271_v12  ;;  %4971 = vst.msk [vmem:[#allocation2] sm:$0xff] %vm14163_vm2, %v13585_v38  ;;  %v4395_v56 = vpop.permute.xlu0 %4394  ;;  %vm14167_vm2 = vmmov %vm14166_vm10 }
 0x52b   : > { %4490 = vst.msk [vmem:[#allocation2 + $0x30] sm:$0xff] %vm13599_vm7, %v4395_v56  ;;  %vm14230_vm7 = vcmask 1040384  }
 0x52c   : > { %v4526_v52 = vpop.permute.xlu1 %4525 }
 0x52d   : > { %4624 = vst.msk [vmem:[#allocation2 + $0x30] sm:$0xff] %vm13598_vm6, %v4526_v52  ;;  %v5078_v52 = vsel %vm14167_vm2, %v5075_v55, %v5077_v33 }
 0x52e   : > { %4973 = vst.msk [vmem:[#allocation2 + $0x30] sm:$0xff] %vm14164_vm0, %v13583_v25  ;;  %v4524_v14 = vpop.permute.xlu0 %4523  ;;  %vm14168_vm0 = vmmov %vm14167_vm2  ;;  %v5170_v49 = vmax.f32 %v11636_v43, %v5078_v52 }
 0x52f   : > { %4623 = vst.msk [vmem:[#allocation2 + $0x18] sm:$0xff] %vm13598_vm6, %v4524_v14  ;;  %vm14170_vm4 = vmmov %vm14168_vm0 }
 0x530   : > { %4972 = vst.msk [vmem:[#allocation2 + $0x18] sm:$0xff] %vm14165_vm11, %v13584_v17  ;;  %vm14169_vm11 = vmmov %vm14168_vm0 }
 0x531   : > { %v5035_v35 = vld [vmem:[#allocation2] sm:$0xfe]  ;;  %vm14171_vm8 = vmmov %vm14168_vm0 }
 0x532   : > { %v5070_v14 = vrot.slane %v5035_v35, 1  ;;  %v5003_v62 = vld [vmem:[#allocation2] sm:$0xff]  ;;  %vm14172_vm10 = vmmov %vm14168_vm0 }
 0x533   : > { %v5082_v23 = vsel %vm14172_vm10, %v5079_v5, %v5081_v42 }
 0x535   : > { %v5201_v4 = vld [vmem:[#allocation2 + $0x30] sm:$0xfe] }
 0x536   : > { %v5005_v22 = vld [vmem:[#allocation2 + $0x30] sm:$0xff]  ;;  %v5207_v12 = vrot.slane %v5201_v4, 1  ;;  %v11922_v4 = vmax.f32 %v11756_v10, %v5114_v19  ;;  %v5241_v10 = vmax.f32 %v5185_v47, %v11789_v58 }
 0x537   : > { %v5073_v18 = vrot.slane %v5005_v22, 1  ;;  %5384 = vst [vmem:[#allocation2 + $0x30] sm:$0xff] %v11639_v34  ;;  %v5004_v56 = vld [vmem:[#allocation2 + $0x18] sm:$0xff] }
 0x538   : > { %v5071_v27 = vrot.slane %v5004_v56, 1  ;;  %v5208_v40 = vsel %vm14168_vm0, %v5207_v12, %v5075_v55 }
 0x539   : > { %v5076_v48 = vsel %vm14169_vm11, %v5073_v18, %v5075_v55  ;;  %v5219_v35 = vmax.f32 %v5005_v22, %v5208_v40  ;;  %vm14179_vm11 = vmmov %vm14172_vm10 }
 0x53a   : > { %v5072_v59 = vsel %vm14170_vm4, %v5070_v14, %v5071_v27  ;;  %v5074_v46 = vsel %vm14171_vm8, %v5071_v27, %v5073_v18  ;;  %v5169_v55 = vmax.f32 %v5005_v22, %v5076_v48  ;;  %v11934_v14 = vmax.f32 %v11832_v24, %v5082_v23 }
 0x53b   : > { %v5167_v15 = vmax.f32 %v5003_v62, %v5072_v59  ;;  %v5168_v33 = vmax.f32 %v5004_v56, %v5074_v46  ;;  %v5242_v27 = vmax.f32 %v5186_v36, %v11922_v4  ;;  %vm14173_vm8 = vcmask 64512  }
 0x53c   : > { %v5225_v11 = vmax.f32 %v5169_v55, %v11854_v54  ;;  %v5226_v42 = vmax.f32 %v5170_v49, %v11934_v14  ;;  %vm14174_vm4 = vmmov %vm14173_vm8 }
 0x53d   : > { %v5223_v12 = vmax.f32 %v5167_v15, %v5219_v35  ;;  %v5224_v19 = vmax.f32 %v5168_v33, %v5170_v49  ;;  %v5272_v18 = vpack.c.bf16 %v5242_v27, %v5241_v10  ;;  %vm14175_vm2 = vmmov %vm14174_vm4 }
 0x53e   : > { %v5264_v46 = vpack.c.bf16 %v5226_v42, %v5225_v11  ;;  %vm14177_vm0 = vmmov %vm14175_vm2 }
 0x53f   : > { %v5263_v43 = vpack.c.bf16 %v5224_v19, %v5223_v12  ;;  %vm14180_vm10 = vmmov %vm14177_vm0 }
 0x541   : > { %8214 = vmatpush3.bf16.msra.mxu0 %v5263_v43 }
 0x542   : > { %8215 = vmatprep.subr.bf16.mxu0 %v5272_v18 }
 0x545   : > { %8216 = vmatpush3.bf16.msra.mxu0 %v5264_v46 }
 0x578   : > { %v8453_v62 = vpop.f32.mrb[8].mxu1 }
 0x579   : > { %v4914_v40 = vadd.f32 %v8453_v62, %v11563_v3  ;;  %v4905_v48 = vpop.f32.mrb[9].mxu1 }
 0x57a   : > { %v4906_v5 = vadd.f32 %v11563_v3, %v4905_v48  ;;  %v8454_v24 = vpop.f32.mrb[10].mxu1 }
 0x57b   : > { %v4962_v47 = vmax.f32 %v4914_v40, 0.0  ;;  %v4917_v36 = vadd.f32 %v8454_v24, %v11563_v3  ;;  %v4908_v22 = vpop.f32.mrb[11].mxu1 }
 0x57c   : > { %v4960_v56 = vmax.f32 %v4906_v5, 0.0  ;;  %v4909_v52 = vadd.f32 %v11563_v3, %v4908_v22 }
 0x57d   : > { %4997 = vst.msk [vmem:[#allocation2 + $0x270] sm:$0xff] %vm14173_vm8, %v4962_v47  ;;  %v4963_v59 = vmax.f32 %v4917_v36, 0.0  ;;  %vm14181_vm8 = vmmov %vm14179_vm11 }
 0x57e   : > { %4995 = vst.msk [vmem:[#allocation2 + $0x240] sm:$0xff] %vm14174_vm4, %v4960_v56  ;;  %v4961_v49 = vmax.f32 %v4909_v52, 0.0  ;;  %vm14182_vm4 = vmmov %vm14177_vm0 }
 0x57f   : > { %4998 = vst.msk [vmem:[#allocation2 + $0x288] sm:$0xff] %vm14175_vm2, %v4963_v59  ;;  %v11946_v23 = vpack.c.bf16 %v4963_v59, %v4962_v47  ;;  %vm14183_vm2 = vmmov %vm14181_vm8 }
 0x580   : > { %4996 = vst.msk [vmem:[#allocation2 + $0x258] sm:$0xff] %vm14177_vm0, %v4961_v49  ;;  %v11949_v15 = vpack.c.bf16 %v4961_v49, %v4960_v56 }
 0x581   : > { %14176 = vst [vmem:[#allocation28_spill] sm:$0xff] %v11946_v23 }
 0x582   : > { %14178 = vst [vmem:[#allocation31_spill] sm:$0xff] %v11949_v15  ;;  %v8589_v15 = vld [vmem:[%s14259_s5] sm:$0xff]  }
 0x583   : > { %8459 = vmatprep.subr.bf16.mxu1 %v8589_v15 }
 0x584   : > { %v8437_v33 = vpop.f32.mrb[40].mxu0  ;;  %v5029_v35 = vld [vmem:[#allocation2 + $0x270] sm:$0xff]  ;;  %8460 = vmatpush3.bf16.msra.mxu1 %v8589_v15 }
 0x585   : > { %v4850_v55 = vadd.f32 %v8437_v33, %v11563_v3  ;;  %v4841_v10 = vpop.f32.mrb[41].mxu0  ;;  %v5027_v12 = vld [vmem:[#allocation2 + $0x240] sm:$0xff]  ;;  %v5121_v40 = vrot.slane %v5029_v35, 1  ;;  %v8591_v15 = vld [vmem:[%s14259_s5 + $0x10] sm:$0xff]  }
 0x586   : > { %v4842_v19 = vadd.f32 %v11563_v3, %v4841_v10  ;;  %v8438_v27 = vpop.f32.mrb[42].mxu0  ;;  %v5117_v43 = vrot.slane %v5027_v12, 1  ;;  %v11953_v11 = vld [vmem:[#allocation2 + $0x288] sm:$0xff] }
 0x587   : > { %v4946_v18 = vmax.f32 %v4850_v55, 0.0  ;;  %v4853_v42 = vadd.f32 %v8438_v27, %v11563_v3  ;;  %v4844_v46 = vpop.f32.mrb[43].mxu0  ;;  %v5028_v62 = vld [vmem:[#allocation2 + $0x258] sm:$0xff]  ;;  %v5123_v48 = vrot.slane %v11953_v11, 1 }
 0x588   : > { %v4944_v5 = vmax.f32 %v4842_v19, 0.0  ;;  %v4845_v24 = vadd.f32 %v11563_v3, %v4844_v46  ;;  %v5118_v47 = vsel %vm14179_vm11, %v5115_v53, %v5117_v43  ;;  %v5119_v36 = vrot.slane %v5028_v62, 1  ;;  %vm14184_vm11 = vmmov %vm14177_vm0 }
 0x589   : > { %4981 = vst.msk [vmem:[#allocation2 + $0xf0] sm:$0xff] %vm14180_vm10, %v4946_v18  ;;  %v4947_v22 = vmax.f32 %v4853_v42, 0.0  ;;  %v5190_v56 = vmax.f32 %v11753_v7, %v5118_v47  ;;  %v5124_v52 = vsel %vm14181_vm8, %v5121_v40, %v5123_v48  ;;  %vm14185_vm10 = vmmov %vm14183_vm2 }
 0x58a   : > { %4979 = vst.msk [vmem:[#allocation2 + $0xc0] sm:$0xff] %vm14182_vm4, %v4944_v5  ;;  %v4945_v59 = vmax.f32 %v4845_v24, 0.0  ;;  %v5120_v49 = vsel %vm14183_vm2, %v5117_v43, %v5119_v36  ;;  %v11968_v33 = vmax.f32 %v5029_v35, %v5124_v52  ;;  %v5122_v27 = vsel %vm14185_vm10, %v5119_v36, %v5121_v40  ;;  %vm14187_vm8 = vmmov %vm14183_vm2 }
 0x58b   : > { %4982 = vst.msk [vmem:[#allocation2 + $0x108] sm:$0xff] %vm14177_vm0, %v4947_v22  ;;  %v11971_v53 = vpack.c.bf16 %v4947_v22, %v4946_v18  ;;  %v5244_v55 = vmax.f32 %v11922_v4, %v5190_v56  ;;  %v11974_v10 = vmax.f32 %v5027_v12, %v5120_v49  ;;  %v8579_v4 = vld [vmem:[%s14186_s15 + $0x4] ss:$8 sps:$4 sm:$0xff]   ;;  %v11989_v42 = vmax.f32 %v5028_v62, %v5122_v27  ;;  %vm14188_vm4 = vmmov %vm14183_vm2 }
 0x58c   : > { %4980 = vst.msk [vmem:[#allocation2 + $0xd8] sm:$0xff] %vm14184_vm11, %v4945_v59  ;;  %v11977_v7 = vpack.c.bf16 %v4945_v59, %v4944_v5  ;;  %5351 = vmatprep.mubr.bf16.mxu0 %v8579_v4  ;;  %vm14189_vm0 = vmmov %vm14183_vm2 }
 0x58d   : > { %v5273_v19 = vpack.c.bf16 %v5244_v55, %v5243_v63  ;;  %v5247_v35 = vmax.f32 %v11974_v10, %v11968_v33  ;;  %v5245_v36 = vmax.f32 %v11782_v57, %v11974_v10  ;;  %v5246_v22 = vmax.f32 %v5190_v56, %v11989_v42  ;;  %vm14190_vm10 = vmmov %vm14184_vm11 }
 0x58f   : > { %8217 = vmatprep.subr.bf16.mxu0 %v5273_v19  ;;  %v5274_v27 = vpack.c.bf16 %v5246_v22, %v5245_v36 }
 0x590   : > { %v5013_v12 = vld [vmem:[#allocation2 + $0xf0] sm:$0xff] }
 0x591   : > { %v5011_v43 = vld [vmem:[#allocation2 + $0xc0] sm:$0xff]  ;;  %v5089_v46 = vrot.slane %v5013_v12, 1 }
 0x592   : > { %v5085_v18 = vrot.slane %v5011_v43, 1  ;;  %5390 = vst [vmem:[#allocation2 + $0xc0] sm:$0xff] %v11639_v34  ;;  %v11991_v58 = vld [vmem:[#allocation2 + $0x108] sm:$0xff] }
 0x593   : > { %v5012_v63 = vld [vmem:[#allocation2 + $0xd8] sm:$0xff]  ;;  %v5091_v5 = vrot.slane %v11991_v58, 1 }
 0x594   : > { %v5086_v40 = vsel %vm14187_vm8, %v5083_v30, %v5085_v18  ;;  %v5087_v24 = vrot.slane %v5012_v63, 1  ;;  %5393 = vst [vmem:[#allocation2 + $0xd8] sm:$0xff] %v11639_v34  ;;  %vm14191_vm8 = vmmov %vm14190_vm10 }
 0x595   : > { %v5174_v47 = vmax.f32 %v11827_v45, %v5086_v40  ;;  %v5092_v62 = vsel %vm14188_vm4, %v5089_v46, %v5091_v5  ;;  %vm14193_vm4 = vmmov %vm14191_vm8 }
 0x596   : > { %v5088_v52 = vsel %vm14183_vm2, %v5085_v18, %v5087_v24  ;;  %v5090_v59 = vsel %vm14189_vm0, %v5087_v24, %v5089_v46  ;;  %v12007_v49 = vmax.f32 %v5013_v12, %v5092_v62  ;;  %vm14195_vm2 = vmmov %vm14189_vm0 }
 0x597   : > { %v5228_v30 = vmax.f32 %v11934_v14, %v5174_v47  ;;  %v12010_v34 = vmax.f32 %v5011_v43, %v5088_v52  ;;  %v12012_v45 = vmax.f32 %v5012_v63, %v5090_v59  ;;  %v8724_v52 = vld [vmem:[%s14121_s4] ss:$0 sm:$0xff]  ;;  %vm14196_vm0 = vmmov %vm14193_vm4  ;;  %s14231_s4 = smov 16  }
 0x599   : > { %v5265_v57 = vpack.c.bf16 %v5228_v30, %v5227_v32  ;;  %v5229_v55 = vmax.f32 %v11850_v6, %v12010_v34  ;;  %v5230_v56 = vmax.f32 %v5174_v47, %v12012_v45 }
 0x59b   : > { %8218 = vmatpush3.bf16.msra.mxu0 %v5265_v57  ;;  %v5266_v14 = vpack.c.bf16 %v5230_v56, %v5229_v55 }
 0x59c   : > { %8219 = vmatprep.subr.bf16.mxu0 %v5274_v27 }
 0x59f   : > { %8220 = vmatpush3.bf16.msra.mxu0 %v5266_v14 }
 0x5e1   : > { %v8457_v4 = vpop.f32.mrb[12].mxu1 }
 0x5e2   : > { %v4930_v12 = vadd.f32 %v8457_v4, %v11563_v3  ;;  %v4921_v43 = vpop.f32.mrb[13].mxu1 }
 0x5e3   : > { %v4922_v54 = vadd.f32 %v11563_v3, %v4921_v43  ;;  %v8458_v32 = vpop.f32.mrb[14].mxu1 }
 0x5e4   : > { %v4966_v18 = vmax.f32 %v4930_v12, 0.0  ;;  %v4933_v6 = vadd.f32 %v8458_v32, %v11563_v3  ;;  %v4924_v63 = vpop.f32.mrb[15].mxu1 }
 0x5e5   : > { %v4964_v46 = vmax.f32 %v4922_v54, 0.0  ;;  %v4925_v40 = vadd.f32 %v11563_v3, %v4924_v63 }
 0x5e6   : > { %5001 = vst.msk [vmem:[#allocation2 + $0x2d0] sm:$0xff] %vm14184_vm11, %v4966_v18  ;;  %v4967_v24 = vmax.f32 %v4933_v6, 0.0  ;;  %vm14197_vm11 = vmmov %vm14196_vm0 }
 0x5e7   : > { %4999 = vst.msk [vmem:[#allocation2 + $0x2a0] sm:$0xff] %vm14190_vm10, %v4964_v46  ;;  %v4965_v47 = vmax.f32 %v4925_v40, 0.0  ;;  %vm14198_vm10 = vmmov %vm14196_vm0 }
 0x5e8   : > { %5002 = vst.msk [vmem:[#allocation2 + $0x2e8] sm:$0xff] %vm14191_vm8, %v4967_v24  ;;  %v12029_v36 = vpack.c.bf16 %v4967_v24, %v4966_v18  ;;  %vm14199_vm8 = vmmov %vm14196_vm0 }
 0x5e9   : > { %5000 = vst.msk [vmem:[#allocation2 + $0x2b8] sm:$0xff] %vm14193_vm4, %v4965_v47  ;;  %v12032_v62 = vpack.c.bf16 %v4965_v47, %v4964_v46  ;;  %vm14200_vm4 = vmmov %vm14195_vm2 }
 0x5ea   : > { %14192 = vst [vmem:[#allocation27_spill] sm:$0xff] %v12029_v36 }
 0x5eb   : > { %14194 = vst [vmem:[#allocation23_spill] sm:$0xff] %v12032_v62  ;;  %v14257_v62 = vmov 0 }
 0x5ec   : > { %v8441_v22 = vpop.f32.mrb[44].mxu0 }
 0x5ed   : > { %v4866_v3 = vadd.f32 %v8724_v52, %v8441_v22  ;;  %v4857_v59 = vpop.f32.mrb[45].mxu0  ;;  %v5033_v46 = vld [vmem:[#allocation2 + $0x2d0] sm:$0xff] }
 0x5ee   : > { %v5031_v30 = vld [vmem:[#allocation2 + $0x2a0] sm:$0xff]  ;;  %v4858_v57 = vadd.f32 %v8724_v52, %v4857_v59  ;;  %v8442_v55 = vpop.f32.mrb[46].mxu0  ;;  %v5129_v59 = vrot.slane %v5033_v46, 1 }
 0x5ef   : > { %v5125_v56 = vrot.slane %v5031_v30, 1  ;;  %v4950_v27 = vmax.f32 %v4866_v3, 0.0  ;;  %v4869_v14 = vadd.f32 %v8724_v52, %v8442_v55  ;;  %v4860_v4 = vpop.f32.mrb[47].mxu0  ;;  %v12043_v24 = vld [vmem:[#allocation2 + $0x2e8] sm:$0xff]  ;;  %v5200_v3 = vld [vmem:[#allocation2 + $0x318] sm:$0xff] }
 0x5f0   : > { %v5032_v12 = vld [vmem:[#allocation2 + $0x2b8] sm:$0xff]  ;;  %v4948_v43 = vmax.f32 %v4858_v57, 0.0  ;;  %v4861_v54 = vadd.f32 %v8724_v52, %v4860_v4  ;;  %v5199_v52 = vld [vmem:[#allocation2 + $0x300] sm:$0xff]  ;;  %v5131_v57 = vrot.slane %v12043_v24, 1  ;;  %v5202_v55 = vld [vmem:[#allocation2 + $0x330] sm:$0x1] }
 0x5f1   : > { %v5126_v32 = vsel %vm14195_vm2, %v5123_v48, %v5125_v56  ;;  %4985 = vst.msk [vmem:[#allocation2 + $0x150] sm:$0xff] %vm14196_vm0, %v4950_v27  ;;  %v4951_v18 = vmax.f32 %v4869_v14, 0.0  ;;  %v5127_v40 = vrot.slane %v5032_v12, 1  ;;  %v5211_v4 = vrot.slane %v5200_v3, 1  ;;  %vm14201_vm0 = vmmov %vm14195_vm2 }
 0x5f2   : > { %v5194_v6 = vmax.f32 %v11953_v11, %v5126_v32  ;;  %4983 = vst.msk [vmem:[#allocation2 + $0x120] sm:$0xff] %vm14197_vm11, %v4948_v43  ;;  %v4949_v63 = vmax.f32 %v4861_v54, 0.0  ;;  %v5036_v32 = vld [vmem:[#allocation2 + $0x300] sm:$0x1]  ;;  %v5132_v25 = vsel %vm14201_vm0, %v5129_v59, %v5131_v57  ;;  %vm14202_vm11 = vmmov %vm14201_vm0 }
 0x5f3   : > { %4986 = vst.msk [vmem:[#allocation2 + $0x168] sm:$0xff] %vm14198_vm10, %v4951_v18  ;;  %v12046_v47 = vpack.c.bf16 %v4951_v18, %v4950_v27  ;;  %v5128_v14 = vsel %vm14200_vm4, %v5125_v56, %v5127_v40  ;;  %v5209_v27 = vrot.slane %v5199_v52, 1  ;;  %v5133_v31 = vrot.slane %v5036_v32, 1  ;;  %vm14203_vm10 = vmmov %vm14201_vm0 }
 0x5f4   : > { %v5248_v22 = vmax.f32 %v11989_v42, %v5194_v6  ;;  %4984 = vst.msk [vmem:[#allocation2 + $0x138] sm:$0xff] %vm14199_vm8, %v4949_v63  ;;  %v12050_v48 = vpack.c.bf16 %v4949_v63, %v4948_v43  ;;  %v5130_v42 = vsel %vm14195_vm2, %v5127_v40, %v5129_v59  ;;  %v5213_v43 = vrot.slane %v5202_v55, 1  ;;  %vm14204_vm8 = vmmov %vm14201_vm0 }
 0x5f5   : > { %v5195_v63 = vmax.f32 %v5031_v30, %v5128_v14  ;;  %v5197_v29 = vmax.f32 %v5033_v46, %v5132_v25  ;;  %vm14205_vm4 = vmmov %vm14201_vm0 }
 0x5f6   : > { %v5275_v11 = vpack.c.bf16 %v5248_v22, %v5247_v35  ;;  %v5196_v35 = vmax.f32 %v5032_v12, %v5130_v42  ;;  %v5210_v22 = vsel %vm14202_vm11, %v5131_v57, %v5209_v27  ;;  %v5214_v30 = vsel %vm14205_vm4, %v5211_v4, %v5213_v43  ;;  %vm14206_vm2 = vmmov %vm14201_vm0 }
 0x5f7   : > { %v5249_v12 = vmax.f32 %v11968_v33, %v5195_v63  ;;  %v5220_v14 = vmax.f32 %v12043_v24, %v5210_v22  ;;  %vm14207_vm11 = vmmov %vm14201_vm0  ;;  %v5222_v22 = vmax.f32 %v5200_v3, %v5214_v30  ;;  %v5251_v36 = vmax.f32 %v5195_v63, %v5197_v29  ;;  %v8586_v63 = vld [vmem:[%s14186_s15 + $0x34] ss:$8 sps:$4 sm:$0xff]   ;;  %v14213_v30 = vld [vmem:[#allocation6_spill] sm:$0xff] }
 0x5f8   : > { %8221 = vmatprep.subr.bf16.mxu0 %v5275_v11  ;;  %v5017_v54 = vld [vmem:[#allocation2 + $0x150] sm:$0xff]  ;;  %v5212_v11 = vsel %vm14203_vm10, %v5209_v27, %v5211_v4  ;;  %v5250_v51 = vmax.f32 %v5194_v6, %v5196_v35  ;;  %vm14209_vm10 = vmmov %vm14201_vm0  ;;  %v14211_v6 = vmax.f32 %v12010_v34, %v12007_v49 }
 0x5f9   : > { %v5015_v18 = vld [vmem:[#allocation2 + $0x120] sm:$0xff]  ;;  %v5097_v19 = vrot.slane %v5017_v54, 1  ;;  %v5221_v43 = vmax.f32 %v5199_v52, %v5212_v11 }
 0x5fa   : > { %v5093_v10 = vrot.slane %v5015_v18, 1  ;;  %v5018_v17 = vld [vmem:[#allocation2 + $0x168] sm:$0xff]  ;;  %v5276_v39 = vpack.c.bf16 %v5250_v51, %v5249_v12 }
 0x5fb   : > { %v5016_v38 = vld [vmem:[#allocation2 + $0x138] sm:$0xff]  ;;  %v5099_v56 = vrot.slane %v5018_v17, 1  ;;  %v5253_v3 = vmax.f32 %v5197_v29, %v5221_v43 }
 0x5fc   : > { %v5094_v40 = vsel %vm14204_vm8, %v5091_v5, %v5093_v10  ;;  %v5095_v55 = vrot.slane %v5016_v38, 1  ;;  %vm14210_vm8 = vmmov %vm14201_vm0  ;;  %v8580_v29 = vld [vmem:[%s14186_s15 + $0x14] ss:$8 sps:$4 sm:$0xff]  }
 0x5fd   : > { %v5178_v59 = vmax.f32 %v11991_v58, %v5094_v40  ;;  %v5100_v42 = vsel %vm14206_vm2, %v5097_v19, %v5099_v56  ;;  %v5102_v5 = vsel %vm14209_vm10, %v5099_v56, %v14208_v21  ;;  %v5134_v58 = vsel %vm14210_vm8, %v5131_v57, %v5133_v31  ;;  %v14212_v56 = vld [vmem:[#allocation4_spill] sm:$0xff] }
 0x5fe   : > { %v5096_v32 = vsel %vm14201_vm0, %v5093_v10, %v5095_v55  ;;  %v5098_v27 = vsel %vm14207_vm11, %v5095_v55, %v5097_v19  ;;  %v5181_v33 = vmax.f32 %v5017_v54, %v5100_v42  ;;  %v5182_v55 = vmax.f32 %v5018_v17, %v5102_v5 }
 0x5ff   : > { %v5232_v25 = vmax.f32 %v12012_v45, %v5178_v59  ;;  %v5179_v46 = vmax.f32 %v5015_v18, %v5096_v32  ;;  %v5180_v4 = vmax.f32 %v5016_v38, %v5098_v27  ;;  %v5252_v21 = vmax.f32 %v5196_v35, %v5220_v14  ;;  %v8588_v35 = vld [vmem:[%s14186_s15 + $0x30] ss:$8 sps:$4 sm:$0xff]  }
 0x600   : > { %v5198_v45 = vmax.f32 %v12043_v24, %v5134_v58  ;;  %v5238_v17 = vmax.f32 %v5182_v55, %v11875_v8  ;;  %v8577_v24 = vld [vmem:[%s14186_s15] ss:$8 sps:$4 sm:$0xff]   ;;  %v8583_v8 = vld [vmem:[%s14186_s15 + $0x24] ss:$8 sps:$4 sm:$0xff]   ;;  %v1176_v11 = vand.u32 7, %v14212_v56  ;;  %vm14225_vm10 = vcmask 64513  }
 0x601   : > { %v5267_v40 = vpack.c.bf16 %v5232_v25, %v14211_v6  ;;  %v5233_v10 = vmax.f32 %v12007_v49, %v5179_v46  ;;  %v5234_v19 = vmax.f32 %v5178_v59, %v5180_v4  ;;  %v5235_v31 = vmax.f32 %v5179_v46, %v5181_v33 }
 0x602   : > { %v5236_v57 = vmax.f32 %v5180_v4, %v5182_v55  ;;  %v5277_v52 = vpack.c.bf16 %v5252_v21, %v5251_v36  ;;  %v5254_v54 = vmax.f32 %v5198_v45, %v5222_v22  ;;  %v5237_v49 = vmax.f32 %v5181_v33, %v11873_v37  ;;  %v8582_v37 = vld [vmem:[%s14186_s15 + $0x10] ss:$8 sps:$4 sm:$0xff]   ;;  %v8585_v36 = vld [vmem:[%s14186_s15 + $0x20] ss:$8 sps:$4 sm:$0xff]   ;;  %s14397_s15 = smov 2  }
 0x603   : > { %8222 = vmatpush3.bf16.msra.mxu0 %v5267_v40  ;;  %v5268_v38 = vpack.c.bf16 %v5234_v19, %v5233_v10  ;;  %v1183_v59 = vand.u32 7, %v14213_v30  ;;  %vm12106_vm4 = vcmp.le.s32.totalorder %v1176_v11, 6  ;;  %vm12112_vm2 = vcmp.ge.s32.totalorder %v1176_v11, 1  ;;  %v14223_v22 = vld [vmem:[#allocation5_spill] sm:$0xff]  ;;  %v14224_v55 = vld [vmem:[#allocation7_spill] sm:$0xff] }
 0x604   : > { %8223 = vmatprep.subr.bf16.mxu0 %v5276_v39  ;;  %v5269_v34 = vpack.c.bf16 %v5236_v57, %v5235_v31  ;;  %v5278_v51 = vpack.c.bf16 %v5254_v54, %v5253_v3  ;;  %v5270_v18 = vpack.c.bf16 %v5238_v17, %v5237_v49  ;;  %v1190_v6 = vand.u32 7, %v14223_v22 }
 0x605   : > { %vm12116_vm0 = vcmp.le.s32.totalorder %v1183_v59, 6  ;;  %vm12124_vm11 = vcmp.ge.s32.totalorder %v1183_v59, 1  ;;  %v1197_v39 = vand.u32 7, %v14224_v55 }
 0x606   : > { %vm12150_vm8 = vcmp.ge.s32.totalorder %v1190_v6, 1  ;;  %vm12154_vm6 = vcmp.le.s32.totalorder %v1190_v6, 6 }
 0x607   : > { %8224 = vmatpush3.bf16.msra.mxu0 %v5268_v38  ;;  %vm12168_vm12 = vcmp.ge.s32.totalorder %v1197_v39, 1  ;;  %vm12172_vm5 = vcmp.le.s32.totalorder %v1197_v39, 6  ;;  %v14244_v39 = vmov 0 }
 0x608   : > { %8225 = vmatprep.subr.bf16.mxu0 %v5277_v52 }
 0x60b   : > { %8226 = vmatpush3.bf16.msra.mxu0 %v5269_v34 }
 0x60c   : > { %8227 = vmatprep.subr.bf16.mxu0 %v5278_v51 }
 0x60f   : > { %8228 = vmatpush3.bf16.msra.mxu0 %v5270_v18 }
 0x612   : > { %5352 = vmatmul.mubr.bf16.vlgmr.msra.gmra.mrb[48].mxu0 %v8577_v24 }
 0x613   : > { %5359 = vmatprep.mubr.bf16.mxu0 %v8580_v29 }
 0x61a   : > { %5360 = vmatmul.mubr.bf16.gmra.mrb[52].mxu0 %v8582_v37 }
 0x61b   : > { %5367 = vmatprep.mubr.bf16.mxu0 %v8583_v8 }
 0x622   : > { %5368 = vmatmul.mubr.bf16.gmra.mrb[56].mxu0 %v8585_v36 }
 0x623   : > { %5375 = vmatprep.mubr.bf16.mxu0 %v8586_v63  ;;  %v14237_v63 = vld [vmem:[#allocation15_spill] sm:$0xff] }
 0x62a   : > { %5376 = vmatmul.mubr.bf16.gmra.mrb[60].mxu0 %v8588_v35  ;;  %v1204_v35 = vand.u32 7, %v14237_v63  ;;  %v14250_v63 = vld [vmem:[#allocation11_spill] sm:$0xff] }
 0x62c   : > { %vm12301_vm1 = vcmp.ge.s32.totalorder %v1204_v35, 1 }
 0x6e5   : > { %v8229_v12 = vpop.f32.mrb[48].mxu0 }
 0x6e6   : > { %v8230_v14 = vpop.f32.mrb[49].mxu0 }
 0x6e7   : > { %v12110_v32 = vadd.f32 %v8230_v14, %v8229_v12  ;;  %v8232_v27 = vpop.f32.mrb[50].mxu0  ;;  %v14239_v14 = vld [vmem:[#allocation9_spill] sm:$0xff] }
 0x6e8   : > { %v8233_v25 = vpop.f32.mrb[51].mxu0 }
 0x6e9   : > { %v12120_v4 = vadd.f32 %v8233_v25, %v8232_v27  ;;  %5493 = vrot.lane.b32.xlu0 %v12110_v32, %s14220_s3  ;;  %v5412_v33 = vsel %vm12106_vm4, %v12110_v32, 0.0  ;;  %v5436_v43 = vsel %vm12112_vm2, %v12110_v32, 0.0  ;;  %v13606_v27 = vand.u32 7, %v14239_v14 }
 0x6ea   : > { %v12135_v40 = vrot.slane %v5412_v33, 7  ;;  %v12148_v38 = vrot.slane %v5436_v43, 1 }
 0x6eb   : > { %5495 = vrot.lane.b32.xlu1 %v12120_v4, %s14220_s3  ;;  %v5413_v10 = vsel %vm12116_vm0, %v12120_v4, 0.0  ;;  %v5437_v19 = vsel %vm12124_vm11, %v12120_v4, 0.0 }
 0x6ec   : > { %5476 = vst.msk [vmem:[#allocation2 + $0x48] sm:$0xfe] %vm14225_vm10, %v12135_v40  ;;  %v5453_v21 = vrot.slane %v5413_v10, 7  ;;  %v5534_v49 = vrot.slane %v5437_v19, 1  ;;  %vm14232_vm10 = vcmask 64512  }
 0x6ed   : > { %v8235_v45 = vpop.f32.mrb[52].mxu0 }
 0x6ee   : > { %v8236_v31 = vpop.f32.mrb[53].mxu0  ;;  %v12160_v3 = vsel %vm14230_vm7, %v12135_v40, %v5453_v21  ;;  %vm14238_vm7 = vcmask 1046528  }
 0x6ef   : > { %v12162_v54 = vadd.f32 %v8236_v31, %v8235_v45  ;;  %v8238_v34 = vpop.f32.mrb[54].mxu0  ;;  %5548 = vrot.lane.b32.xlu1 %v12148_v38, %s14231_s4  ;;  %5477 = vst.msk [vmem:[#allocation2 + $0x60] sm:$0xff] %vm14232_vm10, %v12160_v3  ;;  %v12189_v11 = vsel %vm14238_vm7, %v12148_v38, %v5534_v49  ;;  %vm14240_vm10 = vmmov %vm14238_vm7  ;;  %vm14242_vm7 = vcmask 64512  }
 0x6f0   : > { %v8239_v17 = vpop.f32.mrb[55].mxu0  ;;  %vm14246_vm9 = vmmov %vm14242_vm7 }
 0x6f1   : > { %v12176_v24 = vadd.f32 %v8239_v17, %v8238_v34  ;;  %5497 = vrot.lane.b32.xlu0 %v12162_v54, %s14220_s3  ;;  %v5438_v29 = vsel %vm12150_vm8, %v12162_v54, 0.0  ;;  %v5414_v37 = vsel %vm12154_vm6, %v12162_v54, 0.0  ;;  %v14247_v34 = vmov 0 }
 0x6f2   : > { %v5536_v8 = vrot.slane %v5438_v29, 1  ;;  %v5455_v36 = vrot.slane %v5414_v37, 7  ;;  %v14249_v37 = vld [vmem:[#allocation16_spill] sm:$0xff] }
 0x6f3   : > { %v5439_v59 = vsel %vm12168_vm12, %v12176_v24, 0.0  ;;  %v5415_v12 = vsel %vm12172_vm5, %v12176_v24, 0.0 }
 0x6f4   : > { %v12199_v25 = vsel %vm14240_vm10, %v5534_v49, %v5536_v8  ;;  %v12201_v33 = vrot.slane %v5439_v59, 1  ;;  %v12204_v43 = vsel %vm14241_vm3, %v5453_v21, %v5455_v36  ;;  %v5457_v22 = vrot.slane %v5415_v12, 7 }
 0x6f5   : > { %v8241_v6 = vpop.f32.mrb[56].mxu0  ;;  %5552 = vrot.lane.b32.xlu1 %v12199_v25, %s14231_s4  ;;  %5550 = vrot.lane.b32.xlu0 %v12189_v11, %s14231_s4  ;;  %5478 = vst.msk [vmem:[#allocation2 + $0x78] sm:$0xff] %vm14242_vm7, %v12204_v43  ;;  %vm12219_vm3 = vcmp.le.s32.totalorder %v1204_v35, 6  ;;  %vm12229_vm7 = vcmp.le.s32.totalorder %v13606_v27, 6  ;;  %v13607_v59 = vand.u32 7, %v14250_v63 }
 0x6f6   : > { %v8242_v10 = vpop.f32.mrb[57].mxu0  ;;  %v12214_v19 = vsel %vm14240_vm10, %v5536_v8, %v12201_v33  ;;  %v12217_v55 = vsel %vm14243_vm13, %v5455_v36, %v5457_v22  ;;  %v14245_v39 = vsel %vm12219_vm3, 4294967295, %v14244_v39  ;;  %v14248_v34 = vsel %vm12229_vm7, 4294967295, %v14247_v34 }
 0x6f7   : > { %v12223_v21 = vadd.f32 %v8242_v10, %v8241_v6  ;;  %5479 = vst.msk [vmem:[#allocation2 + $0x90] sm:$0xff] %vm14246_vm9, %v12217_v55  ;;  %v8244_v45 = vpop.f32.mrb[58].mxu0  ;;  %v13608_v8 = vand.u32 7, %v14249_v37  ;;  %vm14251_vm9 = vmmov %vm14243_vm13  ;;  %vm14252_vm13 = vcmask 64512  }
 0x6f8   : > { %v8245_v31 = vpop.f32.mrb[59].mxu0  ;;  %vm14253_vm10 = vmmov %vm14251_vm9 }
 0x6f9   : > { %5554 = vrot.lane.b32.xlu0 %v12214_v19, %s14231_s4  ;;  %5584 = vrot.lane.b32.xlu1 %v12135_v40, %s14116_s0  ;;  %v12237_v49 = vadd.f32 %v8245_v31, %v8244_v45  ;;  %v5416_v17 = vsel %vm12219_vm3, %v12223_v21, 0.0  ;;  %vm12261_vm15 = vcmp.le.s32.totalorder %v13608_v8, 6  ;;  %v5440_v35 = vsel %vm12301_vm1, %v12223_v21, 0.0 }
 0x6fa   : > { %v5459_v29 = vrot.slane %v5416_v17, 7 }
 0x6fb   : > { %v5417_v36 = vsel %vm12229_vm7, %v12237_v49, 0.0 }
 0x6fc   : > { %v12248_v12 = vsel %vm14251_vm9, %v5457_v22, %v5459_v29  ;;  %v5461_v6 = vrot.slane %v5417_v36, 7  ;;  %v14254_v22 = vmov 0  ;;  %vm14256_vm9 = vmmov %vm14252_vm13 }
 0x6fd   : > { %5588 = vrot.lane.b32.xlu1 %v12204_v43, %s14116_s0  ;;  %5586 = vrot.lane.b32.xlu0 %v12160_v3, %s14116_s0  ;;  %v8247_v10 = vpop.f32.mrb[60].mxu0  ;;  %5480 = vst.msk [vmem:[#allocation2 + $0xa8] sm:$0xff] %vm14252_vm13, %v12248_v12  ;;  %v14255_v22 = vsel %vm12261_vm15, 4294967295, %v14254_v22  ;;  %vm12271_vm13 = vcmp.le.s32.totalorder %v13607_v59, 6  ;;  %vm14262_vm7 = vmmov %vm14256_vm9 }
 0x6fe   : > { %v8248_v45 = vpop.f32.mrb[61].mxu0  ;;  %v12257_v31 = vsel %vm14253_vm10, %v5459_v29, %v5461_v6  ;;  %v14258_v62 = vsel %vm12271_vm13, 4294967295, %v14257_v62 }
 0x6ff   : > { %v12265_v17 = vadd.f32 %v8248_v45, %v8247_v10  ;;  %v8250_v36 = vpop.f32.mrb[62].mxu0  ;;  %5481 = vst.msk [vmem:[#allocation2 + $0xc0] sm:$0xff] %vm14256_vm9, %v12257_v31 }
 0x700   : > { %v8251_v27 = vpop.f32.mrb[63].mxu0 }
 0x701   : > { %5620 = vrot.lane.b32.xlu1 %v12110_v32, %s14082_s21  ;;  %5590 = vrot.lane.b32.xlu0 %v12217_v55, %s14116_s0  ;;  %v12279_v29 = vadd.f32 %v8251_v27, %v8250_v36  ;;  %v5418_v10 = vsel %vm12261_vm15, %v12265_v17, 0.0  ;;  %v14260_v27 = vmov 0  ;;  %v5540_v36 = vrot.slane %v5440_v35, 1 }
 0x702   : > { %v5463_v45 = vrot.slane %v5418_v10, 7  ;;  %v14261_v27 = vsel %vm12301_vm1, 4294967295, %v14260_v27  ;;  %vm14284_vm1 = vcmask 261313   ;;  %vm14287_vm15 = vcmask 326912  }
 0x703   : > { %v5419_v59 = vsel %vm12271_vm13, %v12279_v29, 0.0  ;;  %vm14279_vm13 = vcmask 195719  }
 0x704   : > { %v12288_v8 = vsel %vm14253_vm10, %v5461_v6, %v5463_v45  ;;  %v12290_v23 = vrot.slane %v5419_v59, 7  ;;  %v8590_v6 = vld [vmem:[%s14259_s5 + $0x8] sm:$0xff]  }
 0x705   : > { %5624 = vrot.lane.b32.xlu1 %v12162_v54, %s14082_s21  ;;  %5622 = vrot.lane.b32.xlu0 %v12120_v4, %s14082_s21  ;;  %5482 = vst.msk [vmem:[#allocation2 + $0xd8] sm:$0xff] %vm14256_vm9, %v12288_v8 }
 0x706   : > { %v12307_v59 = vsel %vm14253_vm10, %v5463_v45, %v12290_v23  ;;  %5484 = vst.msk [vmem:[#allocation2 + $0x108] sm:$0x1] %vm3465_vm14, %v12290_v23  ;;  %8461 = vmatprep.subr.bf16.mxu1 %v8590_v6  ;;  %vm14263_vm14 = vcmask 1046528   ;;  %v8592_v45 = vld [vmem:[%s14259_s5 + $0x18] sm:$0xff]  }
 0x707   : > { %5483 = vst.msk [vmem:[#allocation2 + $0xf0] sm:$0xff] %vm14262_vm7, %v12307_v59  ;;  %8462 = vmatpush3.bf16.msra.mxu1 %v8590_v6  ;;  %v5541_v10 = vsel %vm14263_vm14, %v12201_v33, %v5540_v36  ;;  %v8593_v6 = vld [vmem:[%s14259_s5 + $0x20] sm:$0xff]   ;;  %v14265_v33 = vand.u32 7, %v14239_v14  ;;  %vm14269_vm9 = vmmov %vm14263_vm14 }
 0x708   : > { %8463 = vmatprep.subr.bf16.mxu1 %v8591_v15  ;;  %vm14273_vm14 = vmmov %vm14269_vm9 }
 0x709   : > { %5654 = vrot.lane.b32.xlu1 %v12189_v11, %s14083_s1  ;;  %5626 = vrot.lane.b32.xlu0 %v12176_v24, %s14082_s21  ;;  %vm12358_vm7 = vcmp.ge.s32.totalorder %v14265_v33, 1 }
 0x70b   : > { %8464 = vmatpush3.bf16.msra.mxu1 %v8591_v15  ;;  %v14270_v15 = vand.u32 7, %v14249_v37  ;;  %v14274_v37 = vand.u32 7, %v14250_v63 }
 0x70c   : > { %8465 = vmatprep.subr.bf16.mxu1 %v8592_v45 }
 0x70d   : > { %5658 = vrot.lane.b32.xlu1 %v12214_v19, %s14083_s1  ;;  %5656 = vrot.lane.b32.xlu0 %v12199_v25, %s14083_s1  ;;  %vm12387_vm10 = vcmp.ge.s32.totalorder %v14270_v15, 1 }
 0x70f   : > { %8466 = vmatpush3.bf16.msra.mxu1 %v8592_v45  ;;  %v14271_v45 = vmov 0 }
 0x710   : > { %8467 = vmatprep.subr.bf16.mxu1 %v8593_v6  ;;  %v14272_v45 = vsel %vm12387_vm10, 4294967295, %v14271_v45 }
 0x711   : > { %5690 = vrot.lane.b32.xlu1 %v12160_v3, %s14091_s22  ;;  %5660 = vrot.lane.b32.xlu0 %v5541_v10, %s14083_s1  ;;  %v8594_v3 = vld [vmem:[%s14259_s5 + $0x28] sm:$0xff]  }
 0x713   : > { %8468 = vmatpush3.bf16.msra.mxu1 %v8593_v6  ;;  %v14275_v6 = vmov 0 }
 0x714   : > { %8469 = vmatprep.subr.bf16.mxu1 %v8594_v3 }
 0x715   : > { %5694 = vrot.lane.b32.xlu1 %v12217_v55, %s14091_s22  ;;  %5692 = vrot.lane.b32.xlu0 %v12204_v43, %s14091_s22  ;;  %v14266_v43 = vmov 0  ;;  %v8596_v55 = vld [vmem:[%s14259_s5 + $0x38] sm:$0xff]  }
 0x716   : > { %v14267_v43 = vsel %vm12358_vm7, 4294967295, %v14266_v43 }
 0x717   : > { %8470 = vmatpush3.bf16.msra.mxu1 %v8594_v3 }
 0x719   : > { %5726 = vrot.lane.b32.xlu1 %v12120_v4, %s14264_s30  ;;  %5696 = vrot.lane.b32.xlu0 %v12248_v12, %s14091_s22  ;;  %v8595_v4 = vld [vmem:[%s14259_s5 + $0x30] sm:$0xff]  }
 0x71a   : > { %8471 = vmatprep.subr.bf16.mxu1 %v8595_v4 }
 0x71b   : > { %8472 = vmatpush3.bf16.msra.mxu1 %v8595_v4 }
 0x71c   : > { %8473 = vmatprep.subr.bf16.mxu1 %v8596_v55 }
 0x71d   : > { %5730 = vrot.lane.b32.xlu1 %v12176_v24, %s14264_s30  ;;  %5728 = vrot.lane.b32.xlu0 %v12162_v54, %s14264_s30  ;;  %v5441_v54 = vsel %vm12358_vm7, %v12237_v49, 0.0 }
 0x71e   : > { %v5542_v14 = vrot.slane %v5441_v54, 1 }
 0x71f   : > { %8474 = vmatpush3.bf16.msra.mxu1 %v8596_v55 }
 0x720   : > { %v5543_v35 = vsel %vm14269_vm9, %v5540_v36, %v5542_v14  ;;  %vm12406_vm9 = vcmp.ge.s32.totalorder %v14274_v37, 1 }
 0x721   : > { %5760 = vrot.lane.b32.xlu1 %v12199_v25, %s14268_s25  ;;  %5732 = vrot.lane.b32.xlu0 %v12223_v21, %s14264_s30  ;;  %v12379_v25 = vld [vmem:[#allocation2 + $0x8] sm:$0xff]  ;;  %v14276_v6 = vsel %vm12406_vm9, 4294967295, %v14275_v6 }
 0x722   : > { %8483 = vmatprep.subr.bf16.mxu1 %v12379_v25 }
 0x725   : > { %5764 = vrot.lane.b32.xlu1 %v5541_v10, %s14268_s25  ;;  %5762 = vrot.lane.b32.xlu0 %v12214_v19, %s14268_s25  ;;  %v5442_v19 = vsel %vm12387_vm10, %v12265_v17, 0.0 }
 0x726   : > { %v5544_v36 = vrot.slane %v5442_v19, 1 }
 0x729   : > { %5499 = vrot.lane.b32.xlu1 %v12176_v24, %s14220_s3  ;;  %5766 = vrot.lane.b32.xlu0 %v5543_v35, %s14268_s25  ;;  %v5545_v24 = vsel %vm14273_vm14, %v5542_v14, %v5544_v36 }
 0x72d   : > { %5503 = vrot.lane.b32.xlu1 %v12237_v49, %s14220_s3  ;;  %5501 = vrot.lane.b32.xlu0 %v12223_v21, %s14220_s3 }
 0x731   : > { %5558 = vrot.lane.b32.xlu1 %v5543_v35, %s14231_s4  ;;  %5556 = vrot.lane.b32.xlu0 %v5541_v10, %s14231_s4  ;;  %v5443_v10 = vsel %vm12406_vm9, %v12279_v29, 0.0 }
 0x732   : > { %v12417_v3 = vrot.slane %v5443_v10, 1 }
 0x734   : > { %v5547_v63 = vsel %vm14273_vm14, %v5544_v36, %v12417_v3  ;;  %vm14277_vm14 = vcmask 130112  }
 0x735   : > { %5592 = vrot.lane.b32.xlu1 %v12248_v12, %s14116_s0  ;;  %5560 = vrot.lane.b32.xlu0 %v5545_v24, %s14231_s4  ;;  %vm14278_vm7 = vmmov %vm14277_vm14 }
 0x736   : > { %vm14280_vm9 = vmmov %vm14278_vm7 }
 0x739   : > { %5505 = vrot.lane.b32.xlu1 %v12265_v17, %s14220_s3  ;;  %5594 = vrot.lane.b32.xlu0 %v12257_v31, %s14116_s0 }
 0x73d   : > { %5628 = vrot.lane.b32.xlu1 %v12223_v21, %s14082_s21  ;;  %5596 = vrot.lane.b32.xlu0 %v12288_v8, %s14116_s0 }
 0x741   : > { %5562 = vrot.lane.b32.xlu1 %v5547_v63, %s14231_s4  ;;  %5630 = vrot.lane.b32.xlu0 %v12237_v49, %s14082_s21 }
 0x745   : > { %5662 = vrot.lane.b32.xlu1 %v5543_v35, %s14083_s1  ;;  %5632 = vrot.lane.b32.xlu0 %v12265_v17, %s14082_s21 }
 0x749   : > { %5598 = vrot.lane.b32.xlu1 %v12307_v59, %s14116_s0  ;;  %5664 = vrot.lane.b32.xlu0 %v5545_v24, %s14083_s1 }
 0x74d   : > { %5698 = vrot.lane.b32.xlu1 %v12257_v31, %s14091_s22  ;;  %5666 = vrot.lane.b32.xlu0 %v5547_v63, %s14083_s1 }
 0x751   : > { %5634 = vrot.lane.b32.xlu1 %v12279_v29, %s14082_s21  ;;  %5700 = vrot.lane.b32.xlu0 %v12288_v8, %s14091_s22 }
 0x755   : > { %5734 = vrot.lane.b32.xlu1 %v12237_v49, %s14264_s30  ;;  %5702 = vrot.lane.b32.xlu0 %v12307_v59, %s14091_s22 }
 0x759   : > { %5668 = vrot.lane.b32.xlu1 %v12417_v3, %s14083_s1  ;;  %5736 = vrot.lane.b32.xlu0 %v12265_v17, %s14264_s30 }
 0x75b   : > { %v5494_v21 = vpop.permute.xlu0 %5493 }
 0x75c   : > { %5517 = vst.msk [vmem:[#allocation2 + $0x48] sm:$0xff] %vm14277_vm14, %v5494_v21  ;;  %vm14281_vm14 = vcmask 195712  }
 0x75d   : > { %v5496_v12 = vpop.permute.xlu1 %5495  ;;  %5768 = vrot.lane.b32.xlu1 %v5545_v24, %s14268_s25  ;;  %5738 = vrot.lane.b32.xlu0 %v12279_v29, %s14264_s30  ;;  %vm14282_vm3 = vmmov %vm14281_vm14 }
 0x75e   : > { %5518 = vst.msk [vmem:[#allocation2 + $0x60] sm:$0xff] %vm14278_vm7, %v5496_v12  ;;  %vm14283_vm7 = vmmov %vm14282_vm3 }
 0x761   : > { %v5549_v49 = vpop.permute.xlu1 %5548  ;;  %5704 = vrot.lane.b32.xlu1 %v12290_v23, %s14091_s22  ;;  %5770 = vrot.lane.b32.xlu0 %v5547_v63, %s14268_s25 }
 0x762   : > { %5575 = vst.msk [vmem:[#allocation2 + $0x30] sm:$0x80] %vm14279_vm13, %v5549_v49  ;;  %vm14285_vm13 = vcmask 261312  }
 0x763   : > { %v5498_v8 = vpop.permute.xlu0 %5497 }
 0x764   : > { %5519 = vst.msk [vmem:[#allocation2 + $0x78] sm:$0xff] %vm14280_vm9, %v5498_v8  ;;  %vm14286_vm9 = vmmov %vm14285_vm13 }
 0x765   : > { %5772 = vrot.lane.b32.xlu0 %v12417_v3, %s14268_s25  ;;  %vm14288_vm10 = vmmov %vm14286_vm9 }
 0x767   : > { %v5553_v31 = vpop.permute.xlu1 %5552  ;;  %v5551_v17 = vpop.permute.xlu0 %5550 }
 0x768   : > { %5577 = vst.msk [vmem:[#allocation2 + $0x60] sm:$0xff] %vm14281_vm14, %v5553_v31 }
 0x769   : > { %5576 = vst.msk [vmem:[#allocation2 + $0x48] sm:$0xff] %vm14282_vm3, %v5551_v17  ;;  %vm14289_vm3 = vmmov %vm14287_vm15 }
 0x76a   : > { %vm14290_vm14 = vmmov %vm14289_vm3 }
 0x76b   : > { %v5555_v59 = vpop.permute.xlu0 %5554  ;;  %v5585_v33 = vpop.permute.xlu1 %5584 }
 0x76c   : > { %5578 = vst.msk [vmem:[#allocation2 + $0x78] sm:$0xff] %vm14283_vm7, %v5555_v59  ;;  %vm14292_vm7 = vmmov %vm14289_vm3 }
 0x76d   : > { %5611 = vst.msk [vmem:[#allocation2 + $0x30] sm:$0xfe] %vm14284_vm1, %v5585_v33  ;;  %vm14291_vm1 = vcmask 392512  }
 0x76f   : > { %v5589_v4 = vpop.permute.xlu1 %5588  ;;  %v5587_v55 = vpop.permute.xlu0 %5586 }
 0x770   : > { %5613 = vst.msk [vmem:[#allocation2 + $0x60] sm:$0xff] %vm14285_vm13, %v5589_v4  ;;  %vm14293_vm13 = vmmov %vm14291_vm1 }
 0x771   : > { %5612 = vst.msk [vmem:[#allocation2 + $0x48] sm:$0xff] %vm14286_vm9, %v5587_v55  ;;  %vm14294_vm9 = vmmov %vm14291_vm1 }
 0x773   : > { %v5621_v54 = vpop.permute.xlu1 %5620  ;;  %v5591_v14 = vpop.permute.xlu0 %5590 }
 0x774   : > { %5644 = vst.msk [vmem:[#allocation2 + $0x30] sm:$0xff] %vm14287_vm15, %v5621_v54  ;;  %vm14295_vm15 = vcmask 458112  }
 0x775   : > { %5614 = vst.msk [vmem:[#allocation2 + $0x78] sm:$0xff] %vm14288_vm10, %v5591_v14  ;;  %vm14296_vm10 = vmmov %vm14291_vm1 }
 0x777   : > { %v5625_v35 = vpop.permute.xlu1 %5624  ;;  %v5623_v15 = vpop.permute.xlu0 %5622 }
 0x778   : > { %5646 = vst.msk [vmem:[#allocation2 + $0x60] sm:$0xff] %vm14289_vm3, %v5625_v35  ;;  %vm14297_vm3 = vmmov %vm14295_vm15 }
 0x779   : > { %5645 = vst.msk [vmem:[#allocation2 + $0x48] sm:$0xff] %vm14290_vm14, %v5623_v15  ;;  %vm14298_vm14 = vmmov %vm14297_vm3 }
 0x77b   : > { %v5655_v19 = vpop.permute.xlu1 %5654  ;;  %v5627_v36 = vpop.permute.xlu0 %5626 }
 0x77c   : > { %5680 = vst.msk [vmem:[#allocation2 + $0x30] sm:$0xff] %vm14291_vm1, %v5655_v19  ;;  %vm14299_vm1 = vcmask 523712  }
 0x77d   : > { %5647 = vst.msk [vmem:[#allocation2 + $0x78] sm:$0xff] %vm14292_vm7, %v5627_v36  ;;  %vm14300_vm7 = vmmov %vm14297_vm3 }
 0x77f   : > { %v5659_v24 = vpop.permute.xlu1 %5658  ;;  %v5657_v37 = vpop.permute.xlu0 %5656 }
 0x780   : > { %5682 = vst.msk [vmem:[#allocation2 + $0x60] sm:$0xff] %vm14293_vm13, %v5659_v24  ;;  %vm14301_vm13 = vmmov %vm14299_vm1 }
 0x781   : > { %5681 = vst.msk [vmem:[#allocation2 + $0x48] sm:$0xff] %vm14294_vm9, %v5657_v37  ;;  %vm14302_vm9 = vmmov %vm14299_vm1 }
 0x783   : > { %v5691_v10 = vpop.permute.xlu1 %5690  ;;  %v5661_v63 = vpop.permute.xlu0 %5660 }
 0x784   : > { %5716 = vst.msk [vmem:[#allocation2 + $0x30] sm:$0xff] %vm14295_vm15, %v5691_v10  ;;  %vm14303_vm15 = vcmask 589312  }
 0x785   : > { %5683 = vst.msk [vmem:[#allocation2 + $0x78] sm:$0xff] %vm14296_vm10, %v5661_v63  ;;  %vm14304_vm10 = vmmov %vm14299_vm1 }
 0x787   : > { %v5695_v21 = vpop.permute.xlu1 %5694  ;;  %v5693_v12 = vpop.permute.xlu0 %5692 }
 0x788   : > { %5718 = vst.msk [vmem:[#allocation2 + $0x60] sm:$0xff] %vm14297_vm3, %v5695_v21  ;;  %vm14305_vm3 = vmmov %vm14303_vm15 }
 0x789   : > { %5717 = vst.msk [vmem:[#allocation2 + $0x48] sm:$0xff] %vm14298_vm14, %v5693_v12  ;;  %vm14306_vm14 = vmmov %vm14305_vm3 }
 0x78b   : > { %v5727_v49 = vpop.permute.xlu1 %5726  ;;  %v5697_v8 = vpop.permute.xlu0 %5696 }
 0x78c   : > { %5749 = vst.msk [vmem:[#allocation2 + $0x30] sm:$0xff] %vm14299_vm1, %v5727_v49  ;;  %vm14307_vm1 = vcmask 130112  }
 0x78d   : > { %5719 = vst.msk [vmem:[#allocation2 + $0x78] sm:$0xff] %vm14300_vm7, %v5697_v8  ;;  %vm14308_vm7 = vmmov %vm14305_vm3 }
 0x78f   : > { %v5731_v31 = vpop.permute.xlu1 %5730  ;;  %v5729_v17 = vpop.permute.xlu0 %5728 }
 0x790   : > { %5751 = vst.msk [vmem:[#allocation2 + $0x60] sm:$0xff] %vm14301_vm13, %v5731_v31  ;;  %vm14309_vm13 = vmmov %vm14307_vm1 }
 0x791   : > { %5750 = vst.msk [vmem:[#allocation2 + $0x48] sm:$0xff] %vm14302_vm9, %v5729_v17  ;;  %vm14310_vm9 = vmmov %vm14307_vm1 }
 0x793   : > { %v5761_v59 = vpop.permute.xlu1 %5760  ;;  %v5733_v33 = vpop.permute.xlu0 %5732 }
 0x794   : > { %5785 = vst.msk [vmem:[#allocation2 + $0x30] sm:$0xff] %vm14303_vm15, %v5761_v59  ;;  %vm14311_vm15 = vcmask 195712  }
 0x795   : > { %5752 = vst.msk [vmem:[#allocation2 + $0x78] sm:$0xff] %vm14304_vm10, %v5733_v33  ;;  %vm14312_vm10 = vmmov %vm14311_vm15 }
 0x797   : > { %v5765_v4 = vpop.permute.xlu1 %5764  ;;  %v5763_v55 = vpop.permute.xlu0 %5762 }
 0x798   : > { %5787 = vst.msk [vmem:[#allocation2 + $0x60] sm:$0xff] %vm14305_vm3, %v5765_v4  ;;  %vm14313_vm3 = vcmask 261312  }
 0x799   : > { %5786 = vst.msk [vmem:[#allocation2 + $0x48] sm:$0xff] %vm14306_vm14, %v5763_v55  ;;  %vm14314_vm14 = vmmov %vm14312_vm10 }
 0x79b   : > { %v5500_v54 = vpop.permute.xlu1 %5499  ;;  %v5767_v14 = vpop.permute.xlu0 %5766  ;;  %v5792_v35 = vld [vmem:[#allocation2 + $0x30] sm:$0xff] }
 0x79c   : > { %5520 = vst.msk [vmem:[#allocation2 + $0x90] sm:$0xff] %vm14307_vm1, %v5500_v54  ;;  %5948 = vst [vmem:[#allocation2 + $0x30] sm:$0xff] %v12379_v25 }
 0x79d   : > { %5788 = vst.msk [vmem:[#allocation2 + $0x78] sm:$0xff] %vm14308_vm7, %v5767_v14  ;;  %vm14315_vm7 = vmmov %vm14313_vm3 }
 0x79f   : > { %v5504_v19 = vpop.permute.xlu1 %5503  ;;  %v5502_v36 = vpop.permute.xlu0 %5501  ;;  %v5794_v63 = vld [vmem:[#allocation2 + $0x60] sm:$0xff] }
 0x7a0   : > { %v5793_v15 = vld [vmem:[#allocation2 + $0x48] sm:$0xff]  ;;  %5522 = vst.msk [vmem:[#allocation2 + $0xc0] sm:$0xff] %vm14309_vm13, %v5504_v19  ;;  %vm14316_vm13 = vcmask 326912  }
 0x7a1   : > { %5951 = vst [vmem:[#allocation2 + $0x48] sm:$0xff] %v12379_v25  ;;  %5521 = vst.msk [vmem:[#allocation2 + $0xa8] sm:$0xff] %vm14310_vm9, %v5502_v36  ;;  %v5800_v24 = vpack.c.bf16 %v5793_v15, %v5792_v35 }
 0x7a2   : > { %vm14317_vm9 = vmmov %vm14313_vm3 }
 0x7a3   : > { %8475 = vmatprep.mubr.bf16.mxu1 %v5800_v24  ;;  %v5559_v37 = vpop.permute.xlu1 %5558  ;;  %v5557_v10 = vpop.permute.xlu0 %5556 }
 0x7a4   : > { %v5795_v21 = vld [vmem:[#allocation2 + $0x78] sm:$0xff]  ;;  %5580 = vst.msk [vmem:[#allocation2 + $0xa8] sm:$0xff] %vm14311_vm15, %v5559_v37  ;;  %vm14318_vm15 = vmmov %vm14312_vm10 }
 0x7a5   : > { %5579 = vst.msk [vmem:[#allocation2 + $0x90] sm:$0xff] %vm14312_vm10, %v5557_v10  ;;  %v5801_v12 = vpack.c.bf16 %v5795_v21, %v5794_v63  ;;  %vm14319_vm10 = vmmov %vm14316_vm13 }
 0x7a7   : > { %8476 = vmatmul.mubr.bf16.vlgmr.msra.gmra.mrb[16].mxu1 %v5801_v12  ;;  %v5593_v49 = vpop.permute.xlu1 %5592  ;;  %v5561_v8 = vpop.permute.xlu0 %5560 }
 0x7a8   : > { %5615 = vst.msk [vmem:[#allocation2 + $0x90] sm:$0xff] %vm14313_vm3, %v5593_v49  ;;  %vm14320_vm3 = vcmask 392512  }
 0x7a9   : > { %5581 = vst.msk [vmem:[#allocation2 + $0xc0] sm:$0xff] %vm14314_vm14, %v5561_v8  ;;  %vm14321_vm14 = vmmov %vm14319_vm10 }
 0x7ab   : > { %v5506_v31 = vpop.permute.xlu1 %5505  ;;  %v5595_v17 = vpop.permute.xlu0 %5594 }
 0x7ac   : > { %5523 = vst.msk [vmem:[#allocation2 + $0xd8] sm:$0xff] %vm14307_vm1, %v5506_v31  ;;  %vm14322_vm1 = vmmov %vm14315_vm7 }
 0x7ad   : > { %5616 = vst.msk [vmem:[#allocation2 + $0xa8] sm:$0xff] %vm14315_vm7, %v5595_v17  ;;  %vm14323_vm7 = vmmov %vm14320_vm3 }
 0x7af   : > { %v5629_v59 = vpop.permute.xlu1 %5628  ;;  %v5597_v33 = vpop.permute.xlu0 %5596 }
 0x7b0   : > { %5648 = vst.msk [vmem:[#allocation2 + $0x90] sm:$0xff] %vm14316_vm13, %v5629_v59  ;;  %vm14324_vm13 = vcmask 458112  }
 0x7b1   : > { %5617 = vst.msk [vmem:[#allocation2 + $0xc0] sm:$0xff] %vm14317_vm9, %v5597_v33  ;;  %vm14325_vm9 = vmmov %vm14320_vm3 }
 0x7b3   : > { %v5563_v4 = vpop.permute.xlu1 %5562  ;;  %v5631_v55 = vpop.permute.xlu0 %5630 }
 0x7b4   : > { %5582 = vst.msk [vmem:[#allocation2 + $0xd8] sm:$0xff] %vm14318_vm15, %v5563_v4  ;;  %vm14326_vm15 = vmmov %vm14319_vm10 }
 0x7b5   : > { %5649 = vst.msk [vmem:[#allocation2 + $0xa8] sm:$0xff] %vm14319_vm10, %v5631_v55  ;;  %vm14327_vm10 = vmmov %vm14324_vm13 }
 0x7b7   : > { %v5663_v54 = vpop.permute.xlu1 %5662  ;;  %v5633_v14 = vpop.permute.xlu0 %5632 }
 0x7b8   : > { %5684 = vst.msk [vmem:[#allocation2 + $0x90] sm:$0xff] %vm14320_vm3, %v5663_v54  ;;  %vm14328_vm3 = vcmask 523712  }
 0x7b9   : > { %5650 = vst.msk [vmem:[#allocation2 + $0xc0] sm:$0xff] %vm14321_vm14, %v5633_v14  ;;  %vm14329_vm14 = vmmov %vm14327_vm10 }
 0x7bb   : > { %v5599_v35 = vpop.permute.xlu1 %5598  ;;  %v5665_v15 = vpop.permute.xlu0 %5664 }
 0x7bc   : > { %5618 = vst.msk [vmem:[#allocation2 + $0xd8] sm:$0xff] %vm14322_vm1, %v5599_v35  ;;  %vm14330_vm1 = vcmask 391488  }
 0x7bd   : > { %5685 = vst.msk [vmem:[#allocation2 + $0xa8] sm:$0xff] %vm14323_vm7, %v5665_v15  ;;  %vm14331_vm7 = vmmov %vm14328_vm3  ;;  %v12525_v15 = vld [vmem:[%s14337_s6] ss:$0 sm:$0xff] }
 0x7bf   : > { %v5699_v19 = vpop.permute.xlu1 %5698  ;;  %v5667_v36 = vpop.permute.xlu0 %5666 }
 0x7c0   : > { %5720 = vst.msk [vmem:[#allocation2 + $0x90] sm:$0xff] %vm14324_vm13, %v5699_v19  ;;  %vm14332_vm13 = vcmask 589312  }
 0x7c1   : > { %5686 = vst.msk [vmem:[#allocation2 + $0xc0] sm:$0xff] %vm14325_vm9, %v5667_v36  ;;  %vm14333_vm9 = vmmov %vm14328_vm3 }
 0x7c3   : > { %v5635_v24 = vpop.permute.xlu1 %5634  ;;  %v5701_v37 = vpop.permute.xlu0 %5700 }
 0x7c4   : > { %5651 = vst.msk [vmem:[#allocation2 + $0xd8] sm:$0xff] %vm14326_vm15, %v5635_v24  ;;  %vm14334_vm15 = vcmask 450944  }
 0x7c5   : > { %5721 = vst.msk [vmem:[#allocation2 + $0xa8] sm:$0xff] %vm14327_vm10, %v5701_v37  ;;  %vm14335_vm10 = vmmov %vm14332_vm13 }
 0x7c7   : > { %v5735_v10 = vpop.permute.xlu1 %5734  ;;  %v5703_v63 = vpop.permute.xlu0 %5702 }
 0x7c8   : > { %5753 = vst.msk [vmem:[#allocation2 + $0x90] sm:$0xff] %vm14328_vm3, %v5735_v10  ;;  %vm14336_vm3 = vcmask 588288  }
 0x7c9   : > { %5722 = vst.msk [vmem:[#allocation2 + $0xc0] sm:$0xff] %vm14329_vm14, %v5703_v63  ;;  %vm13632_vm14 = vcmask 130048  }
 0x7cb   : > { %v5669_v21 = vpop.permute.xlu1 %5668  ;;  %v5737_v12 = vpop.permute.xlu0 %5736 }
 0x7cc   : > { %5687 = vst.msk [vmem:[#allocation2 + $0xd8] sm:$0x7f] %vm14330_vm1, %v5669_v21  ;;  %vm6008_vm1 = vcmask 130049  }
 0x7cd   : > { %5754 = vst.msk [vmem:[#allocation2 + $0xa8] sm:$0xff] %vm14331_vm7, %v5737_v12  ;;  %vm6315_vm7 = vcmask 130055  }
 0x7cf   : > { %v5769_v49 = vpop.permute.xlu1 %5768  ;;  %v5739_v8 = vpop.permute.xlu0 %5738 }
 0x7d0   : > { %5789 = vst.msk [vmem:[#allocation2 + $0x90] sm:$0xff] %vm14332_vm13, %v5769_v49  ;;  %vm14347_vm13 = vnez %v14255_v22 }
 0x7d1   : > { %5755 = vst.msk [vmem:[#allocation2 + $0xc0] sm:$0xff] %vm14333_vm9, %v5739_v8  ;;  %vm6018_vm9 = vcmask 122880  }
 0x7d3   : > { %v5705_v31 = vpop.permute.xlu1 %5704  ;;  %v5771_v17 = vpop.permute.xlu0 %5770 }
 0x7d4   : > { %5723 = vst.msk [vmem:[#allocation2 + $0xd8] sm:$0x1] %vm14334_vm15, %v5705_v31  ;;  %vm14348_vm15 = vnez %v14261_v27 }
 0x7d5   : > { %5790 = vst.msk [vmem:[#allocation2 + $0xa8] sm:$0xff] %vm14335_vm10, %v5771_v17  ;;  %vm14349_vm10 = vnez %v14245_v39 }
 0x7d7   : > { %v5773_v59 = vpop.permute.xlu0 %5772  ;;  %v5796_v33 = vld [vmem:[#allocation2 + $0x90] sm:$0xff] }
 0x7d8   : > { %5791 = vst.msk [vmem:[#allocation2 + $0xc0] sm:$0x7f] %vm14336_vm3, %v5773_v59  ;;  %vm14350_vm3 = vnez %v14276_v6 }
 0x7db   : > { %v5799_v55 = vld [vmem:[#allocation2 + $0xd8] sm:$0xff] }
 0x7dc   : > { %v5797_v4 = vld [vmem:[#allocation2 + $0xa8] sm:$0xff]  ;;  %5957 = vst [vmem:[#allocation2 + $0xd8] sm:$0xff] %v12379_v25 }
 0x7dd   : > { %v5802_v54 = vpack.c.bf16 %v5797_v4, %v5796_v33 }
 0x7df   : > { %8479 = vmatprep.mubr.bf16.mxu1 %v5802_v54  ;;  %v5798_v14 = vld [vmem:[#allocation2 + $0xc0] sm:$0xff] }
 0x7e0   : > { %v5803_v35 = vpack.c.bf16 %v5799_v55, %v5798_v14  ;;  %5954 = vst [vmem:[#allocation2 + $0xc0] sm:$0xff] %v12379_v25 }
 0x7e2   : > { %8480 = vmatmul.mubr.bf16.gmra.mrb[20].mxu1 %v5803_v35 }
 0x87a   : > { %v8477_v19 = vpop.f32.mrb[16].mxu1 }
 0x87b   : > { %v5918_v36 = vadd.f32 %v8477_v19, %v12525_v15  ;;  %v5909_v24 = vpop.f32.mrb[17].mxu1 }
 0x87c   : > { %v5910_v37 = vadd.f32 %v12525_v15, %v5909_v24  ;;  %v8478_v10 = vpop.f32.mrb[18].mxu1 }
 0x87d   : > { %v5942_v63 = vmax.f32 %v5918_v36, 0.0  ;;  %v5921_v21 = vadd.f32 %v8478_v10, %v12525_v15  ;;  %v5912_v12 = vpop.f32.mrb[19].mxu1 }
 0x87e   : > { %v12530_v49 = vmax.f32 %v5910_v37, 0.0  ;;  %v5913_v8 = vadd.f32 %v12525_v15, %v5912_v12  ;;  %v8597_v12 = vld [vmem:[%s13458_s7 + $0x40] sm:$0xff]  }
 0x87f   : > { %v5970_v31 = vsel %vm12150_vm8, %v5942_v63, 0.0  ;;  %v5943_v17 = vmax.f32 %v5921_v21, 0.0  ;;  %6166 = vrot.lane.b32.xlu0 %v5942_v63, %s14268_s25  ;;  %6277 = vrot.lane.b32.xlu1 %v5942_v63, %s13618_s19  ;;  %v5962_v59 = vsel %vm12154_vm6, %v5942_v63, 0.0  ;;  %vm14346_vm8 = vnez %v14272_v45 }
 0x880   : > { %v6072_v33 = vrot.slane %v5970_v31, 1  ;;  %v5941_v4 = vmax.f32 %v5913_v8, 0.0  ;;  %v5987_v55 = vrot.slane %v5962_v59, 7  ;;  %v5968_v54 = vsel %vm12112_vm2, %v12530_v49, 0.0  ;;  %8265 = vmatprep.subr.bf16.mxu0 %v8597_v12  ;;  %v8598_v8 = vld [vmem:[%s13458_s7] sm:$0xff]   ;;  %v8599_v31 = vld [vmem:[%s13458_s7 + $0x48] sm:$0xff]  }
 0x881   : > { %v5971_v57 = vsel %vm12168_vm12, %v5943_v17, 0.0  ;;  %v5963_v14 = vsel %vm12172_vm5, %v5943_v17, 0.0  ;;  %v12546_v35 = vrot.slane %v5968_v54, 1  ;;  %v5960_v52 = vsel %vm12106_vm4, %v12530_v49, 0.0  ;;  %8266 = vmatpush3.bf16.msra.mxu0 %v8598_v8  ;;  %v8600_v54 = vld [vmem:[%s13458_s7 + $0x8] sm:$0xff]   ;;  %v8612_v12 = vld [vmem:[%s13458_s7 + $0x38] sm:$0xff]  }
 0x882   : > { %v12551_v19 = vrot.slane %v5971_v57, 1  ;;  %v5969_v36 = vsel %vm12124_vm11, %v5941_v4, 0.0  ;;  %v12555_v24 = vrot.slane %v5963_v14, 7  ;;  %v12557_v5 = vrot.slane %v5960_v52, 7  ;;  %8267 = vmatprep.subr.bf16.mxu0 %v8599_v31  ;;  %v8601_v57 = vld [vmem:[%s13458_s7 + $0x50] sm:$0xff]   ;;  %v8604_v14 = vld [vmem:[%s13458_s7 + $0x18] sm:$0xff]  }
 0x883   : > { %v6070_v51 = vrot.slane %v5969_v36, 1  ;;  %6032 = vrot.lane.b32.xlu1 %v5942_v63, %s14231_s4  ;;  %6162 = vrot.lane.b32.xlu0 %v12530_v49, %s14268_s25  ;;  %v5961_v18 = vsel %vm12116_vm0, %v5941_v4, 0.0  ;;  %6316 = vst.msk [vmem:[#allocation2 + $0x8] sm:$0x80] %vm6315_vm7, %v12546_v35  ;;  %vm14338_vm5 = vcmask 1046528   ;;  %vm14339_vm12 = vcmask 1040384  }
 0x884   : > { %v6075_v42 = vsel %vm14338_vm5, %v6072_v33, %v12551_v19  ;;  %v5990_v58 = vsel %vm14339_vm12, %v5987_v55, %v12555_v24  ;;  %v5985_v37 = vrot.slane %v5961_v18, 7  ;;  %6009 = vst.msk [vmem:[#allocation2 + $0x48] sm:$0xfe] %vm6008_vm1, %v12557_v5  ;;  %vm14340_vm6 = vmmov %vm14338_vm5  ;;  %v8605_v52 = vld [vmem:[%s13458_s7 + $0x60] sm:$0xff]   ;;  %v8607_v36 = vld [vmem:[%s13458_s7 + $0x68] sm:$0xff]   ;;  %vm6324_vm11 = vcmask 129024  }
 0x885   : > { %6319 = vst.msk [vmem:[#allocation2 + $0x50] sm:$0xff] %vm13632_vm14, %v6075_v42  ;;  %v12574_v10 = vsel %vm14340_vm6, %v6070_v51, %v6072_v33  ;;  %6013 = vst.msk [vmem:[#allocation2 + $0x90] sm:$0xff] %vm13632_vm14, %v5990_v58  ;;  %8268 = vmatpush3.bf16.msra.mxu0 %v8600_v54  ;;  %v8609_v18 = vld [vmem:[%s13458_s7 + $0x70] sm:$0xff]   ;;  %vm14351_vm1 = vnez %v14258_v62  ;;  %vm14352_vm7 = vnez %v14267_v43 }
 0x886   : > { %vm14341_vm4 = vmmov %vm14338_vm5  ;;  %6318 = vst.msk [vmem:[#allocation2 + $0x38] sm:$0xff] %vm13632_vm14, %v12574_v10  ;;  %8269 = vmatprep.subr.bf16.mxu0 %v8601_v57  ;;  %vm14353_vm5 = vnez %v14248_v34 }
 0x887   : > { %v6071_v46 = vsel %vm14341_vm4, %v12546_v35, %v6070_v51  ;;  %vm14342_vm2 = vmmov %vm14339_vm12  ;;  %6279 = vrot.lane.b32.xlu0 %v5943_v17, %s13618_s19  ;;  %6028 = vrot.lane.b32.xlu1 %v12530_v49, %s14231_s4  ;;  %s14344_s19 = smov 112   ;;  %v8608_v51 = vld [vmem:[%s13458_s7 + $0x28] sm:$0xff]  }
 0x888   : > { %6317 = vst.msk [vmem:[#allocation2 + $0x20] sm:$0xff] %vm13632_vm14, %v6071_v46  ;;  %v5986_v63 = vsel %vm14342_vm2, %v12557_v5, %v5985_v37  ;;  %vm14343_vm0 = vmmov %vm14342_vm2 }
 0x889   : > { %v5988_v21 = vsel %vm14343_vm0, %v5985_v37, %v5987_v55  ;;  %6703 = vst [vmem:[#allocation2 + $0x20] sm:$0xff] %v12379_v25  ;;  %6011 = vst.msk [vmem:[#allocation2 + $0x60] sm:$0xff] %vm13632_vm14, %v5986_v63  ;;  %v8610_v37 = vld [vmem:[%s13458_s7 + $0x30] sm:$0xff]  }
 0x88a   : > { %6012 = vst.msk [vmem:[#allocation2 + $0x78] sm:$0xff] %vm13632_vm14, %v5988_v21  ;;  %vm14354_vm12 = vmmov %vm14341_vm4 }
 0x88b   : > { %6034 = vrot.lane.b32.xlu0 %v5943_v17, %s14231_s4  ;;  %6168 = vrot.lane.b32.xlu1 %v5943_v17, %s14268_s25  ;;  %v8602_v17 = vld [vmem:[%s13458_s7 + $0x10] sm:$0xff]   ;;  %vm14355_vm6 = vmmov %vm14343_vm0 }
 0x88c   : > { %v6329_v59 = vld [vmem:[#allocation2 + $0x50] sm:$0xff]  ;;  %8270 = vmatpush3.bf16.msra.mxu0 %v8602_v17  ;;  %vm14356_vm2 = vmmov %vm14341_vm4 }
 0x88d   : > { %v6327_v33 = vld [vmem:[#allocation2 + $0x38] sm:$0xff] }
 0x88e   : > { %v6343_v55 = vpack.c.bf16 %v6329_v59, %v6327_v33  ;;  %6706 = vst [vmem:[#allocation2 + $0x38] sm:$0xff] %v12379_v25  ;;  %v8603_v25 = vld [vmem:[%s13458_s7 + $0x58] sm:$0xff]  }
 0x88f   : > { %6275 = vrot.lane.b32.xlu0 %v5941_v4, %s14344_s19  ;;  %6164 = vrot.lane.b32.xlu1 %v5941_v4, %s14268_s25 }
 0x890   : > { %6517 = vmatprep.mubr.bf16.mxu0 %v6343_v55  ;;  %8271 = vmatprep.subr.bf16.mxu0 %v8603_v25 }
 0x891   : > { %8272 = vmatpush3.bf16.msra.mxu0 %v8604_v14 }
 0x892   : > { %8273 = vmatprep.subr.bf16.mxu0 %v8605_v52 }
 0x893   : > { %6030 = vrot.lane.b32.xlu0 %v5941_v4, %s14231_s4  ;;  %6090 = vrot.lane.b32.xlu1 %v6075_v42, %s14082_s21  ;;  %v8606_v4 = vld [vmem:[%s13458_s7 + $0x20] sm:$0xff]  }
 0x895   : > { %8274 = vmatpush3.bf16.msra.mxu0 %v8606_v4 }
 0x896   : > { %8275 = vmatprep.subr.bf16.mxu0 %v8607_v36 }
 0x897   : > { %6129 = vrot.lane.b32.xlu1 %v5990_v58, %s14091_s22  ;;  %6084 = vrot.lane.b32.xlu0 %v12546_v35, %s14082_s21 }
 0x899   : > { %8276 = vmatpush3.bf16.msra.mxu0 %v8608_v51 }
 0x89a   : > { %8277 = vmatprep.subr.bf16.mxu0 %v8609_v18 }
 0x89b   : > { %6086 = vrot.lane.b32.xlu1 %v6071_v46, %s14082_s21  ;;  %6123 = vrot.lane.b32.xlu0 %v12557_v5, %s14091_s22 }
 0x89d   : > { %8278 = vmatpush3.bf16.msra.mxu0 %v8610_v37 }
 0x89f   : > { %6201 = vrot.lane.b32.xlu0 %v6075_v42, %s13621_s29  ;;  %6125 = vrot.lane.b32.xlu1 %v5986_v63, %s14091_s22  ;;  %v8611_v42 = vld [vmem:[%s13458_s7 + $0x78] sm:$0xff]   ;;  %s13633_s29 = smov 96  }
 0x8a0   : > { %8279 = vmatprep.subr.bf16.mxu0 %v8611_v42 }
 0x8a1   : > { %8280 = vmatpush3.bf16.msra.mxu0 %v8612_v12 }
 0x8a3   : > { %6240 = vrot.lane.b32.xlu0 %v5990_v58, %s13633_s29  ;;  %6199 = vrot.lane.b32.xlu1 %v12574_v10, %s14345_s18 }
 0x8a7   : > { %6197 = vrot.lane.b32.xlu0 %v6071_v46, %s14345_s18  ;;  %6238 = vrot.lane.b32.xlu1 %v5988_v21, %s13633_s29 }
 0x8ab   : > { %6236 = vrot.lane.b32.xlu0 %v5986_v63, %s13633_s29 }
 0x8af   : > { %6088 = vrot.lane.b32.xlu0 %v12574_v10, %s14082_s21 }
 0x8b3   : > { %6127 = vrot.lane.b32.xlu0 %v5988_v21, %s14091_s22 }
 0x8b5   : > { %v8481_v58 = vpop.f32.mrb[20].mxu1 }
 0x8b6   : > { %v5934_v8 = vadd.f32 %v8481_v58, %v12525_v15  ;;  %v5925_v31 = vpop.f32.mrb[21].mxu1 }
 0x8b7   : > { %v5926_v46 = vadd.f32 %v12525_v15, %v5925_v31  ;;  %v8482_v59 = vpop.f32.mrb[22].mxu1 }
 0x8b8   : > { %v5946_v33 = vmax.f32 %v5934_v8, 0.0  ;;  %v5937_v55 = vadd.f32 %v8482_v59, %v12525_v15  ;;  %v5928_v54 = vpop.f32.mrb[23].mxu1 }
 0x8b9   : > { %v5944_v57 = vmax.f32 %v5926_v46, 0.0  ;;  %v5929_v17 = vadd.f32 %v12525_v15, %v5928_v54 }
 0x8ba   : > { %v12667_v63 = vmax.f32 %v5937_v55, 0.0  ;;  %6174 = vrot.lane.b32.xlu0 %v5946_v33, %s14268_s25  ;;  %6285 = vrot.lane.b32.xlu1 %v5946_v33, %s14344_s19  ;;  %v5974_v10 = vsel %vm14346_vm8, %v5946_v33, 0.0  ;;  %v5966_v21 = vsel %vm14347_vm13, %v5946_v33, 0.0  ;;  %vm14357_vm8 = vmmov %vm14356_vm2 }
 0x8bb   : > { %v5945_v25 = vmax.f32 %v5929_v17, 0.0  ;;  %v5972_v14 = vsel %vm14348_vm15, %v5944_v57, 0.0  ;;  %v5964_v15 = vsel %vm14349_vm10, %v5944_v57, 0.0  ;;  %v6080_v52 = vrot.slane %v5974_v10, 1  ;;  %vm14358_vm13 = vmmov %vm14343_vm0 }
 0x8bc   : > { %v6076_v4 = vrot.slane %v5972_v14, 1  ;;  %v5991_v36 = vrot.slane %v5964_v15, 7  ;;  %v5975_v51 = vsel %vm14350_vm3, %v12667_v63, 0.0  ;;  %v5967_v22 = vsel %vm14351_vm1, %v12667_v63, 0.0 }
 0x8bd   : > { %v5973_v45 = vsel %vm14352_vm7, %v5945_v25, 0.0  ;;  %v5965_v27 = vsel %vm14353_vm5, %v5945_v25, 0.0  ;;  %v12689_v18 = vrot.slane %v5975_v51, 1  ;;  %v5995_v39 = vrot.slane %v5966_v21, 7 }
 0x8be   : > { %6170 = vrot.lane.b32.xlu0 %v5944_v57, %s14268_s25  ;;  %6040 = vrot.lane.b32.xlu1 %v5946_v33, %s14231_s4  ;;  %v6077_v6 = vsel %vm14354_vm12, %v12551_v19, %v6076_v4  ;;  %v5992_v62 = vsel %vm14355_vm6, %v12555_v24, %v5991_v36  ;;  %v6078_v37 = vrot.slane %v5973_v45, 1  ;;  %v5993_v42 = vrot.slane %v5965_v27, 7 }
 0x8bf   : > { %6320 = vst.msk [vmem:[#allocation2 + $0x68] sm:$0xff] %vm13632_vm14, %v6077_v6  ;;  %6014 = vst.msk [vmem:[#allocation2 + $0xa8] sm:$0xff] %vm13632_vm14, %v5992_v62  ;;  %v6083_v34 = vsel %vm14341_vm4, %v6080_v52, %v12689_v18  ;;  %v12703_v43 = vrot.slane %v5967_v22, 7  ;;  %vm13630_vm15 = vcmask 392448   ;;  %vm13628_vm10 = vcmask 523648  }
 0x8c0   : > { %6325 = vst.msk [vmem:[#allocation2 + $0xc8] sm:$0x7f] %vm6324_vm11, %v12689_v18  ;;  %v6079_v12 = vsel %vm14356_vm2, %v6076_v4, %v6078_v37  ;;  %v5994_v19 = vsel %vm14343_vm0, %v5991_v36, %v5993_v42  ;;  %v6081_v24 = vsel %vm14357_vm8, %v6078_v37, %v6080_v52  ;;  %v5996_v58 = vsel %vm14358_vm13, %v5993_v42, %v5995_v39  ;;  %vm14359_vm11 = vmmov %vm14343_vm0 }
 0x8c1   : > { %6323 = vst.msk [vmem:[#allocation2 + $0xb0] sm:$0xff] %vm13632_vm14, %v6083_v34  ;;  %6321 = vst.msk [vmem:[#allocation2 + $0x80] sm:$0xff] %vm13632_vm14, %v6079_v12  ;;  %v12730_v8 = vsel %vm14359_vm11, %v5995_v39, %v12703_v43  ;;  %vm6111_vm3 = vcmask 392455   ;;  %vm6186_vm1 = vcmask 654848   ;;  %vm6150_vm7 = vcmask 523649  }
 0x8c2   : > { %6015 = vst.msk [vmem:[#allocation2 + $0xc0] sm:$0xff] %vm13632_vm14, %v5994_v19  ;;  %6322 = vst.msk [vmem:[#allocation2 + $0x98] sm:$0xff] %vm13632_vm14, %v6081_v24  ;;  %6283 = vrot.lane.b32.xlu0 %v5945_v25, %s14344_s19  ;;  %6281 = vrot.lane.b32.xlu1 %v5944_v57, %s14344_s19  ;;  %vm6224_vm5 = vcmask 786048   ;;  %vm13629_vm12 = vcmask 917248   ;;  %vm13626_vm6 = vcmask 1048448   ;;  %vm13627_vm4 = vcmask 785024  }
 0x8c3   : > { %6019 = vst.msk [vmem:[#allocation2 + $0x108] sm:$0x1] %vm6018_vm9, %v12703_v43  ;;  %vm13631_vm9 = vcmask 261248   ;;  %vm6271_vm2 = vcmask 910080   ;;  %vm14360_vm0 = vcmask 392519   ;;  %vm14361_vm8 = vcmask 458113  }
 0x8c4   : > { %6016 = vst.msk [vmem:[#allocation2 + $0xd8] sm:$0xff] %vm13632_vm14, %v5996_v58  ;;  %vm14362_vm13 = vcmask 523712   ;;  %vm14363_vm11 = vcmask 589312  }
 0x8c6   : > { %6038 = vrot.lane.b32.xlu0 %v5945_v25, %s14231_s4  ;;  %6036 = vrot.lane.b32.xlu1 %v5944_v57, %s14231_s4 }
 0x8c8   : > { %v6333_v45 = vld [vmem:[#allocation2 + $0x80] sm:$0xff] }
 0x8ca   : > { %6092 = vrot.lane.b32.xlu0 %v6077_v6, %s14082_s21  ;;  %6172 = vrot.lane.b32.xlu1 %v5945_v25, %s14268_s25 }
 0x8ce   : > { %6131 = vrot.lane.b32.xlu0 %v5992_v62, %s14091_s22  ;;  %6203 = vrot.lane.b32.xlu1 %v6077_v6, %s14345_s18 }
 0x8d2   : > { %6205 = vrot.lane.b32.xlu0 %v6079_v12, %s14345_s18  ;;  %6242 = vrot.lane.b32.xlu1 %v5992_v62, %s13633_s29  ;;  %v6331_v62 = vld [vmem:[#allocation2 + $0x68] sm:$0xff] }
 0x8d3   : > { %v6345_v37 = vpack.c.bf16 %v6333_v45, %v6331_v62  ;;  %v6339_v62 = vld [vmem:[#allocation2 + $0xc8] sm:$0xff] }
 0x8d6   : > { %6244 = vrot.lane.b32.xlu0 %v5994_v19, %s13633_s29  ;;  %6098 = vrot.lane.b32.xlu1 %v6083_v34, %s14082_s21 }
 0x8da   : > { %6209 = vrot.lane.b32.xlu0 %v6083_v34, %s14345_s18  ;;  %6137 = vrot.lane.b32.xlu1 %v12730_v8, %s14091_s22 }
 0x8de   : > { %6248 = vrot.lane.b32.xlu0 %v12730_v8, %s13633_s29  ;;  %6094 = vrot.lane.b32.xlu1 %v6079_v12, %s14082_s21 }
 0x8e2   : > { %6096 = vrot.lane.b32.xlu0 %v6081_v24, %s14082_s21  ;;  %6133 = vrot.lane.b32.xlu1 %v5994_v19, %s14091_s22 }
 0x8e6   : > { %6135 = vrot.lane.b32.xlu0 %v5996_v58, %s14091_s22  ;;  %6207 = vrot.lane.b32.xlu1 %v6081_v24, %s14345_s18 }
 0x8ea   : > { %6287 = vrot.lane.b32.xlu0 %v12667_v63, %s14344_s19  ;;  %6246 = vrot.lane.b32.xlu1 %v5996_v58, %s13633_s29 }
 0x8ee   : > { %5688 = vrot.lane.b32.xlu0 %v12135_v40, %s14091_s22  ;;  %6176 = vrot.lane.b32.xlu1 %v12667_v63, %s14268_s25 }
 0x8f1   : > { %v12749_v31 = vpop.permute.xlu0 %6166  ;;  %v6278_v46 = vpop.permute.xlu1 %6277 }
 0x8f2   : > { %5758 = vrot.lane.b32.xlu0 %v12189_v11, %s14268_s25  ;;  %6211 = vrot.lane.b32.xlu1 %v12689_v18, %s14345_s18 }
 0x8f5   : > { %v6033_v59 = vpop.permute.xlu1 %6032  ;;  %v6163_v33 = vpop.permute.xlu0 %6162 }
 0x8f6   : > { %6055 = vst.msk [vmem:[#allocation2 + $0x78] sm:$0xff] %vm13631_vm9, %v6033_v59  ;;  %6234 = vrot.lane.b32.xlu0 %v12557_v5, %s13633_s29  ;;  %6250 = vrot.lane.b32.xlu1 %v12703_v43, %s13633_s29 }
 0x8f9   : > { %v12760_v40 = vpop.permute.xlu0 %6279  ;;  %v6029_v55 = vpop.permute.xlu1 %6028 }
 0x8fa   : > { %6053 = vst.msk [vmem:[#allocation2 + $0x48] sm:$0xff] %vm13631_vm9, %v6029_v55  ;;  %6273 = vrot.lane.b32.xlu0 %v12530_v49, %s14344_s19  ;;  %5652 = vrot.lane.b32.xlu1 %v12148_v38, %s14083_s1  ;;  %s14409_s1 = smov 3  }
 0x8fd   : > { %v6035_v11 = vpop.permute.xlu0 %6034  ;;  %v6169_v54 = vpop.permute.xlu1 %6168 }
 0x8fe   : > { %6056 = vst.msk [vmem:[#allocation2 + $0x90] sm:$0xff] %vm13631_vm9, %v6035_v11  ;;  %5724 = vrot.lane.b32.xlu1 %v12110_v32, %s14264_s30 }
 0x901   : > { %v6276_v5 = vpop.permute.xlu0 %6275  ;;  %v6165_v57 = vpop.permute.xlu1 %6164 }
 0x902   : > { %6195 = vrot.lane.b32.xlu1 %v12546_v35, %s14345_s18 }
 0x905   : > { %v6031_v17 = vpop.permute.xlu0 %6030  ;;  %v6091_v10 = vpop.permute.xlu1 %6090 }
 0x906   : > { %6054 = vst.msk [vmem:[#allocation2 + $0x60] sm:$0xff] %vm13631_vm9, %v6031_v17  ;;  %5756 = vrot.lane.b32.xlu1 %v12148_v38, %s14268_s25 }
 0x907   : > { %6116 = vst.msk [vmem:[#allocation2 + $0x78] sm:$0xff] %vm13630_vm15, %v6091_v10 }
 0x909   : > { %v6130_v49 = vpop.permute.xlu1 %6129  ;;  %v6085_v32 = vpop.permute.xlu0 %6084 }
 0x90a   : > { %6155 = vst.msk [vmem:[#allocation2 + $0x78] sm:$0xff] %vm13628_vm10, %v6130_v49  ;;  %v6335_v49 = vld [vmem:[#allocation2 + $0x98] sm:$0xff] }
 0x90b   : > { %6112 = vst.msk [vmem:[#allocation2 + $0x30] sm:$0x80] %vm6111_vm3, %v6085_v32  ;;  %v6337_v32 = vld [vmem:[#allocation2 + $0xb0] sm:$0xff]  ;;  %vm13623_vm3 = vcmask 786055  }
 0x90c   : > { %6190 = vst.msk [vmem:[#allocation2 + $0x78] sm:$0xff] %vm6186_vm1, %v6169_v54 }
 0x90d   : > { %v6087_v35 = vpop.permute.xlu1 %6086  ;;  %v6124_v21 = vpop.permute.xlu0 %6123 }
 0x90e   : > { %6114 = vst.msk [vmem:[#allocation2 + $0x48] sm:$0xff] %vm13630_vm15, %v6087_v35 }
 0x90f   : > { %6151 = vst.msk [vmem:[#allocation2 + $0x30] sm:$0xfe] %vm6150_vm7, %v6124_v21 }
 0x910   : > { %6187 = vst.msk [vmem:[#allocation2 + $0x30] sm:$0xff] %vm6186_vm1, %v6163_v33 }
 0x911   : > { %v6202_v38 = vpop.permute.xlu0 %6201  ;;  %v6126_v25 = vpop.permute.xlu1 %6125 }
 0x912   : > { %6153 = vst.msk [vmem:[#allocation2 + $0x48] sm:$0xff] %vm13628_vm10, %v6126_v25  ;;  %v6347_v25 = vpack.c.bf16 %v6337_v32, %v6335_v49 }
 0x913   : > { %6188 = vst.msk [vmem:[#allocation2 + $0x48] sm:$0xff] %vm6186_vm1, %v6165_v57 }
 0x915   : > { %v6241_v14 = vpop.permute.xlu0 %6240  ;;  %v6200_v15 = vpop.permute.xlu1 %6199 }
 0x916   : > { %6226 = vst.msk [vmem:[#allocation2 + $0x48] sm:$0xff] %vm6224_vm5, %v6200_v15 }
 0x919   : > { %v6198_v52 = vpop.permute.xlu0 %6197  ;;  %v6239_v4 = vpop.permute.xlu1 %6238 }
 0x91a   : > { %6225 = vst.msk [vmem:[#allocation2 + $0x30] sm:$0xff] %vm6224_vm5, %v6198_v52 }
 0x91b   : > { %6265 = vst.msk [vmem:[#allocation2 + $0x48] sm:$0xff] %vm13629_vm12, %v6239_v4 }
 0x91c   : > { %6300 = vst.msk [vmem:[#allocation2 + $0x48] sm:$0xff] %vm13626_vm6, %v6278_v46 }
 0x91d   : > { %v6237_v36 = vpop.permute.xlu0 %6236 }
 0x91e   : > { %6264 = vst.msk [vmem:[#allocation2 + $0x30] sm:$0xff] %vm13629_vm12, %v6237_v36 }
 0x91f   : > { %6299 = vst.msk [vmem:[#allocation2 + $0x30] sm:$0xff] %vm13626_vm6, %v6276_v5 }
 0x921   : > { %v6089_v51 = vpop.permute.xlu0 %6088 }
 0x922   : > { %6115 = vst.msk [vmem:[#allocation2 + $0x60] sm:$0xff] %vm13630_vm15, %v6089_v51 }
 0x923   : > { %v6328_v39 = vld [vmem:[#allocation2 + $0x48] sm:$0xff] }
 0x925   : > { %v6128_v22 = vpop.permute.xlu0 %6127 }
 0x926   : > { %6154 = vst.msk [vmem:[#allocation2 + $0x60] sm:$0xff] %vm13628_vm10, %v6128_v22  ;;  %v6326_v27 = vld [vmem:[#allocation2 + $0x30] sm:$0xff] }
 0x927   : > { %6189 = vst.msk [vmem:[#allocation2 + $0x60] sm:$0xff] %vm6186_vm1, %v12749_v31  ;;  %v6342_v6 = vpack.c.bf16 %v6328_v39, %v6326_v27 }
 0x928   : > { %6227 = vst.msk [vmem:[#allocation2 + $0x60] sm:$0xff] %vm6224_vm5, %v6202_v38 }
 0x929   : > { %6266 = vst.msk [vmem:[#allocation2 + $0x60] sm:$0xff] %vm13629_vm12, %v6241_v14  ;;  %6518 = vmatmul.mubr.bf16.vlgmr.msra.gmra.mrb[64].mxu0 %v6342_v6 }
 0x92a   : > { %6301 = vst.msk [vmem:[#allocation2 + $0x60] sm:$0xff] %vm13626_vm6, %v12760_v40  ;;  %6525 = vmatprep.mubr.bf16.mxu0 %v6345_v37 }
 0x92c   : > { %v6175_v42 = vpop.permute.xlu0 %6174  ;;  %v6286_v34 = vpop.permute.xlu1 %6285 }
 0x930   : > { %v6171_v12 = vpop.permute.xlu0 %6170  ;;  %v6041_v19 = vpop.permute.xlu1 %6040 }
 0x931   : > { %6059 = vst.msk [vmem:[#allocation2 + $0xd8] sm:$0xff] %vm13631_vm9, %v6041_v19  ;;  %v6330_v35 = vld [vmem:[#allocation2 + $0x60] sm:$0xff]  ;;  %v12825_v19 = vld [vmem:[#allocation2 + $0x10] sm:$0xff] }
 0x934   : > { %v6284_v24 = vpop.permute.xlu0 %6283  ;;  %v6282_v58 = vpop.permute.xlu1 %6281 }
 0x938   : > { %v6039_v31 = vpop.permute.xlu0 %6038  ;;  %v6037_v46 = vpop.permute.xlu1 %6036 }
 0x939   : > { %6058 = vst.msk [vmem:[#allocation2 + $0xc0] sm:$0xff] %vm13631_vm9, %v6039_v31  ;;  %6057 = vst.msk [vmem:[#allocation2 + $0xa8] sm:$0xff] %vm13631_vm9, %v6037_v46 }
 0x93c   : > { %v6093_v59 = vpop.permute.xlu0 %6092  ;;  %v6173_v33 = vpop.permute.xlu1 %6172 }
 0x93d   : > { %6117 = vst.msk [vmem:[#allocation2 + $0x90] sm:$0xff] %vm13630_vm15, %v6093_v59 }
 0x940   : > { %v6132_v40 = vpop.permute.xlu0 %6131  ;;  %v6204_v55 = vpop.permute.xlu1 %6203 }
 0x941   : > { %6156 = vst.msk [vmem:[#allocation2 + $0x90] sm:$0xff] %vm13628_vm10, %v6132_v40 }
 0x942   : > { %6228 = vst.msk [vmem:[#allocation2 + $0x78] sm:$0xff] %vm6224_vm5, %v6204_v55 }
 0x943   : > { %6191 = vst.msk [vmem:[#allocation2 + $0x90] sm:$0xff] %vm6186_vm1, %v6171_v12 }
 0x944   : > { %v6206_v11 = vpop.permute.xlu0 %6205  ;;  %v6243_v54 = vpop.permute.xlu1 %6242 }
 0x945   : > { %6229 = vst.msk [vmem:[#allocation2 + $0x90] sm:$0xff] %vm6224_vm5, %v6206_v11 }
 0x946   : > { %6267 = vst.msk [vmem:[#allocation2 + $0x78] sm:$0xff] %vm13629_vm12, %v6243_v54 }
 0x947   : > { %6302 = vst.msk [vmem:[#allocation2 + $0x78] sm:$0xff] %vm13626_vm6, %v6282_v58 }
 0x948   : > { %v6245_v5 = vpop.permute.xlu0 %6244  ;;  %v6099_v57 = vpop.permute.xlu1 %6098 }
 0x949   : > { %6268 = vst.msk [vmem:[#allocation2 + $0x90] sm:$0xff] %vm13629_vm12, %v6245_v5 }
 0x94a   : > { %6120 = vst.msk [vmem:[#allocation2 + $0xd8] sm:$0xff] %vm13630_vm15, %v6099_v57 }
 0x94b   : > { %6303 = vst.msk [vmem:[#allocation2 + $0x90] sm:$0xff] %vm13626_vm6, %v6284_v24 }
 0x94c   : > { %v6210_v17 = vpop.permute.xlu0 %6209  ;;  %v6138_v10 = vpop.permute.xlu1 %6137 }
 0x94d   : > { %6159 = vst.msk [vmem:[#allocation2 + $0xd8] sm:$0xff] %vm13628_vm10, %v6138_v10 }
 0x94e   : > { %v6332_v21 = vld [vmem:[#allocation2 + $0x78] sm:$0xff] }
 0x94f   : > { %v6344_v38 = vpack.c.bf16 %v6332_v21, %v6330_v35 }
 0x950   : > { %v6249_v14 = vpop.permute.xlu0 %6248  ;;  %v6095_v15 = vpop.permute.xlu1 %6094 }
 0x951   : > { %6526 = vmatmul.mubr.bf16.gmra.mrb[68].mxu0 %v6344_v38  ;;  %6118 = vst.msk [vmem:[#allocation2 + $0xa8] sm:$0xff] %vm13630_vm15, %v6095_v15 }
 0x952   : > { %6533 = vmatprep.mubr.bf16.mxu0 %v6347_v25 }
 0x954   : > { %v6097_v52 = vpop.permute.xlu0 %6096  ;;  %v6134_v4 = vpop.permute.xlu1 %6133 }
 0x955   : > { %6119 = vst.msk [vmem:[#allocation2 + $0xc0] sm:$0xff] %vm13630_vm15, %v6097_v52  ;;  %vm6732_vm15 = vcmask 126976  }
 0x956   : > { %6157 = vst.msk [vmem:[#allocation2 + $0xa8] sm:$0xff] %vm13628_vm10, %v6134_v4 }
 0x957   : > { %6192 = vst.msk [vmem:[#allocation2 + $0xa8] sm:$0xff] %vm6186_vm1, %v6173_v33 }
 0x958   : > { %v6136_v36 = vpop.permute.xlu0 %6135  ;;  %v6208_v51 = vpop.permute.xlu1 %6207 }
 0x959   : > { %6158 = vst.msk [vmem:[#allocation2 + $0xc0] sm:$0xff] %vm13628_vm10, %v6136_v36  ;;  %vm6843_vm10 = vcmask 130051  }
 0x95a   : > { %6230 = vst.msk [vmem:[#allocation2 + $0xa8] sm:$0xff] %vm6224_vm5, %v6208_v51 }
 0x95b   : > { %6193 = vst.msk [vmem:[#allocation2 + $0xc0] sm:$0xff] %vm6186_vm1, %v6175_v42  ;;  %v6334_v42 = vld [vmem:[#allocation2 + $0x90] sm:$0xff] }
 0x95c   : > { %6231 = vst.msk [vmem:[#allocation2 + $0xc0] sm:$0xff] %vm6224_vm5, %v6210_v17  ;;  %v6288_v22 = vpop.permute.xlu0 %6287  ;;  %v6247_v45 = vpop.permute.xlu1 %6246  ;;  %v12844_v17 = vld [vmem:[%s13459_s8] ss:$0 sm:$0xff] }
 0x95d   : > { %6270 = vst.msk [vmem:[#allocation2 + $0xc0] sm:$0xff] %vm13629_vm12, %v6249_v14  ;;  %6269 = vst.msk [vmem:[#allocation2 + $0xa8] sm:$0xff] %vm13629_vm12, %v6247_v45  ;;  %vm6722_vm12 = vcmask 1044480  }
 0x95e   : > { %6305 = vst.msk [vmem:[#allocation2 + $0xc0] sm:$0xff] %vm13626_vm6, %v6288_v22  ;;  %6304 = vst.msk [vmem:[#allocation2 + $0xa8] sm:$0xff] %vm13626_vm6, %v6286_v34  ;;  %v6349_v34 = vpack.c.bf16 %v12825_v19, %v6339_v62 }
 0x960   : > { %v6177_v27 = vpop.permute.xlu1 %6176  ;;  %v5689_v39 = vpop.permute.xlu0 %5688 }
 0x961   : > { %6194 = vst.msk [vmem:[#allocation2 + $0xd8] sm:$0xff] %vm6186_vm1, %v6177_v27 }
 0x964   : > { %v6212_v6 = vpop.permute.xlu1 %6211  ;;  %v5759_v31 = vpop.permute.xlu0 %5758 }
 0x965   : > { %v6338_v37 = vld [vmem:[#allocation2 + $0xc0] sm:$0xff]  ;;  %6233 = vst.msk [vmem:[#allocation2 + $0xd8] sm:$0x7f] %vm13627_vm4, %v6212_v6  ;;  %v6336_v12 = vld [vmem:[#allocation2 + $0xa8] sm:$0xff]  ;;  %vm6729_vm4 = vcmask 130053  }
 0x966   : > { %6558 = vst.msk [vmem:[#allocation2 + $0xc0] sm:$0xff] %vm13632_vm14, %v12825_v19  ;;  %v6346_v24 = vpack.c.bf16 %v6336_v12, %v6334_v42 }
 0x968   : > { %v6251_v58 = vpop.permute.xlu1 %6250  ;;  %6534 = vmatmul.mubr.bf16.gmra.mrb[72].mxu0 %v6346_v24  ;;  %v6235_v59 = vpop.permute.xlu0 %6234 }
 0x969   : > { %6272 = vst.msk [vmem:[#allocation2 + $0xd8] sm:$0x1] %vm6271_vm2, %v6251_v58  ;;  %6541 = vmatprep.mubr.bf16.mxu0 %v6349_v34  ;;  %vm6261_vm2 = vcmask 917249  }
 0x96c   : > { %v5653_v46 = vpop.permute.xlu1 %5652  ;;  %v6274_v54 = vpop.permute.xlu0 %6273 }
 0x96d   : > { %5679 = vst.msk [vmem:[#allocation2 + $0x18] sm:$0x80] %vm14360_vm0, %v5653_v46  ;;  %vm14364_vm0 = vcmask 589319  }
 0x96e   : > { %5715 = vst.msk [vmem:[#allocation2 + $0x18] sm:$0xfe] %vm14361_vm8, %v5689_v39  ;;  %vm13625_vm8 = vmmov 0  }
 0x96f   : > { %8491 = vmatprep.mubr.msk.bf16.mxu1 %vm13625_vm8, %v12825_v19  ;;  %vm6846_vm8 = vcmask 124928  }
 0x970   : > { %v5725_v33 = vpop.permute.xlu1 %5724  ;;  %v6340_v40 = vld [vmem:[#allocation2 + $0xd8] sm:$0xff] }
 0x971   : > { %5748 = vst.msk [vmem:[#allocation2 + $0x18] sm:$0xff] %vm14362_vm13, %v5725_v33  ;;  %v6348_v55 = vpack.c.bf16 %v6340_v40, %v6338_v37  ;;  %vm14365_vm13 = vcmask 1046528  }
 0x972   : > { %6559 = vst.msk [vmem:[#allocation2 + $0xd8] sm:$0xff] %vm13632_vm14, %v12825_v19 }
 0x973   : > { %5784 = vst.msk [vmem:[#allocation2 + $0x18] sm:$0xff] %vm14363_vm11, %v5759_v31  ;;  %6542 = vmatmul.mubr.bf16.gmra.mrb[76].mxu0 %v6348_v55  ;;  %vm14366_vm11 = vmmov %vm14365_vm13 }
 0x974   : > { %v6196_v11 = vpop.permute.xlu1 %6195 }
 0x975   : > { %6223 = vst.msk [vmem:[#allocation2 + $0x18] sm:$0x80] %vm13623_vm3, %v6196_v11 }
 0x976   : > { %6262 = vst.msk [vmem:[#allocation2 + $0x18] sm:$0xfe] %vm6261_vm2, %v6235_v59  ;;  %vm14367_vm2 = vmmov %vm14366_vm11 }
 0x977   : > { %6298 = vst.msk [vmem:[#allocation2 + $0x18] sm:$0xff] %vm13626_vm6, %v6274_v54  ;;  %vm6736_vm6 = vcmask 1043456  }
 0x978   : > { %v5757_v5 = vpop.permute.xlu1 %5756 }
 0x979   : > { %5783 = vst.msk [vmem:[#allocation2] sm:$0x80] %vm14364_vm0, %v5757_v5  ;;  %vm14368_vm0 = vmmov %vm14367_vm2 }
 0x97a   : > { %vm14374_vm3 = vmmov %vm14368_vm0 }
 0x9fc   : > { %v8281_v57 = vpop.f32.mrb[64].mxu0 }
 0x9fd   : > { %v8282_v10 = vpop.f32.mrb[65].mxu0 }
 0x9fe   : > { %v8283_v49 = vadd.f32 %v8282_v10, %v8281_v57  ;;  %v8284_v32 = vpop.f32.mrb[66].mxu0 }
 0x9ff   : > { %v8285_v35 = vpop.f32.mrb[67].mxu0 }
 0xa00   : > { %v6520_v21 = vadd.f32 %v8283_v49, %v12844_v17  ;;  %v8286_v38 = vadd.f32 %v8285_v35, %v8284_v32 }
 0xa02   : > { %v6550_v25 = vmax.f32 %v6520_v21, 0.0  ;;  %v6523_v14 = vadd.f32 %v8286_v38, %v12844_v17 }
 0xa04   : > { %6560 = vst.msk [vmem:[#allocation2] sm:$0xff] %vm13632_vm14, %v6550_v25  ;;  %v6551_v15 = vmax.f32 %v6523_v14, 0.0 }
 0xa06   : > { %6561 = vst.msk [vmem:[#allocation2 + $0x18] sm:$0xff] %vm13632_vm14, %v6551_v15  ;;  %v12850_v52 = vpack.c.bf16 %v6551_v15, %v6550_v25 }
 0xa0b   : > { %v6576_v34 = vld [vmem:[#allocation2] sm:$0xfe] }
 0xa0c   : > { %v6587_v46 = vrot.slane %v6576_v34, 1  ;;  %v6568_v10 = vld [vmem:[#allocation2] sm:$0xff] }
 0xa0d   : > { %v6569_v4 = vld [vmem:[#allocation2 + $0x18] sm:$0xff] }
 0xa0e   : > { %v6621_v36 = vld [vmem:[#allocation2 + $0x18] sm:$0xfe]  ;;  %v6588_v58 = vrot.slane %v6569_v4, 1 }
 0xa0f   : > { %6702 = vst [vmem:[#allocation2 + $0x18] sm:$0xff] %v12825_v19  ;;  %v6626_v33 = vrot.slane %v6621_v36, 1 }
 0xa10   : > { %v6589_v55 = vsel %vm14365_vm13, %v6587_v46, %v6588_v58  ;;  %vm14369_vm13 = vmmov %vm14368_vm0 }
 0xa11   : > { %v6612_v32 = vmax.f32 %v6568_v10, %v6589_v55 }
 0xa24   : > { %v8287_v51 = vpop.f32.mrb[68].mxu0 }
 0xa25   : > { %v8288_v22 = vpop.f32.mrb[69].mxu0 }
 0xa26   : > { %v8289_v45 = vadd.f32 %v8288_v22, %v8287_v51  ;;  %v8290_v27 = vpop.f32.mrb[70].mxu0 }
 0xa27   : > { %v8291_v39 = vpop.f32.mrb[71].mxu0 }
 0xa28   : > { %v6528_v6 = vadd.f32 %v8289_v45, %v12844_v17  ;;  %v8292_v62 = vadd.f32 %v8291_v39, %v8290_v27 }
 0xa2a   : > { %v6552_v37 = vmax.f32 %v6528_v6, 0.0  ;;  %v6531_v42 = vadd.f32 %v8292_v62, %v12844_v17 }
 0xa2c   : > { %6562 = vst.msk [vmem:[#allocation2 + $0x30] sm:$0xff] %vm13632_vm14, %v6552_v37  ;;  %v6553_v12 = vmax.f32 %v6531_v42, 0.0 }
 0xa2e   : > { %6563 = vst.msk [vmem:[#allocation2 + $0x48] sm:$0xff] %vm13632_vm14, %v6553_v12  ;;  %v12857_v24 = vpack.c.bf16 %v6553_v12, %v6552_v37 }
 0xa33   : > { %v6570_v31 = vld [vmem:[#allocation2 + $0x30] sm:$0xff] }
 0xa34   : > { %v6590_v59 = vrot.slane %v6570_v31, 1  ;;  %6705 = vst [vmem:[#allocation2 + $0x30] sm:$0xff] %v12825_v19 }
 0xa35   : > { %v6571_v40 = vld [vmem:[#allocation2 + $0x48] sm:$0xff] }
 0xa36   : > { %v6591_v11 = vsel %vm14366_vm11, %v6588_v58, %v6590_v59  ;;  %v6592_v54 = vrot.slane %v6571_v40, 1  ;;  %v6627_v5 = vsel %vm14367_vm2, %v6626_v33, %v6590_v59  ;;  %vm14370_vm11 = vmmov %vm14368_vm0 }
 0xa37   : > { %v6635_v57 = vmax.f32 %v6569_v4, %v6627_v5  ;;  %v6613_v35 = vmax.f32 %v6569_v4, %v6591_v11  ;;  %vm14371_vm2 = vmmov %vm14368_vm0 }
 0xa38   : > { %v6593_v49 = vsel %vm14368_vm0, %v6590_v59, %v6592_v54 }
 0xa39   : > { %v6614_v21 = vmax.f32 %v6570_v31, %v6593_v49  ;;  %v6638_v38 = vmax.f32 %v6612_v32, %v6635_v57 }
 0xa3b   : > { %v6639_v25 = vmax.f32 %v6613_v35, %v6614_v21  ;;  %v8293_v14 = vpop.f32.mrb[72].mxu0 }
 0xa3c   : > { %v8294_v15 = vpop.f32.mrb[73].mxu0 }
 0xa3d   : > { %v6648_v36 = vpack.c.bf16 %v6639_v25, %v6638_v38  ;;  %v8295_v51 = vadd.f32 %v8294_v15, %v8293_v14  ;;  %v8296_v22 = vpop.f32.mrb[74].mxu0  ;;  %v6620_v15 = vld [vmem:[#allocation2 + $0xc0] sm:$0xff] }
 0xa3e   : > { %v8297_v45 = vpop.f32.mrb[75].mxu0 }
 0xa3f   : > { %8484 = vmatpush3.bf16.msra.mxu1 %v6648_v36  ;;  %v6536_v27 = vadd.f32 %v8295_v51, %v12844_v17  ;;  %v8298_v39 = vadd.f32 %v8297_v45, %v8296_v22  ;;  %v6622_v36 = vld [vmem:[#allocation2 + $0xd8] sm:$0x1] }
 0xa40   : > { %8485 = vmatprep.subr.bf16.mxu1 %v12825_v19 }
 0xa41   : > { %v6554_v6 = vmax.f32 %v6536_v27, 0.0  ;;  %v6539_v62 = vadd.f32 %v8298_v39, %v12844_v17  ;;  %v6628_v27 = vrot.slane %v6620_v15, 1 }
 0xa43   : > { %6564 = vst.msk [vmem:[#allocation2 + $0x60] sm:$0xff] %vm13632_vm14, %v6554_v6  ;;  %v6555_v4 = vmax.f32 %v6539_v62, 0.0 }
 0xa45   : > { %6565 = vst.msk [vmem:[#allocation2 + $0x78] sm:$0xff] %vm13632_vm14, %v6555_v4  ;;  %v12869_v37 = vpack.c.bf16 %v6555_v4, %v6554_v6 }
 0xa46   : > { %v8299_v42 = vpop.f32.mrb[76].mxu0 }
 0xa47   : > { %v8300_v12 = vpop.f32.mrb[77].mxu0 }
 0xa48   : > { %v8301_v34 = vadd.f32 %v8300_v12, %v8299_v42  ;;  %v8302_v58 = vpop.f32.mrb[78].mxu0 }
 0xa49   : > { %v8303_v31 = vpop.f32.mrb[79].mxu0 }
 0xa4a   : > { %v6544_v46 = vadd.f32 %v8301_v34, %v12844_v17  ;;  %v8304_v59 = vadd.f32 %v8303_v31, %v8302_v58  ;;  %v6572_v33 = vld [vmem:[#allocation2 + $0x60] sm:$0xff] }
 0xa4b   : > { %v6594_v55 = vrot.slane %v6572_v33, 1 }
 0xa4c   : > { %v6556_v11 = vmax.f32 %v6544_v46, 0.0  ;;  %v6547_v5 = vadd.f32 %v8304_v59, %v12844_v17  ;;  %v6573_v57 = vld [vmem:[#allocation2 + $0x78] sm:$0xff]  ;;  %v6577_v17 = vld [vmem:[#allocation2 + $0xc0] sm:$0x1] }
 0xa4d   : > { %v6595_v10 = vsel %vm14369_vm13, %v6592_v54, %v6594_v55  ;;  %v6596_v49 = vrot.slane %v6573_v57, 1  ;;  %v6630_v54 = vrot.slane %v6622_v36, 1  ;;  %v6602_v62 = vrot.slane %v6577_v17, 1  ;;  %vm14372_vm13 = vmmov %vm14368_vm0 }
 0xa4e   : > { %6566 = vst.msk [vmem:[#allocation2 + $0x90] sm:$0xff] %vm13632_vm14, %v6556_v11  ;;  %v6557_v32 = vmax.f32 %v6547_v5, 0.0  ;;  %v6615_v35 = vmax.f32 %v6571_v40, %v6595_v10  ;;  %v1295_v36 = vand.u32 3, %v14213_v30 }
 0xa4f   : > { %v6597_v38 = vsel %vm14370_vm11, %v6594_v55, %v6596_v49  ;;  %v6631_v12 = vsel %vm14368_vm0, %v6628_v27, %v6630_v54  ;;  %vm14373_vm11 = vmmov %vm14368_vm0 }
 0xa50   : > { %6567 = vst.msk [vmem:[#allocation2 + $0xa8] sm:$0xff] %vm13632_vm14, %v6557_v32  ;;  %v6616_v25 = vmax.f32 %v6572_v33, %v6597_v38  ;;  %v12877_v14 = vpack.c.bf16 %v6557_v32, %v6556_v11  ;;  %v6640_v51 = vmax.f32 %v6614_v21, %v6615_v35  ;;  %v6637_v55 = vmax.f32 %v6620_v15, %v6631_v12  ;;  %v8614_v38 = vld [vmem:[%s13460_s9 + $0x40] sm:$0xff]  }
 0xa51   : > { %v1288_v15 = vand.u32 3, %v14212_v56 }
 0xa52   : > { %v6641_v22 = vmax.f32 %v6615_v35, %v6616_v25 }
 0xa53   : > { %vm12908_vm0 = vcmp.ge.s32.totalorder %v1288_v15, 1 }
 0xa54   : > { %v6649_v45 = vpack.c.bf16 %v6641_v22, %v6640_v51  ;;  %v8616_v51 = vld [vmem:[%s13460_s9 + $0x48] sm:$0xff]  }
 0xa55   : > { %v6574_v39 = vld [vmem:[#allocation2 + $0x90] sm:$0xff]  ;;  %v8617_v22 = vld [vmem:[%s13460_s9 + $0x8] sm:$0xff]  }
 0xa56   : > { %8486 = vmatpush3.bf16.msra.mxu1 %v6649_v45  ;;  %v6598_v6 = vrot.slane %v6574_v39, 1  ;;  %v8645_v45 = vld [vmem:[%s13462_s11 + $0x18] sm:$0xff]  }
 0xa57   : > { %8487 = vmatprep.subr.bf16.mxu1 %v12825_v19  ;;  %v6575_v40 = vld [vmem:[#allocation2 + $0xa8] sm:$0xff] }
 0xa58   : > { %v6599_v4 = vsel %vm14371_vm2, %v6596_v49, %v6598_v6  ;;  %v6600_v42 = vrot.slane %v6575_v40, 1  ;;  %vm13624_vm2 = vcmask 523264  }
 0xa59   : > { %v6617_v34 = vmax.f32 %v6573_v57, %v6599_v4  ;;  %v8613_v57 = vld [vmem:[%s13467_s16] sm:$0xff]  }
 0xa5a   : > { %v6601_v21 = vsel %vm14372_vm13, %v6598_v6, %v6600_v42  ;;  %v6603_v58 = vsel %vm14373_vm11, %v6600_v42, %v6602_v62  ;;  %v6629_v31 = vsel %vm14374_vm3, %v6600_v42, %v6628_v27  ;;  %vm12904_vm3 = vcmp.le.s32.totalorder %v1288_v15, 2  ;;  %v8618_v62 = vld [vmem:[%s13460_s9 + $0x50] sm:$0xff]  }
 0xa5b   : > { %v6618_v46 = vmax.f32 %v6574_v39, %v6601_v21  ;;  %v6619_v59 = vmax.f32 %v6575_v40, %v6603_v58  ;;  %v6636_v33 = vmax.f32 %v6575_v40, %v6629_v31  ;;  %v6642_v11 = vmax.f32 %v6616_v25, %v6617_v34  ;;  %v8615_v25 = vld [vmem:[%s13460_s9] sm:$0xff]   ;;  %v8619_v40 = vld [vmem:[%s13460_s9 + $0x10] sm:$0xff]  }
 0xa5c   : > { %vm12912_vm13 = vcmp.le.s32.totalorder %v1295_v36, 2  ;;  %vm12916_vm11 = vcmp.ge.s32.totalorder %v1295_v36, 1 }
 0xa5d   : > { %v6643_v5 = vmax.f32 %v6617_v34, %v6618_v46  ;;  %v6644_v32 = vmax.f32 %v6618_v46, %v6636_v33  ;;  %v6645_v35 = vmax.f32 %v6619_v59, %v6637_v55  ;;  %v8620_v55 = vld [vmem:[%s13460_s9 + $0x58] sm:$0xff]  }
 0xa5f   : > { %v6650_v10 = vpack.c.bf16 %v6643_v5, %v6642_v11  ;;  %v6651_v49 = vpack.c.bf16 %v6645_v35, %v6644_v32  ;;  %v8621_v11 = vld [vmem:[%s13460_s9 + $0x18] sm:$0xff]   ;;  %v8622_v35 = vld [vmem:[%s13460_s9 + $0x60] sm:$0xff]  }
 0xa61   : > { %8488 = vmatpush3.bf16.msra.mxu1 %v6650_v10 }
 0xa62   : > { %8489 = vmatprep.subr.bf16.mxu1 %v12825_v19 }
 0xa65   : > { %8490 = vmatpush3.bf16.msra.mxu1 %v6651_v49  ;;  %v8623_v49 = vld [vmem:[%s13460_s9 + $0x20] sm:$0xff]  }
 0xa66   : > { %8310 = vmatprep.subr.bf16.mxu1 %v8614_v38 }
 0xa68   : > { %8492 = vmatmul.mubr.msk.bf16.vlgmr.msra.gmra.mrb[24].mxu1 %vm13624_vm2, %v8613_v57  ;;  %vm6756_vm2 = vcmask 1042432  }
 0xa69   : > { %8311 = vmatpush3.bf16.msra.mxu1 %v8615_v25 }
 0xa6a   : > { %8312 = vmatprep.subr.bf16.mxu1 %v8616_v51  ;;  %v8624_v51 = vld [vmem:[%s13460_s9 + $0x68] sm:$0xff]  }
 0xa6d   : > { %8313 = vmatpush3.bf16.msra.mxu1 %v8617_v22 }
 0xa6e   : > { %8314 = vmatprep.subr.bf16.mxu1 %v8618_v62  ;;  %v8626_v62 = vld [vmem:[%s13460_s9 + $0x70] sm:$0xff]  }
 0xa71   : > { %8315 = vmatpush3.bf16.msra.mxu1 %v8619_v40  ;;  %v8627_v40 = vld [vmem:[%s13460_s9 + $0x30] sm:$0xff]  }
 0xa72   : > { %8316 = vmatprep.subr.bf16.mxu1 %v8620_v55 }
 0xa75   : > { %8317 = vmatpush3.bf16.msra.mxu1 %v8621_v11 }
 0xa76   : > { %8318 = vmatprep.subr.bf16.mxu1 %v8622_v35 }
 0xa79   : > { %8319 = vmatpush3.bf16.msra.mxu1 %v8623_v49 }
 0xa7a   : > { %8320 = vmatprep.subr.bf16.mxu1 %v8624_v51 }
 0xb3b   : > { %v6695_v27 = vpop.f32.mrb[24].mxu1 }
 0xb3c   : > { %v12922_v54 = vsel %vm12904_vm3, %v6695_v27, 0.0  ;;  %v12926_v39 = vsel %vm12908_vm0, %v6695_v27, 0.0  ;;  %6789 = vrot.lane.b32.xlu1 %v6695_v27, %s14268_s25  ;;  %v8493_v6 = vpop.f32.mrb[25].mxu1  ;;  %v12939_v34 = vrot.slane %v6695_v27, 4  ;;  %v8625_v27 = vld [vmem:[%s13460_s9 + $0x28] sm:$0xff]  }
 0xb3d   : > { %v12936_v4 = vrot.slane %v12922_v54, 3  ;;  %v6757_v42 = vrot.slane %v12926_v39, 5  ;;  %v6698_v12 = vpop.f32.mrb[26].mxu1  ;;  %v6774_v38 = vrot.slane %v12922_v54, 7  ;;  %v6797_v15 = vrot.slane %v12926_v39, 1  ;;  %8321 = vmatpush3.bf16.msra.mxu1 %v8625_v27 }
 0xb3e   : > { %v12943_v21 = vsel %vm12912_vm13, %v6698_v12, 0.0  ;;  %v6719_v58 = vsel %vm12916_vm11, %v6698_v12, 0.0  ;;  %v12947_v31 = vrot.slane %v6698_v12, 4  ;;  %6791 = vrot.lane.b32.xlu0 %v6698_v12, %s14268_s25  ;;  %v8494_v46 = vpop.f32.mrb[27].mxu1  ;;  %8322 = vmatprep.subr.bf16.mxu1 %v8626_v62 }
 0xb3f   : > { %v6724_v59 = vrot.slane %v12943_v21, 3  ;;  %v12951_v33 = vrot.slane %v6719_v58, 5  ;;  %6730 = vst.msk [vmem:[#allocation2 + $0x18] sm:$0xe0] %vm6729_vm4, %v12936_v4  ;;  %v6798_v57 = vrot.slane %v6719_v58, 1  ;;  %v6775_v6 = vrot.slane %v12943_v21, 7 }
 0xb40   : > { %6844 = vst.msk [vmem:[#allocation2 + $0x8] sm:$0xf8] %vm6843_vm10, %v6757_v42  ;;  %6740 = vrot.lane.b32.xlu1 %v12939_v34, %s14231_s4  ;;  %v6739_v5 = vsel %vm6736_vm6, %v12939_v34, %v12947_v31  ;;  %vm14384_vm10 = vcmask 1040384   ;;  %v8629_v58 = vld [vmem:[%s13460_s9 + $0x38] sm:$0xff]   ;;  %vm6749_vm4 = vcmask 261252  }
 0xb41   : > { %v6759_v10 = vsel %vm6756_vm2, %v6757_v42, %v12951_v33  ;;  %6847 = vst.msk [vmem:[#allocation2 + $0x38] sm:$0x7] %vm6846_vm8, %v12951_v33  ;;  %v6725_v32 = vsel %vm6722_vm12, %v12936_v4, %v6724_v59  ;;  %v6776_v12 = vsel %vm14384_vm10, %v6774_v38, %v6775_v6  ;;  %8323 = vmatpush3.bf16.msra.mxu1 %v8627_v40  ;;  %vm6769_vm8 = vcmask 392451   ;;  %v8631_v40 = vld [vmem:[%s13462_s11 + $0x88] sm:$0xff]  }
 0xb42   : > { %6733 = vst.msk [vmem:[#allocation2 + $0x48] sm:$0x1f] %vm6732_vm15, %v6724_v59  ;;  %6742 = vrot.lane.b32.xlu0 %v6739_v5, %s14231_s4  ;;  %vm14383_vm15 = vcmask 1046528   ;;  %vm14386_vm10 = vcmask 917248  }
 0xb43   : > { %6845 = vst.msk [vmem:[#allocation2 + $0x20] sm:$0xff] %vm13632_vm14, %v6759_v10  ;;  %6731 = vst.msk [vmem:[#allocation2 + $0x30] sm:$0xff] %vm13632_vm14, %v6725_v32  ;;  %v6799_v54 = vsel %vm14383_vm15, %v6797_v15, %v6798_v57  ;;  %vm14385_vm15 = vcmask 392448   ;;  %vm14389_vm14 = vcmask 1048448  }
 0xb44   : > { %6760 = vrot.lane.b32.xlu1 %v6757_v42, %s14082_s21  ;;  %v8628_v42 = vld [vmem:[%s13460_s9 + $0x78] sm:$0xff]  }
 0xb45   : > { %8324 = vmatprep.subr.bf16.mxu1 %v8628_v42  ;;  %v8632_v42 = vld [vmem:[%s13462_s11 + $0x90] sm:$0xff]  }
 0xb46   : > { %6804 = vrot.lane.b32.xlu0 %v6798_v57, %s14345_s18  ;;  %8325 = vmatpush3.bf16.msra.mxu1 %v8629_v58  ;;  %v8634_v58 = vld [vmem:[%s13462_s11 + $0xa0] sm:$0xff]  }
 0xb47   : > { %8495 = vmatprep.subr.bf16.mxu1 %v12825_v19 }
 0xb48   : > { %6777 = vrot.lane.b32.xlu1 %v6774_v38, %s14091_s22  ;;  %v6851_v25 = vld [vmem:[#allocation2 + $0x38] sm:$0xff] }
 0xb49   : > { %7036 = vst [vmem:[#allocation2 + $0x38] sm:$0xff] %v12825_v19 }
 0xb4a   : > { %v6849_v36 = vld [vmem:[#allocation2 + $0x20] sm:$0xff]  ;;  %6816 = vrot.lane.b32.xlu0 %v6724_v59, %s13633_s29 }
 0xb4b   : > { %v6853_v22 = vpack.c.bf16 %v6851_v25, %v6849_v36  ;;  %7033 = vst [vmem:[#allocation2 + $0x20] sm:$0xff] %v12825_v19 }
 0xb4c   : > { %6802 = vrot.lane.b32.xlu1 %v6799_v54, %s14345_s18  ;;  %v8630_v54 = vld [vmem:[%s13462_s11 + $0x80] sm:$0xff]  }
 0xb4d   : > { %7021 = vmatprep.mubr.bf16.mxu1 %v6853_v22 }
 0xb4e   : > { %6762 = vrot.lane.b32.xlu0 %v6759_v10, %s14082_s21 }
 0xb50   : > { %6814 = vrot.lane.b32.xlu1 %v6725_v32, %s13633_s29 }
 0xb52   : > { %6779 = vrot.lane.b32.xlu0 %v6776_v12, %s14091_s22  ;;  %v8633_v12 = vld [vmem:[%s13462_s11 + $0x98] sm:$0xff]  }
 0xb54   : > { %6828 = vrot.lane.b32.xlu1 %v6739_v5, %s14344_s19 }
 0xb56   : > { %6830 = vrot.lane.b32.xlu0 %v12947_v31, %s14344_s19 }
 0xbae   : > { %v6790_v46 = vpop.permute.xlu1 %6789 }
 0xbb0   : > { %v6792_v59 = vpop.permute.xlu0 %6791 }
 0xbb2   : > { %v6741_v55 = vpop.permute.xlu1 %6740 }
 0xbb3   : > { %6750 = vst.msk [vmem:[#allocation2 + $0x18] sm:$0xf0] %vm6749_vm4, %v6741_v55  ;;  %vm14387_vm4 = vcmask 523648   ;;  %v8637_v55 = vld [vmem:[%s13462_s11 + $0xb8] sm:$0xff]  }
 0xbb4   : > { %v6743_v11 = vpop.permute.xlu0 %6742 }
 0xbb5   : > { %6751 = vst.msk [vmem:[#allocation2 + $0x30] sm:$0xff] %vm13631_vm9, %v6743_v11  ;;  %vm14388_vm9 = vcmask 785024   ;;  %v8638_v11 = vld [vmem:[%s13462_s11 + $0x40] sm:$0xff]  }
 0xbb6   : > { %v6761_v10 = vpop.permute.xlu1 %6760  ;;  %8332 = vmatprep.subr.bf16.mxu0 %v8638_v11 }
 0xbb7   : > { %6770 = vst.msk [vmem:[#allocation2 + $0x18] sm:$0xf8] %vm6769_vm8, %v6761_v10  ;;  %vm6824_vm8 = vcmask 914176   ;;  %v8639_v10 = vld [vmem:[%s13462_s11] sm:$0xff]  }
 0xbb8   : > { %v6805_v32 = vpop.permute.xlu0 %6804  ;;  %8333 = vmatpush3.bf16.msra.mxu0 %v8639_v10 }
 0xbba   : > { %v6778_v35 = vpop.permute.xlu1 %6777 }
 0xbbb   : > { %6786 = vst.msk [vmem:[#allocation2 + $0x18] sm:$0xfe] %vm6150_vm7, %v6778_v35  ;;  %vm6838_vm7 = vcmask 1044352   ;;  %v8075_v35 = vld [vmem:[%s13461_s10] ss:$0 sm:$0xff] }
 0xbbc   : > { %6795 = vst.msk [vmem:[#allocation2 + $0x18] sm:$0xff] %vm6186_vm1, %v6790_v46  ;;  %v6817_v5 = vpop.permute.xlu0 %6816  ;;  %v8635_v46 = vld [vmem:[%s13462_s11 + $0xa8] sm:$0xff]  }
 0xbbe   : > { %v6803_v49 = vpop.permute.xlu1 %6802 }
 0xbbf   : > { %6810 = vst.msk [vmem:[#allocation2 + $0x18] sm:$0xff] %vm6224_vm5, %v6803_v49  ;;  %v8641_v49 = vld [vmem:[%s13462_s11 + $0x8] sm:$0xff]   ;;  %vm7050_vm5 = vcmask 261125  }
 0xbc0   : > { %v6763_v57 = vpop.permute.xlu0 %6762 }
 0xbc1   : > { %6771 = vst.msk [vmem:[#allocation2 + $0x30] sm:$0xff] %vm14385_vm15, %v6763_v57  ;;  %vm7145_vm15 = vcmask 782848  }
 0xbc2   : > { %v6815_v38 = vpop.permute.xlu1 %6814 }
 0xbc3   : > { %6823 = vst.msk [vmem:[#allocation2 + $0x18] sm:$0xff] %vm14386_vm10, %v6815_v38  ;;  %vm7159_vm10 = vcmask 1044224  }
 0xbc4   : > { %v6780_v25 = vpop.permute.xlu0 %6779 }
 0xbc5   : > { %6787 = vst.msk [vmem:[#allocation2 + $0x30] sm:$0xff] %vm14387_vm4, %v6780_v25  ;;  %vm7092_vm4 = vcmask 785920  }
 0xbc6   : > { %6796 = vst.msk [vmem:[#allocation2 + $0x30] sm:$0xff] %vm6186_vm1, %v6792_v59  ;;  %v6829_v36 = vpop.permute.xlu1 %6828  ;;  %v8636_v59 = vld [vmem:[%s13462_s11 + $0xb0] sm:$0xff]   ;;  %vm7164_vm1 = vcmask 261123  }
 0xbc7   : > { %6811 = vst.msk [vmem:[#allocation2 + $0x30] sm:$0x7f] %vm14388_vm9, %v6805_v32  ;;  %vm7052_vm9 = vcmask 261120  }
 0xbc8   : > { %6837 = vst.msk [vmem:[#allocation2 + $0x18] sm:$0xff] %vm14389_vm14, %v6829_v36  ;;  %v6831_v51 = vpop.permute.xlu0 %6830  ;;  %vm14390_vm14 = vmmov 0  }
 0xbc9   : > { %6825 = vst.msk [vmem:[#allocation2 + $0x30] sm:$0x1f] %vm6824_vm8, %v6817_v5  ;;  %vm7110_vm8 = vcmask 1048320  }
 0xbca   : > { %6839 = vst.msk [vmem:[#allocation2 + $0x30] sm:$0xf] %vm6838_vm7, %v6831_v51  ;;  %vm7108_vm7 = vcmask 1048321  }
 0xbcf   : > { %v6848_v22 = vld [vmem:[#allocation2 + $0x18] sm:$0xff] }
 0xbd0   : > { %7032 = vst [vmem:[#allocation2 + $0x18] sm:$0xff] %v12825_v19 }
 0xbd1   : > { %v6850_v27 = vld [vmem:[#allocation2 + $0x30] sm:$0xff] }
 0xbd2   : > { %v6852_v62 = vpack.c.bf16 %v6850_v27, %v6848_v22  ;;  %7035 = vst [vmem:[#allocation2 + $0x30] sm:$0xff] %v12825_v19  ;;  %v8642_v22 = vld [vmem:[%s13462_s11 + $0x50] sm:$0xff]  }
 0xbd3   : > { %v8643_v27 = vld [vmem:[%s13462_s11 + $0x10] sm:$0xff]  }
 0xbd4   : > { %7022 = vmatmul.mubr.bf16.vlgmr.msra.gmra.mrb[28].mxu1 %v6852_v62 }
 0xbd5   : > { %8496 = vmatpush3.bf16.msra.mxu1 %v8630_v54  ;;  %8511 = vmatprep.mubr.msk.bf16.mxu1 %vm14390_vm14, %v12825_v19  ;;  %vm3856_vm14 = vcmask 194688  }
 0xbd6   : > { %8497 = vmatprep.subr.bf16.mxu1 %v12825_v19 }
 0xbd9   : > { %8498 = vmatpush3.bf16.msra.mxu1 %v8631_v40 }
 0xbda   : > { %8499 = vmatprep.subr.bf16.mxu1 %v12825_v19 }
 0xbdd   : > { %8500 = vmatpush3.bf16.msra.mxu1 %v8632_v42 }
 0xbde   : > { %8501 = vmatprep.subr.bf16.mxu1 %v12825_v19 }
 0xbe1   : > { %8502 = vmatpush3.bf16.msra.mxu1 %v8633_v12 }
 0xbe2   : > { %8503 = vmatprep.subr.bf16.mxu1 %v12825_v19 }
 0xbe5   : > { %8504 = vmatpush3.bf16.msra.mxu1 %v8634_v58 }
 0xbe6   : > { %8505 = vmatprep.subr.bf16.mxu1 %v12825_v19 }
 0xbe9   : > { %8506 = vmatpush3.bf16.msra.mxu1 %v8635_v46 }
 0xbea   : > { %8507 = vmatprep.subr.bf16.mxu1 %v12825_v19 }
 0xbed   : > { %8508 = vmatpush3.bf16.msra.mxu1 %v8636_v59 }
 0xbee   : > { %8509 = vmatprep.subr.bf16.mxu1 %v12825_v19  ;;  %v8640_v19 = vld [vmem:[%s13462_s11 + $0x48] sm:$0xff]  }
 0xbef   : > { %8334 = vmatprep.subr.bf16.mxu0 %v8640_v19  ;;  %v8646_v19 = vld [vmem:[%s13462_s11 + $0x60] sm:$0xff]  }
 0xbf0   : > { %8335 = vmatpush3.bf16.msra.mxu0 %v8641_v49  ;;  %v8647_v49 = vld [vmem:[%s13462_s11 + $0x20] sm:$0xff]  }
 0xbf1   : > { %8510 = vmatpush3.bf16.msra.mxu1 %v8637_v55  ;;  %8336 = vmatprep.subr.bf16.mxu0 %v8642_v22  ;;  %v8644_v55 = vld [vmem:[%s13462_s11 + $0x58] sm:$0xff]  }
 0xbf4   : > { %8337 = vmatpush3.bf16.msra.mxu0 %v8643_v27 }
 0xbf5   : > { %8338 = vmatprep.subr.bf16.mxu0 %v8644_v55  ;;  %v8653_v55 = vld [vmem:[%s13462_s11 + $0x38] sm:$0xff]  }
 0xbf8   : > { %8339 = vmatpush3.bf16.msra.mxu0 %v8645_v45 }
 0xbf9   : > { %8340 = vmatprep.subr.bf16.mxu0 %v8646_v19  ;;  %v14395_v19 = vmax.f32 %v11887_v20, 0.0  ;;  %v8727_v20 = vld [vmem:[%s8889_s20 + $0xf8] sm:$0xff] }
 0xbfc   : > { %8341 = vmatpush3.bf16.msra.mxu0 %v8647_v49  ;;  %v14396_v49 = vmax.f32 %v11611_v41, 0.0 }
 0xca7   : > { %v8326_v32 = vpop.f32.mrb[28].mxu1 }
 0xca8   : > { %v8327_v5 = vpop.f32.mrb[29].mxu1 }
 0xca9   : > { %v8328_v57 = vadd.f32 %v8327_v5, %v8326_v32  ;;  %v8329_v38 = vpop.f32.mrb[30].mxu1 }
 0xcaa   : > { %v8330_v25 = vpop.f32.mrb[31].mxu1 }
 0xcab   : > { %v7024_v36 = vadd.f32 %v8328_v57, %v8075_v35  ;;  %v8331_v51 = vadd.f32 %v8330_v25, %v8329_v38  ;;  %v8648_v38 = vld [vmem:[%s13462_s11 + $0x68] sm:$0xff]  }
 0xcac   : > { %v8649_v25 = vld [vmem:[%s13462_s11 + $0x28] sm:$0xff]   ;;  %8342 = vmatprep.subr.bf16.mxu0 %v8648_v38 }
 0xcad   : > { %v7030_v54 = vmax.f32 %v7024_v36, 0.0  ;;  %v7027_v62 = vadd.f32 %v8331_v51, %v8075_v35  ;;  %v8650_v51 = vld [vmem:[%s13462_s11 + $0x70] sm:$0xff]   ;;  %8343 = vmatpush3.bf16.msra.mxu0 %v8649_v25 }
 0xcae   : > { %8344 = vmatprep.subr.bf16.mxu0 %v8650_v51 }
 0xcaf   : > { %v7031_v40 = vmax.f32 %v7027_v62, 0.0  ;;  %v13090_v42 = vrot.slane %v7030_v54, 4  ;;  %v13094_v12 = vsel %vm12908_vm0, %v7030_v54, 0.0  ;;  %7114 = vst.msk [vmem:[#allocation2 + $0x20] sm:$0xff] %vm7052_vm9, %v7030_v54  ;;  %v7038_v58 = vsel %vm12904_vm3, %v7030_v54, 0.0  ;;  %v8651_v62 = vld [vmem:[%s13462_s11 + $0x30] sm:$0xff]  }
 0xcb0   : > { %v7078_v46 = vrot.slane %v13094_v12, 5  ;;  %v13100_v59 = vrot.slane %v7038_v58, 3  ;;  %vm7167_vm3 = vcmask 256000   ;;  %v7116_v36 = vrot.slane %v13094_v12, 1 }
 0xcb1   : > { %7061 = vrot.lane.b32.xlu1 %v13090_v42, %s14082_s21  ;;  %v13110_v11 = vrot.slane %v7031_v40, 4  ;;  %v7041_v17 = vsel %vm12916_vm11, %v7031_v40, 0.0  ;;  %7115 = vst.msk [vmem:[#allocation2 + $0x38] sm:$0xff] %vm7052_vm9, %v7031_v40  ;;  %v13117_v10 = vsel %vm12912_vm13, %v7031_v40, 0.0  ;;  %8345 = vmatpush3.bf16.msra.mxu0 %v8651_v62  ;;  %vm7090_vm0 = vcmask 785923  }
 0xcb2   : > { %7165 = vst.msk [vmem:[#allocation2 + $0x10] sm:$0xf8] %vm7164_vm1, %v7078_v46  ;;  %v13120_v32 = vrot.slane %v7041_v17, 5  ;;  %v13123_v35 = vrot.slane %v13117_v10, 3  ;;  %v7117_v5 = vrot.slane %v7041_v17, 1  ;;  %v7097_v45 = vrot.slane %v13117_v10, 7 }
 0xcb3   : > { %7051 = vst.msk [vmem:[#allocation2 + $0x18] sm:$0xe0] %vm7050_vm5, %v13100_v59  ;;  %7151 = vrot.lane.b32.xlu0 %v13110_v11, %s13633_s29  ;;  %v7060_v57 = vsel %vm6736_vm6, %v13090_v42, %v13110_v11  ;;  %v7096_v17 = vrot.slane %v7038_v58, 7  ;;  %vm14392_vm6 = vcmask 1040384   ;;  %v14393_v58 = vmax.f32 %v11880_v60, 0.0  ;;  %v14398_v60 = vld [vmem:[#allocation25_spill] sm:$0xff] }
 0xcb4   : > { %v7080_v56 = vsel %vm6756_vm2, %v7078_v46, %v13120_v32  ;;  %7168 = vst.msk [vmem:[#allocation2 + $0x40] sm:$0x7] %vm7167_vm3, %v13120_v32  ;;  %v7046_v30 = vsel %vm6722_vm12, %v13100_v59, %v13123_v35  ;;  %vm14391_vm12 = vcmask 1046528   ;;  %vm7070_vm2 = vcmask 523524  }
 0xcb5   : > { %7081 = vrot.lane.b32.xlu1 %v7078_v46, %s14268_s25  ;;  %7166 = vst.msk [vmem:[#allocation2 + $0x28] sm:$0xff] %vm7052_vm9, %v7080_v56  ;;  %7053 = vst.msk [vmem:[#allocation2 + $0x30] sm:$0xff] %vm7052_vm9, %v7046_v30  ;;  %v7118_v27 = vsel %vm14391_vm12, %v7116_v36, %v7117_v5  ;;  %v8652_v46 = vld [vmem:[%s13462_s11 + $0x78] sm:$0xff]   ;;  %vm7131_vm13 = vcmask 522496   ;;  %vm7072_vm11 = vcmask 523520   ;;  %vm14415_vm9 = vcmask 130048  }
 0xcb6   : > { %8346 = vmatprep.subr.bf16.mxu0 %v8652_v46  ;;  %vm14416_vm1 = vmmov %vm14415_vm9  ;;  %vm14417_vm5 = vcmask 523264   ;;  %vm14418_vm3 = vcmask 130112   ;;  %vm6752_vm12 = vcmask 257152  }
 0xcb7   : > { %7123 = vrot.lane.b32.xlu0 %v7117_v5, %s14082_s21  ;;  %8347 = vmatpush3.bf16.msra.mxu0 %v8653_v55  ;;  %v7098_v5 = vsel %vm14392_vm6, %v7096_v17, %v7097_v45  ;;  %vm3991_vm6 = vcmask 254144  }
 0xcb9   : > { %7149 = vrot.lane.b32.xlu1 %v7060_v57, %s13633_s29 }
 0xcbb   : > { %7063 = vrot.lane.b32.xlu0 %v7060_v57, %s14082_s21  ;;  %v7174_v22 = vld [vmem:[#allocation2 + $0x40] sm:$0xff]  ;;  %v7664_v57 = vpack.c.bf16 %v14396_v49, %v14395_v19  ;;  %v8657_v19 = vld [vmem:[%s13468_s17 + $0x10] ss:$8 sps:$4 sm:$0xff]   ;;  %v8659_v49 = vld [vmem:[%s13468_s17 + $0x14] ss:$8 sps:$4 sm:$0xff]  }
 0xcbc   : > { %v7171_v54 = vld [vmem:[#allocation2 + $0x28] sm:$0xff] }
 0xcbd   : > { %7121 = vrot.lane.b32.xlu1 %v7118_v27, %s14082_s21  ;;  %v7177_v40 = vpack.c.bf16 %v7174_v22, %v7171_v54 }
 0xcbf   : > { %7137 = vrot.lane.b32.xlu0 %v13123_v35, %s14268_s25  ;;  %8512 = vmatmul.mubr.bf16.vlgmr.msra.gmra.mrb[32].mxu1 %v7177_v40 }
 0xcc1   : > { %7135 = vrot.lane.b32.xlu1 %v7046_v30, %s14268_s25 }
 0xcc3   : > { %7083 = vrot.lane.b32.xlu0 %v7080_v56, %s14268_s25  ;;  %v14394_v56 = vmax.f32 %v11893_v9, 0.0 }
 0xcc5   : > { %7099 = vrot.lane.b32.xlu1 %v7096_v17, %s13633_s29  ;;  %v7663_v30 = vpack.c.bf16 %v14394_v56, %v14393_v58  ;;  %v8654_v56 = vld [vmem:[%s13468_s17] ss:$8 sps:$4 sm:$0xff]  }
 0xcc7   : > { %7101 = vrot.lane.b32.xlu0 %v7098_v5, %s13633_s29 }
 0xce5   : > { %7561 = vxpose.xlu0.c.b16.start [1/4] (short) (narrow) %v12850_v52, 16 }
 0xce9   : > { %7562 = vxpose.xlu0.c.b16.cont [2/4] (short) (narrow) %v12857_v24, 16 }
 0xced   : > { %7563 = vxpose.xlu0.c.b16.cont [3/4] (short) (narrow) %v12869_v37, 16 }
 0xcf1   : > { %7564 = vxpose.xlu0.c.b16.end [4/4] (short) (narrow) %v12877_v14, 16 }
 0xcf5   : > { %7711 = vxpose.xlu0.c.b16.start [1/8] (narrow) %v7663_v30, 16  ;;  %v8656_v30 = vld [vmem:[%s13468_s17 + $0x4] ss:$8 sps:$4 sm:$0xff]  }
 0xcf6   : > { %7903 = vmatprep.subr.bf16.mxu1 %v8656_v30  ;;  %v8711_v30 = vld [vmem:[%s13468_s17 + $0xf0] ss:$8 sps:$4 sm:$0xff]  }
 0xcf7   : > { %7904 = vmatpush1.bf16.msra.mxu1 %v8654_v56  ;;  %v8707_v56 = vld [vmem:[%s13468_s17 + $0xe4] ss:$8 sps:$4 sm:$0xff]  }
 0xcf8   : > { %7905 = vmatprep.subr.bf16.mxu1 %v8659_v49 }
 0xcf9   : > { %7712 = vxpose.xlu0.c.b16.cont [2/8] (narrow) %v7664_v57, 16  ;;  %v8660_v57 = vld [vmem:[%s13468_s17 + $0x20] ss:$8 sps:$4 sm:$0xff]  }
 0xcfb   : > { %7906 = vmatpush1.bf16.msra.mxu1 %v8657_v19  ;;  %v8713_v19 = vld [vmem:[%s13468_s17 + $0xf4] ss:$8 sps:$4 sm:$0xff]  }
 0xcfd   : > { %7713 = vxpose.xlu0.c.b16.cont [3/8] (narrow) %v11807_v2, 16  ;;  %v14400_v2 = vld [vmem:[#allocation24_spill] sm:$0xff] }
 0xd01   : > { %7714 = vxpose.xlu0.c.b16.cont [4/8] (narrow) %v11803_v26, 16 }
 0xd05   : > { %7715 = vxpose.xlu0.c.b16.cont [5/8] (narrow) %v11977_v7, 16 }
 0xd09   : > { %7716 = vxpose.xlu0.c.b16.cont [6/8] (narrow) %v11971_v53, 16 }
 0xd0d   : > { %7717 = vxpose.xlu0.c.b16.cont [7/8] (narrow) %v12050_v48, 16 }
 0xd11   : > { %7718 = vxpose.xlu0.c.b16.end [8/8] (narrow) %v12046_v47, 16 }
 0xd1a   : > { %1910 = vrot.lane.b32.xlu0 %v14398_v60, %s14397_s15  ;;  %v8662_v60 = vld [vmem:[%s13468_s17 + $0x24] ss:$8 sps:$4 sm:$0xff]  }
 0xd1b   : > { %7907 = vmatprep.subr.bf16.mxu1 %v8662_v60 }
 0xd1c   : > { %7908 = vmatpush1.bf16.msra.mxu1 %v8660_v57  ;;  %v8092_v57 = vld [vmem:[%s13463_s12] ss:$0 sm:$0xff] }
 0xd1e   : > { %1685 = vrot.lane.b32.xlu0 %v8727_v20, %s14399_s23  ;;  %v8663_v20 = vld [vmem:[%s13468_s17 + $0x30] ss:$8 sps:$4 sm:$0xff]  }
 0xd22   : > { %5600 = vrot.lane.b32.xlu0 %v12290_v23, %s14116_s0 }
 0xd23   : > { %v7062_v41 = vpop.permute.xlu1 %7061 }
 0xd24   : > { %7071 = vst.msk [vmem:[#allocation2 + $0x18] sm:$0xf0] %vm7070_vm2, %v7062_v41  ;;  %v8665_v41 = vld [vmem:[%s13468_s17 + $0x34] ss:$8 sps:$4 sm:$0xff]   ;;  %vm6772_vm2 = vcmask 387328  }
 0xd25   : > { %v7152_v26 = vpop.permute.xlu0 %7151  ;;  %7909 = vmatprep.subr.bf16.mxu1 %v8665_v41 }
 0xd26   : > { %1912 = vrot.lane.b32.xlu0 %v14400_v2, %s14397_s15  ;;  %7910 = vmatpush1.bf16.msra.mxu1 %v8663_v20  ;;  %v8668_v2 = vld [vmem:[%s13468_s17 + $0x44] ss:$8 sps:$4 sm:$0xff]  }
 0xd27   : > { %v7082_v9 = vpop.permute.xlu1 %7081  ;;  %7911 = vmatprep.subr.bf16.mxu1 %v8668_v2 }
 0xd28   : > { %7091 = vst.msk [vmem:[#allocation2 + $0x18] sm:$0xf8] %vm7090_vm0, %v7082_v9  ;;  %v8669_v9 = vld [vmem:[%s13468_s17 + $0x50] ss:$8 sps:$4 sm:$0xff]   ;;  %vm6121_vm0 = vcmask 391424  }
 0xd29   : > { %v7124_v53 = vpop.permute.xlu0 %7123 }
 0xd2a   : > { %7132 = vst.msk [vmem:[#allocation2 + $0x38] sm:$0x7f] %vm7131_vm13, %v7124_v53  ;;  %6042 = vrot.lane.b32.xlu0 %v12667_v63, %s14231_s4  ;;  %v8671_v53 = vld [vmem:[%s13468_s17 + $0x54] ss:$8 sps:$4 sm:$0xff]   ;;  %vm14419_vm13 = vmmov %vm14416_vm1 }
 0xd2b   : > { %v7150_v7 = vpop.permute.xlu1 %7149 }
 0xd2d   : > { %v7064_v47 = vpop.permute.xlu0 %7063 }
 0xd2e   : > { %7073 = vst.msk [vmem:[#allocation2 + $0x30] sm:$0xff] %vm7072_vm11, %v7064_v47  ;;  %7065 = vrot.lane.b32.xlu0 %v13110_v11, %s14082_s21  ;;  %v8674_v47 = vld [vmem:[%s13468_s17 + $0x64] ss:$8 sps:$4 sm:$0xff]  }
 0xd2f   : > { %v7122_v23 = vpop.permute.xlu1 %7121 }
 0xd30   : > { %7130 = vst.msk [vmem:[#allocation2 + $0x20] sm:$0xff] %vm7072_vm11, %v7122_v23  ;;  %v8675_v23 = vld [vmem:[%s13468_s17 + $0x70] ss:$8 sps:$4 sm:$0xff]   ;;  %vm6160_vm11 = vcmask 516480  }
 0xd31   : > { %v7138_v48 = vpop.permute.xlu0 %7137 }
 0xd32   : > { %7146 = vst.msk [vmem:[#allocation2 + $0x38] sm:$0x1f] %vm7145_vm15, %v7138_v48  ;;  %3561 = vrot.lane.b32.xlu0 %v10996_v28, %s14220_s3  ;;  %v8677_v48 = vld [vmem:[%s13468_s17 + $0x74] ss:$8 sps:$4 sm:$0xff]   ;;  %vm14420_vm15 = vcmask 261248  }
 0xd33   : > { %7160 = vst.msk [vmem:[#allocation2 + $0x38] sm:$0xf] %vm7159_vm10, %v7152_v26  ;;  %v7136_v63 = vpop.permute.xlu1 %7135  ;;  %v8666_v26 = vld [vmem:[%s13468_s17 + $0x40] ss:$8 sps:$4 sm:$0xff]   ;;  %vm7054_vm10 = vcmask 258048  }
 0xd34   : > { %7144 = vst.msk [vmem:[#allocation2 + $0x20] sm:$0xff] %vm7092_vm4, %v7136_v63  ;;  %7912 = vmatpush1.bf16.msra.mxu1 %v8666_v26  ;;  %v8678_v63 = vld [vmem:[%s13468_s17 + $0x80] ss:$8 sps:$4 sm:$0xff]  }
 0xd35   : > { %7158 = vst.msk [vmem:[#allocation2 + $0x20] sm:$0xff] %vm7110_vm8, %v7150_v7  ;;  %v7084_v52 = vpop.permute.xlu0 %7083  ;;  %7913 = vmatprep.subr.bf16.mxu1 %v8671_v53  ;;  %v8672_v7 = vld [vmem:[%s13468_s17 + $0x60] ss:$8 sps:$4 sm:$0xff]  }
 0xd36   : > { %7093 = vst.msk [vmem:[#allocation2 + $0x30] sm:$0xff] %vm7092_vm4, %v7084_v52  ;;  %6100 = vrot.lane.b32.xlu0 %v12689_v18, %s14082_s21  ;;  %v8680_v52 = vld [vmem:[%s13468_s17 + $0x84] ss:$8 sps:$4 sm:$0xff]   ;;  %vm7074_vm4 = vcmask 519424  }
 0xd37   : > { %v7100_v24 = vpop.permute.xlu1 %7099 }
 0xd38   : > { %7109 = vst.msk [vmem:[#allocation2 + $0x18] sm:$0xfe] %vm7108_vm7, %v7100_v24  ;;  %7914 = vmatpush1.bf16.msra.mxu1 %v8669_v9  ;;  %v8681_v24 = vld [vmem:[%s13468_s17 + $0x90] ss:$8 sps:$4 sm:$0xff]   ;;  %vm7112_vm7 = vcmask 1041152  }
 0xd39   : > { %v7102_v37 = vpop.permute.xlu0 %7101  ;;  %7915 = vmatprep.subr.bf16.mxu1 %v8674_v47 }
 0xd3a   : > { %7111 = vst.msk [vmem:[#allocation2 + $0x30] sm:$0xff] %vm7110_vm8, %v7102_v37  ;;  %7085 = vrot.lane.b32.xlu0 %v13120_v32, %s14268_s25  ;;  %v7173_v28 = vld [vmem:[#allocation2 + $0x38] sm:$0xff]  ;;  %vm7094_vm8 = vcmask 780800  }
 0xd3b   : > { %v8683_v37 = vld [vmem:[%s13468_s17 + $0x94] ss:$8 sps:$4 sm:$0xff]  }
 0xd3c   : > { %v7170_v14 = vld [vmem:[#allocation2 + $0x20] sm:$0xff]  ;;  %7916 = vmatpush1.bf16.msra.mxu1 %v8672_v7 }
 0xd3d   : > { %v7176_v11 = vpack.c.bf16 %v7173_v28, %v7170_v14  ;;  %7917 = vmatprep.subr.bf16.mxu1 %v8677_v48  ;;  %v8684_v14 = vld [vmem:[%s13468_s17 + $0xa0] ss:$8 sps:$4 sm:$0xff]   ;;  %v8686_v28 = vld [vmem:[%s13468_s17 + $0xa4] ss:$8 sps:$4 sm:$0xff]  }
 0xd3e   : > { %3787 = vrot.lane.b32.xlu0 %v11558_v13, %s14231_s4 }
 0xd3f   : > { %7409 = vmatprep.mubr.bf16.mxu0 %v7176_v11  ;;  %v7169_v38 = vld [vmem:[#allocation2 + $0x18] sm:$0xff]  ;;  %v8687_v11 = vld [vmem:[%s13464_s13] ss:$8 sps:$4 sm:$0xff]  }
 0xd40   : > { %7918 = vmatpush1.bf16.msra.mxu1 %v8675_v23 }
 0xd41   : > { %v7172_v25 = vld [vmem:[#allocation2 + $0x30] sm:$0xff]  ;;  %7919 = vmatprep.subr.bf16.mxu1 %v8680_v52  ;;  %v14401_v52 = vmax.f32 %v11773_v16, 0.0  ;;  %v14408_v16 = vld [vmem:[#allocation27_spill] sm:$0xff] }
 0xd42   : > { %6139 = vrot.lane.b32.xlu0 %v12703_v43, %s14091_s22  ;;  %v7175_v18 = vpack.c.bf16 %v7172_v25, %v7169_v38  ;;  %v8689_v38 = vld [vmem:[%s13464_s13 + $0x4] ss:$8 sps:$4 sm:$0xff]   ;;  %v8690_v25 = vld [vmem:[%s13468_s17 + $0xb0] ss:$8 sps:$4 sm:$0xff]  }
 0xd43   : > { %7496 = vmatprep.subr.bf16.mxu0 %v8689_v38  ;;  %v14407_v38 = vld [vmem:[#allocation23_spill] sm:$0xff] }
 0xd44   : > { %7410 = vmatmul.mubr.bf16.vlgmr.msra.gmra.mrb[80].mxu0 %v7175_v18  ;;  %7920 = vmatpush1.bf16.msra.mxu1 %v8678_v63  ;;  %v8692_v18 = vld [vmem:[%s13468_s17 + $0xb4] ss:$8 sps:$4 sm:$0xff]  }
 0xd45   : > { %7921 = vmatprep.subr.bf16.mxu1 %v8683_v37  ;;  %7497 = vmatpush1.bf16.msra.mxu0 %v8687_v11 }
 0xd46   : > { %7103 = vrot.lane.b32.xlu0 %v7097_v45, %s13633_s29  ;;  %s8531_s29 = smul.u32 112, %s14425_s28 }
 0xd48   : > { %7922 = vmatpush1.bf16.msra.mxu1 %v8681_v24  ;;  %v14402_v24 = vmax.f32 %v11811_v61, 0.0  ;;  %v8728_v61 = vld [vmem:[%s8889_s20 + $0xf0] sm:$0xff]  ;;  %s14413_s20 = smov 96  }
 0xd49   : > { %7923 = vmatprep.subr.bf16.mxu1 %v8686_v28  ;;  %v14404_v28 = vmax.f32 %v11569_v50, 0.0  ;;  %v14410_v50 = vld [vmem:[#allocation18_spill] sm:$0xff] }
 0xd4a   : > { %v7671_v37 = vpack.c.bf16 %v14402_v24, %v14401_v52 }
 0xd4b   : > { %v13226_v51 = vpop.trf.xlu0 }
 0xd4c   : > { %7924 = vmatpush1.bf16.msra.mxu1 %v8684_v14  ;;  %v14403_v14 = vmax.f32 %v11799_v44, 0.0  ;;  %v14414_v44 = vld [vmem:[#allocation38_spill] sm:$0xff] }
 0xd4d   : > { %7925 = vmatprep.subr.bf16.mxu1 %v8692_v18 }
 0xd4e   : > { %v7672_v11 = vpack.c.bf16 %v14404_v28, %v14403_v14 }
 0xd50   : > { %7926 = vmatpush1.bf16.msra.mxu1 %v8690_v25 }
 0xd5b   : > { %v13228_v32 = vpop.trf.xlu0 }
 0xd8c   : > { %v1911_v22 = vpop.permute.xlu0 %1910 }
 0xd8d   : > { %v8757_v22 = vmov 0  }
 0xd8e   : > { %7528 = vmatprep.mubr.bf16.mxu0 %v8757_v22 }
 0xd90   : > { %v1686_v27 = vpop.permute.xlu0 %1685 }
 0xd91   : > { %v8695_v27 = vld [vmem:[%s13468_s17 + $0xc4] ss:$8 sps:$4 sm:$0xff]  }
 0xd92   : > { %v13230_v54 = vpop.f32.mrb[32].mxu1  ;;  %7927 = vmatprep.subr.bf16.mxu1 %v8695_v27 }
 0xd93   : > { %v8513_v13 = vpop.f32.mrb[33].mxu1 }
 0xd94   : > { %v13232_v62 = vpop.f32.mrb[34].mxu1  ;;  %v13234_v40 = vpop.permute.xlu0 %5600  ;;  %v8693_v13 = vld [vmem:[%s13468_s17 + $0xc0] ss:$8 sps:$4 sm:$0xff]  }
 0xd95   : > { %v8514_v43 = vpop.f32.mrb[35].mxu1  ;;  %7928 = vmatpush1.bf16.msra.mxu1 %v8693_v13 }
 0xd96   : > { %v8698_v43 = vld [vmem:[%s13465_s14 + $0x4] ss:$8 sps:$4 sm:$0xff]  }
 0xd97   : > { %7620 = vmatprep.subr.bf16.mxu0 %v8698_v43 }
 0xd98   : > { %v1913_v46 = vpop.permute.xlu0 %1912 }
 0xd99   : > { %v8699_v46 = vld [vmem:[%s13468_s17 + $0xd0] ss:$8 sps:$4 sm:$0xff]  }
 0xd9c   : > { %v13236_v55 = vpop.permute.xlu0 %6042 }
 0xda0   : > { %v13238_v17 = vpop.permute.xlu0 %7065 }
 0xda4   : > { %v3562_v10 = vpop.permute.xlu0 %3561 }
 0xda5   : > { %v8701_v10 = vld [vmem:[%s13468_s17 + $0xd4] ss:$8 sps:$4 sm:$0xff]  }
 0xda6   : > { %7929 = vmatprep.subr.bf16.mxu1 %v8701_v10 }
 0xda7   : > { %7930 = vmatpush1.bf16.msra.mxu1 %v8699_v46 }
 0xda8   : > { %v13240_v45 = vpop.permute.xlu0 %6100  ;;  %7931 = vmatprep.subr.bf16.mxu1 %v8707_v56 }
 0xdac   : > { %v13242_v5 = vpop.permute.xlu0 %7085 }
 0xdb0   : > { %v3788_v58 = vpop.permute.xlu0 %3787 }
 0xdb1   : > { %v8705_v58 = vld [vmem:[%s13468_s17 + $0xe0] ss:$8 sps:$4 sm:$0xff]  }
 0xdb2   : > { %7932 = vmatpush1.bf16.msra.mxu1 %v8705_v58 }
 0xdb3   : > { %7933 = vmatprep.subr.bf16.mxu1 %v8713_v19 }
 0xdb6   : > { %7934 = vmatpush1.bf16.msra.mxu1 %v8711_v30 }
 0xe17   : > { %v8348_v49 = vpop.f32.mrb[80].mxu0 }
 0xe18   : > { %v8349_v60 = vpop.f32.mrb[81].mxu0 }
 0xe19   : > { %v8350_v20 = vadd.f32 %v8349_v60, %v8348_v49  ;;  %v8351_v41 = vpop.f32.mrb[82].mxu0 }
 0xe1a   : > { %v8352_v26 = vpop.f32.mrb[83].mxu0 }
 0xe1b   : > { %v7412_v2 = vadd.f32 %v8350_v20, %v8092_v57  ;;  %v8353_v9 = vadd.f32 %v8352_v26, %v8351_v41 }
 0xe1d   : > { %v7453_v53 = vadd.f32 %v13230_v54, %v7412_v2  ;;  %v7415_v7 = vadd.f32 %v8353_v9, %v8092_v57  ;;  %v14405_v54 = vld [vmem:[#allocation31_spill] sm:$0xff] }
 0xe1f   : > { %v7456_v47 = vadd.f32 %v13232_v62, %v7415_v7  ;;  %v7459_v23 = vmax.f32 %v7453_v53, 0.0  ;;  %v14406_v62 = vld [vmem:[#allocation28_spill] sm:$0xff] }
 0xe21   : > { %v7460_v48 = vmax.f32 %v7456_v47, 0.0 }
 0xe23   : > { %v7461_v63 = vpack.c.bf16 %v7460_v48, %v7459_v23 }
 0xe25   : > { %7464 = vxpose.xlu1.c.b16.start.end [1/1] (short) (narrow) %v7461_v63, 32 }
 0xe2a   : > { %7727 = vxpose.xlu1.c.b16.start [1/8] (narrow) %v7671_v37, 16 }
 0xe2e   : > { %7728 = vxpose.xlu1.c.b16.cont [2/8] (narrow) %v7672_v11, 16 }
 0xe32   : > { %7729 = vxpose.xlu1.c.b16.cont [3/8] (narrow) %v11742_v1, 16  ;;  %v14412_v1 = vld [vmem:[#allocation17_spill] sm:$0xff] }
 0xe36   : > { %7730 = vxpose.xlu1.c.b16.cont [4/8] (narrow) %v11738_v0, 16  ;;  %v14411_v0 = vld [vmem:[#allocation26_spill] sm:$0xff] }
 0xe3a   : > { %7731 = vxpose.xlu1.c.b16.cont [5/8] (narrow) %v14405_v54, 16 }
 0xe3e   : > { %7732 = vxpose.xlu1.c.b16.cont [6/8] (narrow) %v14406_v62, 16 }
 0xe42   : > { %7733 = vxpose.xlu1.c.b16.cont [7/8] (narrow) %v14407_v38, 16 }
 0xe46   : > { %7734 = vxpose.xlu1.c.b16.end [8/8] (narrow) %v14408_v16, 16 }
 0xe4a   : > { %1683 = vrot.lane.b32.xlu1 %v8728_v61, %s14399_s23 }
 0xe4e   : > { %5507 = vrot.lane.b32.xlu1 %v12279_v29, %s14220_s3  ;;  %v8696_v29 = vld [vmem:[%s13465_s14] ss:$8 sps:$4 sm:$0xff]  }
 0xe52   : > { %6744 = vrot.lane.b32.xlu1 %v12947_v31, %s14231_s4  ;;  %v8708_v31 = vld [vmem:[%s13465_s14 + $0x20] ss:$8 sps:$4 sm:$0xff]  }
 0xe56   : > { %5564 = vrot.lane.b32.xlu1 %v12417_v3, %s14231_s4  ;;  %v8704_v3 = vld [vmem:[%s13465_s14 + $0x14] ss:$8 sps:$4 sm:$0xff]  }
 0xe5a   : > { %6764 = vrot.lane.b32.xlu1 %v12951_v33, %s14082_s21  ;;  %v8716_v33 = vld [vmem:[%s13465_s14 + $0x34] ss:$8 sps:$4 sm:$0xff]  }
 0xe5e   : > { %2047 = vrot.lane.b32.xlu1 %v14410_v50, %s14409_s1  ;;  %s575_s1 = scalar_lea.vmem %s14422_s24, %s8531_s29 }
 0xe62   : > { %6781 = vrot.lane.b32.xlu1 %v6775_v6, %s14091_s22  ;;  %v8714_v6 = vld [vmem:[%s13465_s14 + $0x30] ss:$8 sps:$4 sm:$0xff]  }
 0xe66   : > { %3559 = vrot.lane.b32.xlu1 %v14411_v0, %s14220_s3 }
 0xe6a   : > { %6800 = vrot.lane.b32.xlu1 %v6797_v15, %s14345_s18 }
 0xe6e   : > { %7119 = vrot.lane.b32.xlu1 %v7116_v36, %s14082_s21 }
 0xe72   : > { %3785 = vrot.lane.b32.xlu1 %v14412_v1, %s14231_s4 }
 0xe76   : > { %6812 = vrot.lane.b32.xlu1 %v12936_v4, %s14413_s20  ;;  %v8702_v4 = vld [vmem:[%s13465_s14 + $0x10] ss:$8 sps:$4 sm:$0xff]  }
 0xe7a   : > { %7133 = vrot.lane.b32.xlu1 %v13100_v59, %s14268_s25 }
 0xe7e   : > { %3922 = vrot.lane.b32.xlu1 %v14414_v44, %s14116_s0 }
 0xe82   : > { %6826 = vrot.lane.b32.xlu1 %v12939_v34, %s14344_s19  ;;  %v8710_v34 = vld [vmem:[%s13465_s14 + $0x24] ss:$8 sps:$4 sm:$0xff]  }
 0xe86   : > { %7147 = vrot.lane.b32.xlu1 %v13090_v42, %s14413_s20 }
 0xe8b   : > { %v7472_v39 = vpop.trf.xlu1 }
 0xe8c   : > { %8119 = vmatmul.mubr.msk.bf16.vlgmr.msra.gmra.mrb[84].mxu0 %vm14415_vm9, %v7472_v39  ;;  %vm7128_vm9 = vcmask 523527  }
 0xe8d   : > { %7621 = vmatpush1.bf16.msra.mxu0 %v8696_v29  ;;  %7538 = vmatprep.mubr.bf16.mxu0 %v8757_v22 }
 0xe8e   : > { %7622 = vmatprep.subr.bf16.mxu0 %v8704_v3 }
 0xe8f   : > { %v7473_v21 = vpop.trf.xlu1 }
 0xe91   : > { %7623 = vmatpush1.bf16.msra.mxu0 %v8702_v4 }
 0xe92   : > { %7624 = vmatprep.subr.bf16.mxu0 %v8710_v34 }
 0xe93   : > { %v7735_v15 = vpop.trf.xlu1 }
 0xe94   : > { %8120 = vmatmul.mubr.msk.bf16.gmra.mrb[88].mxu0 %vm14416_vm1, %v7473_v21  ;;  %7935 = vmatprep.mubr.bf16.mxu1 %v7735_v15  ;;  %vm6821_vm1 = vcmask 917253  }
 0xe95   : > { %7625 = vmatpush1.bf16.msra.mxu0 %v8708_v31  ;;  %7652 = vmatprep.mubr.bf16.mxu0 %v8757_v22 }
 0xe96   : > { %7626 = vmatprep.subr.bf16.mxu0 %v8716_v33  ;;  %7936 = vmatmul.mubr.bf16.vlgmr.msra.gmra.mrb[36].mxu1 %v13228_v32  ;;  %v6140_v32 = vpop.permute.xlu0 %6139 }
 0xe99   : > { %7627 = vmatpush1.bf16.msra.mxu0 %v8714_v6 }
 0xe9c   : > { %8129 = vmatmul.mubr.msk.bf16.vlgmr.msra.gmra.mrb[92].mxu0 %vm14417_vm5, %v13226_v51  ;;  %vm7142_vm5 = vcmask 785925  }
 0xebc   : > { %v1684_v42 = vpop.permute.xlu1 %1683 }
 0xec0   : > { %v5508_v12 = vpop.permute.xlu1 %5507 }
 0xec1   : > { %5524 = vst.msk [vmem:[#allocation2 + $0xf0] sm:$0xff] %vm14418_vm3, %v5508_v12  ;;  %vm6835_vm3 = vcmask 1048452  }
 0xec4   : > { %v6745_v59 = vpop.permute.xlu1 %6744 }
 0xec5   : > { %6753 = vst.msk [vmem:[#allocation2 + $0x48] sm:$0xf] %vm6752_vm12, %v6745_v59  ;;  %vm7156_vm12 = vcmask 1048324  }
 0xec8   : > { %v5565_v36 = vpop.permute.xlu1 %5564 }
 0xec9   : > { %5583 = vst.msk [vmem:[#allocation2 + $0xf0] sm:$0x7f] %vm3856_vm14, %v5565_v36  ;;  %vm14421_vm14 = vcmask 786055  }
 0xeca   : > { %5619 = vst.msk [vmem:[#allocation2 + $0xf0] sm:$0x1] %vm3991_vm6, %v13234_v40 }
 0xecb   : > { %6017 = vst.msk [vmem:[#allocation2 + $0xf0] sm:$0xff] %vm14419_vm13, %v12730_v8  ;;  %v7104_v8 = vpop.permute.xlu0 %7103 }
 0xecc   : > { %6060 = vst.msk [vmem:[#allocation2 + $0xf0] sm:$0xff] %vm14420_vm15, %v13236_v55  ;;  %v6765_v51 = vpop.permute.xlu1 %6764 }
 0xecd   : > { %6773 = vst.msk [vmem:[#allocation2 + $0x48] sm:$0x7] %vm6772_vm2, %v6765_v51 }
 0xece   : > { %6122 = vst.msk [vmem:[#allocation2 + $0xf0] sm:$0x7f] %vm6121_vm0, %v13240_v45 }
 0xecf   : > { %6161 = vst.msk [vmem:[#allocation2 + $0xf0] sm:$0x1] %vm6160_vm11, %v6140_v32 }
 0xed0   : > { %v2048_v25 = vpop.permute.xlu1 %2047 }
 0xed4   : > { %v6782_v18 = vpop.permute.xlu1 %6781 }
 0xed5   : > { %6788 = vst.msk [vmem:[#allocation2 + $0x48] sm:$0x1] %vm6160_vm11, %v6782_v18 }
 0xed6   : > { %7055 = vst.msk [vmem:[#allocation2 + $0x48] sm:$0x1f] %vm7054_vm10, %v13123_v35 }
 0xed7   : > { %7075 = vst.msk [vmem:[#allocation2 + $0x48] sm:$0xf] %vm7074_vm4, %v13238_v17 }
 0xed8   : > { %7095 = vst.msk [vmem:[#allocation2 + $0x48] sm:$0x7] %vm7094_vm8, %v13242_v5  ;;  %v3560_v40 = vpop.permute.xlu1 %3559 }
 0xed9   : > { %7113 = vst.msk [vmem:[#allocation2 + $0x48] sm:$0x1] %vm7112_vm7, %v7104_v8 }
 0xedc   : > { %v6801_v55 = vpop.permute.xlu1 %6800 }
 0xedd   : > { %6809 = vst.msk [vmem:[#allocation2] sm:$0x80] %vm14421_vm14, %v6801_v55 }
 0xee0   : > { %v7120_v45 = vpop.permute.xlu1 %7119 }
 0xee1   : > { %7129 = vst.msk [vmem:[#allocation2 + $0x8] sm:$0x80] %vm7128_vm9, %v7120_v45 }
 0xee4   : > { %v3786_v22 = vpop.permute.xlu1 %3785 }
 0xee8   : > { %v6813_v27 = vpop.permute.xlu1 %6812 }
 0xee9   : > { %6822 = vst.msk [vmem:[#allocation2] sm:$0xe0] %vm6821_vm1, %v6813_v27 }
 0xeec   : > { %v7134_v35 = vpop.permute.xlu1 %7133 }
 0xeed   : > { %7143 = vst.msk [vmem:[#allocation2 + $0x8] sm:$0xe0] %vm7142_vm5, %v7134_v35 }
 0xef0   : > { %v3923_v17 = vpop.permute.xlu1 %3922 }
 0xef4   : > { %v6827_v13 = vpop.permute.xlu1 %6826 }
 0xef5   : > { %6836 = vst.msk [vmem:[#allocation2] sm:$0xf0] %vm6835_vm3, %v6827_v13 }
 0xef8   : > { %v7148_v5 = vpop.permute.xlu1 %7147 }
 0xef9   : > { %7157 = vst.msk [vmem:[#allocation2 + $0x8] sm:$0xf0] %vm7156_vm12, %v7148_v5 }
 0xf5f   : > { %v7530_v43 = vpop.f32.mrb[84].mxu0 }
 0xf60   : > { %7944 = vst [vmem:[%s575_s1] sm:$0xff] %v7530_v43  ;;  %v7532_v46 = vpop.f32.mrb[85].mxu0 }
 0xf61   : > { %7945 = vst [vmem:[%s575_s1 + $0x8] sm:$0xff] %v7532_v46  ;;  %v7534_v10 = vpop.f32.mrb[86].mxu0 }
 0xf62   : > { %7946 = vst [vmem:[%s575_s1 + $0x10] sm:$0xff] %v7534_v10  ;;  %v7536_v58 = vpop.f32.mrb[87].mxu0 }
 0xf63   : > { %7947 = vst [vmem:[%s575_s1 + $0x18] sm:$0xff] %v7536_v58 }
 0xf67   : > { %v7540_v56 = vpop.f32.mrb[88].mxu0 }
 0xf68   : > { %7948 = vst [vmem:[%s575_s1 + $0x20] sm:$0xff] %v7540_v56  ;;  %v7542_v30 = vpop.f32.mrb[89].mxu0 }
 0xf69   : > { %7949 = vst [vmem:[%s575_s1 + $0x28] sm:$0xff] %v7542_v30  ;;  %v7544_v19 = vpop.f32.mrb[90].mxu0  ;;  %v7937_v49 = vpop.f32.mrb[36].mxu1 }
 0xf6a   : > { %7950 = vst [vmem:[%s575_s1 + $0x30] sm:$0xff] %v7544_v19  ;;  %v7546_v57 = vpop.f32.mrb[91].mxu0  ;;  %7956 = vst [vmem:[%s575_s1 + $0x60] sm:$0xff] %v7937_v49  ;;  %v7939_v60 = vpop.f32.mrb[37].mxu1 }
 0xf6b   : > { %7951 = vst [vmem:[%s575_s1 + $0x38] sm:$0xff] %v7546_v57  ;;  %7957 = vst [vmem:[%s575_s1 + $0x68] sm:$0xff] %v7939_v60  ;;  %v7941_v20 = vpop.f32.mrb[38].mxu1 }
 0xf6c   : > { %v7942_v41 = vpop.f32.mrb[39].mxu1 }
 0xf6f   : > { %v7654_v26 = vpop.f32.mrb[92].mxu0 }
 0xf70   : > { %7952 = vst [vmem:[%s575_s1 + $0x40] sm:$0xff] %v7654_v26  ;;  %v7656_v2 = vpop.f32.mrb[93].mxu0 }
 0xf71   : > { %7953 = vst [vmem:[%s575_s1 + $0x48] sm:$0xff] %v7656_v2  ;;  %v7658_v9 = vpop.f32.mrb[94].mxu0 }
 0xf72   : > { %7954 = vst [vmem:[%s575_s1 + $0x50] sm:$0xff] %v7658_v9  ;;  %v7660_v53 = vpop.f32.mrb[95].mxu0 }
 0xf73   : > { %7955 = vst [vmem:[%s575_s1 + $0x58] sm:$0xff] %v7660_v53 }
 0xf74 PF: > { %s14423_s28 = sld [smem:[#allocation3_spill]] }
 0xf7a   : > { %s28_s27 = sadd.s32 1, %s14423_s28  }
 0xf7b   : > { %p25_p4 = scmp.ge.s32.totalorder %s28_s27, 4  }
 0xf7d   :  { %27 = sbr.rel (!%p25_p4) target bundleno = 10 (0xa), region = 122 }

</bundles_post_ra>
